<compile_context>
chip_gen: v7x
topology: tpu7x:2x2x1
jax: 0.10.0
libtpu: 0.0.40
codegen_flags: <defaults>
</compile_context>

<pallas_src>
import jax
import jax.numpy as jnp
from jax import lax
from jax.experimental import pallas as pl
from jax.experimental.pallas import tpu as pltpu


def _vmem_limit_bytes(*nbytes):
    """Scoped-VMEM budget: tile footprint * 1.5, capped at 75% of physical
    VMEM (leaves headroom for compiler scratch; matters on v7x's 64 MiB)."""
    try:
        phys = getattr(pltpu.get_tpu_info(), "vmem_capacity_bytes",
                       64 * 1024 * 1024)
    except Exception:
        phys = 64 * 1024 * 1024
    cap = int(phys * 0.75)
    est = int(1.5 * sum(nbytes)) + (1 << 20)
    return min(cap, max(32 * 1024 * 1024, est))


# ----------------------------- conv3x3 + ReLU ------------------------------ #

def _conv3x3_relu_kernel(x_ref, w_ref, b_ref, o_ref, col_ref):
    """3x3 / stride-1 / pad-1 conv + bias + ReLU for one Cout tile.

    Grid: (Cout // TN,)  -- "arbitrary" (im2col slab is built once at step 0
    and reused from persistent VMEM scratch on every later step).

    x_ref:   (B, H, W, Cin)   bf16  full activation (same block every step)
    w_ref:   (9*Cin, TN)      bf16  tap-major weight tile, rows (kh, kw, cin)
    b_ref:   (1, TN)          f32   bias tile
    o_ref:   (B*H, W, TN)     bf16  output tile (rows in NHWC order)
    col_ref: (B*H, W, 9*Cin)  bf16  persistent VMEM scratch: im2col slab
    """
    B, H, W, Cin = x_ref.shape

    @pl.when(pl.program_id(0) == 0)
    def _build_im2col():
        # col[b*H + h, w, (kh*3+kw)*Cin + c] = x[b, h+kh-1, w+kw-1, c]
        # (zero outside the image).  Only the halo row/column of each tap is
        # zeroed explicitly; the interior is overwritten by the tap copies.
        for b in range(B):
            r0 = b * H
            for kh in range(3):
                for kw in range(3):
                    dh, dw = kh - 1, kw - 1
                    c0 = (kh * 3 + kw) * Cin
                    if dh != 0:
                        hr = 0 if dh < 0 else H - 1
                        col_ref[r0 + hr:r0 + hr + 1, :, c0:c0 + Cin] = (
                            jnp.zeros((1, W, Cin), col_ref.dtype))
                    if dw != 0:
                        wc = 0 if dw < 0 else W - 1
                        col_ref[r0:r0 + H, wc:wc + 1, c0:c0 + Cin] = (
                            jnp.zeros((H, 1, Cin), col_ref.dtype))
                    oh, sh, nh = (-dh, 0, H + dh) if dh < 0 else (0, dh, H - dh)
                    ow, sw, nw = (-dw, 0, W + dw) if dw < 0 else (0, dw, W - dw)
                    col_ref[r0 + oh:r0 + oh + nh,
                            ow:ow + nw, c0:c0 + Cin] = (
                        x_ref[b, sh:sh + nh, sw:sw + nw, :])

    # One (M=B*H*W, K=9*Cin) x (K, TN) MXU pass, f32 accumulation.
    acc = lax.dot_general(
        col_ref[...], w_ref[...],
        dimension_numbers=(((2,), (0,)), ((), ())),
        preferred_element_type=jnp.float32)            # (B*H, W, TN)
    acc = acc + b_ref[0][None, None, :]
    o_ref[...] = jnp.maximum(acc, 0.0).astype(o_ref.dtype)


def conv3x3_relu(x_nhwc, w_km, b, *, tn=256):
    """x_nhwc: (B,H,W,Cin) bf16; w_km: (9*Cin, Cout) bf16; b: (Cout,) f32.

    tn: Cout tile width.  256 matches the v6e/v7x MXU; use 128 on v5e.
    """
    B, H, W, Cin = x_nhwc.shape
    K, Cout = w_km.shape
    assert K == 9 * Cin
    tn = min(tn, Cout)
    assert Cout % tn == 0, (Cout, tn)

    vmem = _vmem_limit_bytes(
        2 * B * H * W * Cin * 2,    # x block (bf16), double-buffered
        2 * K * tn * 2,             # weight tile, double-buffered
        2 * tn * 4,                 # bias tile
        2 * B * H * W * tn * 2,     # output tile, double-buffered
        B * H * W * K * 2)          # im2col scratch

    out = pl.pallas_call(
        _conv3x3_relu_kernel,
        out_shape=jax.ShapeDtypeStruct((B * H, W, Cout), jnp.bfloat16),
        grid_spec=pltpu.PrefetchScalarGridSpec(
            num_scalar_prefetch=0,
            grid=(Cout // tn,),
            in_specs=[
                pl.BlockSpec((B, H, W, Cin), lambda n: (0, 0, 0, 0)),
                pl.BlockSpec((K, tn), lambda n: (0, n)),
                pl.BlockSpec((1, tn), lambda n: (0, n)),
            ],
            out_specs=pl.BlockSpec((B * H, W, tn), lambda n: (0, 0, n)),
            scratch_shapes=[pltpu.VMEM((B * H, W, K), jnp.bfloat16)],
        ),
        compiler_params=pltpu.CompilerParams(
            dimension_semantics=("arbitrary",),   # required for the step-0 hoist
            vmem_limit_bytes=vmem),
    )(x_nhwc, w_km, b.reshape(1, Cout))
    return out.reshape(B, H, W, Cout)


# --------------------- fused identity/appearance heads --------------------- #

def _fc_heads_kernel(x_ref, w_ref, b_ref, o_ref, acc_ref):
    """Fused identity + appearance Linear heads, (N, K)-tiled.

    Grid: (2E // TN, D_in // TK) -- N axis "parallel", K axis "arbitrary".

    x_ref: (B, TK) bf16;  w_ref: (TK, TN) bf16;  b_ref: (1, TN) f32
    o_ref: (B, TN) f32;   acc_ref: (B, TN) f32 scratch
    """
    k = pl.program_id(1)

    @pl.when(k == 0)
    def _init():
        # Initialize the accumulator with the broadcast bias (saves a pass).
        acc_ref[...] = jnp.broadcast_to(b_ref[...], acc_ref.shape)

    acc_ref[...] += jnp.dot(x_ref[...], w_ref[...],
                            preferred_element_type=jnp.float32)

    @pl.when(k == pl.num_programs(1) - 1)
    def _finalize():
        o_ref[...] = acc_ref[...]


def fc_dual_heads(x_flat, w_fc, b_fc, *, tk=4096, tn=None):
    """x_flat: (B, D_in) bf16; w_fc: (D_in, 2E) bf16; b_fc: (2E,) f32."""
    B, D_in = x_flat.shape
    K, E2 = w_fc.shape
    assert K == D_in
    tk = min(tk, D_in)
    assert D_in % tk == 0, (D_in, tk)
    if tn is None:
        # Split the fused output columns across two tiles when each tile is
        # still >=128 wide (keeps (8,128) layout + allows v7x megacore split).
        tn = E2 // 2 if (E2 % 256 == 0) else E2
    assert E2 % tn == 0, (E2, tn)

    vmem = _vmem_limit_bytes(
        2 * B * tk * 2,      # x tile, double-buffered
        2 * tk * tn * 2,     # weight tile, double-buffered
        2 * tn * 4,          # bias
        2 * B * tn * 4,      # output
        B * tn * 4)          # accumulator

    return pl.pallas_call(
        _fc_heads_kernel,
        out_shape=jax.ShapeDtypeStruct((B, E2), jnp.float32),
        grid_spec=pltpu.PrefetchScalarGridSpec(
            num_scalar_prefetch=0,
            grid=(E2 // tn, D_in // tk),
            in_specs=[
                pl.BlockSpec((B, tk), lambda n, k: (0, k)),
                pl.BlockSpec((tk, tn), lambda n, k: (k, n)),
                pl.BlockSpec((1, tn), lambda n, k: (0, n)),
            ],
            out_specs=pl.BlockSpec((B, tn), lambda n, k: (0, n)),
            scratch_shapes=[pltpu.VMEM((B, tn), jnp.float32)],
        ),
        compiler_params=pltpu.CompilerParams(
            dimension_semantics=("parallel", "arbitrary"),
            vmem_limit_bytes=vmem),
    )(x_flat, w_fc, b_fc.reshape(1, E2))


# ------------------------- offline weight preparation ----------------------- #

def prepare_params(raw, *, spatial=(8, 8), dtype=jnp.bfloat16):
    """Fold all layout transforms into the weights offline (zero runtime cost).

    conv OIHW (Cout, Cin, 3, 3) -> (9*Cin, Cout) tap-major bf16 (rows kh,kw,cin).
    fc   (E, C*H*W) in PyTorch NCHW-flatten order -> rows permuted to the NHWC
         flatten order the conv kernels produce, transposed to (D_in, E); both
         heads concatenated into one (D_in, 2E) bf16 matrix (single MXU pass).
    """
    H, W = spatial

    def conv_w(w_oihw):
        cout, cin, kh, kw = w_oihw.shape
        return (jnp.transpose(w_oihw, (2, 3, 1, 0))
                .reshape(kh * kw * cin, cout).astype(dtype))

    def fc_w(w_out_in):
        e, d = w_out_in.shape
        c = d // (H * W)
        w = jnp.transpose(w_out_in).reshape(c, H, W, e)   # rows: c*H*W + h*W + w
        return jnp.transpose(w, (1, 2, 0, 3)).reshape(H * W * c, e)  # NHWC rows

    params = {}
    for i in (1, 2, 3):
        params[f"w{i}"] = conv_w(raw[f"w{i}"])
        params[f"b{i}"] = raw[f"b{i}"].astype(jnp.float32)
    params["w_fc"] = jnp.concatenate(
        [fc_w(raw["w_id"]), fc_w(raw["w_ap"])], axis=1).astype(dtype)
    params["b_fc"] = jnp.concatenate(
        [raw["b_id"], raw["b_ap"]]).astype(jnp.float32)
    return params


# --------------------------------- forward ---------------------------------- #

@jax.jit
def face_encoder_forward(feat_nchw, params):
    """feat_nchw: (B, C_feat, 8, 8) -- output of the (un-reimplemented) backbone."""
    x = jnp.transpose(feat_nchw, (0, 2, 3, 1)).astype(jnp.bfloat16)  # NCHW->NHWC
    # Weight-streaming convs; tn=256 for v6e/v7x (use tn=128 on v5e).
    x = conv3x3_relu(x, params["w1"], params["b1"], tn=256)
    x = conv3x3_relu(x, params["w2"], params["b2"], tn=256)
    x = conv3x3_relu(x, params["w3"], params["b3"], tn=256)
    # NHWC flatten; the reference module's NCHW-flatten permutation has been
    # folded into the fc weight rows, so no transpose is needed here.
    b = x.shape[0]
    x_flat = x.reshape(b, -1)
    out = fc_dual_heads(x_flat, params["w_fc"], params["b_fc"], tk=4096)
    e = out.shape[-1] // 2
    return out[:, :e], out[:, e:]


# -------------------------------- reference --------------------------------- #

def face_encoder_reference(feat_nchw, raw):
    """f32 mirror of the PyTorch module's post-backbone forward."""
    dn = ("NCHW", "OIHW", "NCHW")
    x = feat_nchw
    for wk, bk in (("w1", "b1"), ("w2", "b2"), ("w3", "b3")):
        x = lax.conv_general_dilated(x, raw[wk], window_strides=(1, 1),
                                     padding="SAME", dimension_numbers=dn)
        x = jnp.maximum(x + raw[bk][None, :, None, None], 0.0)
    x_flat = x.reshape(x.shape[0], -1)                     # NCHW flatten
    ident = x_flat @ raw["w_id"].T + raw["b_id"][None, :]
    appear = x_flat @ raw["w_ap"].T + raw["b_ap"][None, :]
    return ident, appear


# ----------------------------------- main ------------------------------------ #

if __name__ == "__main__":
    # Small, structure-preserving stand-ins for 2048 -> 1024 -> 512 -> emb=512.
    B = 2
    H = W = 8            # spatial size after the ResNet50 backbone
    C_FEAT = 64          # stands for 2048
    C1 = 256             # stands for 1024
    C2 = 32              # stands for 512
    EMB = 32             # embedding_dim

    key = jax.random.PRNGKey(0)
    ks = jax.random.split(key, 11)

    def init(k, shape, scale=0.05):
        return (scale * jax.random.normal(k, shape)).astype(jnp.float32)

    raw = {
        "w1": init(ks[0], (C1, C_FEAT, 3, 3)),        # PyTorch OIHW layout
        "b1": init(ks[1], (C1,)),
        "w2": init(ks[2], (C2, C1, 3, 3)),
        "b2": init(ks[3], (C2,)),
        "w3": init(ks[4], (EMB, C2, 3, 3)),
        "b3": init(ks[5], (EMB,)),
        "w_id": init(ks[6], (EMB, EMB * H * W)),      # PyTorch (out, in), NCHW order
        "b_id": init(ks[7], (EMB,)),
        "w_ap": init(ks[8], (EMB, EMB * H * W)),
        "b_ap": init(ks[9], (EMB,)),
    }
    feat = init(ks[10], (B, C_FEAT, H, W), scale=1.0)  # backbone output, NCHW

    params = prepare_params(raw, spatial=(H, W))

    ident, appear = face_encoder_forward(feat, params)
    jax.block_until_ready((ident, appear))

    ident_ref, appear_ref = face_encoder_reference(feat, raw)

    def rel_err(a, b_):
        return float(jnp.linalg.norm(a.astype(jnp.float32) - b_) /
                     (jnp.linalg.norm(b_) + 1e-6))

    assert ident.shape == (B, EMB) and appear.shape == (B, EMB)
    # bf16 weights/activations with f32 accumulation -> a few % relative error.
    assert rel_err(ident, ident_ref) < 5e-2, rel_err(ident, ident_ref)
    assert rel_err(appear, appear_ref) < 5e-2, rel_err(appear, appear_ref)

    print("KERNEL_OK")
</pallas_src>

<mosaic_0001>
module attributes {stable_mosaic.version = 11 : i64} {
  func.func @_conv3x3_relu_kernel(%arg0: i32, %arg1: memref<2x8x8x256xbf16, #tpu.memory_space<vmem>>, %arg2: memref<2304x32xbf16, #tpu.memory_space<vmem>>, %arg3: memref<1x32xf32, #tpu.memory_space<vmem>>, %arg4: memref<16x8x32xbf16, #tpu.memory_space<vmem>>, %arg5: memref<16x8x2304xbf16, #tpu.memory_space<vmem>>) attributes {dimension_semantics = [#tpu.dimension_semantics<arbitrary>], iteration_bounds = array<i64: 1>, scalar_prefetch = 0 : i64, scratch_operands = 1 : i64, tpu.core_type = #tpu.core_type<tc>, window_params = [{pipeline_mode = #tpu.pipeline_mode<synchronous>, transform_indices = @transform_0, window_bounds = array<i64: 2, 8, 8, 256>}, {transform_indices = @transform_1, window_bounds = array<i64: 2304, 32>}, {transform_indices = @transform_2, window_bounds = array<i64: 1, 32>}, {transform_indices = @transform_3, window_bounds = array<i64: 16, 8, 32>}]} {
    %c0_i32 = arith.constant 0 : i32
    %0 = arith.cmpi eq, %arg0, %c0_i32 : i32
    %1 = arith.extui %0 : i1 to i32
    %c0_i32_0 = arith.constant 0 : i32
    %2 = arith.cmpi ne, %1, %c0_i32_0 : i32
    scf.if %2 {
      %cst_11 = arith.constant 0.000000e+00 : bf16
      %15 = vector.broadcast %cst_11 : bf16 to vector<1x8x256xbf16>
      %c0_12 = arith.constant 0 : index
      %c0_13 = arith.constant 0 : index
      %c0_14 = arith.constant 0 : index
      %16 = vector.load %arg5[%c0_12, %c0_13, %c0_14] : memref<16x8x2304xbf16, #tpu.memory_space<vmem>>, vector<1x8x256xbf16>
      tpu.vector_store %arg5[%c0_12, %c0_13, %c0_14], %15 {strides = array<i32>} : memref<16x8x2304xbf16, #tpu.memory_space<vmem>>, vector<1x8x256xbf16>,
      %cst_15 = arith.constant 0.000000e+00 : bf16
      %17 = vector.broadcast %cst_15 : bf16 to vector<8x1x256xbf16>
      %c0_16 = arith.constant 0 : index
      %c0_17 = arith.constant 0 : index
      %c0_18 = arith.constant 0 : index
      %18 = vector.load %arg5[%c0_16, %c0_17, %c0_18] : memref<16x8x2304xbf16, #tpu.memory_space<vmem>>, vector<8x1x256xbf16>
      tpu.vector_store %arg5[%c0_16, %c0_17, %c0_18], %17 {strides = array<i32>} : memref<16x8x2304xbf16, #tpu.memory_space<vmem>>, vector<8x1x256xbf16>,
      %c0_19 = arith.constant 0 : index
      %c0_20 = arith.constant 0 : index
      %c0_21 = arith.constant 0 : index
      %c0_22 = arith.constant 0 : index
      %19 = vector.load %arg1[%c0_19, %c0_20, %c0_21, %c0_22] : memref<2x8x8x256xbf16, #tpu.memory_space<vmem>>, vector<1x7x7x256xbf16>
      %20 = vector.shape_cast %19 : vector<1x7x7x256xbf16> to vector<7x7x256xbf16>
      %c1 = arith.constant 1 : index
      %c1_23 = arith.constant 1 : index
      %c0_24 = arith.constant 0 : index
      %21 = vector.load %arg5[%c1, %c1_23, %c0_24] : memref<16x8x2304xbf16, #tpu.memory_space<vmem>>, vector<7x7x256xbf16>
      tpu.vector_store %arg5[%c1, %c1_23, %c0_24], %20 {strides = array<i32>} : memref<16x8x2304xbf16, #tpu.memory_space<vmem>>, vector<7x7x256xbf16>,
      %cst_25 = arith.constant 0.000000e+00 : bf16
      %22 = vector.broadcast %cst_25 : bf16 to vector<1x8x256xbf16>
      %c0_26 = arith.constant 0 : index
      %c0_27 = arith.constant 0 : index
      %c256 = arith.constant 256 : index
      %23 = vector.load %arg5[%c0_26, %c0_27, %c256] : memref<16x8x2304xbf16, #tpu.memory_space<vmem>>, vector<1x8x256xbf16>
      tpu.vector_store %arg5[%c0_26, %c0_27, %c256], %22 {strides = array<i32>} : memref<16x8x2304xbf16, #tpu.memory_space<vmem>>, vector<1x8x256xbf16>,
      %c0_28 = arith.constant 0 : index
      %c0_29 = arith.constant 0 : index
      %c0_30 = arith.constant 0 : index
      %c0_31 = arith.constant 0 : index
      %24 = vector.load %arg1[%c0_28, %c0_29, %c0_30, %c0_31] : memref<2x8x8x256xbf16, #tpu.memory_space<vmem>>, vector<1x7x8x256xbf16>
      %25 = vector.shape_cast %24 : vector<1x7x8x256xbf16> to vector<7x8x256xbf16>
      %c1_32 = arith.constant 1 : index
      %c0_33 = arith.constant 0 : index
      %c256_34 = arith.constant 256 : index
      %26 = vector.load %arg5[%c1_32, %c0_33, %c256_34] : memref<16x8x2304xbf16, #tpu.memory_space<vmem>>, vector<7x8x256xbf16>
      tpu.vector_store %arg5[%c1_32, %c0_33, %c256_34], %25 {strides = array<i32>} : memref<16x8x2304xbf16, #tpu.memory_space<vmem>>, vector<7x8x256xbf16>,
      %cst_35 = arith.constant 0.000000e+00 : bf16
      %27 = vector.broadcast %cst_35 : bf16 to vector<1x8x256xbf16>
      %c0_36 = arith.constant 0 : index
      %c0_37 = arith.constant 0 : index
      %c512 = arith.constant 512 : index
      %28 = vector.load %arg5[%c0_36, %c0_37, %c512] : memref<16x8x2304xbf16, #tpu.memory_space<vmem>>, vector<1x8x256xbf16>
      tpu.vector_store %arg5[%c0_36, %c0_37, %c512], %27 {strides = array<i32>} : memref<16x8x2304xbf16, #tpu.memory_space<vmem>>, vector<1x8x256xbf16>,
      %cst_38 = arith.constant 0.000000e+00 : bf16
      %29 = vector.broadcast %cst_38 : bf16 to vector<8x1x256xbf16>
      %c0_39 = arith.constant 0 : index
      %c7 = arith.constant 7 : index
      %c512_40 = arith.constant 512 : index
      %30 = vector.load %arg5[%c0_39, %c7, %c512_40] : memref<16x8x2304xbf16, #tpu.memory_space<vmem>>, vector<8x1x256xbf16>
      tpu.vector_store %arg5[%c0_39, %c7, %c512_40], %29 {strides = array<i32>} : memref<16x8x2304xbf16, #tpu.memory_space<vmem>>, vector<8x1x256xbf16>,
      %c0_41 = arith.constant 0 : index
      %c0_42 = arith.constant 0 : index
      %c1_43 = arith.constant 1 : index
      %c0_44 = arith.constant 0 : index
      %31 = vector.load %arg1[%c0_41, %c0_42, %c1_43, %c0_44] : memref<2x8x8x256xbf16, #tpu.memory_space<vmem>>, vector<1x7x7x256xbf16>
      %32 = vector.shape_cast %31 : vector<1x7x7x256xbf16> to vector<7x7x256xbf16>
      %c1_45 = arith.constant 1 : index
      %c0_46 = arith.constant 0 : index
      %c512_47 = arith.constant 512 : index
      %33 = vector.load %arg5[%c1_45, %c0_46, %c512_47] : memref<16x8x2304xbf16, #tpu.memory_space<vmem>>, vector<7x7x256xbf16>
      tpu.vector_store %arg5[%c1_45, %c0_46, %c512_47], %32 {strides = array<i32>} : memref<16x8x2304xbf16, #tpu.memory_space<vmem>>, vector<7x7x256xbf16>,
      %cst_48 = arith.constant 0.000000e+00 : bf16
      %34 = vector.broadcast %cst_48 : bf16 to vector<8x1x256xbf16>
      %c0_49 = arith.constant 0 : index
      %c0_50 = arith.constant 0 : index
      %c768 = arith.constant 768 : index
      %35 = vector.load %arg5[%c0_49, %c0_50, %c768] : memref<16x8x2304xbf16, #tpu.memory_space<vmem>>, vector<8x1x256xbf16>
      tpu.vector_store %arg5[%c0_49, %c0_50, %c768], %34 {strides = array<i32>} : memref<16x8x2304xbf16, #tpu.memory_space<vmem>>, vector<8x1x256xbf16>,
      %c0_51 = arith.constant 0 : index
      %c0_52 = arith.constant 0 : index
      %c0_53 = arith.constant 0 : index
      %c0_54 = arith.constant 0 : index
      %36 = vector.load %arg1[%c0_51, %c0_52, %c0_53, %c0_54] : memref<2x8x8x256xbf16, #tpu.memory_space<vmem>>, vector<1x8x7x256xbf16>
      %37 = vector.shape_cast %36 : vector<1x8x7x256xbf16> to vector<8x7x256xbf16>
      %c0_55 = arith.constant 0 : index
      %c1_56 = arith.constant 1 : index
      %c768_57 = arith.constant 768 : index
      %38 = vector.load %arg5[%c0_55, %c1_56, %c768_57] : memref<16x8x2304xbf16, #tpu.memory_space<vmem>>, vector<8x7x256xbf16>
      tpu.vector_store %arg5[%c0_55, %c1_56, %c768_57], %37 {strides = array<i32>} : memref<16x8x2304xbf16, #tpu.memory_space<vmem>>, vector<8x7x256xbf16>,
      %c0_58 = arith.constant 0 : index
      %c0_59 = arith.constant 0 : index
      %c0_60 = arith.constant 0 : index
      %c0_61 = arith.constant 0 : index
      %39 = vector.load %arg1[%c0_58, %c0_59, %c0_60, %c0_61] : memref<2x8x8x256xbf16, #tpu.memory_space<vmem>>, vector<1x8x8x256xbf16>
      %40 = vector.shape_cast %39 : vector<1x8x8x256xbf16> to vector<8x8x256xbf16>
      %c0_62 = arith.constant 0 : index
      %c0_63 = arith.constant 0 : index
      %c1024 = arith.constant 1024 : index
      %41 = vector.load %arg5[%c0_62, %c0_63, %c1024] : memref<16x8x2304xbf16, #tpu.memory_space<vmem>>, vector<8x8x256xbf16>
      tpu.vector_store %arg5[%c0_62, %c0_63, %c1024], %40 {strides = array<i32>} : memref<16x8x2304xbf16, #tpu.memory_space<vmem>>, vector<8x8x256xbf16>,
      %cst_64 = arith.constant 0.000000e+00 : bf16
      %42 = vector.broadcast %cst_64 : bf16 to vector<8x1x256xbf16>
      %c0_65 = arith.constant 0 : index
      %c7_66 = arith.constant 7 : index
      %c1280 = arith.constant 1280 : index
      %43 = vector.load %arg5[%c0_65, %c7_66, %c1280] : memref<16x8x2304xbf16, #tpu.memory_space<vmem>>, vector<8x1x256xbf16>
      tpu.vector_store %arg5[%c0_65, %c7_66, %c1280], %42 {strides = array<i32>} : memref<16x8x2304xbf16, #tpu.memory_space<vmem>>, vector<8x1x256xbf16>,
      %c0_67 = arith.constant 0 : index
      %c0_68 = arith.constant 0 : index
      %c1_69 = arith.constant 1 : index
      %c0_70 = arith.constant 0 : index
      %44 = vector.load %arg1[%c0_67, %c0_68, %c1_69, %c0_70] : memref<2x8x8x256xbf16, #tpu.memory_space<vmem>>, vector<1x8x7x256xbf16>
      %45 = vector.shape_cast %44 : vector<1x8x7x256xbf16> to vector<8x7x256xbf16>
      %c0_71 = arith.constant 0 : index
      %c0_72 = arith.constant 0 : index
      %c1280_73 = arith.constant 1280 : index
      %46 = vector.load %arg5[%c0_71, %c0_72, %c1280_73] : memref<16x8x2304xbf16, #tpu.memory_space<vmem>>, vector<8x7x256xbf16>
      tpu.vector_store %arg5[%c0_71, %c0_72, %c1280_73], %45 {strides = array<i32>} : memref<16x8x2304xbf16, #tpu.memory_space<vmem>>, vector<8x7x256xbf16>,
      %cst_74 = arith.constant 0.000000e+00 : bf16
      %47 = vector.broadcast %cst_74 : bf16 to vector<1x8x256xbf16>
      %c7_75 = arith.constant 7 : index
      %c0_76 = arith.constant 0 : index
      %c1536 = arith.constant 1536 : index
      %48 = vector.load %arg5[%c7_75, %c0_76, %c1536] : memref<16x8x2304xbf16, #tpu.memory_space<vmem>>, vector<1x8x256xbf16>
      tpu.vector_store %arg5[%c7_75, %c0_76, %c1536], %47 {strides = array<i32>} : memref<16x8x2304xbf16, #tpu.memory_space<vmem>>, vector<1x8x256xbf16>,
      %cst_77 = arith.constant 0.000000e+00 : bf16
      %49 = vector.broadcast %cst_77 : bf16 to vector<8x1x256xbf16>
      %c0_78 = arith.constant 0 : index
      %c0_79 = arith.constant 0 : index
      %c1536_80 = arith.constant 1536 : index
      %50 = vector.load %arg5[%c0_78, %c0_79, %c1536_80] : memref<16x8x2304xbf16, #tpu.memory_space<vmem>>, vector<8x1x256xbf16>
      tpu.vector_store %arg5[%c0_78, %c0_79, %c1536_80], %49 {strides = array<i32>} : memref<16x8x2304xbf16, #tpu.memory_space<vmem>>, vector<8x1x256xbf16>,
      %c0_81 = arith.constant 0 : index
      %c1_82 = arith.constant 1 : index
      %c0_83 = arith.constant 0 : index
      %c0_84 = arith.constant 0 : index
      %51 = vector.load %arg1[%c0_81, %c1_82, %c0_83, %c0_84] : memref<2x8x8x256xbf16, #tpu.memory_space<vmem>>, vector<1x7x7x256xbf16>
      %52 = vector.shape_cast %51 : vector<1x7x7x256xbf16> to vector<7x7x256xbf16>
      %c0_85 = arith.constant 0 : index
      %c1_86 = arith.constant 1 : index
      %c1536_87 = arith.constant 1536 : index
      %53 = vector.load %arg5[%c0_85, %c1_86, %c1536_87] : memref<16x8x2304xbf16, #tpu.memory_space<vmem>>, vector<7x7x256xbf16>
      tpu.vector_store %arg5[%c0_85, %c1_86, %c1536_87], %52 {strides = array<i32>} : memref<16x8x2304xbf16, #tpu.memory_space<vmem>>, vector<7x7x256xbf16>,
      %cst_88 = arith.constant 0.000000e+00 : bf16
      %54 = vector.broadcast %cst_88 : bf16 to vector<1x8x256xbf16>
      %c7_89 = arith.constant 7 : index
      %c0_90 = arith.constant 0 : index
      %c1792 = arith.constant 1792 : index
      %55 = vector.load %arg5[%c7_89, %c0_90, %c1792] : memref<16x8x2304xbf16, #tpu.memory_space<vmem>>, vector<1x8x256xbf16>
      tpu.vector_store %arg5[%c7_89, %c0_90, %c1792], %54 {strides = array<i32>} : memref<16x8x2304xbf16, #tpu.memory_space<vmem>>, vector<1x8x256xbf16>,
      %c0_91 = arith.constant 0 : index
      %c1_92 = arith.constant 1 : index
      %c0_93 = arith.constant 0 : index
      %c0_94 = arith.constant 0 : index
      %56 = vector.load %arg1[%c0_91, %c1_92, %c0_93, %c0_94] : memref<2x8x8x256xbf16, #tpu.memory_space<vmem>>, vector<1x7x8x256xbf16>
      %57 = vector.shape_cast %56 : vector<1x7x8x256xbf16> to vector<7x8x256xbf16>
      %c0_95 = arith.constant 0 : index
      %c0_96 = arith.constant 0 : index
      %c1792_97 = arith.constant 1792 : index
      %58 = vector.load %arg5[%c0_95, %c0_96, %c1792_97] : memref<16x8x2304xbf16, #tpu.memory_space<vmem>>, vector<7x8x256xbf16>
      tpu.vector_store %arg5[%c0_95, %c0_96, %c1792_97], %57 {strides = array<i32>} : memref<16x8x2304xbf16, #tpu.memory_space<vmem>>, vector<7x8x256xbf16>,
      %cst_98 = arith.constant 0.000000e+00 : bf16
      %59 = vector.broadcast %cst_98 : bf16 to vector<1x8x256xbf16>
      %c7_99 = arith.constant 7 : index
      %c0_100 = arith.constant 0 : index
      %c2048 = arith.constant 2048 : index
      %60 = vector.load %arg5[%c7_99, %c0_100, %c2048] : memref<16x8x2304xbf16, #tpu.memory_space<vmem>>, vector<1x8x256xbf16>
      tpu.vector_store %arg5[%c7_99, %c0_100, %c2048], %59 {strides = array<i32>} : memref<16x8x2304xbf16, #tpu.memory_space<vmem>>, vector<1x8x256xbf16>,
      %cst_101 = arith.constant 0.000000e+00 : bf16
      %61 = vector.broadcast %cst_101 : bf16 to vector<8x1x256xbf16>
      %c0_102 = arith.constant 0 : index
      %c7_103 = arith.constant 7 : index
      %c2048_104 = arith.constant 2048 : index
      %62 = vector.load %arg5[%c0_102, %c7_103, %c2048_104] : memref<16x8x2304xbf16, #tpu.memory_space<vmem>>, vector<8x1x256xbf16>
      tpu.vector_store %arg5[%c0_102, %c7_103, %c2048_104], %61 {strides = array<i32>} : memref<16x8x2304xbf16, #tpu.memory_space<vmem>>, vector<8x1x256xbf16>,
      %c0_105 = arith.constant 0 : index
      %c1_106 = arith.constant 1 : index
      %c1_107 = arith.constant 1 : index
      %c0_108 = arith.constant 0 : index
      %63 = vector.load %arg1[%c0_105, %c1_106, %c1_107, %c0_108] : memref<2x8x8x256xbf16, #tpu.memory_space<vmem>>, vector<1x7x7x256xbf16>
      %64 = vector.shape_cast %63 : vector<1x7x7x256xbf16> to vector<7x7x256xbf16>
      %c0_109 = arith.constant 0 : index
      %c0_110 = arith.constant 0 : index
      %c2048_111 = arith.constant 2048 : index
      %65 = vector.load %arg5[%c0_109, %c0_110, %c2048_111] : memref<16x8x2304xbf16, #tpu.memory_space<vmem>>, vector<7x7x256xbf16>
      tpu.vector_store %arg5[%c0_109, %c0_110, %c2048_111], %64 {strides = array<i32>} : memref<16x8x2304xbf16, #tpu.memory_space<vmem>>, vector<7x7x256xbf16>,
      %cst_112 = arith.constant 0.000000e+00 : bf16
      %66 = vector.broadcast %cst_112 : bf16 to vector<1x8x256xbf16>
      %c8 = arith.constant 8 : index
      %c0_113 = arith.constant 0 : index
      %c0_114 = arith.constant 0 : index
      %67 = vector.load %arg5[%c8, %c0_113, %c0_114] : memref<16x8x2304xbf16, #tpu.memory_space<vmem>>, vector<1x8x256xbf16>
      tpu.vector_store %arg5[%c8, %c0_113, %c0_114], %66 {strides = array<i32>} : memref<16x8x2304xbf16, #tpu.memory_space<vmem>>, vector<1x8x256xbf16>,
      %cst_115 = arith.constant 0.000000e+00 : bf16
      %68 = vector.broadcast %cst_115 : bf16 to vector<8x1x256xbf16>
      %c8_116 = arith.constant 8 : index
      %c0_117 = arith.constant 0 : index
      %c0_118 = arith.constant 0 : index
      %69 = vector.load %arg5[%c8_116, %c0_117, %c0_118] : memref<16x8x2304xbf16, #tpu.memory_space<vmem>>, vector<8x1x256xbf16>
      tpu.vector_store %arg5[%c8_116, %c0_117, %c0_118], %68 {strides = array<i32>} : memref<16x8x2304xbf16, #tpu.memory_space<vmem>>, vector<8x1x256xbf16>,
      %c1_119 = arith.constant 1 : index
      %c0_120 = arith.constant 0 : index
      %c0_121 = arith.constant 0 : index
      %c0_122 = arith.constant 0 : index
      %70 = vector.load %arg1[%c1_119, %c0_120, %c0_121, %c0_122] : memref<2x8x8x256xbf16, #tpu.memory_space<vmem>>, vector<1x7x7x256xbf16>
      %71 = vector.shape_cast %70 : vector<1x7x7x256xbf16> to vector<7x7x256xbf16>
      %c9 = arith.constant 9 : index
      %c1_123 = arith.constant 1 : index
      %c0_124 = arith.constant 0 : index
      %72 = vector.load %arg5[%c9, %c1_123, %c0_124] : memref<16x8x2304xbf16, #tpu.memory_space<vmem>>, vector<7x7x256xbf16>
      tpu.vector_store %arg5[%c9, %c1_123, %c0_124], %71 {strides = array<i32>} : memref<16x8x2304xbf16, #tpu.memory_space<vmem>>, vector<7x7x256xbf16>,
      %cst_125 = arith.constant 0.000000e+00 : bf16
      %73 = vector.broadcast %cst_125 : bf16 to vector<1x8x256xbf16>
      %c8_126 = arith.constant 8 : index
      %c0_127 = arith.constant 0 : index
      %c256_128 = arith.constant 256 : index
      %74 = vector.load %arg5[%c8_126, %c0_127, %c256_128] : memref<16x8x2304xbf16, #tpu.memory_space<vmem>>, vector<1x8x256xbf16>
      tpu.vector_store %arg5[%c8_126, %c0_127, %c256_128], %73 {strides = array<i32>} : memref<16x8x2304xbf16, #tpu.memory_space<vmem>>, vector<1x8x256xbf16>,
      %c1_129 = arith.constant 1 : index
      %c0_130 = arith.constant 0 : index
      %c0_131 = arith.constant 0 : index
      %c0_132 = arith.constant 0 : index
      %75 = vector.load %arg1[%c1_129, %c0_130, %c0_131, %c0_132] : memref<2x8x8x256xbf16, #tpu.memory_space<vmem>>, vector<1x7x8x256xbf16>
      %76 = vector.shape_cast %75 : vector<1x7x8x256xbf16> to vector<7x8x256xbf16>
      %c9_133 = arith.constant 9 : index
      %c0_134 = arith.constant 0 : index
      %c256_135 = arith.constant 256 : index
      %77 = vector.load %arg5[%c9_133, %c0_134, %c256_135] : memref<16x8x2304xbf16, #tpu.memory_space<vmem>>, vector<7x8x256xbf16>
      tpu.vector_store %arg5[%c9_133, %c0_134, %c256_135], %76 {strides = array<i32>} : memref<16x8x2304xbf16, #tpu.memory_space<vmem>>, vector<7x8x256xbf16>,
      %cst_136 = arith.constant 0.000000e+00 : bf16
      %78 = vector.broadcast %cst_136 : bf16 to vector<1x8x256xbf16>
      %c8_137 = arith.constant 8 : index
      %c0_138 = arith.constant 0 : index
      %c512_139 = arith.constant 512 : index
      %79 = vector.load %arg5[%c8_137, %c0_138, %c512_139] : memref<16x8x2304xbf16, #tpu.memory_space<vmem>>, vector<1x8x256xbf16>
      tpu.vector_store %arg5[%c8_137, %c0_138, %c512_139], %78 {strides = array<i32>} : memref<16x8x2304xbf16, #tpu.memory_space<vmem>>, vector<1x8x256xbf16>,
      %cst_140 = arith.constant 0.000000e+00 : bf16
      %80 = vector.broadcast %cst_140 : bf16 to vector<8x1x256xbf16>
      %c8_141 = arith.constant 8 : index
      %c7_142 = arith.constant 7 : index
      %c512_143 = arith.constant 512 : index
      %81 = vector.load %arg5[%c8_141, %c7_142, %c512_143] : memref<16x8x2304xbf16, #tpu.memory_space<vmem>>, vector<8x1x256xbf16>
      tpu.vector_store %arg5[%c8_141, %c7_142, %c512_143], %80 {strides = array<i32>} : memref<16x8x2304xbf16, #tpu.memory_space<vmem>>, vector<8x1x256xbf16>,
      %c1_144 = arith.constant 1 : index
      %c0_145 = arith.constant 0 : index
      %c1_146 = arith.constant 1 : index
      %c0_147 = arith.constant 0 : index
      %82 = vector.load %arg1[%c1_144, %c0_145, %c1_146, %c0_147] : memref<2x8x8x256xbf16, #tpu.memory_space<vmem>>, vector<1x7x7x256xbf16>
      %83 = vector.shape_cast %82 : vector<1x7x7x256xbf16> to vector<7x7x256xbf16>
      %c9_148 = arith.constant 9 : index
      %c0_149 = arith.constant 0 : index
      %c512_150 = arith.constant 512 : index
      %84 = vector.load %arg5[%c9_148, %c0_149, %c512_150] : memref<16x8x2304xbf16, #tpu.memory_space<vmem>>, vector<7x7x256xbf16>
      tpu.vector_store %arg5[%c9_148, %c0_149, %c512_150], %83 {strides = array<i32>} : memref<16x8x2304xbf16, #tpu.memory_space<vmem>>, vector<7x7x256xbf16>,
      %cst_151 = arith.constant 0.000000e+00 : bf16
      %85 = vector.broadcast %cst_151 : bf16 to vector<8x1x256xbf16>
      %c8_152 = arith.constant 8 : index
      %c0_153 = arith.constant 0 : index
      %c768_154 = arith.constant 768 : index
      %86 = vector.load %arg5[%c8_152, %c0_153, %c768_154] : memref<16x8x2304xbf16, #tpu.memory_space<vmem>>, vector<8x1x256xbf16>
      tpu.vector_store %arg5[%c8_152, %c0_153, %c768_154], %85 {strides = array<i32>} : memref<16x8x2304xbf16, #tpu.memory_space<vmem>>, vector<8x1x256xbf16>,
      %c1_155 = arith.constant 1 : index
      %c0_156 = arith.constant 0 : index
      %c0_157 = arith.constant 0 : index
      %c0_158 = arith.constant 0 : index
      %87 = vector.load %arg1[%c1_155, %c0_156, %c0_157, %c0_158] : memref<2x8x8x256xbf16, #tpu.memory_space<vmem>>, vector<1x8x7x256xbf16>
      %88 = vector.shape_cast %87 : vector<1x8x7x256xbf16> to vector<8x7x256xbf16>
      %c8_159 = arith.constant 8 : index
      %c1_160 = arith.constant 1 : index
      %c768_161 = arith.constant 768 : index
      %89 = vector.load %arg5[%c8_159, %c1_160, %c768_161] : memref<16x8x2304xbf16, #tpu.memory_space<vmem>>, vector<8x7x256xbf16>
      tpu.vector_store %arg5[%c8_159, %c1_160, %c768_161], %88 {strides = array<i32>} : memref<16x8x2304xbf16, #tpu.memory_space<vmem>>, vector<8x7x256xbf16>,
      %c1_162 = arith.constant 1 : index
      %c0_163 = arith.constant 0 : index
      %c0_164 = arith.constant 0 : index
      %c0_165 = arith.constant 0 : index
      %90 = vector.load %arg1[%c1_162, %c0_163, %c0_164, %c0_165] : memref<2x8x8x256xbf16, #tpu.memory_space<vmem>>, vector<1x8x8x256xbf16>
      %91 = vector.shape_cast %90 : vector<1x8x8x256xbf16> to vector<8x8x256xbf16>
      %c8_166 = arith.constant 8 : index
      %c0_167 = arith.constant 0 : index
      %c1024_168 = arith.constant 1024 : index
      %92 = vector.load %arg5[%c8_166, %c0_167, %c1024_168] : memref<16x8x2304xbf16, #tpu.memory_space<vmem>>, vector<8x8x256xbf16>
      tpu.vector_store %arg5[%c8_166, %c0_167, %c1024_168], %91 {strides = array<i32>} : memref<16x8x2304xbf16, #tpu.memory_space<vmem>>, vector<8x8x256xbf16>,
      %cst_169 = arith.constant 0.000000e+00 : bf16
      %93 = vector.broadcast %cst_169 : bf16 to vector<8x1x256xbf16>
      %c8_170 = arith.constant 8 : index
      %c7_171 = arith.constant 7 : index
      %c1280_172 = arith.constant 1280 : index
      %94 = vector.load %arg5[%c8_170, %c7_171, %c1280_172] : memref<16x8x2304xbf16, #tpu.memory_space<vmem>>, vector<8x1x256xbf16>
      tpu.vector_store %arg5[%c8_170, %c7_171, %c1280_172], %93 {strides = array<i32>} : memref<16x8x2304xbf16, #tpu.memory_space<vmem>>, vector<8x1x256xbf16>,
      %c1_173 = arith.constant 1 : index
      %c0_174 = arith.constant 0 : index
      %c1_175 = arith.constant 1 : index
      %c0_176 = arith.constant 0 : index
      %95 = vector.load %arg1[%c1_173, %c0_174, %c1_175, %c0_176] : memref<2x8x8x256xbf16, #tpu.memory_space<vmem>>, vector<1x8x7x256xbf16>
      %96 = vector.shape_cast %95 : vector<1x8x7x256xbf16> to vector<8x7x256xbf16>
      %c8_177 = arith.constant 8 : index
      %c0_178 = arith.constant 0 : index
      %c1280_179 = arith.constant 1280 : index
      %97 = vector.load %arg5[%c8_177, %c0_178, %c1280_179] : memref<16x8x2304xbf16, #tpu.memory_space<vmem>>, vector<8x7x256xbf16>
      tpu.vector_store %arg5[%c8_177, %c0_178, %c1280_179], %96 {strides = array<i32>} : memref<16x8x2304xbf16, #tpu.memory_space<vmem>>, vector<8x7x256xbf16>,
      %cst_180 = arith.constant 0.000000e+00 : bf16
      %98 = vector.broadcast %cst_180 : bf16 to vector<1x8x256xbf16>
      %c15 = arith.constant 15 : index
      %c0_181 = arith.constant 0 : index
      %c1536_182 = arith.constant 1536 : index
      %99 = vector.load %arg5[%c15, %c0_181, %c1536_182] : memref<16x8x2304xbf16, #tpu.memory_space<vmem>>, vector<1x8x256xbf16>
      tpu.vector_store %arg5[%c15, %c0_181, %c1536_182], %98 {strides = array<i32>} : memref<16x8x2304xbf16, #tpu.memory_space<vmem>>, vector<1x8x256xbf16>,
      %cst_183 = arith.constant 0.000000e+00 : bf16
      %100 = vector.broadcast %cst_183 : bf16 to vector<8x1x256xbf16>
      %c8_184 = arith.constant 8 : index
      %c0_185 = arith.constant 0 : index
      %c1536_186 = arith.constant 1536 : index
      %101 = vector.load %arg5[%c8_184, %c0_185, %c1536_186] : memref<16x8x2304xbf16, #tpu.memory_space<vmem>>, vector<8x1x256xbf16>
      tpu.vector_store %arg5[%c8_184, %c0_185, %c1536_186], %100 {strides = array<i32>} : memref<16x8x2304xbf16, #tpu.memory_space<vmem>>, vector<8x1x256xbf16>,
      %c1_187 = arith.constant 1 : index
      %c1_188 = arith.constant 1 : index
      %c0_189 = arith.constant 0 : index
      %c0_190 = arith.constant 0 : index
      %102 = vector.load %arg1[%c1_187, %c1_188, %c0_189, %c0_190] : memref<2x8x8x256xbf16, #tpu.memory_space<vmem>>, vector<1x7x7x256xbf16>
      %103 = vector.shape_cast %102 : vector<1x7x7x256xbf16> to vector<7x7x256xbf16>
      %c8_191 = arith.constant 8 : index
      %c1_192 = arith.constant 1 : index
      %c1536_193 = arith.constant 1536 : index
      %104 = vector.load %arg5[%c8_191, %c1_192, %c1536_193] : memref<16x8x2304xbf16, #tpu.memory_space<vmem>>, vector<7x7x256xbf16>
      tpu.vector_store %arg5[%c8_191, %c1_192, %c1536_193], %103 {strides = array<i32>} : memref<16x8x2304xbf16, #tpu.memory_space<vmem>>, vector<7x7x256xbf16>,
      %cst_194 = arith.constant 0.000000e+00 : bf16
      %105 = vector.broadcast %cst_194 : bf16 to vector<1x8x256xbf16>
      %c15_195 = arith.constant 15 : index
      %c0_196 = arith.constant 0 : index
      %c1792_197 = arith.constant 1792 : index
      %106 = vector.load %arg5[%c15_195, %c0_196, %c1792_197] : memref<16x8x2304xbf16, #tpu.memory_space<vmem>>, vector<1x8x256xbf16>
      tpu.vector_store %arg5[%c15_195, %c0_196, %c1792_197], %105 {strides = array<i32>} : memref<16x8x2304xbf16, #tpu.memory_space<vmem>>, vector<1x8x256xbf16>,
      %c1_198 = arith.constant 1 : index
      %c1_199 = arith.constant 1 : index
      %c0_200 = arith.constant 0 : index
      %c0_201 = arith.constant 0 : index
      %107 = vector.load %arg1[%c1_198, %c1_199, %c0_200, %c0_201] : memref<2x8x8x256xbf16, #tpu.memory_space<vmem>>, vector<1x7x8x256xbf16>
      %108 = vector.shape_cast %107 : vector<1x7x8x256xbf16> to vector<7x8x256xbf16>
      %c8_202 = arith.constant 8 : index
      %c0_203 = arith.constant 0 : index
      %c1792_204 = arith.constant 1792 : index
      %109 = vector.load %arg5[%c8_202, %c0_203, %c1792_204] : memref<16x8x2304xbf16, #tpu.memory_space<vmem>>, vector<7x8x256xbf16>
      tpu.vector_store %arg5[%c8_202, %c0_203, %c1792_204], %108 {strides = array<i32>} : memref<16x8x2304xbf16, #tpu.memory_space<vmem>>, vector<7x8x256xbf16>,
      %cst_205 = arith.constant 0.000000e+00 : bf16
      %110 = vector.broadcast %cst_205 : bf16 to vector<1x8x256xbf16>
      %c15_206 = arith.constant 15 : index
      %c0_207 = arith.constant 0 : index
      %c2048_208 = arith.constant 2048 : index
      %111 = vector.load %arg5[%c15_206, %c0_207, %c2048_208] : memref<16x8x2304xbf16, #tpu.memory_space<vmem>>, vector<1x8x256xbf16>
      tpu.vector_store %arg5[%c15_206, %c0_207, %c2048_208], %110 {strides = array<i32>} : memref<16x8x2304xbf16, #tpu.memory_space<vmem>>, vector<1x8x256xbf16>,
      %cst_209 = arith.constant 0.000000e+00 : bf16
      %112 = vector.broadcast %cst_209 : bf16 to vector<8x1x256xbf16>
      %c8_210 = arith.constant 8 : index
      %c7_211 = arith.constant 7 : index
      %c2048_212 = arith.constant 2048 : index
      %113 = vector.load %arg5[%c8_210, %c7_211, %c2048_212] : memref<16x8x2304xbf16, #tpu.memory_space<vmem>>, vector<8x1x256xbf16>
      tpu.vector_store %arg5[%c8_210, %c7_211, %c2048_212], %112 {strides = array<i32>} : memref<16x8x2304xbf16, #tpu.memory_space<vmem>>, vector<8x1x256xbf16>,
      %c1_213 = arith.constant 1 : index
      %c1_214 = arith.constant 1 : index
      %c1_215 = arith.constant 1 : index
      %c0_216 = arith.constant 0 : index
      %114 = vector.load %arg1[%c1_213, %c1_214, %c1_215, %c0_216] : memref<2x8x8x256xbf16, #tpu.memory_space<vmem>>, vector<1x7x7x256xbf16>
      %115 = vector.shape_cast %114 : vector<1x7x7x256xbf16> to vector<7x7x256xbf16>
      %c8_217 = arith.constant 8 : index
      %c0_218 = arith.constant 0 : index
      %c2048_219 = arith.constant 2048 : index
      %116 = vector.load %arg5[%c8_217, %c0_218, %c2048_219] : memref<16x8x2304xbf16, #tpu.memory_space<vmem>>, vector<7x7x256xbf16>
      tpu.vector_store %arg5[%c8_217, %c0_218, %c2048_219], %115 {strides = array<i32>} : memref<16x8x2304xbf16, #tpu.memory_space<vmem>>, vector<7x7x256xbf16>,
    } else {
    }
    %c0 = arith.constant 0 : index
    %c0_1 = arith.constant 0 : index
    %c0_2 = arith.constant 0 : index
    %3 = vector.load %arg5[%c0, %c0_1, %c0_2] : memref<16x8x2304xbf16, #tpu.memory_space<vmem>>, vector<16x8x2304xbf16>
    %c0_3 = arith.constant 0 : index
    %c0_4 = arith.constant 0 : index
    %4 = vector.load %arg2[%c0_3, %c0_4] : memref<2304x32xbf16, #tpu.memory_space<vmem>>, vector<2304x32xbf16>
    %cst = arith.constant dense<0.000000e+00> : vector<16x8x32xf32>
    %5 = tpu.matmul %3, %4, %cst {dimension_numbers = #tpu.dot_dimension_numbers<[2], [0], [0, 1], [1], [0, 0, 0, 1, 1, 1], [], []>} : vector<16x8x2304xbf16>, vector<2304x32xbf16>, vector<16x8x32xf32> -> vector<16x8x32xf32>
    %c0_5 = arith.constant 0 : index
    %c0_6 = arith.constant 0 : index
    %6 = vector.load %arg3[%c0_5, %c0_6] : memref<1x32xf32, #tpu.memory_space<vmem>>, vector<1x32xf32>
    %7 = vector.shape_cast %6 : vector<1x32xf32> to vector<32xf32>
    %8 = vector.shape_cast %7 : vector<32xf32> to vector<1x1x32xf32>
    %9 = vector.broadcast %8 : vector<1x1x32xf32> to vector<16x8x32xf32>
    %10 = arith.addf %5, %9 : vector<16x8x32xf32>
    %cst_7 = arith.constant 0.000000e+00 : f32
    %11 = vector.broadcast %cst_7 : f32 to vector<16x8x32xf32>
    %12 = arith.maximumf %10, %11 : vector<16x8x32xf32>
    %13 = arith.truncf %12 : vector<16x8x32xf32> to vector<16x8x32xbf16>
    %c0_8 = arith.constant 0 : index
    %c0_9 = arith.constant 0 : index
    %c0_10 = arith.constant 0 : index
    %14 = vector.load %arg4[%c0_8, %c0_9, %c0_10] : memref<16x8x32xbf16, #tpu.memory_space<vmem>>, vector<16x8x32xbf16>
    tpu.vector_store %arg4[%c0_8, %c0_9, %c0_10], %13 {strides = array<i32>} : memref<16x8x32xbf16, #tpu.memory_space<vmem>>, vector<16x8x32xbf16>,
    return
  }
  func.func @transform_0(%arg0: i32) -> (i32, i32, i32, i32) {
    %c0_i32 = arith.constant 0 : i32
    %c0_i32_0 = arith.constant 0 : i32
    %c0_i32_1 = arith.constant 0 : i32
    %c0_i32_2 = arith.constant 0 : i32
    %c0_i32_3 = arith.constant 0 : i32
    return %c0_i32, %c0_i32_0, %c0_i32_1, %c0_i32_2 : i32, i32, i32, i32
  }
  func.func @transform_1(%arg0: i32) -> (i32, i32) {
    %c0_i32 = arith.constant 0 : i32
    %c0_i32_0 = arith.constant 0 : i32
    return %c0_i32, %arg0 : i32, i32
  }
  func.func @transform_2(%arg0: i32) -> (i32, i32) {
    %c0_i32 = arith.constant 0 : i32
    %c0_i32_0 = arith.constant 0 : i32
    return %c0_i32, %arg0 : i32, i32
  }
  func.func @transform_3(%arg0: i32) -> (i32, i32, i32) {
    %c0_i32 = arith.constant 0 : i32
    %c0_i32_0 = arith.constant 0 : i32
    %c0_i32_1 = arith.constant 0 : i32
    return %c0_i32, %c0_i32_0, %arg0 : i32, i32, i32
  }
}

module attributes {stable_mosaic.version = 11 : i64} {
  func.func @_conv3x3_relu_kernel(%arg0: i32, %arg1: memref<2x8x8x64xbf16, #tpu.memory_space<vmem>>, %arg2: memref<576x256xbf16, #tpu.memory_space<vmem>>, %arg3: memref<1x256xf32, #tpu.memory_space<vmem>>, %arg4: memref<16x8x256xbf16, #tpu.memory_space<vmem>>, %arg5: memref<16x8x576xbf16, #tpu.memory_space<vmem>>) attributes {dimension_semantics = [#tpu.dimension_semantics<arbitrary>], iteration_bounds = array<i64: 1>, scalar_prefetch = 0 : i64, scratch_operands = 1 : i64, tpu.core_type = #tpu.core_type<tc>, window_params = [{pipeline_mode = #tpu.pipeline_mode<synchronous>, transform_indices = @transform_0, window_bounds = array<i64: 2, 8, 8, 64>}, {transform_indices = @transform_1, window_bounds = array<i64: 576, 256>}, {transform_indices = @transform_2, window_bounds = array<i64: 1, 256>}, {transform_indices = @transform_3, window_bounds = array<i64: 16, 8, 256>}]} {
    %c0_i32 = arith.constant 0 : i32
    %0 = arith.cmpi eq, %arg0, %c0_i32 : i32
    %1 = arith.extui %0 : i1 to i32
    %c0_i32_0 = arith.constant 0 : i32
    %2 = arith.cmpi ne, %1, %c0_i32_0 : i32
    scf.if %2 {
      %cst_11 = arith.constant 0.000000e+00 : bf16
      %15 = vector.broadcast %cst_11 : bf16 to vector<1x8x64xbf16>
      %c0_12 = arith.constant 0 : index
      %c0_13 = arith.constant 0 : index
      %c0_14 = arith.constant 0 : index
      %16 = vector.load %arg5[%c0_12, %c0_13, %c0_14] : memref<16x8x576xbf16, #tpu.memory_space<vmem>>, vector<1x8x64xbf16>
      tpu.vector_store %arg5[%c0_12, %c0_13, %c0_14], %15 {strides = array<i32>} : memref<16x8x576xbf16, #tpu.memory_space<vmem>>, vector<1x8x64xbf16>,
      %cst_15 = arith.constant 0.000000e+00 : bf16
      %17 = vector.broadcast %cst_15 : bf16 to vector<8x1x64xbf16>
      %c0_16 = arith.constant 0 : index
      %c0_17 = arith.constant 0 : index
      %c0_18 = arith.constant 0 : index
      %18 = vector.load %arg5[%c0_16, %c0_17, %c0_18] : memref<16x8x576xbf16, #tpu.memory_space<vmem>>, vector<8x1x64xbf16>
      tpu.vector_store %arg5[%c0_16, %c0_17, %c0_18], %17 {strides = array<i32>} : memref<16x8x576xbf16, #tpu.memory_space<vmem>>, vector<8x1x64xbf16>,
      %c0_19 = arith.constant 0 : index
      %c0_20 = arith.constant 0 : index
      %c0_21 = arith.constant 0 : index
      %c0_22 = arith.constant 0 : index
      %19 = vector.load %arg1[%c0_19, %c0_20, %c0_21, %c0_22] : memref<2x8x8x64xbf16, #tpu.memory_space<vmem>>, vector<1x7x7x64xbf16>
      %20 = vector.shape_cast %19 : vector<1x7x7x64xbf16> to vector<7x7x64xbf16>
      %c1 = arith.constant 1 : index
      %c1_23 = arith.constant 1 : index
      %c0_24 = arith.constant 0 : index
      %21 = vector.load %arg5[%c1, %c1_23, %c0_24] : memref<16x8x576xbf16, #tpu.memory_space<vmem>>, vector<7x7x64xbf16>
      tpu.vector_store %arg5[%c1, %c1_23, %c0_24], %20 {strides = array<i32>} : memref<16x8x576xbf16, #tpu.memory_space<vmem>>, vector<7x7x64xbf16>,
      %cst_25 = arith.constant 0.000000e+00 : bf16
      %22 = vector.broadcast %cst_25 : bf16 to vector<1x8x64xbf16>
      %c0_26 = arith.constant 0 : index
      %c0_27 = arith.constant 0 : index
      %c64 = arith.constant 64 : index
      %23 = vector.load %arg5[%c0_26, %c0_27, %c64] : memref<16x8x576xbf16, #tpu.memory_space<vmem>>, vector<1x8x64xbf16>
      tpu.vector_store %arg5[%c0_26, %c0_27, %c64], %22 {strides = array<i32>} : memref<16x8x576xbf16, #tpu.memory_space<vmem>>, vector<1x8x64xbf16>,
      %c0_28 = arith.constant 0 : index
      %c0_29 = arith.constant 0 : index
      %c0_30 = arith.constant 0 : index
      %c0_31 = arith.constant 0 : index
      %24 = vector.load %arg1[%c0_28, %c0_29, %c0_30, %c0_31] : memref<2x8x8x64xbf16, #tpu.memory_space<vmem>>, vector<1x7x8x64xbf16>
      %25 = vector.shape_cast %24 : vector<1x7x8x64xbf16> to vector<7x8x64xbf16>
      %c1_32 = arith.constant 1 : index
      %c0_33 = arith.constant 0 : index
      %c64_34 = arith.constant 64 : index
      %26 = vector.load %arg5[%c1_32, %c0_33, %c64_34] : memref<16x8x576xbf16, #tpu.memory_space<vmem>>, vector<7x8x64xbf16>
      tpu.vector_store %arg5[%c1_32, %c0_33, %c64_34], %25 {strides = array<i32>} : memref<16x8x576xbf16, #tpu.memory_space<vmem>>, vector<7x8x64xbf16>,
      %cst_35 = arith.constant 0.000000e+00 : bf16
      %27 = vector.broadcast %cst_35 : bf16 to vector<1x8x64xbf16>
      %c0_36 = arith.constant 0 : index
      %c0_37 = arith.constant 0 : index
      %c128 = arith.constant 128 : index
      %28 = vector.load %arg5[%c0_36, %c0_37, %c128] : memref<16x8x576xbf16, #tpu.memory_space<vmem>>, vector<1x8x64xbf16>
      tpu.vector_store %arg5[%c0_36, %c0_37, %c128], %27 {strides = array<i32>} : memref<16x8x576xbf16, #tpu.memory_space<vmem>>, vector<1x8x64xbf16>,
      %cst_38 = arith.constant 0.000000e+00 : bf16
      %29 = vector.broadcast %cst_38 : bf16 to vector<8x1x64xbf16>
      %c0_39 = arith.constant 0 : index
      %c7 = arith.constant 7 : index
      %c128_40 = arith.constant 128 : index
      %30 = vector.load %arg5[%c0_39, %c7, %c128_40] : memref<16x8x576xbf16, #tpu.memory_space<vmem>>, vector<8x1x64xbf16>
      tpu.vector_store %arg5[%c0_39, %c7, %c128_40], %29 {strides = array<i32>} : memref<16x8x576xbf16, #tpu.memory_space<vmem>>, vector<8x1x64xbf16>,
      %c0_41 = arith.constant 0 : index
      %c0_42 = arith.constant 0 : index
      %c1_43 = arith.constant 1 : index
      %c0_44 = arith.constant 0 : index
      %31 = vector.load %arg1[%c0_41, %c0_42, %c1_43, %c0_44] : memref<2x8x8x64xbf16, #tpu.memory_space<vmem>>, vector<1x7x7x64xbf16>
      %32 = vector.shape_cast %31 : vector<1x7x7x64xbf16> to vector<7x7x64xbf16>
      %c1_45 = arith.constant 1 : index
      %c0_46 = arith.constant 0 : index
      %c128_47 = arith.constant 128 : index
      %33 = vector.load %arg5[%c1_45, %c0_46, %c128_47] : memref<16x8x576xbf16, #tpu.memory_space<vmem>>, vector<7x7x64xbf16>
      tpu.vector_store %arg5[%c1_45, %c0_46, %c128_47], %32 {strides = array<i32>} : memref<16x8x576xbf16, #tpu.memory_space<vmem>>, vector<7x7x64xbf16>,
      %cst_48 = arith.constant 0.000000e+00 : bf16
      %34 = vector.broadcast %cst_48 : bf16 to vector<8x1x64xbf16>
      %c0_49 = arith.constant 0 : index
      %c0_50 = arith.constant 0 : index
      %c192 = arith.constant 192 : index
      %35 = vector.load %arg5[%c0_49, %c0_50, %c192] : memref<16x8x576xbf16, #tpu.memory_space<vmem>>, vector<8x1x64xbf16>
      tpu.vector_store %arg5[%c0_49, %c0_50, %c192], %34 {strides = array<i32>} : memref<16x8x576xbf16, #tpu.memory_space<vmem>>, vector<8x1x64xbf16>,
      %c0_51 = arith.constant 0 : index
      %c0_52 = arith.constant 0 : index
      %c0_53 = arith.constant 0 : index
      %c0_54 = arith.constant 0 : index
      %36 = vector.load %arg1[%c0_51, %c0_52, %c0_53, %c0_54] : memref<2x8x8x64xbf16, #tpu.memory_space<vmem>>, vector<1x8x7x64xbf16>
      %37 = vector.shape_cast %36 : vector<1x8x7x64xbf16> to vector<8x7x64xbf16>
      %c0_55 = arith.constant 0 : index
      %c1_56 = arith.constant 1 : index
      %c192_57 = arith.constant 192 : index
      %38 = vector.load %arg5[%c0_55, %c1_56, %c192_57] : memref<16x8x576xbf16, #tpu.memory_space<vmem>>, vector<8x7x64xbf16>
      tpu.vector_store %arg5[%c0_55, %c1_56, %c192_57], %37 {strides = array<i32>} : memref<16x8x576xbf16, #tpu.memory_space<vmem>>, vector<8x7x64xbf16>,
      %c0_58 = arith.constant 0 : index
      %c0_59 = arith.constant 0 : index
      %c0_60 = arith.constant 0 : index
      %c0_61 = arith.constant 0 : index
      %39 = vector.load %arg1[%c0_58, %c0_59, %c0_60, %c0_61] : memref<2x8x8x64xbf16, #tpu.memory_space<vmem>>, vector<1x8x8x64xbf16>
      %40 = vector.shape_cast %39 : vector<1x8x8x64xbf16> to vector<8x8x64xbf16>
      %c0_62 = arith.constant 0 : index
      %c0_63 = arith.constant 0 : index
      %c256 = arith.constant 256 : index
      %41 = vector.load %arg5[%c0_62, %c0_63, %c256] : memref<16x8x576xbf16, #tpu.memory_space<vmem>>, vector<8x8x64xbf16>
      tpu.vector_store %arg5[%c0_62, %c0_63, %c256], %40 {strides = array<i32>} : memref<16x8x576xbf16, #tpu.memory_space<vmem>>, vector<8x8x64xbf16>,
      %cst_64 = arith.constant 0.000000e+00 : bf16
      %42 = vector.broadcast %cst_64 : bf16 to vector<8x1x64xbf16>
      %c0_65 = arith.constant 0 : index
      %c7_66 = arith.constant 7 : index
      %c320 = arith.constant 320 : index
      %43 = vector.load %arg5[%c0_65, %c7_66, %c320] : memref<16x8x576xbf16, #tpu.memory_space<vmem>>, vector<8x1x64xbf16>
      tpu.vector_store %arg5[%c0_65, %c7_66, %c320], %42 {strides = array<i32>} : memref<16x8x576xbf16, #tpu.memory_space<vmem>>, vector<8x1x64xbf16>,
      %c0_67 = arith.constant 0 : index
      %c0_68 = arith.constant 0 : index
      %c1_69 = arith.constant 1 : index
      %c0_70 = arith.constant 0 : index
      %44 = vector.load %arg1[%c0_67, %c0_68, %c1_69, %c0_70] : memref<2x8x8x64xbf16, #tpu.memory_space<vmem>>, vector<1x8x7x64xbf16>
      %45 = vector.shape_cast %44 : vector<1x8x7x64xbf16> to vector<8x7x64xbf16>
      %c0_71 = arith.constant 0 : index
      %c0_72 = arith.constant 0 : index
      %c320_73 = arith.constant 320 : index
      %46 = vector.load %arg5[%c0_71, %c0_72, %c320_73] : memref<16x8x576xbf16, #tpu.memory_space<vmem>>, vector<8x7x64xbf16>
      tpu.vector_store %arg5[%c0_71, %c0_72, %c320_73], %45 {strides = array<i32>} : memref<16x8x576xbf16, #tpu.memory_space<vmem>>, vector<8x7x64xbf16>,
      %cst_74 = arith.constant 0.000000e+00 : bf16
      %47 = vector.broadcast %cst_74 : bf16 to vector<1x8x64xbf16>
      %c7_75 = arith.constant 7 : index
      %c0_76 = arith.constant 0 : index
      %c384 = arith.constant 384 : index
      %48 = vector.load %arg5[%c7_75, %c0_76, %c384] : memref<16x8x576xbf16, #tpu.memory_space<vmem>>, vector<1x8x64xbf16>
      tpu.vector_store %arg5[%c7_75, %c0_76, %c384], %47 {strides = array<i32>} : memref<16x8x576xbf16, #tpu.memory_space<vmem>>, vector<1x8x64xbf16>,
      %cst_77 = arith.constant 0.000000e+00 : bf16
      %49 = vector.broadcast %cst_77 : bf16 to vector<8x1x64xbf16>
      %c0_78 = arith.constant 0 : index
      %c0_79 = arith.constant 0 : index
      %c384_80 = arith.constant 384 : index
      %50 = vector.load %arg5[%c0_78, %c0_79, %c384_80] : memref<16x8x576xbf16, #tpu.memory_space<vmem>>, vector<8x1x64xbf16>
      tpu.vector_store %arg5[%c0_78, %c0_79, %c384_80], %49 {strides = array<i32>} : memref<16x8x576xbf16, #tpu.memory_space<vmem>>, vector<8x1x64xbf16>,
      %c0_81 = arith.constant 0 : index
      %c1_82 = arith.constant 1 : index
      %c0_83 = arith.constant 0 : index
      %c0_84 = arith.constant 0 : index
      %51 = vector.load %arg1[%c0_81, %c1_82, %c0_83, %c0_84] : memref<2x8x8x64xbf16, #tpu.memory_space<vmem>>, vector<1x7x7x64xbf16>
      %52 = vector.shape_cast %51 : vector<1x7x7x64xbf16> to vector<7x7x64xbf16>
      %c0_85 = arith.constant 0 : index
      %c1_86 = arith.constant 1 : index
      %c384_87 = arith.constant 384 : index
      %53 = vector.load %arg5[%c0_85, %c1_86, %c384_87] : memref<16x8x576xbf16, #tpu.memory_space<vmem>>, vector<7x7x64xbf16>
      tpu.vector_store %arg5[%c0_85, %c1_86, %c384_87], %52 {strides = array<i32>} : memref<16x8x576xbf16, #tpu.memory_space<vmem>>, vector<7x7x64xbf16>,
      %cst_88 = arith.constant 0.000000e+00 : bf16
      %54 = vector.broadcast %cst_88 : bf16 to vector<1x8x64xbf16>
      %c7_89 = arith.constant 7 : index
      %c0_90 = arith.constant 0 : index
      %c448 = arith.constant 448 : index
      %55 = vector.load %arg5[%c7_89, %c0_90, %c448] : memref<16x8x576xbf16, #tpu.memory_space<vmem>>, vector<1x8x64xbf16>
      tpu.vector_store %arg5[%c7_89, %c0_90, %c448], %54 {strides = array<i32>} : memref<16x8x576xbf16, #tpu.memory_space<vmem>>, vector<1x8x64xbf16>,
      %c0_91 = arith.constant 0 : index
      %c1_92 = arith.constant 1 : index
      %c0_93 = arith.constant 0 : index
      %c0_94 = arith.constant 0 : index
      %56 = vector.load %arg1[%c0_91, %c1_92, %c0_93, %c0_94] : memref<2x8x8x64xbf16, #tpu.memory_space<vmem>>, vector<1x7x8x64xbf16>
      %57 = vector.shape_cast %56 : vector<1x7x8x64xbf16> to vector<7x8x64xbf16>
      %c0_95 = arith.constant 0 : index
      %c0_96 = arith.constant 0 : index
      %c448_97 = arith.constant 448 : index
      %58 = vector.load %arg5[%c0_95, %c0_96, %c448_97] : memref<16x8x576xbf16, #tpu.memory_space<vmem>>, vector<7x8x64xbf16>
      tpu.vector_store %arg5[%c0_95, %c0_96, %c448_97], %57 {strides = array<i32>} : memref<16x8x576xbf16, #tpu.memory_space<vmem>>, vector<7x8x64xbf16>,
      %cst_98 = arith.constant 0.000000e+00 : bf16
      %59 = vector.broadcast %cst_98 : bf16 to vector<1x8x64xbf16>
      %c7_99 = arith.constant 7 : index
      %c0_100 = arith.constant 0 : index
      %c512 = arith.constant 512 : index
      %60 = vector.load %arg5[%c7_99, %c0_100, %c512] : memref<16x8x576xbf16, #tpu.memory_space<vmem>>, vector<1x8x64xbf16>
      tpu.vector_store %arg5[%c7_99, %c0_100, %c512], %59 {strides = array<i32>} : memref<16x8x576xbf16, #tpu.memory_space<vmem>>, vector<1x8x64xbf16>,
      %cst_101 = arith.constant 0.000000e+00 : bf16
      %61 = vector.broadcast %cst_101 : bf16 to vector<8x1x64xbf16>
      %c0_102 = arith.constant 0 : index
      %c7_103 = arith.constant 7 : index
      %c512_104 = arith.constant 512 : index
      %62 = vector.load %arg5[%c0_102, %c7_103, %c512_104] : memref<16x8x576xbf16, #tpu.memory_space<vmem>>, vector<8x1x64xbf16>
      tpu.vector_store %arg5[%c0_102, %c7_103, %c512_104], %61 {strides = array<i32>} : memref<16x8x576xbf16, #tpu.memory_space<vmem>>, vector<8x1x64xbf16>,
      %c0_105 = arith.constant 0 : index
      %c1_106 = arith.constant 1 : index
      %c1_107 = arith.constant 1 : index
      %c0_108 = arith.constant 0 : index
      %63 = vector.load %arg1[%c0_105, %c1_106, %c1_107, %c0_108] : memref<2x8x8x64xbf16, #tpu.memory_space<vmem>>, vector<1x7x7x64xbf16>
      %64 = vector.shape_cast %63 : vector<1x7x7x64xbf16> to vector<7x7x64xbf16>
      %c0_109 = arith.constant 0 : index
      %c0_110 = arith.constant 0 : index
      %c512_111 = arith.constant 512 : index
      %65 = vector.load %arg5[%c0_109, %c0_110, %c512_111] : memref<16x8x576xbf16, #tpu.memory_space<vmem>>, vector<7x7x64xbf16>
      tpu.vector_store %arg5[%c0_109, %c0_110, %c512_111], %64 {strides = array<i32>} : memref<16x8x576xbf16, #tpu.memory_space<vmem>>, vector<7x7x64xbf16>,
      %cst_112 = arith.constant 0.000000e+00 : bf16
      %66 = vector.broadcast %cst_112 : bf16 to vector<1x8x64xbf16>
      %c8 = arith.constant 8 : index
      %c0_113 = arith.constant 0 : index
      %c0_114 = arith.constant 0 : index
      %67 = vector.load %arg5[%c8, %c0_113, %c0_114] : memref<16x8x576xbf16, #tpu.memory_space<vmem>>, vector<1x8x64xbf16>
      tpu.vector_store %arg5[%c8, %c0_113, %c0_114], %66 {strides = array<i32>} : memref<16x8x576xbf16, #tpu.memory_space<vmem>>, vector<1x8x64xbf16>,
      %cst_115 = arith.constant 0.000000e+00 : bf16
      %68 = vector.broadcast %cst_115 : bf16 to vector<8x1x64xbf16>
      %c8_116 = arith.constant 8 : index
      %c0_117 = arith.constant 0 : index
      %c0_118 = arith.constant 0 : index
      %69 = vector.load %arg5[%c8_116, %c0_117, %c0_118] : memref<16x8x576xbf16, #tpu.memory_space<vmem>>, vector<8x1x64xbf16>
      tpu.vector_store %arg5[%c8_116, %c0_117, %c0_118], %68 {strides = array<i32>} : memref<16x8x576xbf16, #tpu.memory_space<vmem>>, vector<8x1x64xbf16>,
      %c1_119 = arith.constant 1 : index
      %c0_120 = arith.constant 0 : index
      %c0_121 = arith.constant 0 : index
      %c0_122 = arith.constant 0 : index
      %70 = vector.load %arg1[%c1_119, %c0_120, %c0_121, %c0_122] : memref<2x8x8x64xbf16, #tpu.memory_space<vmem>>, vector<1x7x7x64xbf16>
      %71 = vector.shape_cast %70 : vector<1x7x7x64xbf16> to vector<7x7x64xbf16>
      %c9 = arith.constant 9 : index
      %c1_123 = arith.constant 1 : index
      %c0_124 = arith.constant 0 : index
      %72 = vector.load %arg5[%c9, %c1_123, %c0_124] : memref<16x8x576xbf16, #tpu.memory_space<vmem>>, vector<7x7x64xbf16>
      tpu.vector_store %arg5[%c9, %c1_123, %c0_124], %71 {strides = array<i32>} : memref<16x8x576xbf16, #tpu.memory_space<vmem>>, vector<7x7x64xbf16>,
      %cst_125 = arith.constant 0.000000e+00 : bf16
      %73 = vector.broadcast %cst_125 : bf16 to vector<1x8x64xbf16>
      %c8_126 = arith.constant 8 : index
      %c0_127 = arith.constant 0 : index
      %c64_128 = arith.constant 64 : index
      %74 = vector.load %arg5[%c8_126, %c0_127, %c64_128] : memref<16x8x576xbf16, #tpu.memory_space<vmem>>, vector<1x8x64xbf16>
      tpu.vector_store %arg5[%c8_126, %c0_127, %c64_128], %73 {strides = array<i32>} : memref<16x8x576xbf16, #tpu.memory_space<vmem>>, vector<1x8x64xbf16>,
      %c1_129 = arith.constant 1 : index
      %c0_130 = arith.constant 0 : index
      %c0_131 = arith.constant 0 : index
      %c0_132 = arith.constant 0 : index
      %75 = vector.load %arg1[%c1_129, %c0_130, %c0_131, %c0_132] : memref<2x8x8x64xbf16, #tpu.memory_space<vmem>>, vector<1x7x8x64xbf16>
      %76 = vector.shape_cast %75 : vector<1x7x8x64xbf16> to vector<7x8x64xbf16>
      %c9_133 = arith.constant 9 : index
      %c0_134 = arith.constant 0 : index
      %c64_135 = arith.constant 64 : index
      %77 = vector.load %arg5[%c9_133, %c0_134, %c64_135] : memref<16x8x576xbf16, #tpu.memory_space<vmem>>, vector<7x8x64xbf16>
      tpu.vector_store %arg5[%c9_133, %c0_134, %c64_135], %76 {strides = array<i32>} : memref<16x8x576xbf16, #tpu.memory_space<vmem>>, vector<7x8x64xbf16>,
      %cst_136 = arith.constant 0.000000e+00 : bf16
      %78 = vector.broadcast %cst_136 : bf16 to vector<1x8x64xbf16>
      %c8_137 = arith.constant 8 : index
      %c0_138 = arith.constant 0 : index
      %c128_139 = arith.constant 128 : index
      %79 = vector.load %arg5[%c8_137, %c0_138, %c128_139] : memref<16x8x576xbf16, #tpu.memory_space<vmem>>, vector<1x8x64xbf16>
      tpu.vector_store %arg5[%c8_137, %c0_138, %c128_139], %78 {strides = array<i32>} : memref<16x8x576xbf16, #tpu.memory_space<vmem>>, vector<1x8x64xbf16>,
      %cst_140 = arith.constant 0.000000e+00 : bf16
      %80 = vector.broadcast %cst_140 : bf16 to vector<8x1x64xbf16>
      %c8_141 = arith.constant 8 : index
      %c7_142 = arith.constant 7 : index
      %c128_143 = arith.constant 128 : index
      %81 = vector.load %arg5[%c8_141, %c7_142, %c128_143] : memref<16x8x576xbf16, #tpu.memory_space<vmem>>, vector<8x1x64xbf16>
      tpu.vector_store %arg5[%c8_141, %c7_142, %c128_143], %80 {strides = array<i32>} : memref<16x8x576xbf16, #tpu.memory_space<vmem>>, vector<8x1x64xbf16>,
      %c1_144 = arith.constant 1 : index
      %c0_145 = arith.constant 0 : index
      %c1_146 = arith.constant 1 : index
      %c0_147 = arith.constant 0 : index
      %82 = vector.load %arg1[%c1_144, %c0_145, %c1_146, %c0_147] : memref<2x8x8x64xbf16, #tpu.memory_space<vmem>>, vector<1x7x7x64xbf16>
      %83 = vector.shape_cast %82 : vector<1x7x7x64xbf16> to vector<7x7x64xbf16>
      %c9_148 = arith.constant 9 : index
      %c0_149 = arith.constant 0 : index
      %c128_150 = arith.constant 128 : index
      %84 = vector.load %arg5[%c9_148, %c0_149, %c128_150] : memref<16x8x576xbf16, #tpu.memory_space<vmem>>, vector<7x7x64xbf16>
      tpu.vector_store %arg5[%c9_148, %c0_149, %c128_150], %83 {strides = array<i32>} : memref<16x8x576xbf16, #tpu.memory_space<vmem>>, vector<7x7x64xbf16>,
      %cst_151 = arith.constant 0.000000e+00 : bf16
      %85 = vector.broadcast %cst_151 : bf16 to vector<8x1x64xbf16>
      %c8_152 = arith.constant 8 : index
      %c0_153 = arith.constant 0 : index
      %c192_154 = arith.constant 192 : index
      %86 = vector.load %arg5[%c8_152, %c0_153, %c192_154] : memref<16x8x576xbf16, #tpu.memory_space<vmem>>, vector<8x1x64xbf16>
      tpu.vector_store %arg5[%c8_152, %c0_153, %c192_154], %85 {strides = array<i32>} : memref<16x8x576xbf16, #tpu.memory_space<vmem>>, vector<8x1x64xbf16>,
      %c1_155 = arith.constant 1 : index
      %c0_156 = arith.constant 0 : index
      %c0_157 = arith.constant 0 : index
      %c0_158 = arith.constant 0 : index
      %87 = vector.load %arg1[%c1_155, %c0_156, %c0_157, %c0_158] : memref<2x8x8x64xbf16, #tpu.memory_space<vmem>>, vector<1x8x7x64xbf16>
      %88 = vector.shape_cast %87 : vector<1x8x7x64xbf16> to vector<8x7x64xbf16>
      %c8_159 = arith.constant 8 : index
      %c1_160 = arith.constant 1 : index
      %c192_161 = arith.constant 192 : index
      %89 = vector.load %arg5[%c8_159, %c1_160, %c192_161] : memref<16x8x576xbf16, #tpu.memory_space<vmem>>, vector<8x7x64xbf16>
      tpu.vector_store %arg5[%c8_159, %c1_160, %c192_161], %88 {strides = array<i32>} : memref<16x8x576xbf16, #tpu.memory_space<vmem>>, vector<8x7x64xbf16>,
      %c1_162 = arith.constant 1 : index
      %c0_163 = arith.constant 0 : index
      %c0_164 = arith.constant 0 : index
      %c0_165 = arith.constant 0 : index
      %90 = vector.load %arg1[%c1_162, %c0_163, %c0_164, %c0_165] : memref<2x8x8x64xbf16, #tpu.memory_space<vmem>>, vector<1x8x8x64xbf16>
      %91 = vector.shape_cast %90 : vector<1x8x8x64xbf16> to vector<8x8x64xbf16>
      %c8_166 = arith.constant 8 : index
      %c0_167 = arith.constant 0 : index
      %c256_168 = arith.constant 256 : index
      %92 = vector.load %arg5[%c8_166, %c0_167, %c256_168] : memref<16x8x576xbf16, #tpu.memory_space<vmem>>, vector<8x8x64xbf16>
      tpu.vector_store %arg5[%c8_166, %c0_167, %c256_168], %91 {strides = array<i32>} : memref<16x8x576xbf16, #tpu.memory_space<vmem>>, vector<8x8x64xbf16>,
      %cst_169 = arith.constant 0.000000e+00 : bf16
      %93 = vector.broadcast %cst_169 : bf16 to vector<8x1x64xbf16>
      %c8_170 = arith.constant 8 : index
      %c7_171 = arith.constant 7 : index
      %c320_172 = arith.constant 320 : index
      %94 = vector.load %arg5[%c8_170, %c7_171, %c320_172] : memref<16x8x576xbf16, #tpu.memory_space<vmem>>, vector<8x1x64xbf16>
      tpu.vector_store %arg5[%c8_170, %c7_171, %c320_172], %93 {strides = array<i32>} : memref<16x8x576xbf16, #tpu.memory_space<vmem>>, vector<8x1x64xbf16>,
      %c1_173 = arith.constant 1 : index
      %c0_174 = arith.constant 0 : index
      %c1_175 = arith.constant 1 : index
      %c0_176 = arith.constant 0 : index
      %95 = vector.load %arg1[%c1_173, %c0_174, %c1_175, %c0_176] : memref<2x8x8x64xbf16, #tpu.memory_space<vmem>>, vector<1x8x7x64xbf16>
      %96 = vector.shape_cast %95 : vector<1x8x7x64xbf16> to vector<8x7x64xbf16>
      %c8_177 = arith.constant 8 : index
      %c0_178 = arith.constant 0 : index
      %c320_179 = arith.constant 320 : index
      %97 = vector.load %arg5[%c8_177, %c0_178, %c320_179] : memref<16x8x576xbf16, #tpu.memory_space<vmem>>, vector<8x7x64xbf16>
      tpu.vector_store %arg5[%c8_177, %c0_178, %c320_179], %96 {strides = array<i32>} : memref<16x8x576xbf16, #tpu.memory_space<vmem>>, vector<8x7x64xbf16>,
      %cst_180 = arith.constant 0.000000e+00 : bf16
      %98 = vector.broadcast %cst_180 : bf16 to vector<1x8x64xbf16>
      %c15 = arith.constant 15 : index
      %c0_181 = arith.constant 0 : index
      %c384_182 = arith.constant 384 : index
      %99 = vector.load %arg5[%c15, %c0_181, %c384_182] : memref<16x8x576xbf16, #tpu.memory_space<vmem>>, vector<1x8x64xbf16>
      tpu.vector_store %arg5[%c15, %c0_181, %c384_182], %98 {strides = array<i32>} : memref<16x8x576xbf16, #tpu.memory_space<vmem>>, vector<1x8x64xbf16>,
      %cst_183 = arith.constant 0.000000e+00 : bf16
      %100 = vector.broadcast %cst_183 : bf16 to vector<8x1x64xbf16>
      %c8_184 = arith.constant 8 : index
      %c0_185 = arith.constant 0 : index
      %c384_186 = arith.constant 384 : index
      %101 = vector.load %arg5[%c8_184, %c0_185, %c384_186] : memref<16x8x576xbf16, #tpu.memory_space<vmem>>, vector<8x1x64xbf16>
      tpu.vector_store %arg5[%c8_184, %c0_185, %c384_186], %100 {strides = array<i32>} : memref<16x8x576xbf16, #tpu.memory_space<vmem>>, vector<8x1x64xbf16>,
      %c1_187 = arith.constant 1 : index
      %c1_188 = arith.constant 1 : index
      %c0_189 = arith.constant 0 : index
      %c0_190 = arith.constant 0 : index
      %102 = vector.load %arg1[%c1_187, %c1_188, %c0_189, %c0_190] : memref<2x8x8x64xbf16, #tpu.memory_space<vmem>>, vector<1x7x7x64xbf16>
      %103 = vector.shape_cast %102 : vector<1x7x7x64xbf16> to vector<7x7x64xbf16>
      %c8_191 = arith.constant 8 : index
      %c1_192 = arith.constant 1 : index
      %c384_193 = arith.constant 384 : index
      %104 = vector.load %arg5[%c8_191, %c1_192, %c384_193] : memref<16x8x576xbf16, #tpu.memory_space<vmem>>, vector<7x7x64xbf16>
      tpu.vector_store %arg5[%c8_191, %c1_192, %c384_193], %103 {strides = array<i32>} : memref<16x8x576xbf16, #tpu.memory_space<vmem>>, vector<7x7x64xbf16>,
      %cst_194 = arith.constant 0.000000e+00 : bf16
      %105 = vector.broadcast %cst_194 : bf16 to vector<1x8x64xbf16>
      %c15_195 = arith.constant 15 : index
      %c0_196 = arith.constant 0 : index
      %c448_197 = arith.constant 448 : index
      %106 = vector.load %arg5[%c15_195, %c0_196, %c448_197] : memref<16x8x576xbf16, #tpu.memory_space<vmem>>, vector<1x8x64xbf16>
      tpu.vector_store %arg5[%c15_195, %c0_196, %c448_197], %105 {strides = array<i32>} : memref<16x8x576xbf16, #tpu.memory_space<vmem>>, vector<1x8x64xbf16>,
      %c1_198 = arith.constant 1 : index
      %c1_199 = arith.constant 1 : index
      %c0_200 = arith.constant 0 : index
      %c0_201 = arith.constant 0 : index
      %107 = vector.load %arg1[%c1_198, %c1_199, %c0_200, %c0_201] : memref<2x8x8x64xbf16, #tpu.memory_space<vmem>>, vector<1x7x8x64xbf16>
      %108 = vector.shape_cast %107 : vector<1x7x8x64xbf16> to vector<7x8x64xbf16>
      %c8_202 = arith.constant 8 : index
      %c0_203 = arith.constant 0 : index
      %c448_204 = arith.constant 448 : index
      %109 = vector.load %arg5[%c8_202, %c0_203, %c448_204] : memref<16x8x576xbf16, #tpu.memory_space<vmem>>, vector<7x8x64xbf16>
      tpu.vector_store %arg5[%c8_202, %c0_203, %c448_204], %108 {strides = array<i32>} : memref<16x8x576xbf16, #tpu.memory_space<vmem>>, vector<7x8x64xbf16>,
      %cst_205 = arith.constant 0.000000e+00 : bf16
      %110 = vector.broadcast %cst_205 : bf16 to vector<1x8x64xbf16>
      %c15_206 = arith.constant 15 : index
      %c0_207 = arith.constant 0 : index
      %c512_208 = arith.constant 512 : index
      %111 = vector.load %arg5[%c15_206, %c0_207, %c512_208] : memref<16x8x576xbf16, #tpu.memory_space<vmem>>, vector<1x8x64xbf16>
      tpu.vector_store %arg5[%c15_206, %c0_207, %c512_208], %110 {strides = array<i32>} : memref<16x8x576xbf16, #tpu.memory_space<vmem>>, vector<1x8x64xbf16>,
      %cst_209 = arith.constant 0.000000e+00 : bf16
      %112 = vector.broadcast %cst_209 : bf16 to vector<8x1x64xbf16>
      %c8_210 = arith.constant 8 : index
      %c7_211 = arith.constant 7 : index
      %c512_212 = arith.constant 512 : index
      %113 = vector.load %arg5[%c8_210, %c7_211, %c512_212] : memref<16x8x576xbf16, #tpu.memory_space<vmem>>, vector<8x1x64xbf16>
      tpu.vector_store %arg5[%c8_210, %c7_211, %c512_212], %112 {strides = array<i32>} : memref<16x8x576xbf16, #tpu.memory_space<vmem>>, vector<8x1x64xbf16>,
      %c1_213 = arith.constant 1 : index
      %c1_214 = arith.constant 1 : index
      %c1_215 = arith.constant 1 : index
      %c0_216 = arith.constant 0 : index
      %114 = vector.load %arg1[%c1_213, %c1_214, %c1_215, %c0_216] : memref<2x8x8x64xbf16, #tpu.memory_space<vmem>>, vector<1x7x7x64xbf16>
      %115 = vector.shape_cast %114 : vector<1x7x7x64xbf16> to vector<7x7x64xbf16>
      %c8_217 = arith.constant 8 : index
      %c0_218 = arith.constant 0 : index
      %c512_219 = arith.constant 512 : index
      %116 = vector.load %arg5[%c8_217, %c0_218, %c512_219] : memref<16x8x576xbf16, #tpu.memory_space<vmem>>, vector<7x7x64xbf16>
      tpu.vector_store %arg5[%c8_217, %c0_218, %c512_219], %115 {strides = array<i32>} : memref<16x8x576xbf16, #tpu.memory_space<vmem>>, vector<7x7x64xbf16>,
    } else {
    }
    %c0 = arith.constant 0 : index
    %c0_1 = arith.constant 0 : index
    %c0_2 = arith.constant 0 : index
    %3 = vector.load %arg5[%c0, %c0_1, %c0_2] : memref<16x8x576xbf16, #tpu.memory_space<vmem>>, vector<16x8x576xbf16>
    %c0_3 = arith.constant 0 : index
    %c0_4 = arith.constant 0 : index
    %4 = vector.load %arg2[%c0_3, %c0_4] : memref<576x256xbf16, #tpu.memory_space<vmem>>, vector<576x256xbf16>
    %cst = arith.constant dense<0.000000e+00> : vector<16x8x256xf32>
    %5 = tpu.matmul %3, %4, %cst {dimension_numbers = #tpu.dot_dimension_numbers<[2], [0], [0, 1], [1], [0, 0, 0, 1, 1, 1], [], []>} : vector<16x8x576xbf16>, vector<576x256xbf16>, vector<16x8x256xf32> -> vector<16x8x256xf32>
    %c0_5 = arith.constant 0 : index
    %c0_6 = arith.constant 0 : index
    %6 = vector.load %arg3[%c0_5, %c0_6] : memref<1x256xf32, #tpu.memory_space<vmem>>, vector<1x256xf32>
    %7 = vector.shape_cast %6 : vector<1x256xf32> to vector<256xf32>
    %8 = vector.shape_cast %7 : vector<256xf32> to vector<1x1x256xf32>
    %9 = vector.broadcast %8 : vector<1x1x256xf32> to vector<16x8x256xf32>
    %10 = arith.addf %5, %9 : vector<16x8x256xf32>
    %cst_7 = arith.constant 0.000000e+00 : f32
    %11 = vector.broadcast %cst_7 : f32 to vector<16x8x256xf32>
    %12 = arith.maximumf %10, %11 : vector<16x8x256xf32>
    %13 = arith.truncf %12 : vector<16x8x256xf32> to vector<16x8x256xbf16>
    %c0_8 = arith.constant 0 : index
    %c0_9 = arith.constant 0 : index
    %c0_10 = arith.constant 0 : index
    %14 = vector.load %arg4[%c0_8, %c0_9, %c0_10] : memref<16x8x256xbf16, #tpu.memory_space<vmem>>, vector<16x8x256xbf16>
    tpu.vector_store %arg4[%c0_8, %c0_9, %c0_10], %13 {strides = array<i32>} : memref<16x8x256xbf16, #tpu.memory_space<vmem>>, vector<16x8x256xbf16>,
    return
  }
  func.func @transform_0(%arg0: i32) -> (i32, i32, i32, i32) {
    %c0_i32 = arith.constant 0 : i32
    %c0_i32_0 = arith.constant 0 : i32
    %c0_i32_1 = arith.constant 0 : i32
    %c0_i32_2 = arith.constant 0 : i32
    %c0_i32_3 = arith.constant 0 : i32
    return %c0_i32, %c0_i32_0, %c0_i32_1, %c0_i32_2 : i32, i32, i32, i32
  }
  func.func @transform_1(%arg0: i32) -> (i32, i32) {
    %c0_i32 = arith.constant 0 : i32
    %c0_i32_0 = arith.constant 0 : i32
    return %c0_i32, %arg0 : i32, i32
  }
  func.func @transform_2(%arg0: i32) -> (i32, i32) {
    %c0_i32 = arith.constant 0 : i32
    %c0_i32_0 = arith.constant 0 : i32
    return %c0_i32, %arg0 : i32, i32
  }
  func.func @transform_3(%arg0: i32) -> (i32, i32, i32) {
    %c0_i32 = arith.constant 0 : i32
    %c0_i32_0 = arith.constant 0 : i32
    %c0_i32_1 = arith.constant 0 : i32
    return %c0_i32, %c0_i32_0, %arg0 : i32, i32, i32
  }
}

module attributes {stable_mosaic.version = 11 : i64} {
  func.func @_conv3x3_relu_kernel(%arg0: i32, %arg1: memref<2x8x8x32xbf16, #tpu.memory_space<vmem>>, %arg2: memref<288x32xbf16, #tpu.memory_space<vmem>>, %arg3: memref<1x32xf32, #tpu.memory_space<vmem>>, %arg4: memref<16x8x32xbf16, #tpu.memory_space<vmem>>, %arg5: memref<16x8x288xbf16, #tpu.memory_space<vmem>>) attributes {dimension_semantics = [#tpu.dimension_semantics<arbitrary>], iteration_bounds = array<i64: 1>, scalar_prefetch = 0 : i64, scratch_operands = 1 : i64, tpu.core_type = #tpu.core_type<tc>, window_params = [{pipeline_mode = #tpu.pipeline_mode<synchronous>, transform_indices = @transform_0, window_bounds = array<i64: 2, 8, 8, 32>}, {transform_indices = @transform_1, window_bounds = array<i64: 288, 32>}, {transform_indices = @transform_2, window_bounds = array<i64: 1, 32>}, {transform_indices = @transform_3, window_bounds = array<i64: 16, 8, 32>}]} {
    %c0_i32 = arith.constant 0 : i32
    %0 = arith.cmpi eq, %arg0, %c0_i32 : i32
    %1 = arith.extui %0 : i1 to i32
    %c0_i32_0 = arith.constant 0 : i32
    %2 = arith.cmpi ne, %1, %c0_i32_0 : i32
    scf.if %2 {
      %cst_11 = arith.constant 0.000000e+00 : bf16
      %15 = vector.broadcast %cst_11 : bf16 to vector<1x8x32xbf16>
      %c0_12 = arith.constant 0 : index
      %c0_13 = arith.constant 0 : index
      %c0_14 = arith.constant 0 : index
      %16 = vector.load %arg5[%c0_12, %c0_13, %c0_14] : memref<16x8x288xbf16, #tpu.memory_space<vmem>>, vector<1x8x32xbf16>
      tpu.vector_store %arg5[%c0_12, %c0_13, %c0_14], %15 {strides = array<i32>} : memref<16x8x288xbf16, #tpu.memory_space<vmem>>, vector<1x8x32xbf16>,
      %cst_15 = arith.constant 0.000000e+00 : bf16
      %17 = vector.broadcast %cst_15 : bf16 to vector<8x1x32xbf16>
      %c0_16 = arith.constant 0 : index
      %c0_17 = arith.constant 0 : index
      %c0_18 = arith.constant 0 : index
      %18 = vector.load %arg5[%c0_16, %c0_17, %c0_18] : memref<16x8x288xbf16, #tpu.memory_space<vmem>>, vector<8x1x32xbf16>
      tpu.vector_store %arg5[%c0_16, %c0_17, %c0_18], %17 {strides = array<i32>} : memref<16x8x288xbf16, #tpu.memory_space<vmem>>, vector<8x1x32xbf16>,
      %c0_19 = arith.constant 0 : index
      %c0_20 = arith.constant 0 : index
      %c0_21 = arith.constant 0 : index
      %c0_22 = arith.constant 0 : index
      %19 = vector.load %arg1[%c0_19, %c0_20, %c0_21, %c0_22] : memref<2x8x8x32xbf16, #tpu.memory_space<vmem>>, vector<1x7x7x32xbf16>
      %20 = vector.shape_cast %19 : vector<1x7x7x32xbf16> to vector<7x7x32xbf16>
      %c1 = arith.constant 1 : index
      %c1_23 = arith.constant 1 : index
      %c0_24 = arith.constant 0 : index
      %21 = vector.load %arg5[%c1, %c1_23, %c0_24] : memref<16x8x288xbf16, #tpu.memory_space<vmem>>, vector<7x7x32xbf16>
      tpu.vector_store %arg5[%c1, %c1_23, %c0_24], %20 {strides = array<i32>} : memref<16x8x288xbf16, #tpu.memory_space<vmem>>, vector<7x7x32xbf16>,
      %cst_25 = arith.constant 0.000000e+00 : bf16
      %22 = vector.broadcast %cst_25 : bf16 to vector<1x8x32xbf16>
      %c0_26 = arith.constant 0 : index
      %c0_27 = arith.constant 0 : index
      %c32 = arith.constant 32 : index
      %23 = vector.load %arg5[%c0_26, %c0_27, %c32] : memref<16x8x288xbf16, #tpu.memory_space<vmem>>, vector<1x8x32xbf16>
      tpu.vector_store %arg5[%c0_26, %c0_27, %c32], %22 {strides = array<i32>} : memref<16x8x288xbf16, #tpu.memory_space<vmem>>, vector<1x8x32xbf16>,
      %c0_28 = arith.constant 0 : index
      %c0_29 = arith.constant 0 : index
      %c0_30 = arith.constant 0 : index
      %c0_31 = arith.constant 0 : index
      %24 = vector.load %arg1[%c0_28, %c0_29, %c0_30, %c0_31] : memref<2x8x8x32xbf16, #tpu.memory_space<vmem>>, vector<1x7x8x32xbf16>
      %25 = vector.shape_cast %24 : vector<1x7x8x32xbf16> to vector<7x8x32xbf16>
      %c1_32 = arith.constant 1 : index
      %c0_33 = arith.constant 0 : index
      %c32_34 = arith.constant 32 : index
      %26 = vector.load %arg5[%c1_32, %c0_33, %c32_34] : memref<16x8x288xbf16, #tpu.memory_space<vmem>>, vector<7x8x32xbf16>
      tpu.vector_store %arg5[%c1_32, %c0_33, %c32_34], %25 {strides = array<i32>} : memref<16x8x288xbf16, #tpu.memory_space<vmem>>, vector<7x8x32xbf16>,
      %cst_35 = arith.constant 0.000000e+00 : bf16
      %27 = vector.broadcast %cst_35 : bf16 to vector<1x8x32xbf16>
      %c0_36 = arith.constant 0 : index
      %c0_37 = arith.constant 0 : index
      %c64 = arith.constant 64 : index
      %28 = vector.load %arg5[%c0_36, %c0_37, %c64] : memref<16x8x288xbf16, #tpu.memory_space<vmem>>, vector<1x8x32xbf16>
      tpu.vector_store %arg5[%c0_36, %c0_37, %c64], %27 {strides = array<i32>} : memref<16x8x288xbf16, #tpu.memory_space<vmem>>, vector<1x8x32xbf16>,
      %cst_38 = arith.constant 0.000000e+00 : bf16
      %29 = vector.broadcast %cst_38 : bf16 to vector<8x1x32xbf16>
      %c0_39 = arith.constant 0 : index
      %c7 = arith.constant 7 : index
      %c64_40 = arith.constant 64 : index
      %30 = vector.load %arg5[%c0_39, %c7, %c64_40] : memref<16x8x288xbf16, #tpu.memory_space<vmem>>, vector<8x1x32xbf16>
      tpu.vector_store %arg5[%c0_39, %c7, %c64_40], %29 {strides = array<i32>} : memref<16x8x288xbf16, #tpu.memory_space<vmem>>, vector<8x1x32xbf16>,
      %c0_41 = arith.constant 0 : index
      %c0_42 = arith.constant 0 : index
      %c1_43 = arith.constant 1 : index
      %c0_44 = arith.constant 0 : index
      %31 = vector.load %arg1[%c0_41, %c0_42, %c1_43, %c0_44] : memref<2x8x8x32xbf16, #tpu.memory_space<vmem>>, vector<1x7x7x32xbf16>
      %32 = vector.shape_cast %31 : vector<1x7x7x32xbf16> to vector<7x7x32xbf16>
      %c1_45 = arith.constant 1 : index
      %c0_46 = arith.constant 0 : index
      %c64_47 = arith.constant 64 : index
      %33 = vector.load %arg5[%c1_45, %c0_46, %c64_47] : memref<16x8x288xbf16, #tpu.memory_space<vmem>>, vector<7x7x32xbf16>
      tpu.vector_store %arg5[%c1_45, %c0_46, %c64_47], %32 {strides = array<i32>} : memref<16x8x288xbf16, #tpu.memory_space<vmem>>, vector<7x7x32xbf16>,
      %cst_48 = arith.constant 0.000000e+00 : bf16
      %34 = vector.broadcast %cst_48 : bf16 to vector<8x1x32xbf16>
      %c0_49 = arith.constant 0 : index
      %c0_50 = arith.constant 0 : index
      %c96 = arith.constant 96 : index
      %35 = vector.load %arg5[%c0_49, %c0_50, %c96] : memref<16x8x288xbf16, #tpu.memory_space<vmem>>, vector<8x1x32xbf16>
      tpu.vector_store %arg5[%c0_49, %c0_50, %c96], %34 {strides = array<i32>} : memref<16x8x288xbf16, #tpu.memory_space<vmem>>, vector<8x1x32xbf16>,
      %c0_51 = arith.constant 0 : index
      %c0_52 = arith.constant 0 : index
      %c0_53 = arith.constant 0 : index
      %c0_54 = arith.constant 0 : index
      %36 = vector.load %arg1[%c0_51, %c0_52, %c0_53, %c0_54] : memref<2x8x8x32xbf16, #tpu.memory_space<vmem>>, vector<1x8x7x32xbf16>
      %37 = vector.shape_cast %36 : vector<1x8x7x32xbf16> to vector<8x7x32xbf16>
      %c0_55 = arith.constant 0 : index
      %c1_56 = arith.constant 1 : index
      %c96_57 = arith.constant 96 : index
      %38 = vector.load %arg5[%c0_55, %c1_56, %c96_57] : memref<16x8x288xbf16, #tpu.memory_space<vmem>>, vector<8x7x32xbf16>
      tpu.vector_store %arg5[%c0_55, %c1_56, %c96_57], %37 {strides = array<i32>} : memref<16x8x288xbf16, #tpu.memory_space<vmem>>, vector<8x7x32xbf16>,
      %c0_58 = arith.constant 0 : index
      %c0_59 = arith.constant 0 : index
      %c0_60 = arith.constant 0 : index
      %c0_61 = arith.constant 0 : index
      %39 = vector.load %arg1[%c0_58, %c0_59, %c0_60, %c0_61] : memref<2x8x8x32xbf16, #tpu.memory_space<vmem>>, vector<1x8x8x32xbf16>
      %40 = vector.shape_cast %39 : vector<1x8x8x32xbf16> to vector<8x8x32xbf16>
      %c0_62 = arith.constant 0 : index
      %c0_63 = arith.constant 0 : index
      %c128 = arith.constant 128 : index
      %41 = vector.load %arg5[%c0_62, %c0_63, %c128] : memref<16x8x288xbf16, #tpu.memory_space<vmem>>, vector<8x8x32xbf16>
      tpu.vector_store %arg5[%c0_62, %c0_63, %c128], %40 {strides = array<i32>} : memref<16x8x288xbf16, #tpu.memory_space<vmem>>, vector<8x8x32xbf16>,
      %cst_64 = arith.constant 0.000000e+00 : bf16
      %42 = vector.broadcast %cst_64 : bf16 to vector<8x1x32xbf16>
      %c0_65 = arith.constant 0 : index
      %c7_66 = arith.constant 7 : index
      %c160 = arith.constant 160 : index
      %43 = vector.load %arg5[%c0_65, %c7_66, %c160] : memref<16x8x288xbf16, #tpu.memory_space<vmem>>, vector<8x1x32xbf16>
      tpu.vector_store %arg5[%c0_65, %c7_66, %c160], %42 {strides = array<i32>} : memref<16x8x288xbf16, #tpu.memory_space<vmem>>, vector<8x1x32xbf16>,
      %c0_67 = arith.constant 0 : index
      %c0_68 = arith.constant 0 : index
      %c1_69 = arith.constant 1 : index
      %c0_70 = arith.constant 0 : index
      %44 = vector.load %arg1[%c0_67, %c0_68, %c1_69, %c0_70] : memref<2x8x8x32xbf16, #tpu.memory_space<vmem>>, vector<1x8x7x32xbf16>
      %45 = vector.shape_cast %44 : vector<1x8x7x32xbf16> to vector<8x7x32xbf16>
      %c0_71 = arith.constant 0 : index
      %c0_72 = arith.constant 0 : index
      %c160_73 = arith.constant 160 : index
      %46 = vector.load %arg5[%c0_71, %c0_72, %c160_73] : memref<16x8x288xbf16, #tpu.memory_space<vmem>>, vector<8x7x32xbf16>
      tpu.vector_store %arg5[%c0_71, %c0_72, %c160_73], %45 {strides = array<i32>} : memref<16x8x288xbf16, #tpu.memory_space<vmem>>, vector<8x7x32xbf16>,
      %cst_74 = arith.constant 0.000000e+00 : bf16
      %47 = vector.broadcast %cst_74 : bf16 to vector<1x8x32xbf16>
      %c7_75 = arith.constant 7 : index
      %c0_76 = arith.constant 0 : index
      %c192 = arith.constant 192 : index
      %48 = vector.load %arg5[%c7_75, %c0_76, %c192] : memref<16x8x288xbf16, #tpu.memory_space<vmem>>, vector<1x8x32xbf16>
      tpu.vector_store %arg5[%c7_75, %c0_76, %c192], %47 {strides = array<i32>} : memref<16x8x288xbf16, #tpu.memory_space<vmem>>, vector<1x8x32xbf16>,
      %cst_77 = arith.constant 0.000000e+00 : bf16
      %49 = vector.broadcast %cst_77 : bf16 to vector<8x1x32xbf16>
      %c0_78 = arith.constant 0 : index
      %c0_79 = arith.constant 0 : index
      %c192_80 = arith.constant 192 : index
      %50 = vector.load %arg5[%c0_78, %c0_79, %c192_80] : memref<16x8x288xbf16, #tpu.memory_space<vmem>>, vector<8x1x32xbf16>
      tpu.vector_store %arg5[%c0_78, %c0_79, %c192_80], %49 {strides = array<i32>} : memref<16x8x288xbf16, #tpu.memory_space<vmem>>, vector<8x1x32xbf16>,
      %c0_81 = arith.constant 0 : index
      %c1_82 = arith.constant 1 : index
      %c0_83 = arith.constant 0 : index
      %c0_84 = arith.constant 0 : index
      %51 = vector.load %arg1[%c0_81, %c1_82, %c0_83, %c0_84] : memref<2x8x8x32xbf16, #tpu.memory_space<vmem>>, vector<1x7x7x32xbf16>
      %52 = vector.shape_cast %51 : vector<1x7x7x32xbf16> to vector<7x7x32xbf16>
      %c0_85 = arith.constant 0 : index
      %c1_86 = arith.constant 1 : index
      %c192_87 = arith.constant 192 : index
      %53 = vector.load %arg5[%c0_85, %c1_86, %c192_87] : memref<16x8x288xbf16, #tpu.memory_space<vmem>>, vector<7x7x32xbf16>
      tpu.vector_store %arg5[%c0_85, %c1_86, %c192_87], %52 {strides = array<i32>} : memref<16x8x288xbf16, #tpu.memory_space<vmem>>, vector<7x7x32xbf16>,
      %cst_88 = arith.constant 0.000000e+00 : bf16
      %54 = vector.broadcast %cst_88 : bf16 to vector<1x8x32xbf16>
      %c7_89 = arith.constant 7 : index
      %c0_90 = arith.constant 0 : index
      %c224 = arith.constant 224 : index
      %55 = vector.load %arg5[%c7_89, %c0_90, %c224] : memref<16x8x288xbf16, #tpu.memory_space<vmem>>, vector<1x8x32xbf16>
      tpu.vector_store %arg5[%c7_89, %c0_90, %c224], %54 {strides = array<i32>} : memref<16x8x288xbf16, #tpu.memory_space<vmem>>, vector<1x8x32xbf16>,
      %c0_91 = arith.constant 0 : index
      %c1_92 = arith.constant 1 : index
      %c0_93 = arith.constant 0 : index
      %c0_94 = arith.constant 0 : index
      %56 = vector.load %arg1[%c0_91, %c1_92, %c0_93, %c0_94] : memref<2x8x8x32xbf16, #tpu.memory_space<vmem>>, vector<1x7x8x32xbf16>
      %57 = vector.shape_cast %56 : vector<1x7x8x32xbf16> to vector<7x8x32xbf16>
      %c0_95 = arith.constant 0 : index
      %c0_96 = arith.constant 0 : index
      %c224_97 = arith.constant 224 : index
      %58 = vector.load %arg5[%c0_95, %c0_96, %c224_97] : memref<16x8x288xbf16, #tpu.memory_space<vmem>>, vector<7x8x32xbf16>
      tpu.vector_store %arg5[%c0_95, %c0_96, %c224_97], %57 {strides = array<i32>} : memref<16x8x288xbf16, #tpu.memory_space<vmem>>, vector<7x8x32xbf16>,
      %cst_98 = arith.constant 0.000000e+00 : bf16
      %59 = vector.broadcast %cst_98 : bf16 to vector<1x8x32xbf16>
      %c7_99 = arith.constant 7 : index
      %c0_100 = arith.constant 0 : index
      %c256 = arith.constant 256 : index
      %60 = vector.load %arg5[%c7_99, %c0_100, %c256] : memref<16x8x288xbf16, #tpu.memory_space<vmem>>, vector<1x8x32xbf16>
      tpu.vector_store %arg5[%c7_99, %c0_100, %c256], %59 {strides = array<i32>} : memref<16x8x288xbf16, #tpu.memory_space<vmem>>, vector<1x8x32xbf16>,
      %cst_101 = arith.constant 0.000000e+00 : bf16
      %61 = vector.broadcast %cst_101 : bf16 to vector<8x1x32xbf16>
      %c0_102 = arith.constant 0 : index
      %c7_103 = arith.constant 7 : index
      %c256_104 = arith.constant 256 : index
      %62 = vector.load %arg5[%c0_102, %c7_103, %c256_104] : memref<16x8x288xbf16, #tpu.memory_space<vmem>>, vector<8x1x32xbf16>
      tpu.vector_store %arg5[%c0_102, %c7_103, %c256_104], %61 {strides = array<i32>} : memref<16x8x288xbf16, #tpu.memory_space<vmem>>, vector<8x1x32xbf16>,
      %c0_105 = arith.constant 0 : index
      %c1_106 = arith.constant 1 : index
      %c1_107 = arith.constant 1 : index
      %c0_108 = arith.constant 0 : index
      %63 = vector.load %arg1[%c0_105, %c1_106, %c1_107, %c0_108] : memref<2x8x8x32xbf16, #tpu.memory_space<vmem>>, vector<1x7x7x32xbf16>
      %64 = vector.shape_cast %63 : vector<1x7x7x32xbf16> to vector<7x7x32xbf16>
      %c0_109 = arith.constant 0 : index
      %c0_110 = arith.constant 0 : index
      %c256_111 = arith.constant 256 : index
      %65 = vector.load %arg5[%c0_109, %c0_110, %c256_111] : memref<16x8x288xbf16, #tpu.memory_space<vmem>>, vector<7x7x32xbf16>
      tpu.vector_store %arg5[%c0_109, %c0_110, %c256_111], %64 {strides = array<i32>} : memref<16x8x288xbf16, #tpu.memory_space<vmem>>, vector<7x7x32xbf16>,
      %cst_112 = arith.constant 0.000000e+00 : bf16
      %66 = vector.broadcast %cst_112 : bf16 to vector<1x8x32xbf16>
      %c8 = arith.constant 8 : index
      %c0_113 = arith.constant 0 : index
      %c0_114 = arith.constant 0 : index
      %67 = vector.load %arg5[%c8, %c0_113, %c0_114] : memref<16x8x288xbf16, #tpu.memory_space<vmem>>, vector<1x8x32xbf16>
      tpu.vector_store %arg5[%c8, %c0_113, %c0_114], %66 {strides = array<i32>} : memref<16x8x288xbf16, #tpu.memory_space<vmem>>, vector<1x8x32xbf16>,
      %cst_115 = arith.constant 0.000000e+00 : bf16
      %68 = vector.broadcast %cst_115 : bf16 to vector<8x1x32xbf16>
      %c8_116 = arith.constant 8 : index
      %c0_117 = arith.constant 0 : index
      %c0_118 = arith.constant 0 : index
      %69 = vector.load %arg5[%c8_116, %c0_117, %c0_118] : memref<16x8x288xbf16, #tpu.memory_space<vmem>>, vector<8x1x32xbf16>
      tpu.vector_store %arg5[%c8_116, %c0_117, %c0_118], %68 {strides = array<i32>} : memref<16x8x288xbf16, #tpu.memory_space<vmem>>, vector<8x1x32xbf16>,
      %c1_119 = arith.constant 1 : index
      %c0_120 = arith.constant 0 : index
      %c0_121 = arith.constant 0 : index
      %c0_122 = arith.constant 0 : index
      %70 = vector.load %arg1[%c1_119, %c0_120, %c0_121, %c0_122] : memref<2x8x8x32xbf16, #tpu.memory_space<vmem>>, vector<1x7x7x32xbf16>
      %71 = vector.shape_cast %70 : vector<1x7x7x32xbf16> to vector<7x7x32xbf16>
      %c9 = arith.constant 9 : index
      %c1_123 = arith.constant 1 : index
      %c0_124 = arith.constant 0 : index
      %72 = vector.load %arg5[%c9, %c1_123, %c0_124] : memref<16x8x288xbf16, #tpu.memory_space<vmem>>, vector<7x7x32xbf16>
      tpu.vector_store %arg5[%c9, %c1_123, %c0_124], %71 {strides = array<i32>} : memref<16x8x288xbf16, #tpu.memory_space<vmem>>, vector<7x7x32xbf16>,
      %cst_125 = arith.constant 0.000000e+00 : bf16
      %73 = vector.broadcast %cst_125 : bf16 to vector<1x8x32xbf16>
      %c8_126 = arith.constant 8 : index
      %c0_127 = arith.constant 0 : index
      %c32_128 = arith.constant 32 : index
      %74 = vector.load %arg5[%c8_126, %c0_127, %c32_128] : memref<16x8x288xbf16, #tpu.memory_space<vmem>>, vector<1x8x32xbf16>
      tpu.vector_store %arg5[%c8_126, %c0_127, %c32_128], %73 {strides = array<i32>} : memref<16x8x288xbf16, #tpu.memory_space<vmem>>, vector<1x8x32xbf16>,
      %c1_129 = arith.constant 1 : index
      %c0_130 = arith.constant 0 : index
      %c0_131 = arith.constant 0 : index
      %c0_132 = arith.constant 0 : index
      %75 = vector.load %arg1[%c1_129, %c0_130, %c0_131, %c0_132] : memref<2x8x8x32xbf16, #tpu.memory_space<vmem>>, vector<1x7x8x32xbf16>
      %76 = vector.shape_cast %75 : vector<1x7x8x32xbf16> to vector<7x8x32xbf16>
      %c9_133 = arith.constant 9 : index
      %c0_134 = arith.constant 0 : index
      %c32_135 = arith.constant 32 : index
      %77 = vector.load %arg5[%c9_133, %c0_134, %c32_135] : memref<16x8x288xbf16, #tpu.memory_space<vmem>>, vector<7x8x32xbf16>
      tpu.vector_store %arg5[%c9_133, %c0_134, %c32_135], %76 {strides = array<i32>} : memref<16x8x288xbf16, #tpu.memory_space<vmem>>, vector<7x8x32xbf16>,
      %cst_136 = arith.constant 0.000000e+00 : bf16
      %78 = vector.broadcast %cst_136 : bf16 to vector<1x8x32xbf16>
      %c8_137 = arith.constant 8 : index
      %c0_138 = arith.constant 0 : index
      %c64_139 = arith.constant 64 : index
      %79 = vector.load %arg5[%c8_137, %c0_138, %c64_139] : memref<16x8x288xbf16, #tpu.memory_space<vmem>>, vector<1x8x32xbf16>
      tpu.vector_store %arg5[%c8_137, %c0_138, %c64_139], %78 {strides = array<i32>} : memref<16x8x288xbf16, #tpu.memory_space<vmem>>, vector<1x8x32xbf16>,
      %cst_140 = arith.constant 0.000000e+00 : bf16
      %80 = vector.broadcast %cst_140 : bf16 to vector<8x1x32xbf16>
      %c8_141 = arith.constant 8 : index
      %c7_142 = arith.constant 7 : index
      %c64_143 = arith.constant 64 : index
      %81 = vector.load %arg5[%c8_141, %c7_142, %c64_143] : memref<16x8x288xbf16, #tpu.memory_space<vmem>>, vector<8x1x32xbf16>
      tpu.vector_store %arg5[%c8_141, %c7_142, %c64_143], %80 {strides = array<i32>} : memref<16x8x288xbf16, #tpu.memory_space<vmem>>, vector<8x1x32xbf16>,
      %c1_144 = arith.constant 1 : index
      %c0_145 = arith.constant 0 : index
      %c1_146 = arith.constant 1 : index
      %c0_147 = arith.constant 0 : index
      %82 = vector.load %arg1[%c1_144, %c0_145, %c1_146, %c0_147] : memref<2x8x8x32xbf16, #tpu.memory_space<vmem>>, vector<1x7x7x32xbf16>
      %83 = vector.shape_cast %82 : vector<1x7x7x32xbf16> to vector<7x7x32xbf16>
      %c9_148 = arith.constant 9 : index
      %c0_149 = arith.constant 0 : index
      %c64_150 = arith.constant 64 : index
      %84 = vector.load %arg5[%c9_148, %c0_149, %c64_150] : memref<16x8x288xbf16, #tpu.memory_space<vmem>>, vector<7x7x32xbf16>
      tpu.vector_store %arg5[%c9_148, %c0_149, %c64_150], %83 {strides = array<i32>} : memref<16x8x288xbf16, #tpu.memory_space<vmem>>, vector<7x7x32xbf16>,
      %cst_151 = arith.constant 0.000000e+00 : bf16
      %85 = vector.broadcast %cst_151 : bf16 to vector<8x1x32xbf16>
      %c8_152 = arith.constant 8 : index
      %c0_153 = arith.constant 0 : index
      %c96_154 = arith.constant 96 : index
      %86 = vector.load %arg5[%c8_152, %c0_153, %c96_154] : memref<16x8x288xbf16, #tpu.memory_space<vmem>>, vector<8x1x32xbf16>
      tpu.vector_store %arg5[%c8_152, %c0_153, %c96_154], %85 {strides = array<i32>} : memref<16x8x288xbf16, #tpu.memory_space<vmem>>, vector<8x1x32xbf16>,
      %c1_155 = arith.constant 1 : index
      %c0_156 = arith.constant 0 : index
      %c0_157 = arith.constant 0 : index
      %c0_158 = arith.constant 0 : index
      %87 = vector.load %arg1[%c1_155, %c0_156, %c0_157, %c0_158] : memref<2x8x8x32xbf16, #tpu.memory_space<vmem>>, vector<1x8x7x32xbf16>
      %88 = vector.shape_cast %87 : vector<1x8x7x32xbf16> to vector<8x7x32xbf16>
      %c8_159 = arith.constant 8 : index
      %c1_160 = arith.constant 1 : index
      %c96_161 = arith.constant 96 : index
      %89 = vector.load %arg5[%c8_159, %c1_160, %c96_161] : memref<16x8x288xbf16, #tpu.memory_space<vmem>>, vector<8x7x32xbf16>
      tpu.vector_store %arg5[%c8_159, %c1_160, %c96_161], %88 {strides = array<i32>} : memref<16x8x288xbf16, #tpu.memory_space<vmem>>, vector<8x7x32xbf16>,
      %c1_162 = arith.constant 1 : index
      %c0_163 = arith.constant 0 : index
      %c0_164 = arith.constant 0 : index
      %c0_165 = arith.constant 0 : index
      %90 = vector.load %arg1[%c1_162, %c0_163, %c0_164, %c0_165] : memref<2x8x8x32xbf16, #tpu.memory_space<vmem>>, vector<1x8x8x32xbf16>
      %91 = vector.shape_cast %90 : vector<1x8x8x32xbf16> to vector<8x8x32xbf16>
      %c8_166 = arith.constant 8 : index
      %c0_167 = arith.constant 0 : index
      %c128_168 = arith.constant 128 : index
      %92 = vector.load %arg5[%c8_166, %c0_167, %c128_168] : memref<16x8x288xbf16, #tpu.memory_space<vmem>>, vector<8x8x32xbf16>
      tpu.vector_store %arg5[%c8_166, %c0_167, %c128_168], %91 {strides = array<i32>} : memref<16x8x288xbf16, #tpu.memory_space<vmem>>, vector<8x8x32xbf16>,
      %cst_169 = arith.constant 0.000000e+00 : bf16
      %93 = vector.broadcast %cst_169 : bf16 to vector<8x1x32xbf16>
      %c8_170 = arith.constant 8 : index
      %c7_171 = arith.constant 7 : index
      %c160_172 = arith.constant 160 : index
      %94 = vector.load %arg5[%c8_170, %c7_171, %c160_172] : memref<16x8x288xbf16, #tpu.memory_space<vmem>>, vector<8x1x32xbf16>
      tpu.vector_store %arg5[%c8_170, %c7_171, %c160_172], %93 {strides = array<i32>} : memref<16x8x288xbf16, #tpu.memory_space<vmem>>, vector<8x1x32xbf16>,
      %c1_173 = arith.constant 1 : index
      %c0_174 = arith.constant 0 : index
      %c1_175 = arith.constant 1 : index
      %c0_176 = arith.constant 0 : index
      %95 = vector.load %arg1[%c1_173, %c0_174, %c1_175, %c0_176] : memref<2x8x8x32xbf16, #tpu.memory_space<vmem>>, vector<1x8x7x32xbf16>
      %96 = vector.shape_cast %95 : vector<1x8x7x32xbf16> to vector<8x7x32xbf16>
      %c8_177 = arith.constant 8 : index
      %c0_178 = arith.constant 0 : index
      %c160_179 = arith.constant 160 : index
      %97 = vector.load %arg5[%c8_177, %c0_178, %c160_179] : memref<16x8x288xbf16, #tpu.memory_space<vmem>>, vector<8x7x32xbf16>
      tpu.vector_store %arg5[%c8_177, %c0_178, %c160_179], %96 {strides = array<i32>} : memref<16x8x288xbf16, #tpu.memory_space<vmem>>, vector<8x7x32xbf16>,
      %cst_180 = arith.constant 0.000000e+00 : bf16
      %98 = vector.broadcast %cst_180 : bf16 to vector<1x8x32xbf16>
      %c15 = arith.constant 15 : index
      %c0_181 = arith.constant 0 : index
      %c192_182 = arith.constant 192 : index
      %99 = vector.load %arg5[%c15, %c0_181, %c192_182] : memref<16x8x288xbf16, #tpu.memory_space<vmem>>, vector<1x8x32xbf16>
      tpu.vector_store %arg5[%c15, %c0_181, %c192_182], %98 {strides = array<i32>} : memref<16x8x288xbf16, #tpu.memory_space<vmem>>, vector<1x8x32xbf16>,
      %cst_183 = arith.constant 0.000000e+00 : bf16
      %100 = vector.broadcast %cst_183 : bf16 to vector<8x1x32xbf16>
      %c8_184 = arith.constant 8 : index
      %c0_185 = arith.constant 0 : index
      %c192_186 = arith.constant 192 : index
      %101 = vector.load %arg5[%c8_184, %c0_185, %c192_186] : memref<16x8x288xbf16, #tpu.memory_space<vmem>>, vector<8x1x32xbf16>
      tpu.vector_store %arg5[%c8_184, %c0_185, %c192_186], %100 {strides = array<i32>} : memref<16x8x288xbf16, #tpu.memory_space<vmem>>, vector<8x1x32xbf16>,
      %c1_187 = arith.constant 1 : index
      %c1_188 = arith.constant 1 : index
      %c0_189 = arith.constant 0 : index
      %c0_190 = arith.constant 0 : index
      %102 = vector.load %arg1[%c1_187, %c1_188, %c0_189, %c0_190] : memref<2x8x8x32xbf16, #tpu.memory_space<vmem>>, vector<1x7x7x32xbf16>
      %103 = vector.shape_cast %102 : vector<1x7x7x32xbf16> to vector<7x7x32xbf16>
      %c8_191 = arith.constant 8 : index
      %c1_192 = arith.constant 1 : index
      %c192_193 = arith.constant 192 : index
      %104 = vector.load %arg5[%c8_191, %c1_192, %c192_193] : memref<16x8x288xbf16, #tpu.memory_space<vmem>>, vector<7x7x32xbf16>
      tpu.vector_store %arg5[%c8_191, %c1_192, %c192_193], %103 {strides = array<i32>} : memref<16x8x288xbf16, #tpu.memory_space<vmem>>, vector<7x7x32xbf16>,
      %cst_194 = arith.constant 0.000000e+00 : bf16
      %105 = vector.broadcast %cst_194 : bf16 to vector<1x8x32xbf16>
      %c15_195 = arith.constant 15 : index
      %c0_196 = arith.constant 0 : index
      %c224_197 = arith.constant 224 : index
      %106 = vector.load %arg5[%c15_195, %c0_196, %c224_197] : memref<16x8x288xbf16, #tpu.memory_space<vmem>>, vector<1x8x32xbf16>
      tpu.vector_store %arg5[%c15_195, %c0_196, %c224_197], %105 {strides = array<i32>} : memref<16x8x288xbf16, #tpu.memory_space<vmem>>, vector<1x8x32xbf16>,
      %c1_198 = arith.constant 1 : index
      %c1_199 = arith.constant 1 : index
      %c0_200 = arith.constant 0 : index
      %c0_201 = arith.constant 0 : index
      %107 = vector.load %arg1[%c1_198, %c1_199, %c0_200, %c0_201] : memref<2x8x8x32xbf16, #tpu.memory_space<vmem>>, vector<1x7x8x32xbf16>
      %108 = vector.shape_cast %107 : vector<1x7x8x32xbf16> to vector<7x8x32xbf16>
      %c8_202 = arith.constant 8 : index
      %c0_203 = arith.constant 0 : index
      %c224_204 = arith.constant 224 : index
      %109 = vector.load %arg5[%c8_202, %c0_203, %c224_204] : memref<16x8x288xbf16, #tpu.memory_space<vmem>>, vector<7x8x32xbf16>
      tpu.vector_store %arg5[%c8_202, %c0_203, %c224_204], %108 {strides = array<i32>} : memref<16x8x288xbf16, #tpu.memory_space<vmem>>, vector<7x8x32xbf16>,
      %cst_205 = arith.constant 0.000000e+00 : bf16
      %110 = vector.broadcast %cst_205 : bf16 to vector<1x8x32xbf16>
      %c15_206 = arith.constant 15 : index
      %c0_207 = arith.constant 0 : index
      %c256_208 = arith.constant 256 : index
      %111 = vector.load %arg5[%c15_206, %c0_207, %c256_208] : memref<16x8x288xbf16, #tpu.memory_space<vmem>>, vector<1x8x32xbf16>
      tpu.vector_store %arg5[%c15_206, %c0_207, %c256_208], %110 {strides = array<i32>} : memref<16x8x288xbf16, #tpu.memory_space<vmem>>, vector<1x8x32xbf16>,
      %cst_209 = arith.constant 0.000000e+00 : bf16
      %112 = vector.broadcast %cst_209 : bf16 to vector<8x1x32xbf16>
      %c8_210 = arith.constant 8 : index
      %c7_211 = arith.constant 7 : index
      %c256_212 = arith.constant 256 : index
      %113 = vector.load %arg5[%c8_210, %c7_211, %c256_212] : memref<16x8x288xbf16, #tpu.memory_space<vmem>>, vector<8x1x32xbf16>
      tpu.vector_store %arg5[%c8_210, %c7_211, %c256_212], %112 {strides = array<i32>} : memref<16x8x288xbf16, #tpu.memory_space<vmem>>, vector<8x1x32xbf16>,
      %c1_213 = arith.constant 1 : index
      %c1_214 = arith.constant 1 : index
      %c1_215 = arith.constant 1 : index
      %c0_216 = arith.constant 0 : index
      %114 = vector.load %arg1[%c1_213, %c1_214, %c1_215, %c0_216] : memref<2x8x8x32xbf16, #tpu.memory_space<vmem>>, vector<1x7x7x32xbf16>
      %115 = vector.shape_cast %114 : vector<1x7x7x32xbf16> to vector<7x7x32xbf16>
      %c8_217 = arith.constant 8 : index
      %c0_218 = arith.constant 0 : index
      %c256_219 = arith.constant 256 : index
      %116 = vector.load %arg5[%c8_217, %c0_218, %c256_219] : memref<16x8x288xbf16, #tpu.memory_space<vmem>>, vector<7x7x32xbf16>
      tpu.vector_store %arg5[%c8_217, %c0_218, %c256_219], %115 {strides = array<i32>} : memref<16x8x288xbf16, #tpu.memory_space<vmem>>, vector<7x7x32xbf16>,
    } else {
    }
    %c0 = arith.constant 0 : index
    %c0_1 = arith.constant 0 : index
    %c0_2 = arith.constant 0 : index
    %3 = vector.load %arg5[%c0, %c0_1, %c0_2] : memref<16x8x288xbf16, #tpu.memory_space<vmem>>, vector<16x8x288xbf16>
    %c0_3 = arith.constant 0 : index
    %c0_4 = arith.constant 0 : index
    %4 = vector.load %arg2[%c0_3, %c0_4] : memref<288x32xbf16, #tpu.memory_space<vmem>>, vector<288x32xbf16>
    %cst = arith.constant dense<0.000000e+00> : vector<16x8x32xf32>
    %5 = tpu.matmul %3, %4, %cst {dimension_numbers = #tpu.dot_dimension_numbers<[2], [0], [0, 1], [1], [0, 0, 0, 1, 1, 1], [], []>} : vector<16x8x288xbf16>, vector<288x32xbf16>, vector<16x8x32xf32> -> vector<16x8x32xf32>
    %c0_5 = arith.constant 0 : index
    %c0_6 = arith.constant 0 : index
    %6 = vector.load %arg3[%c0_5, %c0_6] : memref<1x32xf32, #tpu.memory_space<vmem>>, vector<1x32xf32>
    %7 = vector.shape_cast %6 : vector<1x32xf32> to vector<32xf32>
    %8 = vector.shape_cast %7 : vector<32xf32> to vector<1x1x32xf32>
    %9 = vector.broadcast %8 : vector<1x1x32xf32> to vector<16x8x32xf32>
    %10 = arith.addf %5, %9 : vector<16x8x32xf32>
    %cst_7 = arith.constant 0.000000e+00 : f32
    %11 = vector.broadcast %cst_7 : f32 to vector<16x8x32xf32>
    %12 = arith.maximumf %10, %11 : vector<16x8x32xf32>
    %13 = arith.truncf %12 : vector<16x8x32xf32> to vector<16x8x32xbf16>
    %c0_8 = arith.constant 0 : index
    %c0_9 = arith.constant 0 : index
    %c0_10 = arith.constant 0 : index
    %14 = vector.load %arg4[%c0_8, %c0_9, %c0_10] : memref<16x8x32xbf16, #tpu.memory_space<vmem>>, vector<16x8x32xbf16>
    tpu.vector_store %arg4[%c0_8, %c0_9, %c0_10], %13 {strides = array<i32>} : memref<16x8x32xbf16, #tpu.memory_space<vmem>>, vector<16x8x32xbf16>,
    return
  }
  func.func @transform_0(%arg0: i32) -> (i32, i32, i32, i32) {
    %c0_i32 = arith.constant 0 : i32
    %c0_i32_0 = arith.constant 0 : i32
    %c0_i32_1 = arith.constant 0 : i32
    %c0_i32_2 = arith.constant 0 : i32
    %c0_i32_3 = arith.constant 0 : i32
    return %c0_i32, %c0_i32_0, %c0_i32_1, %c0_i32_2 : i32, i32, i32, i32
  }
  func.func @transform_1(%arg0: i32) -> (i32, i32) {
    %c0_i32 = arith.constant 0 : i32
    %c0_i32_0 = arith.constant 0 : i32
    return %c0_i32, %arg0 : i32, i32
  }
  func.func @transform_2(%arg0: i32) -> (i32, i32) {
    %c0_i32 = arith.constant 0 : i32
    %c0_i32_0 = arith.constant 0 : i32
    return %c0_i32, %arg0 : i32, i32
  }
  func.func @transform_3(%arg0: i32) -> (i32, i32, i32) {
    %c0_i32 = arith.constant 0 : i32
    %c0_i32_0 = arith.constant 0 : i32
    %c0_i32_1 = arith.constant 0 : i32
    return %c0_i32, %c0_i32_0, %arg0 : i32, i32, i32
  }
}

module attributes {stable_mosaic.version = 11 : i64} {
  func.func @_fc_heads_kernel(%arg0: i32, %arg1: i32, %arg2: memref<2x2048xbf16, #tpu.memory_space<vmem>>, %arg3: memref<2048x64xbf16, #tpu.memory_space<vmem>>, %arg4: memref<1x64xf32, #tpu.memory_space<vmem>>, %arg5: memref<2x64xf32, #tpu.memory_space<vmem>>, %arg6: memref<2x64xf32, #tpu.memory_space<vmem>>) attributes {dimension_semantics = [#tpu.dimension_semantics<parallel>, #tpu.dimension_semantics<arbitrary>], iteration_bounds = array<i64: 1, 1>, scalar_prefetch = 0 : i64, scratch_operands = 1 : i64, tpu.core_type = #tpu.core_type<tc>, window_params = [{transform_indices = @transform_0, window_bounds = array<i64: 2, 2048>}, {transform_indices = @transform_1, window_bounds = array<i64: 2048, 64>}, {transform_indices = @transform_2, window_bounds = array<i64: 1, 64>}, {transform_indices = @transform_3, window_bounds = array<i64: 2, 64>}]} {
    %c0_i32 = arith.constant 0 : i32
    %0 = arith.cmpi eq, %arg1, %c0_i32 : i32
    %1 = arith.extui %0 : i1 to i32
    %c0_i32_0 = arith.constant 0 : i32
    %2 = arith.cmpi ne, %1, %c0_i32_0 : i32
    scf.if %2 {
      %c0_10 = arith.constant 0 : index
      %c0_11 = arith.constant 0 : index
      %12 = vector.load %arg4[%c0_10, %c0_11] : memref<1x64xf32, #tpu.memory_space<vmem>>, vector<1x64xf32>
      %13 = vector.shape_cast %12 : vector<1x64xf32> to vector<1x64xf32>
      %14 = vector.broadcast %13 : vector<1x64xf32> to vector<2x64xf32>
      %c0_12 = arith.constant 0 : index
      %c0_13 = arith.constant 0 : index
      %15 = vector.load %arg6[%c0_12, %c0_13] : memref<2x64xf32, #tpu.memory_space<vmem>>, vector<2x64xf32>
      tpu.vector_store %arg6[%c0_12, %c0_13], %14 {strides = array<i32>} : memref<2x64xf32, #tpu.memory_space<vmem>>, vector<2x64xf32>,
    } else {
    }
    %c0 = arith.constant 0 : index
    %c0_1 = arith.constant 0 : index
    %3 = vector.load %arg6[%c0, %c0_1] : memref<2x64xf32, #tpu.memory_space<vmem>>, vector<2x64xf32>
    %c0_2 = arith.constant 0 : index
    %c0_3 = arith.constant 0 : index
    %4 = vector.load %arg2[%c0_2, %c0_3] : memref<2x2048xbf16, #tpu.memory_space<vmem>>, vector<2x2048xbf16>
    %c0_4 = arith.constant 0 : index
    %c0_5 = arith.constant 0 : index
    %5 = vector.load %arg3[%c0_4, %c0_5] : memref<2048x64xbf16, #tpu.memory_space<vmem>>, vector<2048x64xbf16>
    %cst = arith.constant dense<0.000000e+00> : vector<2x64xf32>
    %6 = tpu.matmul %4, %5, %cst {dimension_numbers = #tpu.dot_dimension_numbers<[1], [0], [0], [1], [0, 0, 1, 1], [], []>} : vector<2x2048xbf16>, vector<2048x64xbf16>, vector<2x64xf32> -> vector<2x64xf32>
    %7 = arith.addf %3, %6 : vector<2x64xf32>
    %c0_6 = arith.constant 0 : index
    %c0_7 = arith.constant 0 : index
    %8 = vector.load %arg6[%c0_6, %c0_7] : memref<2x64xf32, #tpu.memory_space<vmem>>, vector<2x64xf32>
    tpu.vector_store %arg6[%c0_6, %c0_7], %7 {strides = array<i32>} : memref<2x64xf32, #tpu.memory_space<vmem>>, vector<2x64xf32>,
    %c0_i32_8 = arith.constant 0 : i32
    %9 = arith.cmpi eq, %arg1, %c0_i32_8 : i32
    %10 = arith.extui %9 : i1 to i32
    %c0_i32_9 = arith.constant 0 : i32
    %11 = arith.cmpi ne, %10, %c0_i32_9 : i32
    scf.if %11 {
      %c0_10 = arith.constant 0 : index
      %c0_11 = arith.constant 0 : index
      %12 = vector.load %arg6[%c0_10, %c0_11] : memref<2x64xf32, #tpu.memory_space<vmem>>, vector<2x64xf32>
      %c0_12 = arith.constant 0 : index
      %c0_13 = arith.constant 0 : index
      %13 = vector.load %arg5[%c0_12, %c0_13] : memref<2x64xf32, #tpu.memory_space<vmem>>, vector<2x64xf32>
      tpu.vector_store %arg5[%c0_12, %c0_13], %12 {strides = array<i32>} : memref<2x64xf32, #tpu.memory_space<vmem>>, vector<2x64xf32>,
    } else {
    }
    return
  }
  func.func @transform_0(%arg0: i32, %arg1: i32) -> (i32, i32) {
    %c0_i32 = arith.constant 0 : i32
    %c0_i32_0 = arith.constant 0 : i32
    return %c0_i32, %arg1 : i32, i32
  }
  func.func @transform_1(%arg0: i32, %arg1: i32) -> (i32, i32) {
    %c0_i32 = arith.constant 0 : i32
    return %arg1, %arg0 : i32, i32
  }
  func.func @transform_2(%arg0: i32, %arg1: i32) -> (i32, i32) {
    %c0_i32 = arith.constant 0 : i32
    %c0_i32_0 = arith.constant 0 : i32
    return %c0_i32, %arg0 : i32, i32
  }
  func.func @transform_3(%arg0: i32, %arg1: i32) -> (i32, i32) {
    %c0_i32 = arith.constant 0 : i32
    %c0_i32_0 = arith.constant 0 : i32
    return %c0_i32, %arg0 : i32, i32
  }
}

</mosaic_0001>

<bundles_post_ra>
// kernel: face_encoder_forward.4
= control target key start
LH: loop header
LB: loop body
LE: loop exit
PB: predicated region body
PF: predicated region fallthrough
CT: control target
= control target key end

     0   :  { %s3536_s18 = smov 64   ;;  %vm19_vm0 = vcmask 519168   ;;  %vm21_vm1 = vcmask 516096   ;;  %vm22_vm2 = vsmask.f32 256  ;;  %vm181_vm3 = vcmask 519171   ;;  %s5131_s0 = inlined_call_operand.vmem [shape: bf16[2,8,8,64], index: 0, kind: input, shape index: {}]   ;;  %s5132_s1 = inlined_call_operand.vmem [shape: bf16[576,256], index: 1, kind: input, shape index: {}]   ;;  %s5133_s2 = inlined_call_operand.vmem [shape: f32[1,256], index: 2, kind: input, shape index: {}]   ;;  %s5134_s3 = inlined_call_operand.vmem [shape: bf16[16,8,256], index: 3, kind: output, shape index: {}]  }
   0x1   :  { %v138_v0 = vld [vmem:[%s5131_s0] sm:$0xf]  ;;  %v2998_v2 = vld [vmem:[%s5131_s0 + $0x4] sm:$0xf]  ;;  %v336_v15 = vld [vmem:[%s5131_s0 + $0x8] sm:$0xf] }
   0x2   :  { %v334_v1 = vld [vmem:[%s5131_s0] sm:$0xf]  ;;  %152 = vrot.lane.b32.xlu1 %v138_v0, %s3536_s18  ;;  %v335_v5 = vld [vmem:[%s5131_s0 + $0x4] sm:$0xf]  ;;  %v357_v19 = vshrl.u32 %v336_v15, 16  ;;  %v360_v25 = vshll.u32 %v336_v15, 16  ;;  %vm3922_vm5 = vmand %vm21_vm1, %vm22_vm2 }
   0x3   :  { %v343_v3 = vshrl.u32 %v334_v1, 16  ;;  %v346_v4 = vshll.u32 %v334_v1, 16  ;;  %v490_v6 = vld [vmem:[%s5131_s0] sm:$0xf]  ;;  %v350_v7 = vshrl.u32 %v335_v5, 16  ;;  %v353_v8 = vshll.u32 %v335_v5, 16 }
   0x4   :  { %v499_v9 = vshrl.u32 %v490_v6, 16  ;;  %v502_v10 = vshll.u32 %v490_v6, 16  ;;  %v491_v11 = vld [vmem:[%s5131_s0 + $0x4] sm:$0xf]  ;;  %v359_v24 = vrot.slane %v357_v19, 7  ;;  %vm308_vm6 = vcmask 1040896  }
   0x5   :  { %v345_v12 = vrot.slane %v343_v3, 7  ;;  %v508_v13 = vshrl.u32 %v491_v11, 16  ;;  %v511_v14 = vshll.u32 %v491_v11, 16  ;;  %v352_v16 = vrot.slane %v350_v7, 7  ;;  %v492_v26 = vld [vmem:[%s5131_s0 + $0x8] sm:$0xf]  ;;  %vm3962_vm7 = vmand %vm308_vm6, %vm22_vm2 }
   0x6   :  { %v501_v17 = vrot.slane %v499_v9, 4  ;;  %v504_v18 = vrot.slane %v502_v10, 5  ;;  %745 = vrot.lane.b32.xlu1 %v2998_v2, %s3536_s18  ;;  %v517_v29 = vshrl.u32 %v492_v26, 16  ;;  %v337_v31 = vld [vmem:[%s5131_s0 + $0xc] sm:$0xf]  ;;  %v520_v32 = vshll.u32 %v492_v26, 16 }
   0x7   :  { %v348_v20 = vor.u32 %v346_v4, %v345_v12  ;;  %v510_v21 = vrot.slane %v508_v13, 4  ;;  %v513_v22 = vrot.slane %v511_v14, 5  ;;  %v355_v27 = vor.u32 %v353_v8, %v352_v16  ;;  %v493_v38 = vld [vmem:[%s5131_s0 + $0xc] sm:$0xf]  ;;  %v139_v39 = vld [vmem:[%s5131_s0 + $0x4] sm:$0xf] }
   0x8   :  { %v505_v23 = vor.u32 %v504_v18, %v501_v17  ;;  %v362_v33 = vor.u32 %v360_v25, %v359_v24  ;;  %v519_v34 = vrot.slane %v517_v29, 4  ;;  %v522_v35 = vrot.slane %v520_v32, 5  ;;  %v338_v45 = vld [vmem:[%s5131_s0 + $0x10] sm:$0xf]  ;;  %v2999_v46 = vld [vmem:[%s5131_s0 + $0x8] sm:$0xf] }
   0x9   :  { %398 = vrot.lane.b32.xlu0 %v348_v20, %s3536_s18  ;;  %v514_v28 = vor.u32 %v513_v22, %v510_v21  ;;  %v364_v37 = vshrl.u32 %v337_v31, 16  ;;  %v367_v42 = vshll.u32 %v337_v31, 16  ;;  %v526_v43 = vshrl.u32 %v493_v38, 16  ;;  %v494_v49 = vld [vmem:[%s5131_s0 + $0x10] sm:$0xf] }
   0xa   :  { %v506_v30 = vrot.slane %v505_v23, 4  ;;  %v523_v40 = vor.u32 %v522_v35, %v519_v34  ;;  %v529_v44 = vshll.u32 %v493_v38, 16  ;;  %v371_v48 = vshrl.u32 %v338_v45, 16  ;;  %v495_v55 = vld [vmem:[%s5131_s0 + $0x14] sm:$0xf] }
   0xb   :  { %v515_v36 = vrot.slane %v514_v28, 4  ;;  %v366_v41 = vrot.slane %v364_v37, 7  ;;  %v528_v51 = vrot.slane %v526_v43, 4  ;;  %v535_v53 = vshrl.u32 %v494_v49, 16  ;;  %v3000_v58 = vld [vmem:[%s5131_s0 + $0xc] sm:$0xf] }
   0xc   :  { %570 = vrot.lane.b32.xlu1 %v506_v30, %s3536_s18  ;;  %v524_v47 = vrot.slane %v523_v40, 4  ;;  %v531_v52 = vrot.slane %v529_v44, 5  ;;  %v538_v54 = vshll.u32 %v494_v49, 16  ;;  %v373_v56 = vrot.slane %v371_v48, 7  ;;  %v339_v60 = vld [vmem:[%s5131_s0 + $0x14] sm:$0xf] }
   0xd   :  { %400 = vrot.lane.b32.xlu0 %v355_v27, %s3536_s18  ;;  %v369_v50 = vor.u32 %v367_v42, %v366_v41  ;;  %v374_v57 = vshll.u32 %v338_v45, 16  ;;  %v140_v61 = vld [vmem:[%s5131_s0 + $0x8] sm:$0xf]  ;;  %v544_v62 = vshrl.u32 %v495_v55, 16  ;;  %v547_v63 = vshll.u32 %v495_v55, 16 }
   0xe   :  { %v532_v59 = vor.u32 %v531_v52, %v528_v51  ;;  %v3360_v0 = vld [vmem:[%s5132_s1 + $0x4] ss:$8 sps:$4 sm:$0xff]   ;;  %v537_v1 = vrot.slane %v535_v53, 4  ;;  %v540_v2 = vrot.slane %v538_v54, 5  ;;  %v3362_v3 = vld [vmem:[%s5132_s1] ss:$8 sps:$4 sm:$0xff]  }
   0xf   :  { %v376_v4 = vor.u32 %v374_v57, %v373_v56  ;;  %v378_v5 = vshrl.u32 %v339_v60, 16  ;;  %v496_v6 = vld [vmem:[%s5131_s0 + $0x18] sm:$0xf]  ;;  %2472 = vmatprep.subr.bf16.mxu1 %v3360_v0  ;;  %v3363_v7 = vld [vmem:[%s5132_s1 + $0x14] ss:$8 sps:$4 sm:$0xff]   ;;  %v546_v11 = vrot.slane %v544_v62, 4 }
  0x10   :  { %402 = vrot.lane.b32.xlu1 %v362_v33, %s3536_s18  ;;  %v533_v8 = vrot.slane %v532_v59, 4  ;;  %v3640_v9 = vld [vmem:[%s5131_s0 + $0x18] sm:$0xf]  ;;  %2473 = vmatpush1.bf16.msra.mxu1 %v3362_v3  ;;  %v549_v12 = vrot.slane %v547_v63, 5  ;;  %v3648_v13 = vld [vmem:[%s5131_s0 + $0x1c] sm:$0xf]  ;;  %v541_v15 = vor.u32 %v540_v2, %v537_v1 }
  0x11   :  { %572 = vrot.lane.b32.xlu0 %v515_v36, %s3536_s18  ;;  %v3365_v10 = vld [vmem:[%s5132_s1 + $0x10] ss:$8 sps:$4 sm:$0xff]   ;;  %2474 = vmatprep.subr.bf16.mxu1 %v3363_v7  ;;  %v141_v14 = vld [vmem:[%s5131_s0 + $0xc] sm:$0xf]  ;;  %v553_v16 = vshrl.u32 %v496_v6, 16  ;;  %v556_v17 = vshll.u32 %v496_v6, 16 }
  0x12   :  { %v3656_v18 = vld [vmem:[%s5132_s1 + $0x104] ss:$8 sps:$4 sm:$0xff]   ;;  %v3001_v19 = vld [vmem:[%s5131_s0 + $0x10] sm:$0xf]  ;;  %v381_v20 = vshll.u32 %v339_v60, 16  ;;  %v380_v23 = vrot.slane %v378_v5, 7  ;;  %v550_v26 = vor.u32 %v549_v12, %v546_v11 }
  0x13   :  { %v3368_v21 = vld [vmem:[%s5132_s1 + $0x24] ss:$8 sps:$4 sm:$0xff]   ;;  %v3370_v22 = vld [vmem:[%s5132_s1 + $0x100] ss:$8 sps:$4 sm:$0xff]   ;;  %v497_v24 = vld [vmem:[%s5131_s0 + $0x1c] sm:$0xf]  ;;  %2585 = vmatprep.subr.bf16.mxu0 %v3656_v18 }
  0x14   :  { %154 = vrot.lane.b32.xlu1 %v139_v39, %s3536_s18  ;;  %2475 = vmatpush1.bf16.msra.mxu1 %v3365_v10  ;;  %v3371_v25 = vld [vmem:[%s5132_s1 + $0x20] ss:$8 sps:$4 sm:$0xff]   ;;  %v385_v27 = vshrl.u32 %v3640_v9, 16  ;;  %v392_v28 = vshrl.u32 %v3648_v13, 16  ;;  %v3372_v29 = vld [vmem:[%s5132_s1 + $0x114] ss:$8 sps:$4 sm:$0xff]   ;;  %v383_v38 = vor.u32 %v381_v20, %v380_v23 }
  0x15   :  { %747 = vrot.lane.b32.xlu0 %v2999_v46, %s3536_s18  ;;  %2476 = vmatprep.subr.bf16.mxu1 %v3368_v21  ;;  %v3374_v30 = vld [vmem:[%s5132_s1 + $0x34] ss:$8 sps:$4 sm:$0xff]   ;;  %v542_v31 = vrot.slane %v541_v15, 4  ;;  %v555_v32 = vrot.slane %v553_v16, 4  ;;  %v558_v33 = vrot.slane %v556_v17, 5  ;;  %v562_v35 = vshrl.u32 %v497_v24, 16 }
  0x16   :  { %2586 = vmatpush1.bf16.msra.mxu0 %v3370_v22  ;;  %v3376_v34 = vld [vmem:[%s5132_s1 + $0x110] ss:$8 sps:$4 sm:$0xff]   ;;  %v3691_v36 = vld [vmem:[%s5131_s0 + $0x20] sm:$0xf]  ;;  %v3378_v37 = vld [vmem:[%s5132_s1 + $0x124] ss:$8 sps:$4 sm:$0xff]  }
  0x17   :  { %2587 = vmatprep.subr.bf16.mxu0 %v3372_v29  ;;  %v388_v39 = vshll.u32 %v3640_v9, 16  ;;  %v565_v40 = vshll.u32 %v497_v24, 16  ;;  %v3701_v41 = vld [vmem:[%s5131_s0 + $0x24] sm:$0xf]  ;;  %v3377_v42 = vld [vmem:[%s5132_s1 + $0x30] ss:$8 sps:$4 sm:$0xff]   ;;  %v559_v53 = vor.u32 %v558_v33, %v555_v32 }
  0x18   :  { %574 = vrot.lane.b32.xlu1 %v524_v47, %s3536_s18  ;;  %2477 = vmatpush1.bf16.msra.mxu1 %v3371_v25  ;;  %v3706_v43 = vrot.slane %v550_v26, 4  ;;  %v387_v44 = vrot.slane %v385_v27, 7  ;;  %v3708_v45 = vrot.slane %v392_v28, 7  ;;  %v395_v46 = vshll.u32 %v3648_v13, 16  ;;  %v3380_v47 = vld [vmem:[%s5132_s1 + $0x44] ss:$8 sps:$4 sm:$0xff]  }
  0x19   :  { %404 = vrot.lane.b32.xlu0 %v369_v50, %s3536_s18  ;;  %2478 = vmatprep.subr.bf16.mxu1 %v3374_v30  ;;  %v3002_v48 = vld [vmem:[%s5131_s0 + $0x14] sm:$0xf]  ;;  %v1207_v49 = vshrl.u32 %v3691_v36, 16  ;;  %v3721_v50 = vld [vmem:[%s5131_s0 + $0x28] sm:$0xf]  ;;  %v564_v54 = vrot.slane %v562_v35, 4 }
  0x1a   :  { %2588 = vmatpush1.bf16.msra.mxu0 %v3376_v34  ;;  %v3382_v51 = vld [vmem:[%s5132_s1 + $0x120] ss:$8 sps:$4 sm:$0xff]   ;;  %v142_v52 = vld [vmem:[%s5131_s0 + $0x10] sm:$0xf]  ;;  %v1214_v55 = vshrl.u32 %v3701_v41, 16  ;;  %v567_v57 = vrot.slane %v565_v40, 5  ;;  %v390_v3 = vor.u32 %v388_v39, %v387_v44  ;;  %v397_v40 = vor.u32 %v395_v46, %v3708_v45 }
  0x1b   :  { %2589 = vmatprep.subr.bf16.mxu0 %v3378_v37  ;;  %v3384_v56 = vld [vmem:[%s5132_s1 + $0x134] ss:$8 sps:$4 sm:$0xff]   ;;  %v3383_v59 = vld [vmem:[%s5132_s1 + $0x40] ss:$8 sps:$4 sm:$0xff]   ;;  %v3537_v60 = vmov 0   ;;  %v1210_v0 = vshll.u32 %v3691_v36, 16 }
  0x1c   :  { %749 = vrot.lane.b32.xlu1 %v3000_v58, %s3536_s18  ;;  %v3738_v58 = vld [vmem:[%s5131_s0 + $0x2c] sm:$0xf]  ;;  %2479 = vmatpush1.bf16.msra.mxu1 %v3377_v42  ;;  %180 = vst.msk [vmem:[#allocation2 + $0x4] sm:$0xf] %vm19_vm0, %v3537_v60  ;;  %20 = vst.msk [vmem:[#allocation2] sm:$0xf] %vm19_vm0, %v3537_v60 }
  0x1d   :  { %156 = vrot.lane.b32.xlu0 %v140_v61, %s3536_s18  ;;  %620 = vst.msk [vmem:[#allocation2 + $0x98] sm:$0xf] %vm19_vm0, %v3537_v60  ;;  %773 = vst.msk [vmem:[#allocation2 + $0x9c] sm:$0xf] %vm19_vm0, %v3537_v60  ;;  %v1221_v61 = vshrl.u32 %v3721_v50, 16  ;;  %2480 = vmatprep.subr.bf16.mxu1 %v3380_v47  ;;  %v1217_v1 = vshll.u32 %v3701_v41, 16 }
  0x1e   :  { %897 = vst.msk [vmem:[#allocation2 + $0xa0] sm:$0xf] %vm19_vm0, %v3537_v60  ;;  %1051 = vst.msk [vmem:[#allocation2 + $0xa4] sm:$0xf] %vm19_vm0, %v3537_v60  ;;  %v3763_v62 = vld [vmem:[%s5131_s0 + $0x30] sm:$0xf]  ;;  %2590 = vmatpush1.bf16.msra.mxu0 %v3382_v51 }
  0x1f   :  { %1479 = vst.msk [vmem:[#allocation2 + $0x138] sm:$0xf] %vm19_vm0, %v3537_v60  ;;  %1632 = vst.msk [vmem:[#allocation2 + $0x13c] sm:$0xf] %vm19_vm0, %v3537_v60  ;;  %v3386_v63 = vld [vmem:[%s5132_s1 + $0x54] ss:$8 sps:$4 sm:$0xff]   ;;  %2591 = vmatprep.subr.bf16.mxu0 %v3384_v56 }
  0x20   :  { %406 = vrot.lane.b32.xlu1 %v376_v4, %s3536_s18  ;;  %v3388_v2 = vld [vmem:[%s5132_s1 + $0x130] ss:$8 sps:$4 sm:$0xff]   ;;  %v3774_v4 = vrot.slane %v559_v53, 4  ;;  %v3776_v5 = vrot.slane %v1207_v49, 7  ;;  %v3781_v6 = vld [vmem:[%s5131_s0 + $0x34] sm:$0xf]  ;;  %2481 = vmatpush1.bf16.msra.mxu1 %v3383_v59 }
  0x21   :  { %576 = vrot.lane.b32.xlu0 %v533_v8, %s3536_s18  ;;  %v3390_v7 = vld [vmem:[%s5132_s1 + $0x144] ss:$8 sps:$4 sm:$0xff]   ;;  %v568_v8 = vor.u32 %v567_v57, %v564_v54  ;;  %v3787_v9 = vrot.slane %v1214_v55, 7  ;;  %v1224_v10 = vshll.u32 %v3721_v50, 16  ;;  %v1228_v11 = vshrl.u32 %v3738_v58, 16  ;;  %2482 = vmatprep.subr.bf16.mxu1 %v3386_v63 }
  0x22   :  { %v3389_v12 = vld [vmem:[%s5132_s1 + $0x50] ss:$8 sps:$4 sm:$0xff]   ;;  %v1235_v15 = vshrl.u32 %v3763_v62, 16  ;;  %v3392_v16 = vld [vmem:[%s5132_s1 + $0x64] ss:$8 sps:$4 sm:$0xff]   ;;  %v1242_v20 = vshrl.u32 %v3781_v6, 16  ;;  %2592 = vmatpush1.bf16.msra.mxu0 %v3388_v2 }
  0x23   :  { %v143_v17 = vld [vmem:[%s5131_s0 + $0x14] sm:$0xf]  ;;  %v3394_v21 = vld [vmem:[%s5132_s1 + $0x140] ss:$8 sps:$4 sm:$0xff]   ;;  %v3003_v22 = vld [vmem:[%s5131_s0 + $0x18] sm:$0xf]  ;;  %2593 = vmatprep.subr.bf16.mxu0 %v3390_v7 }
  0x24   :  { %158 = vrot.lane.b32.xlu1 %v141_v14, %s3536_s18  ;;  %v3794_v14 = vrot.slane %v1221_v61, 7  ;;  %v3815_v23 = vld [vmem:[%s5131_s0 + $0x38] sm:$0xf]  ;;  %v3049_v24 = vld [vmem:[%s5131_s0 + $0x20] sm:$0xf]  ;;  %v3825_v26 = vrot.slane %v568_v8, 4  ;;  %2483 = vmatpush1.bf16.msra.mxu1 %v3389_v12 }
  0x25   :  { %751 = vrot.lane.b32.xlu0 %v3001_v19, %s3536_s18  ;;  %v1231_v19 = vshll.u32 %v3738_v58, 16  ;;  %v3396_v25 = vld [vmem:[%s5132_s1 + $0x154] ss:$8 sps:$4 sm:$0xff]   ;;  %v3827_v27 = vrot.slane %v1228_v11, 7  ;;  %v3395_v28 = vld [vmem:[%s5132_s1 + $0x60] ss:$8 sps:$4 sm:$0xff]   ;;  %2484 = vmatprep.subr.bf16.mxu1 %v3392_v16  ;;  %v1219_v11 = vor.u32 %v1217_v1, %v3787_v9 }
  0x26   :  { %v3832_v29 = vrot.slane %v1235_v15, 7  ;;  %v1238_v30 = vshll.u32 %v3763_v62, 16  ;;  %v3838_v32 = vrot.slane %v1242_v20, 7  ;;  %v1245_v33 = vshll.u32 %v3781_v6, 16  ;;  %2594 = vmatpush1.bf16.msra.mxu0 %v3394_v21  ;;  %v3400_v35 = vld [vmem:[%s5132_s1 + $0x150] ss:$8 sps:$4 sm:$0xff]  }
  0x27   :  { %v1249_v34 = vshrl.u32 %v3815_v23, 16  ;;  %v3849_v37 = vld [vmem:[%s5131_s0 + $0x3c] sm:$0xf]  ;;  %2595 = vmatprep.subr.bf16.mxu0 %v3396_v25  ;;  %v3402_v39 = vld [vmem:[%s5132_s1 + $0x164] ss:$8 sps:$4 sm:$0xff]   ;;  %v1252_v42 = vshll.u32 %v3815_v23, 16 }
  0x28   :  { %578 = vrot.lane.b32.xlu1 %v542_v31, %s3536_s18  ;;  %v3398_v31 = vld [vmem:[%s5132_s1 + $0x74] ss:$8 sps:$4 sm:$0xff]   ;;  %2485 = vmatpush1.bf16.msra.mxu1 %v3395_v28  ;;  %v3401_v44 = vld [vmem:[%s5132_s1 + $0x70] ss:$8 sps:$4 sm:$0xff]   ;;  %v1362_v47 = vshll.u32 %v3049_v24, 16  ;;  %v1256_v46 = vshrl.u32 %v3849_v37, 16 }
  0x29   :  { %408 = vrot.lane.b32.xlu0 %v383_v38, %s3536_s18  ;;  %v3050_v38 = vld [vmem:[%s5131_s0 + $0x24] sm:$0xf]  ;;  %2486 = vmatprep.subr.bf16.mxu1 %v3398_v31  ;;  %v3004_v13 = vld [vmem:[%s5131_s0 + $0x1c] sm:$0xf]  ;;  %v3874_v45 = vrot.slane %v1249_v34, 7  ;;  %v1259_v51 = vshll.u32 %v3849_v37, 16 }
  0x2a   :  { %v3404_v49 = vld [vmem:[%s5132_s1 + $0x84] ss:$8 sps:$4 sm:$0xff]   ;;  %2596 = vmatpush1.bf16.msra.mxu0 %v3400_v35  ;;  %v3406_v53 = vld [vmem:[%s5132_s1 + $0x160] ss:$8 sps:$4 sm:$0xff]   ;;  %v144_v54 = vld [vmem:[%s5131_s0 + $0x18] sm:$0xf] }
  0x2b   :  { %v1371_v55 = vshll.u32 %v3050_v38, 16  ;;  %2597 = vmatprep.subr.bf16.mxu0 %v3402_v39  ;;  %v3407_v56 = vld [vmem:[%s5132_s1 + $0x80] ss:$8 sps:$4 sm:$0xff]   ;;  %v3408_v57 = vld [vmem:[%s5132_s1 + $0x174] ss:$8 sps:$4 sm:$0xff]   ;;  %v3898_v2 = vrot.slane %v1362_v47, 5 }
  0x2c   :  { %753 = vrot.lane.b32.xlu1 %v3002_v48, %s3536_s18  ;;  %v3051_v48 = vld [vmem:[%s5131_s0 + $0x28] sm:$0xf]  ;;  %2487 = vmatpush1.bf16.msra.mxu1 %v3401_v44  ;;  %v3052_v63 = vld [vmem:[%s5131_s0 + $0x2c] sm:$0xf]  ;;  %v3412_v8 = vld [vmem:[%s5132_s1 + $0x170] ss:$8 sps:$4 sm:$0xff]  }
  0x2d   :  { %160 = vrot.lane.b32.xlu0 %v142_v52, %s3536_s18  ;;  %v1368_v52 = vshrl.u32 %v3050_v38, 16  ;;  %v1377_v61 = vshrl.u32 %v3051_v48, 16  ;;  %2488 = vmatprep.subr.bf16.mxu1 %v3404_v49  ;;  %vm113_vm4 = vsmask.f32 7938  ;;  %v3915_v12 = vrot.slane %v1371_v55, 5  ;;  %v1855_v36 = vld [vmem:[%s5132_s1 + $0x1a0] sm:$0xff] }
  0x2e   :  { %2598 = vmatpush1.bf16.msra.mxu0 %v3406_v53  ;;  %v1380_v15 = vshll.u32 %v3051_v48, 16  ;;  %v3414_v16 = vld [vmem:[%s5132_s1 + $0x184] ss:$8 sps:$4 sm:$0xff]   ;;  %v1386_v41 = vshrl.u32 %v3052_v63, 16  ;;  %v1389_v1 = vshll.u32 %v3052_v63, 16  ;;  %v1226_v38 = vor.u32 %v1224_v10, %v3794_v14  ;;  %v1826_v48 = vld [vmem:[%s5132_s1 + $0xb8] sm:$0xff]  ;;  %vm4013_vm10 = vmand %vm19_vm0, %vm113_vm4 }
  0x2f   :  { %v3906_v7 = vrot.slane %v1368_v52, 4  ;;  %2599 = vmatprep.subr.bf16.mxu0 %v3408_v57  ;;  %v3927_v20 = vrot.slane %v1377_v61, 4  ;;  %v3413_v9 = vld [vmem:[%s5132_s1 + $0x90] ss:$8 sps:$4 sm:$0xff]   ;;  %v27_v25 = vld [vmem:[#allocation2 + $0x14] sm:$0x1]  ;;  %v1212_v10 = vor.u32 %v1210_v0, %v3776_v5 }
  0x30   :  { %410 = vrot.lane.b32.xlu1 %v390_v3, %s3536_s18  ;;  %v3410_v3 = vld [vmem:[%s5132_s1 + $0x94] ss:$8 sps:$4 sm:$0xff]   ;;  %2489 = vmatpush1.bf16.msra.mxu1 %v3407_v56  ;;  %v3419_v31 = vld [vmem:[%s5132_s1 + $0xa0] ss:$8 sps:$4 sm:$0xff]   ;;  %v28_v34 = vsel %vm3922_vm5, 0, %v27_v25  ;;  %v3950_v39 = vrot.slane %v1380_v15, 5 }
  0x31   :  { %580 = vrot.lane.b32.xlu0 %v3706_v43, %s3536_s18  ;;  %v1359_v43 = vshrl.u32 %v3049_v24, 16  ;;  %2490 = vmatprep.subr.bf16.mxu1 %v3410_v3  ;;  %v3418_v24 = vld [vmem:[%s5132_s1 + $0x180] ss:$8 sps:$4 sm:$0xff]   ;;  %29 = vst [vmem:[#allocation2 + $0x14] sm:$0x1] %v28_v34  ;;  %v3971_v14 = vrot.slane %v1386_v41, 4  ;;  %v1374_v63 = vor.u32 %v3915_v12, %v3906_v7 }
  0x32   :  { %2600 = vmatpush1.bf16.msra.mxu0 %v3412_v8  ;;  %v48_v35 = vld [vmem:[%s5131_s0] sm:$0xf]  ;;  %v3422_v49 = vld [vmem:[%s5132_s1 + $0xb4] ss:$8 sps:$4 sm:$0xff]   ;;  %vm182_vm8 = vsmask.f32 7950 }
  0x33   :  { %v3893_v59 = vrot.slane %v1359_v43, 4  ;;  %2601 = vmatprep.subr.bf16.mxu0 %v3414_v16  ;;  %v3958_v43 = vld [vmem:[%s5132_s1 + $0xb0] sm:$0xff]  ;;  %v56_v44 = vshrl.u32 %v48_v35, 16  ;;  %v59_v47 = vshll.u32 %v48_v35, 16  ;;  %v184_v0 = vld [vmem:[#allocation2 + $0x4] sm:$0x8]  ;;  %vm4001_vm9 = vmand %vm181_vm3, %vm182_vm8 }
  0x34   :  { %162 = vrot.lane.b32.xlu1 %v143_v17, %s3536_s18  ;;  %2491 = vmatpush1.bf16.msra.mxu1 %v3413_v9  ;;  %v3020_v5 = vld [vmem:[%s5131_s0 + $0x24] sm:$0xf]  ;;  %v3990_v53 = vrot.slane %v1389_v1, 5  ;;  %v1856_v56 = vld [vmem:[%s5132_s1 + $0x1a8] sm:$0xff]  ;;  %v185_v8 = vsel %vm4001_vm9, 0, %v184_v0  ;;  %v3140_v12 = vcombine.low %v3958_v43, %v1826_v48  ;;  %v1233_v1 = vor.u32 %v1231_v19, %v3827_v27  ;;  %v1829_v48 = vld [vmem:[%s5132_s1 + $0xd0] sm:$0xff] }
  0x35   :  { %755 = vrot.lane.b32.xlu0 %v3003_v22, %s3536_s18  ;;  %v3416_v22 = vld [vmem:[%s5132_s1 + $0xa4] ss:$8 sps:$4 sm:$0xff]   ;;  %v1365_v52 = vor.u32 %v3898_v2, %v3893_v59  ;;  %v3019_v59 = vld [vmem:[%s5131_s0 + $0x20] sm:$0xf]  ;;  %v4028_v7 = vld [vmem:[%s5131_s0 + $0x34] sm:$0xf]  ;;  %v1240_v9 = vor.u32 %v1238_v30, %v3832_v29  ;;  %v1383_v29 = vor.u32 %v3950_v39, %v3927_v20  ;;  %v4059_v25 = vcombine.low %v1855_v36, %v1856_v56 }
  0x36   :  { %2492 = vmatprep.subr.bf16.mxu1 %v3416_v22  ;;  %2602 = vmatpush1.bf16.msra.mxu0 %v3418_v24  ;;  %v310_v61 = vld [vmem:[#allocation2 + $0x4] sm:$0x1]  ;;  %v621_v15 = vld [vmem:[#allocation2 + $0xc] sm:$0x1]  ;;  %186 = vst [vmem:[#allocation2 + $0x4] sm:$0x8] %v185_v8 }
  0x37   :  { %v622_v16 = vsel %vm3922_vm5, 0, %v621_v15  ;;  %v2991_v41 = vld [vmem:[%s5131_s0 + $0x4] sm:$0xf]  ;;  %v1828_v22 = vld [vmem:[%s5132_s1 + $0xc8] sm:$0xff]  ;;  %v4053_v62 = vrot.slane %v1256_v46, 7  ;;  %v4055_v27 = vrot.slane %v1365_v52, 4 }
  0x38   :  { %582 = vrot.lane.b32.xlu1 %v3774_v4, %s3536_s18  ;;  %v3053_v4 = vld [vmem:[%s5131_s0 + $0x30] sm:$0xf]  ;;  %2493 = vmatpush1.bf16.msra.mxu1 %v3419_v31  ;;  %v3427_v24 = vld [vmem:[%s5132_s1 + $0xc4] ss:$8 sps:$4 sm:$0xff]   ;;  %623 = vst [vmem:[#allocation2 + $0xc] sm:$0x1] %v622_v16  ;;  %v1392_v31 = vor.u32 %v3990_v53, %v3971_v14 }
  0x39   :  { %412 = vrot.lane.b32.xlu0 %v397_v40, %s3536_s18  ;;  %v1395_v21 = vshrl.u32 %v3053_v4, 16  ;;  %v1398_v28 = vshll.u32 %v3053_v4, 16  ;;  %v3420_v40 = vld [vmem:[%s5132_s1 + $0x194] ss:$8 sps:$4 sm:$0xff]   ;;  %v3425_v4 = vld [vmem:[%s5132_s1 + $0x1a4] ss:$8 sps:$4 sm:$0xff]   ;;  %2494 = vmatprep.subr.bf16.mxu1 %v3422_v49 }
  0x3a   :  { %2603 = vmatprep.subr.bf16.mxu0 %v3420_v40  ;;  %v654_v58 = vshrl.u32 %v2991_v41, 16  ;;  %v657_v19 = vshll.u32 %v2991_v41, 16  ;;  %v115_v30 = vld [vmem:[#allocation2 + $0x14] sm:$0xf]  ;;  %v187_v35 = vld [vmem:[#allocation2 + $0x18] sm:$0x8] }
  0x3b   :  { %v3994_v55 = vrot.slane %v1398_v28, 5  ;;  %v4062_v28 = vrot.slane %v1374_v63, 4  ;;  %v3429_v20 = vld [vmem:[%s5132_s1 + $0x1b4] ss:$8 sps:$4 sm:$0xff]   ;;  %v188_v40 = vsel %vm4001_vm9, 0, %v187_v35  ;;  %v4092_v36 = vrot.slane %v1383_v29, 4 }
  0x3c   :  { %757 = vrot.lane.b32.xlu1 %v3004_v13, %s3536_s18  ;;  %v3424_v13 = vld [vmem:[%s5132_s1 + $0x190] ss:$8 sps:$4 sm:$0xff]   ;;  %v656_v34 = vrot.slane %v654_v58, 7  ;;  %2495 = vmatpush1.bf16.msra.mxu1 %v3140_v12  ;;  %vm285_vm11 = vsmask.f32 3328  ;;  %vm464_vm12 = vcmask 1043971  }
  0x3d   :  { %164 = vrot.lane.b32.xlu0 %v144_v54, %s3536_s18  ;;  %v3992_v54 = vrot.slane %v1395_v21, 4  ;;  %v1827_v21 = vld [vmem:[%s5132_s1 + $0xc0] sm:$0xff]  ;;  %2604 = vmatpush1.bf16.msra.mxu0 %v3424_v13  ;;  %189 = vst [vmem:[#allocation2 + $0x18] sm:$0x8] %v188_v40  ;;  %v1830_v49 = vld [vmem:[%s5132_s1 + $0xd8] sm:$0xff]  ;;  %v4105_v53 = vrot.slane %v1392_v31, 4  ;;  %vm4110_vm13 = vmand %vm19_vm0, %vm285_vm11 }
  0x3e   :  { %2605 = vmatprep.subr.bf16.mxu0 %v3425_v4  ;;  %v3142_v39 = vcombine.low %v1827_v21, %v1828_v22  ;;  %v208_v43 = vld [vmem:[%s5131_s0] sm:$0xf]  ;;  %2496 = vmatprep.subr.bf16.mxu1 %v3427_v24  ;;  %v3431_v13 = vld [vmem:[%s5132_s1 + $0xd4] ss:$8 sps:$4 sm:$0xff]   ;;  %v3433_v0 = vld [vmem:[%s5132_s1 + $0x1b0] ss:$8 sps:$4 sm:$0xff]   ;;  %v3144_v4 = vcombine.low %v1829_v48, %v1830_v49 }
  0x3f   :  { %v219_v14 = vshll.u32 %v208_v43, 16  ;;  %v3021_v52 = vld [vmem:[%s5131_s0 + $0x28] sm:$0xf]  ;;  %v3434_v8 = vld [vmem:[%s5132_s1 + $0x1c4] ss:$8 sps:$4 sm:$0xff]   ;;  %vm4152_vm14 = vmand %vm464_vm12, %vm182_vm8  ;;  %vm136_vm15 = vcmask 1043968  }
  0x40   :  { %1264 = vrot.lane.b32.xlu1 %v1219_v11, %s3536_s18  ;;  %v311_v11 = vsel %vm3962_vm7, 0, %v310_v61  ;;  %v1860_v63 = vld [vmem:[%s5132_s1 + $0x1c8] sm:$0xff]  ;;  %2497 = vmatpush1.bf16.msra.mxu1 %v3142_v39  ;;  %v209_v58 = vld [vmem:[%s5131_s0 + $0x4] sm:$0xf]  ;;  %v1862_v31 = vld [vmem:[%s5132_s1 + $0x1d8] sm:$0xff]  ;;  %vm2447_vm3 = vcmask 523264  }
  0x41   :  { %584 = vrot.lane.b32.xlu0 %v3825_v26, %s3536_s18  ;;  %v58_v26 = vrot.slane %v56_v44, 7  ;;  %312 = vst [vmem:[#allocation2 + $0x4] sm:$0x1] %v311_v11  ;;  %v1401_v44 = vor.u32 %v3994_v55, %v3992_v54  ;;  %2606 = vmatpush1.bf16.msra.mxu0 %v4059_v25  ;;  %v1407_v54 = vshll.u32 %v4028_v7, 16  ;;  %v221_v61 = vrot.slane %v219_v14, 5  ;;  %v1863_v14 = vld [vmem:[%s5132_s1 + $0x1e0] sm:$0xff]  ;;  %vm4438_vm1 = vmand %vm136_vm15, %vm113_vm4 }
  0x42   :  { %2607 = vmatprep.subr.bf16.mxu0 %v3429_v20  ;;  %v449_v11 = vld [vmem:[%s5131_s0 + $0x4] sm:$0xf]  ;;  %2498 = vmatprep.subr.bf16.mxu1 %v3431_v13  ;;  %v3438_v22 = vld [vmem:[%s5132_s1 + $0xe0] ss:$8 sps:$4 sm:$0xff]   ;;  %v190_v24 = vld [vmem:[#allocation2 + $0x2c] sm:$0x8] }
  0x43   :  { %v61_v3 = vor.u32 %v59_v47, %v58_v26  ;;  %v659_v47 = vor.u32 %v657_v19, %v656_v34  ;;  %v3022_v26 = vld [vmem:[%s5131_s0 + $0x2c] sm:$0xf]  ;;  %v4128_v15 = vrot.slane %v1401_v44, 4  ;;  %457 = vst.msk [vmem:[#allocation2 + $0x1c] sm:$0xf] %vm19_vm0, %v449_v11  ;;  %v228_v29 = vshll.u32 %v209_v58, 16  ;;  %vm4459_vm2 = vmand %vm136_vm15, %vm285_vm11 }
  0x44   :  { %1266 = vrot.lane.b32.xlu1 %v1226_v38, %s3536_s18  ;;  %v1404_v38 = vshrl.u32 %v4028_v7, 16  ;;  %v287_v34 = vld [vmem:[#allocation2 + $0x18] sm:$0xf]  ;;  %2499 = vmatpush1.bf16.msra.mxu1 %v3144_v4  ;;  %v3439_v20 = vld [vmem:[%s5132_s1 + $0x1d4] ss:$8 sps:$4 sm:$0xff]  }
  0x45   :  { %1262 = vrot.lane.b32.xlu0 %v1212_v10, %s3536_s18  ;;  %v116_v46 = vsel %vm4013_vm10, %v61_v3, %v115_v30  ;;  %v216_v10 = vshrl.u32 %v208_v43, 16  ;;  %v709_v3 = vld [vmem:[#allocation2 + $0xc] sm:$0xf]  ;;  %2608 = vmatpush1.bf16.msra.mxu0 %v3433_v0  ;;  %v1861_v30 = vld [vmem:[%s5132_s1 + $0x1d0] sm:$0xff]  ;;  %v624_v35 = vld [vmem:[#allocation2 + $0x20] sm:$0x1] }
  0x46   :  { %117 = vst [vmem:[#allocation2 + $0x14] sm:$0xf] %v116_v46  ;;  %v4130_v12 = vrot.slane %v1404_v38, 4  ;;  %v710_v16 = vsel %vm4013_vm10, %v659_v47, %v709_v3  ;;  %2609 = vmatprep.subr.bf16.mxu0 %v3434_v8  ;;  %v1247_v46 = vor.u32 %v1245_v33, %v3838_v32  ;;  %v230_v40 = vrot.slane %v228_v29, 5  ;;  %v2992_v6 = vld [vmem:[%s5131_s0 + $0x8] sm:$0xf] }
  0x47   :  { %v218_v56 = vrot.slane %v216_v10, 4  ;;  %711 = vst [vmem:[#allocation2 + $0xc] sm:$0xf] %v710_v16  ;;  %v625_v43 = vsel %vm3922_vm5, 0, %v624_v35  ;;  %v3024_v32 = vld [vmem:[%s5131_s0 + $0x34] sm:$0xf]  ;;  %v4182_v10 = vcombine.low %v1861_v30, %v1862_v31 }
  0x48   :  { %1025 = vrot.lane.b32.xlu1 %v3020_v5, %s3536_s18  ;;  %v448_v5 = vld [vmem:[%s5131_s0] sm:$0xf]  ;;  %626 = vst [vmem:[#allocation2 + $0x20] sm:$0x1] %v625_v43  ;;  %v661_v44 = vshrl.u32 %v2992_v6, 16  ;;  %v664_v47 = vshll.u32 %v2992_v6, 16 }
  0x49   :  { %1023 = vrot.lane.b32.xlu0 %v3019_v59, %s3536_s18  ;;  %456 = vst.msk [vmem:[#allocation2 + $0x8] sm:$0xf] %vm19_vm0, %v448_v5  ;;  %v1859_v59 = vld [vmem:[%s5132_s1 + $0x1c0] sm:$0xff]  ;;  %v222_v41 = vor.u32 %v221_v61, %v218_v56  ;;  %v3023_v48 = vld [vmem:[%s5131_s0 + $0x30] sm:$0xf]  ;;  %v1864_v5 = vld [vmem:[%s5132_s1 + $0x1e8] sm:$0xff] }
  0x4a   :  { %v4141_v21 = vcombine.low %v1859_v59, %v1860_v63  ;;  %v3443_v0 = vld [vmem:[%s5132_s1 + $0xf0] ss:$8 sps:$4 sm:$0xff]   ;;  %v663_v56 = vrot.slane %v661_v44, 7  ;;  %v30_v61 = vld [vmem:[#allocation2 + $0x28] sm:$0x1]  ;;  %v4265_v44 = vrot.slane %v1407_v54, 5 }
  0x4b   :  { %v223_v19 = vrot.slane %v222_v41, 4  ;;  %v1865_v59 = vld [vmem:[%s5132_s1 + $0x1f0] sm:$0xff]  ;;  %v31_v4 = vsel %vm3922_vm5, 0, %v30_v61  ;;  %v49_v8 = vld [vmem:[%s5131_s0 + $0x4] sm:$0xf]  ;;  %v1866_v11 = vld [vmem:[%s5132_s1 + $0x1f8] sm:$0xff] }
  0x4c   :  { %1270 = vrot.lane.b32.xlu1 %v1240_v9, %s3536_s18  ;;  %v1254_v9 = vor.u32 %v1252_v42, %v3874_v45  ;;  %v191_v42 = vsel %vm4001_vm9, 0, %v190_v24  ;;  %v225_v45 = vshrl.u32 %v209_v58, 16  ;;  %2610 = vmatpush1.bf16.msra.mxu0 %v4141_v21  ;;  %v4219_v16 = vld [vmem:[%s5131_s0 + $0x38] sm:$0xf]  ;;  %v666_v41 = vor.u32 %v664_v47, %v663_v56  ;;  %32 = vst [vmem:[#allocation2 + $0x28] sm:$0x1] %v31_v4 }
  0x4d   :  { %1268 = vrot.lane.b32.xlu0 %v1233_v1, %s3536_s18  ;;  %v3436_v1 = vld [vmem:[%s5132_s1 + $0xe4] ss:$8 sps:$4 sm:$0xff]   ;;  %192 = vst [vmem:[#allocation2 + $0x2c] sm:$0x8] %v191_v42  ;;  %v288_v38 = vsel %vm4110_vm13, %v223_v19, %v287_v34  ;;  %2611 = vmatprep.subr.bf16.mxu0 %v3439_v20  ;;  %v193_v24 = vld [vmem:[#allocation2 + $0x40] sm:$0x8]  ;;  %v4225_v58 = vcombine.low %v1863_v14, %v1864_v5 }
  0x4e   :  { %2500 = vmatprep.subr.bf16.mxu1 %v3436_v1  ;;  %v227_v39 = vrot.slane %v225_v45, 4  ;;  %289 = vst [vmem:[#allocation2 + $0x18] sm:$0xf] %v288_v38  ;;  %v63_v1 = vshrl.u32 %v49_v8, 16  ;;  %v1261_v19 = vor.u32 %v1259_v51, %v4053_v62  ;;  %v194_v45 = vsel %vm4001_vm9, 0, %v193_v24 }
  0x4f   :  { %2501 = vmatpush1.bf16.msra.mxu1 %v3438_v22  ;;  %v3444_v22 = vld [vmem:[%s5132_s1 + $0x1e4] ss:$8 sps:$4 sm:$0xff]   ;;  %v210_v29 = vld [vmem:[%s5131_s0 + $0x8] sm:$0xf]  ;;  %195 = vst [vmem:[#allocation2 + $0x40] sm:$0x8] %v194_v45  ;;  %v4241_v35 = vcombine.low %v1865_v59, %v1866_v11 }
  0x50   :  { %1029 = vrot.lane.b32.xlu1 %v3022_v26, %s3536_s18  ;;  %v466_v33 = vld [vmem:[#allocation2 + $0x8] sm:$0x8]  ;;  %v231_v13 = vor.u32 %v230_v40, %v227_v39  ;;  %v3441_v26 = vld [vmem:[%s5132_s1 + $0xf4] ss:$8 sps:$4 sm:$0xff]   ;;  %2612 = vmatpush1.bf16.msra.mxu0 %v4182_v10  ;;  %v65_v31 = vrot.slane %v63_v1, 7  ;;  %v234_v37 = vshrl.u32 %v210_v29, 16 }
  0x51   :  { %1027 = vrot.lane.b32.xlu0 %v3021_v52, %s3536_s18  ;;  %v467_v49 = vsel %vm4152_vm14, 0, %v466_v33  ;;  %v469_v52 = vld [vmem:[#allocation2 + $0x1c] sm:$0x8]  ;;  %2502 = vmatprep.subr.bf16.mxu1 %v3441_v26  ;;  %v237_v51 = vshll.u32 %v210_v29, 16  ;;  %v24_v62 = vld [vmem:[#allocation2] sm:$0x1] }
  0x52   :  { %468 = vst [vmem:[#allocation2 + $0x8] sm:$0x8] %v467_v49  ;;  %v470_v63 = vsel %vm4152_vm14, 0, %v469_v52  ;;  %v232_v3 = vrot.slane %v231_v13, 4  ;;  %v712_v34 = vld [vmem:[#allocation2 + $0x20] sm:$0xf]  ;;  %2613 = vmatprep.subr.bf16.mxu0 %v3444_v22 }
  0x53   :  { %471 = vst [vmem:[#allocation2 + $0x1c] sm:$0x8] %v470_v63  ;;  %2503 = vmatpush1.bf16.msra.mxu1 %v3443_v0  ;;  %v25_v20 = vsel %vm3922_vm5, 0, %v24_v62  ;;  %v3064_v38 = vld [vmem:[%s5131_s0 + $0x24] sm:$0xf]  ;;  %v713_v40 = vsel %vm4013_vm10, %v666_v41, %v712_v34  ;;  %v236_v6 = vrot.slane %v234_v37, 4 }
  0x54   :  { %1274 = vrot.lane.b32.xlu1 %v1254_v9, %s3536_s18  ;;  %v66_v9 = vshll.u32 %v49_v8, 16  ;;  %v290_v42 = vld [vmem:[#allocation2 + $0x2c] sm:$0xf]  ;;  %3230 = vmatprep.subr.bf16.mxu1 %v3656_v18  ;;  %26 = vst [vmem:[#allocation2] sm:$0x1] %v25_v20  ;;  %v1413_v47 = vshrl.u32 %v4219_v16, 16 }
  0x55   :  { %1272 = vrot.lane.b32.xlu0 %v1247_v46, %s3536_s18  ;;  %v291_v30 = vsel %vm4110_vm13, %v232_v3, %v290_v42  ;;  %v313_v46 = vld [vmem:[#allocation2 + $0x18] sm:$0x1]  ;;  %2614 = vmatpush1.bf16.msra.mxu0 %v4225_v58  ;;  %v3449_v18 = vld [vmem:[%s5132_s1 + $0x1f4] ss:$8 sps:$4 sm:$0xff]   ;;  %714 = vst [vmem:[#allocation2 + $0x20] sm:$0xf] %v713_v40 }
  0x56   :  { %292 = vst [vmem:[#allocation2 + $0x2c] sm:$0xf] %v291_v30  ;;  %v314_v39 = vsel %vm3962_vm7, 0, %v313_v46  ;;  %v68_v43 = vor.u32 %v66_v9, %v65_v31  ;;  %v3025_v33 = vld [vmem:[%s5131_s0 + $0x38] sm:$0xf]  ;;  %v239_v14 = vrot.slane %v237_v51, 5  ;;  %2615 = vmatprep.subr.bf16.mxu0 %v3449_v18 }
  0x57   :  { %315 = vst [vmem:[#allocation2 + $0x18] sm:$0x1] %v314_v39  ;;  %137 = vst.msk [vmem:[#allocation2] sm:$0xf] %vm136_vm15, %v3537_v60  ;;  %v50_v7 = vld [vmem:[%s5131_s0 + $0x8] sm:$0xf] }
  0x58   :  { %1033 = vrot.lane.b32.xlu1 %v3024_v32, %s3536_s18  ;;  %v450_v32 = vld [vmem:[%s5131_s0 + $0x8] sm:$0xf]  ;;  %v627_v54 = vld [vmem:[#allocation2 + $0x34] sm:$0x1]  ;;  %v1416_v49 = vshll.u32 %v4219_v16, 16  ;;  %v240_v26 = vor.u32 %v239_v14, %v236_v6  ;;  %v70_v0 = vshrl.u32 %v50_v7, 16 }
  0x59   :  { %1031 = vrot.lane.b32.xlu0 %v3023_v48, %s3536_s18  ;;  %458 = vst.msk [vmem:[#allocation2 + $0x30] sm:$0xf] %vm19_vm0, %v450_v32  ;;  %v33_v48 = vld [vmem:[#allocation2 + $0x3c] sm:$0x1]  ;;  %v118_v13 = vld [vmem:[#allocation2 + $0x28] sm:$0xf]  ;;  %2616 = vmatpush1.bf16.msra.mxu0 %v4241_v35 }
  0x5a   :  { %v73_v5 = vshll.u32 %v50_v7, 16  ;;  %v119_v52 = vsel %vm4013_vm10, %v68_v43, %v118_v13  ;;  %v628_v56 = vsel %vm3922_vm5, 0, %v627_v54  ;;  %v2993_v61 = vld [vmem:[%s5131_s0 + $0xc] sm:$0xf]  ;;  %v293_v63 = vld [vmem:[#allocation2 + $0x40] sm:$0xf] }
  0x5b   :  { %v451_v59 = vld [vmem:[%s5131_s0 + $0xc] sm:$0xf]  ;;  %120 = vst [vmem:[#allocation2 + $0x28] sm:$0xf] %v119_v52  ;;  %v241_v3 = vrot.slane %v240_v26, 4  ;;  %v72_v4 = vrot.slane %v70_v0, 7 }
  0x5c   :  { %1430 = vrot.lane.b32.xlu1 %v4055_v27, %s3536_s18  ;;  %v34_v27 = vsel %vm3922_vm5, 0, %v33_v48  ;;  %629 = vst [vmem:[#allocation2 + $0x34] sm:$0x1] %v628_v56  ;;  %v668_v8 = vshrl.u32 %v2993_v61, 16  ;;  %v671_v11 = vshll.u32 %v2993_v61, 16  ;;  %v4305_v30 = vrot.slane %v1413_v47, 4 }
  0x5d   :  { %1276 = vrot.lane.b32.xlu0 %v1261_v19, %s3536_s18  ;;  %35 = vst [vmem:[#allocation2 + $0x3c] sm:$0x1] %v34_v27  ;;  %459 = vst.msk [vmem:[#allocation2 + $0x44] sm:$0xf] %vm19_vm0, %v451_v59  ;;  %v316_v16 = vld [vmem:[#allocation2 + $0x2c] sm:$0x1]  ;;  %v294_v22 = vsel %vm4110_vm13, %v241_v3, %v293_v63  ;;  %v75_v24 = vor.u32 %v73_v5, %v72_v4 }
  0x5e   :  { %v196_v41 = vld [vmem:[#allocation2 + $0x54] sm:$0x8]  ;;  %v211_v1 = vld [vmem:[%s5131_s0 + $0xc] sm:$0xf]  ;;  %v317_v9 = vsel %vm3962_vm7, 0, %v316_v16  ;;  %v670_v19 = vrot.slane %v668_v8, 7 }
  0x5f   :  { %v630_v42 = vld [vmem:[#allocation2 + $0x48] sm:$0x1]  ;;  %v2994_v45 = vld [vmem:[%s5131_s0 + $0x10] sm:$0xf]  ;;  %v3066_v29 = vld [vmem:[%s5131_s0 + $0x2c] sm:$0xf] }
  0x60   :  { %1604 = vrot.lane.b32.xlu1 %v3064_v38, %s3536_s18  ;;  %v4307_v31 = vrot.slane %v1416_v49, 5  ;;  %318 = vst [vmem:[#allocation2 + $0x2c] sm:$0x1] %v317_v9  ;;  %295 = vst [vmem:[#allocation2 + $0x40] sm:$0xf] %v294_v22  ;;  %v197_v51 = vsel %vm4001_vm9, 0, %v196_v41  ;;  %v673_v20 = vor.u32 %v671_v11, %v670_v19 }
  0x61   :  { %1035 = vrot.lane.b32.xlu0 %v3025_v33, %s3536_s18  ;;  %v472_v37 = vld [vmem:[#allocation2 + $0x30] sm:$0x8]  ;;  %v243_v62 = vshrl.u32 %v211_v1, 16  ;;  %v3065_v46 = vld [vmem:[%s5131_s0 + $0x28] sm:$0xf]  ;;  %v246_v38 = vshll.u32 %v211_v1, 16 }
  0x62   :  { %v473_v34 = vsel %vm4152_vm14, 0, %v472_v37  ;;  %198 = vst [vmem:[#allocation2 + $0x54] sm:$0x8] %v197_v51  ;;  %v631_v39 = vsel %vm3922_vm5, 0, %v630_v42  ;;  %v36_v40 = vld [vmem:[#allocation2 + $0x50] sm:$0x1]  ;;  %v1419_v37 = vor.u32 %v4307_v31, %v4305_v30 }
  0x63   :  { %v4325_v43 = vld [vmem:[%s5131_s0 + $0x3c] sm:$0xf]  ;;  %474 = vst [vmem:[#allocation2 + $0x30] sm:$0x8] %v473_v34  ;;  %v245_v6 = vrot.slane %v243_v62, 4  ;;  %v675_v32 = vshrl.u32 %v2994_v45, 16 }
  0x64   :  { %1434 = vrot.lane.b32.xlu1 %v4092_v36, %s3536_s18  ;;  %v121_v36 = vld [vmem:[#allocation2 + $0x3c] sm:$0xf]  ;;  %632 = vst [vmem:[#allocation2 + $0x48] sm:$0x1] %v631_v39  ;;  %v678_v18 = vshll.u32 %v2994_v45, 16  ;;  %v37_v33 = vsel %vm3922_vm5, 0, %v36_v40 }
  0x65   :  { %1432 = vrot.lane.b32.xlu0 %v4062_v28, %s3536_s18  ;;  %v122_v47 = vsel %vm4013_vm10, %v75_v24, %v121_v36  ;;  %v248_v14 = vrot.slane %v246_v38, 5  ;;  %38 = vst [vmem:[#allocation2 + $0x50] sm:$0x1] %v37_v33  ;;  %v51_v28 = vld [vmem:[%s5131_s0 + $0xc] sm:$0xf]  ;;  %v677_v54 = vrot.slane %v675_v32, 7 }
  0x66   :  { %v199_v48 = vld [vmem:[#allocation2 + $0x68] sm:$0x8]  ;;  %123 = vst [vmem:[#allocation2 + $0x3c] sm:$0xf] %v122_v47  ;;  %v715_v27 = vld [vmem:[#allocation2 + $0x34] sm:$0xf] }
  0x67   :  { %v475_v7 = vld [vmem:[#allocation2 + $0x44] sm:$0x8]  ;;  %v77_v49 = vshrl.u32 %v51_v28, 16  ;;  %v716_v13 = vsel %vm4013_vm10, %v673_v20, %v715_v27  ;;  %v249_v0 = vor.u32 %v248_v14, %v245_v6  ;;  %v80_v5 = vshll.u32 %v51_v28, 16  ;;  %v212_v52 = vld [vmem:[%s5131_s0 + $0x10] sm:$0xf] }
  0x68   :  { %1608 = vrot.lane.b32.xlu1 %v3066_v29, %s3536_s18  ;;  %v476_v26 = vsel %vm4152_vm14, 0, %v475_v7  ;;  %v452_v56 = vld [vmem:[%s5131_s0 + $0x10] sm:$0xf]  ;;  %717 = vst [vmem:[#allocation2 + $0x34] sm:$0xf] %v716_v13  ;;  %v680_v61 = vor.u32 %v678_v18, %v677_v54  ;;  %v200_v63 = vsel %vm4001_vm9, 0, %v199_v48 }
  0x69   :  { %1606 = vrot.lane.b32.xlu0 %v3065_v46, %s3536_s18  ;;  %477 = vst [vmem:[#allocation2 + $0x44] sm:$0x8] %v476_v26  ;;  %v79_v59 = vrot.slane %v77_v49, 7  ;;  %v252_v3 = vshrl.u32 %v212_v52, 16  ;;  %460 = vst.msk [vmem:[#allocation2 + $0x58] sm:$0xf] %vm19_vm0, %v452_v56 }
  0x6a   :  { %v39_v4 = vld [vmem:[#allocation2 + $0x64] sm:$0x1]  ;;  %v1422_v8 = vshrl.u32 %v4325_v43, 16  ;;  %v1425_v11 = vshll.u32 %v4325_v43, 16  ;;  %v319_v16 = vld [vmem:[#allocation2 + $0x40] sm:$0x1] }
  0x6b   :  { %v250_v41 = vrot.slane %v249_v0, 4  ;;  %201 = vst [vmem:[#allocation2 + $0x68] sm:$0x8] %v200_v63  ;;  %v255_v1 = vshll.u32 %v212_v52, 16  ;;  %v320_v9 = vsel %vm3962_vm7, 0, %v319_v16  ;;  %v82_v24 = vor.u32 %v80_v5, %v79_v59 }
  0x6c   :  { %v296_v22 = vld [vmem:[#allocation2 + $0x54] sm:$0xf]  ;;  %v254_v19 = vrot.slane %v252_v3, 4  ;;  %v40_v42 = vsel %vm3922_vm5, 0, %v39_v4  ;;  %v3067_v45 = vld [vmem:[%s5131_s0 + $0x30] sm:$0xf]  ;;  %1438 = vrot.lane.b32.xlu1 %v4128_v15, %s3536_s18  ;;  %v1410_v15 = vor.u32 %v4265_v44, %v4130_v12 }
  0x6d   :  { %v3068_v29 = vld [vmem:[%s5131_s0 + $0x34] sm:$0xf]  ;;  %321 = vst [vmem:[#allocation2 + $0x40] sm:$0x1] %v320_v9  ;;  %v297_v51 = vsel %vm4110_vm13, %v250_v41, %v296_v22  ;;  %v718_v62 = vld [vmem:[#allocation2 + $0x48] sm:$0xf]  ;;  %1436 = vrot.lane.b32.xlu0 %v4105_v53, %s3536_s18 }
  0x6e   :  { %v257_v46 = vrot.slane %v255_v1, 5  ;;  %41 = vst [vmem:[#allocation2 + $0x64] sm:$0x1] %v40_v42  ;;  %298 = vst [vmem:[#allocation2 + $0x54] sm:$0xf] %v297_v51  ;;  %v719_v34 = vsel %vm4013_vm10, %v680_v61, %v718_v62  ;;  %v4384_v43 = vrot.slane %v1422_v8, 4 }
  0x6f   :  { %v124_v20 = vld [vmem:[#allocation2 + $0x50] sm:$0xf]  ;;  %v633_v31 = vld [vmem:[#allocation2 + $0x5c] sm:$0x1]  ;;  %720 = vst [vmem:[#allocation2 + $0x48] sm:$0xf] %v719_v34 }
  0x70   :  { %v52_v30 = vld [vmem:[%s5131_s0 + $0x10] sm:$0xf]  ;;  %v125_v38 = vsel %vm4013_vm10, %v82_v24, %v124_v20  ;;  %v258_v39 = vor.u32 %v257_v46, %v254_v19  ;;  %v2995_v12 = vld [vmem:[%s5131_s0 + $0x14] sm:$0xf]  ;;  %v4386_v36 = vrot.slane %v1425_v11, 5  ;;  %v634_v6 = vsel %vm3922_vm5, 0, %v633_v31  ;;  %1612 = vrot.lane.b32.xlu1 %v3068_v29, %s3536_s18 }
  0x71   :  { %v84_v40 = vshrl.u32 %v52_v30, 16  ;;  %v87_v53 = vshll.u32 %v52_v30, 16  ;;  %v453_v44 = vld [vmem:[%s5131_s0 + $0x14] sm:$0xf]  ;;  %126 = vst [vmem:[#allocation2 + $0x50] sm:$0xf] %v125_v38  ;;  %1610 = vrot.lane.b32.xlu0 %v3067_v45, %s3536_s18 }
  0x72   :  { %v682_v32 = vshrl.u32 %v2995_v12, 16  ;;  %461 = vst.msk [vmem:[#allocation2 + $0x6c] sm:$0xf] %vm19_vm0, %v453_v44  ;;  %v202_v18 = vld [vmem:[#allocation2 + $0x7c] sm:$0x8]  ;;  %v1420_v33 = vrot.slane %v1419_v37, 4  ;;  %v1428_v61 = vor.u32 %v4386_v36, %v4384_v43 }
  0x73   :  { %v259_v47 = vrot.slane %v258_v39, 4  ;;  %v478_v14 = vld [vmem:[#allocation2 + $0x58] sm:$0x8]  ;;  %v86_v28 = vrot.slane %v84_v40, 7  ;;  %635 = vst [vmem:[#allocation2 + $0x5c] sm:$0x1] %v634_v6 }
  0x74   :  { %v685_v48 = vshll.u32 %v2995_v12, 16  ;;  %v1411_v27 = vrot.slane %v1410_v15, 4  ;;  %v299_v7 = vld [vmem:[#allocation2 + $0x68] sm:$0xf]  ;;  %v479_v54 = vsel %vm4152_vm14, 0, %v478_v14  ;;  %v684_v49 = vrot.slane %v682_v32, 7  ;;  %1442 = vrot.lane.b32.xlu1 %v1420_v33, %s3536_s18  ;;  %v153_v9 = vpop.permute.xlu1 %152 }
  0x75   :  { %v203_v13 = vsel %vm4001_vm9, 0, %v202_v18  ;;  %v300_v26 = vsel %vm4110_vm13, %v259_v47, %v299_v7  ;;  %480 = vst [vmem:[#allocation2 + $0x58] sm:$0x8] %v479_v54  ;;  %v89_v0 = vor.u32 %v87_v53, %v86_v28  ;;  %v213_v5 = vld [vmem:[%s5131_s0 + $0x14] sm:$0xf]  ;;  %v1429_v12 = vrot.slane %v1428_v61, 4 }
  0x76   :  { %204 = vst [vmem:[#allocation2 + $0x7c] sm:$0x8] %v203_v13  ;;  %v636_v52 = vld [vmem:[#allocation2 + $0x70] sm:$0x1]  ;;  %v2996_v56 = vld [vmem:[%s5131_s0 + $0x18] sm:$0xf]  ;;  %v687_v16 = vor.u32 %v685_v48, %v684_v49  ;;  %1440 = vrot.lane.b32.xlu0 %v1411_v27, %s3536_s18 }
  0x77   :  { %301 = vst [vmem:[#allocation2 + $0x68] sm:$0xf] %v300_v26  ;;  %v127_v59 = vld [vmem:[#allocation2 + $0x64] sm:$0xf]  ;;  %v261_v63 = vshrl.u32 %v213_v5, 16  ;;  %v264_v3 = vshll.u32 %v213_v5, 16 }
  0x78   :  { %v3069_v4 = vld [vmem:[%s5131_s0 + $0x38] sm:$0xf]  ;;  %v322_v8 = vld [vmem:[#allocation2 + $0x54] sm:$0x1]  ;;  %v128_v11 = vsel %vm4013_vm10, %v89_v0, %v127_v59  ;;  %v637_v41 = vsel %vm3922_vm5, 0, %v636_v52  ;;  %v689_v1 = vshrl.u32 %v2996_v56, 16  ;;  %v746_v53 = vpop.permute.xlu1 %745 }
  0x79   :  { %v3070_v22 = vld [vmem:[%s5131_s0 + $0x3c] sm:$0xf]  ;;  %v323_v24 = vsel %vm3962_vm7, 0, %v322_v8  ;;  %129 = vst [vmem:[#allocation2 + $0x64] sm:$0xf] %v128_v11  ;;  %v263_v19 = vrot.slane %v261_v63, 4 }
  0x7a   :  { %v266_v42 = vrot.slane %v264_v3, 5  ;;  %638 = vst [vmem:[#allocation2 + $0x70] sm:$0x1] %v637_v41  ;;  %v692_v45 = vshll.u32 %v2996_v56, 16  ;;  %173 = vst.msk [vmem:[#allocation2 + $0x14] sm:$0xf] %vm136_vm15, %v153_v9  ;;  %1616 = vrot.lane.b32.xlu1 %v3070_v22, %s3536_s18  ;;  %1614 = vrot.lane.b32.xlu0 %v3069_v4, %s3536_s18 }
  0x7b   :  { %324 = vst [vmem:[#allocation2 + $0x54] sm:$0x1] %v323_v24  ;;  %v481_v29 = vld [vmem:[#allocation2 + $0x6c] sm:$0x8]  ;;  %v691_v37 = vrot.slane %v689_v1, 7  ;;  %v399_v28 = vpop.permute.xlu0 %398 }
  0x7c   :  { %v3461_v51 = vld [vmem:[%s5132_s1 + $0x204] ss:$8 sps:$4 sm:$0xff]   ;;  %v721_v46 = vld [vmem:[#allocation2 + $0x5c] sm:$0xf]  ;;  %v482_v15 = vsel %vm4152_vm14, 0, %v481_v29  ;;  %v267_v34 = vor.u32 %v266_v42, %v263_v19 }
  0x7d   :  { %v424_v62 = vld [vmem:[#allocation2 + $0x4] sm:$0xf]  ;;  %v42_v20 = vld [vmem:[#allocation2 + $0x78] sm:$0x1]  ;;  %v722_v30 = vsel %vm4013_vm10, %v687_v16, %v721_v46  ;;  %483 = vst [vmem:[#allocation2 + $0x6c] sm:$0x8] %v482_v15  ;;  %2698 = vmatprep.subr.bf16.mxu0 %v3461_v51  ;;  %v694_v36 = vor.u32 %v692_v45, %v691_v37 }
  0x7e   :  { %v43_v31 = vsel %vm3922_vm5, 0, %v42_v20  ;;  %v53_v38 = vld [vmem:[%s5131_s0 + $0x14] sm:$0xf]  ;;  %v205_v39 = vld [vmem:[#allocation2 + $0x90] sm:$0x8]  ;;  %v268_v44 = vrot.slane %v267_v34, 4  ;;  %v425_v13 = vsel %vm4438_vm1, %v399_v28, %v424_v62  ;;  %1444 = vrot.lane.b32.xlu0 %v1429_v12, %s3536_s18  ;;  %v571_v8 = vpop.permute.xlu1 %570 }
  0x7f   :  { %723 = vst [vmem:[#allocation2 + $0x5c] sm:$0xf] %v722_v30  ;;  %v302_v43 = vld [vmem:[#allocation2 + $0x7c] sm:$0xf]  ;;  %44 = vst [vmem:[#allocation2 + $0x78] sm:$0x1] %v43_v31  ;;  %v401_v1 = vpop.permute.xlu0 %400 }
  0x80   :  { %v91_v6 = vshrl.u32 %v53_v38, 16  ;;  %766 = vst.msk [vmem:[#allocation2 + $0xc] sm:$0xf] %vm136_vm15, %v746_v53  ;;  %v595_v32 = vld [vmem:[#allocation2 + $0x8] sm:$0xf]  ;;  %v94_v33 = vshll.u32 %v53_v38, 16  ;;  %v303_v27 = vsel %vm4110_vm13, %v268_v44, %v302_v43 }
  0x81   :  { %v325_v18 = vld [vmem:[#allocation2 + $0x68] sm:$0x1]  ;;  %v206_v47 = vsel %vm4001_vm9, 0, %v205_v39  ;;  %v214_v14 = vld [vmem:[%s5131_s0 + $0x18] sm:$0xf]  ;;  %v596_v9 = vsel %vm4459_vm2, %v571_v8, %v595_v32 }
  0x82   :  { %v326_v48 = vsel %vm3962_vm7, 0, %v325_v18  ;;  %v93_v7 = vrot.slane %v91_v6, 7  ;;  %207 = vst [vmem:[#allocation2 + $0x90] sm:$0x8] %v206_v47  ;;  %v270_v54 = vshrl.u32 %v214_v14, 16  ;;  %v273_v5 = vshll.u32 %v214_v14, 16  ;;  %v403_v30 = vpop.permute.xlu1 %402 }
  0x83   :  { %v454_v49 = vld [vmem:[%s5131_s0 + $0x18] sm:$0xf]  ;;  %327 = vst [vmem:[#allocation2 + $0x68] sm:$0x1] %v326_v48  ;;  %304 = vst [vmem:[#allocation2 + $0x7c] sm:$0xf] %v303_v27  ;;  %v573_v44 = vpop.permute.xlu0 %572 }
  0x84   :  { %v724_v0 = vld [vmem:[#allocation2 + $0x70] sm:$0xf]  ;;  %462 = vst.msk [vmem:[#allocation2 + $0x80] sm:$0xf] %vm19_vm0, %v454_v49  ;;  %v45_v52 = vld [vmem:[#allocation2 + $0x8c] sm:$0x1]  ;;  %v96_v59 = vor.u32 %v94_v33, %v93_v7 }
  0x85   :  { %426 = vst [vmem:[#allocation2 + $0x4] sm:$0xf] %v425_v13  ;;  %v427_v56 = vld [vmem:[#allocation2 + $0x18] sm:$0xf]  ;;  %v725_v61 = vsel %vm4013_vm10, %v694_v36, %v724_v0  ;;  %v272_v63 = vrot.slane %v270_v54, 4  ;;  %v46_v3 = vsel %vm3922_vm5, 0, %v45_v52 }
  0x86   :  { %v54_v4 = vld [vmem:[%s5131_s0 + $0x18] sm:$0xf]  ;;  %726 = vst [vmem:[#allocation2 + $0x70] sm:$0xf] %v725_v61  ;;  %v275_v11 = vrot.slane %v273_v5, 5  ;;  %v428_v42 = vsel %vm4438_vm1, %v401_v1, %v427_v56  ;;  %v155_v7 = vpop.permute.xlu1 %154 }
  0x87   :  { %47 = vst [vmem:[#allocation2 + $0x8c] sm:$0x1] %v46_v3  ;;  %v98_v16 = vshrl.u32 %v54_v4, 16  ;;  %v101_v41 = vshll.u32 %v54_v4, 16  ;;  %v598_v22 = vld [vmem:[#allocation2 + $0x1c] sm:$0xf]  ;;  %v748_v52 = vpop.permute.xlu0 %747 }
  0x88   :  { %v430_v24 = vld [vmem:[#allocation2 + $0x2c] sm:$0xf]  ;;  %v639_v19 = vld [vmem:[#allocation2 + $0x84] sm:$0x1]  ;;  %597 = vst [vmem:[#allocation2 + $0x8] sm:$0xf] %v596_v9  ;;  %v276_v29 = vor.u32 %v275_v11, %v272_v63  ;;  %v599_v18 = vsel %vm4459_vm2, %v573_v44, %v598_v22 }
  0x89   :  { %v130_v45 = vld [vmem:[#allocation2 + $0x78] sm:$0xf]  ;;  %v100_v37 = vrot.slane %v98_v16, 7  ;;  %v640_v51 = vsel %vm3922_vm5, 0, %v639_v19  ;;  %v2997_v62 = vld [vmem:[%s5131_s0 + $0x1c] sm:$0xf]  ;;  %v431_v43 = vsel %vm4438_vm1, %v403_v30, %v430_v24 }
  0x8a   :  { %429 = vst [vmem:[#allocation2 + $0x18] sm:$0xf] %v428_v42  ;;  %v131_v46 = vsel %vm4013_vm10, %v96_v59, %v130_v45  ;;  %641 = vst [vmem:[#allocation2 + $0x84] sm:$0x1] %v640_v51  ;;  %v696_v15 = vshrl.u32 %v2997_v62, 16  ;;  %v277_v31 = vrot.slane %v276_v29, 4  ;;  %v575_v24 = vpop.permute.xlu1 %574 }
  0x8b   :  { %v455_v34 = vld [vmem:[%s5131_s0 + $0x1c] sm:$0xf]  ;;  %v1052_v20 = vld [vmem:[#allocation2 + $0xa4] sm:$0x8]  ;;  %132 = vst [vmem:[#allocation2 + $0x78] sm:$0xf] %v131_v46  ;;  %v103_v39 = vor.u32 %v101_v41, %v100_v37  ;;  %v405_v37 = vpop.permute.xlu0 %404 }
  0x8c   :  { %v305_v38 = vld [vmem:[#allocation2 + $0x90] sm:$0xf]  ;;  %463 = vst.msk [vmem:[#allocation2 + $0x94] sm:$0xf] %vm19_vm0, %v455_v34  ;;  %v1053_v53 = vsel %vm4001_vm9, 0, %v1052_v20  ;;  %v699_v32 = vshll.u32 %v2997_v62, 16 }
  0x8d   :  { %v1174_v12 = vld [vmem:[#allocation2 + $0xa4] sm:$0x1]  ;;  %v328_v36 = vld [vmem:[#allocation2 + $0x7c] sm:$0x1]  ;;  %v484_v6 = vld [vmem:[#allocation2 + $0x80] sm:$0x8]  ;;  %v306_v47 = vsel %vm4110_vm13, %v277_v31, %v305_v38 }
  0x8e   :  { %1054 = vst [vmem:[#allocation2 + $0xa4] sm:$0x8] %v1053_v53  ;;  %432 = vst [vmem:[#allocation2 + $0x2c] sm:$0xf] %v431_v43  ;;  %v329_v33 = vsel %vm3962_vm7, 0, %v328_v36  ;;  %v485_v14 = vsel %vm4152_vm14, 0, %v484_v6  ;;  %v750_v6 = vpop.permute.xlu1 %749 }
  0x8f   :  { %600 = vst [vmem:[#allocation2 + $0x1c] sm:$0xf] %v599_v18  ;;  %330 = vst [vmem:[#allocation2 + $0x7c] sm:$0x1] %v329_v33  ;;  %v133_v28 = vld [vmem:[#allocation2 + $0x8c] sm:$0xf] }
  0x90   :  { %307 = vst [vmem:[#allocation2 + $0x90] sm:$0xf] %v306_v47  ;;  %486 = vst [vmem:[#allocation2 + $0x80] sm:$0x8] %v485_v14  ;;  %v698_v48 = vrot.slane %v696_v15, 7  ;;  %v1175_v27 = vsel %vm3962_vm7, 0, %v1174_v12  ;;  %v134_v49 = vsel %vm4013_vm10, %v103_v39, %v133_v28  ;;  %v157_v28 = vpop.permute.xlu0 %156 }
  0x91   :  { %v601_v54 = vld [vmem:[#allocation2 + $0x30] sm:$0xf]  ;;  %1176 = vst [vmem:[#allocation2 + $0xa4] sm:$0x1] %v1175_v27  ;;  %v1055_v13 = vld [vmem:[#allocation2 + $0xb8] sm:$0x8] }
  0x92   :  { %v3026_v0 = vld [vmem:[%s5131_s0 + $0x20] sm:$0xf]  ;;  %v901_v5 = vld [vmem:[#allocation2 + $0xb4] sm:$0x1]  ;;  %174 = vst.msk [vmem:[#allocation2 + $0x28] sm:$0xf] %vm136_vm15, %v155_v7  ;;  %v701_v61 = vor.u32 %v699_v32, %v698_v48  ;;  %v602_v51 = vsel %vm4459_vm2, %v575_v24, %v601_v54 }
  0x93   :  { %v433_v56 = vld [vmem:[#allocation2 + $0x40] sm:$0xf]  ;;  %135 = vst [vmem:[#allocation2 + $0x8c] sm:$0xf] %v134_v49  ;;  %v1056_v59 = vsel %vm4001_vm9, 0, %v1055_v13  ;;  %v1084_v63 = vshrl.u32 %v3026_v0, 16 }
  0x94   :  { %v1087_v3 = vshll.u32 %v3026_v0, 16  ;;  %v3012_v4 = vld [vmem:[%s5131_s0 + $0x20] sm:$0xf]  ;;  %767 = vst.msk [vmem:[#allocation2 + $0x20] sm:$0xf] %vm136_vm15, %v748_v52  ;;  %v902_v16 = vsel %vm3922_vm5, 0, %v901_v5  ;;  %v434_v30 = vsel %vm4438_vm1, %v405_v37, %v433_v56 }
  0x95   :  { %v3446_v8 = vld [vmem:[#allocation2] ss:$20 sps:$4 sm:$0xff]   ;;  %v3448_v11 = vld [vmem:[#allocation2 + $0x4] ss:$20 sps:$4 sm:$0xff]   ;;  %1057 = vst [vmem:[#allocation2 + $0xb8] sm:$0x8] %v1056_v59 }
  0x96   :  { %v727_v41 = vld [vmem:[#allocation2 + $0x84] sm:$0xf]  ;;  %v487_v1 = vld [vmem:[#allocation2 + $0x94] sm:$0x8]  ;;  %v1086_v9 = vrot.slane %v1084_v63, 4  ;;  %v1089_v22 = vrot.slane %v1087_v3, 5  ;;  %2504 = vmatprep.mubr.bf16.mxu1 %v3448_v11 }
  0x97   :  { %903 = vst [vmem:[#allocation2 + $0xb4] sm:$0x1] %v902_v16  ;;  %v728_v19 = vsel %vm4013_vm10, %v701_v61, %v727_v41  ;;  %v488_v42 = vsel %vm4152_vm14, 0, %v487_v1  ;;  %v931_v45 = vshrl.u32 %v3012_v4, 16  ;;  %v1058_v29 = vld [vmem:[#allocation2 + $0xcc] sm:$0x8]  ;;  %2505 = vmatmul.mubr.bf16.vlgmr.msra.gmra.mrb[0].mxu1 %v3446_v8  ;;  %v407_v8 = vpop.permute.xlu1 %406 }
  0x98   :  { %729 = vst [vmem:[#allocation2 + $0x84] sm:$0xf] %v728_v19  ;;  %489 = vst [vmem:[#allocation2 + $0x94] sm:$0x8] %v488_v42  ;;  %v1090_v62 = vor.u32 %v1089_v22, %v1086_v9  ;;  %v934_v46 = vshll.u32 %v3012_v4, 16  ;;  %v1059_v15 = vsel %vm4001_vm9, 0, %v1058_v29  ;;  %v577_v22 = vpop.permute.xlu0 %576 }
  0x99   :  { %v3027_v34 = vld [vmem:[%s5131_s0 + $0x24] sm:$0xf]  ;;  %v1061_v20 = vld [vmem:[#allocation2 + $0xe0] sm:$0x8]  ;;  %603 = vst [vmem:[#allocation2 + $0x30] sm:$0xf] %v602_v51 }
  0x9a   :  { %v3510_v31 = vld [vmem:[%s5132_s1 + $0x100] ss:$8 sps:$4 sm:$0xff]   ;;  %v331_v38 = vld [vmem:[#allocation2 + $0x90] sm:$0x1]  ;;  %1060 = vst [vmem:[#allocation2 + $0xcc] sm:$0x8] %v1059_v15 }
  0x9b   :  { %3246 = vmatpush1.bf16.msra.mxu1 %v3510_v31  ;;  %435 = vst [vmem:[#allocation2 + $0x40] sm:$0xf] %v434_v30  ;;  %v3459_v39 = vld [vmem:[%s5132_s1 + $0x200] ss:$8 sps:$4 sm:$0xff]   ;;  %v3511_v53 = vld [vmem:[%s5132_s1 + $0x114] ss:$8 sps:$4 sm:$0xff]  }
  0x9c   :  { %3231 = vmatprep.subr.bf16.mxu1 %v3511_v53  ;;  %v332_v12 = vsel %vm3962_vm7, 0, %v331_v38  ;;  %v1091_v44 = vrot.slane %v1090_v62, 4  ;;  %v933_v43 = vrot.slane %v931_v45, 7  ;;  %v1093_v36 = vshrl.u32 %v3027_v34, 16  ;;  %v436_v32 = vld [vmem:[#allocation2 + $0x54] sm:$0xf] }
  0x9d   :  { %333 = vst [vmem:[#allocation2 + $0x90] sm:$0x1] %v332_v12  ;;  %v3467_v18 = vld [vmem:[%s5132_s1 + $0x214] ss:$8 sps:$4 sm:$0xff]   ;;  %v1096_v33 = vshll.u32 %v3027_v34, 16  ;;  %v1062_v47 = vsel %vm4001_vm9, 0, %v1061_v20  ;;  %v437_v24 = vsel %vm4438_vm1, %v407_v8, %v436_v32  ;;  %v752_v32 = vpop.permute.xlu0 %751 }
  0x9e   :  { %v3028_v14 = vld [vmem:[%s5131_s0 + $0x28] sm:$0xf]  ;;  %v3453_v27 = vld [vmem:[#allocation2 + $0xc] ss:$20 sps:$4 sm:$0xff]   ;;  %768 = vst.msk [vmem:[#allocation2 + $0x34] sm:$0xf] %vm136_vm15, %v750_v6  ;;  %v936_v7 = vor.u32 %v934_v46, %v933_v43 }
  0x9f   :  { %v3451_v48 = vld [vmem:[#allocation2 + $0x8] ss:$20 sps:$4 sm:$0xff]   ;;  %v1095_v54 = vrot.slane %v1093_v36, 4  ;;  %1063 = vst [vmem:[#allocation2 + $0xe0] sm:$0x8] %v1062_v47  ;;  %v1098_v5 = vrot.slane %v1096_v33, 5  ;;  %2617 = vmatprep.mubr.bf16.mxu0 %v3453_v27 }
  0xa0   :  { %175 = vst.msk [vmem:[#allocation2 + $0x3c] sm:$0xf] %vm136_vm15, %v157_v28  ;;  %v3512_v49 = vld [vmem:[%s5132_s1 + $0x110] ss:$8 sps:$4 sm:$0xff]   ;;  %v987_v0 = vld [vmem:[#allocation2 + $0xb4] sm:$0xf]  ;;  %2618 = vmatmul.mubr.bf16.vlgmr.msra.gmra.mrb[0].mxu0 %v3451_v48 }
  0xa1   :  { %3247 = vmatpush1.bf16.msra.mxu1 %v3512_v49  ;;  %v1153_v13 = vld [vmem:[#allocation2 + $0xb8] sm:$0xf]  ;;  %v1102_v52 = vshrl.u32 %v3028_v14, 16  ;;  %v604_v56 = vld [vmem:[#allocation2 + $0x44] sm:$0xf]  ;;  %v988_v63 = vsel %vm4013_vm10, %v936_v7, %v987_v0  ;;  %v1105_v3 = vshll.u32 %v3028_v14, 16  ;;  %v1099_v41 = vor.u32 %v1098_v5, %v1095_v54  ;;  %2699 = vmatpush1.bf16.msra.mxu0 %v3459_v39  ;;  %v159_v39 = vpop.permute.xlu1 %158 }
  0xa2   :  { %v3513_v61 = vld [vmem:[%s5132_s1 + $0x124] ss:$8 sps:$4 sm:$0xff]   ;;  %v1154_v59 = vsel %vm4110_vm13, %v1091_v44, %v1153_v13  ;;  %v642_v4 = vld [vmem:[#allocation2 + $0x98] sm:$0x1]  ;;  %989 = vst [vmem:[#allocation2 + $0xb4] sm:$0xf] %v988_v63  ;;  %v605_v29 = vsel %vm4459_vm2, %v577_v22, %v604_v56  ;;  %2700 = vmatprep.subr.bf16.mxu0 %v3467_v18 }
  0xa3   :  { %3232 = vmatprep.subr.bf16.mxu1 %v3513_v61  ;;  %v3465_v11 = vld [vmem:[%s5132_s1 + $0x210] ss:$8 sps:$4 sm:$0xff]   ;;  %v3472_v16 = vld [vmem:[%s5132_s1 + $0x224] ss:$8 sps:$4 sm:$0xff]   ;;  %1155 = vst [vmem:[#allocation2 + $0xb8] sm:$0xf] %v1154_v59 }
  0xa4   :  { %v1104_v1 = vrot.slane %v1102_v52, 4  ;;  %v643_v9 = vsel %vm3922_vm5, 0, %v642_v4  ;;  %v1156_v19 = vld [vmem:[#allocation2 + $0xcc] sm:$0xf]  ;;  %v1107_v42 = vrot.slane %v1105_v3, 5  ;;  %v1100_v51 = vrot.slane %v1099_v41, 4 }
  0xa5   :  { %644 = vst [vmem:[#allocation2 + $0x98] sm:$0x1] %v643_v9  ;;  %v904_v45 = vld [vmem:[#allocation2 + $0xc8] sm:$0x1]  ;;  %438 = vst [vmem:[#allocation2 + $0x54] sm:$0xf] %v437_v24  ;;  %2701 = vmatpush1.bf16.msra.mxu0 %v3465_v11  ;;  %v579_v61 = vpop.permute.xlu1 %578  ;;  %v409_v11 = vpop.permute.xlu0 %408 }
  0xa6   :  { %v3514_v37 = vld [vmem:[%s5132_s1 + $0x120] ss:$8 sps:$4 sm:$0xff]   ;;  %730 = vst.msk [vmem:[#allocation2 + $0x98] sm:$0xf] %vm136_vm15, %v3537_v60  ;;  %v905_v62 = vsel %vm3922_vm5, 0, %v904_v45  ;;  %v1108_v30 = vor.u32 %v1107_v42, %v1104_v1  ;;  %v1157_v12 = vsel %vm4110_vm13, %v1100_v51, %v1156_v19  ;;  %2702 = vmatprep.subr.bf16.mxu0 %v3472_v16 }
  0xa7   :  { %3248 = vmatpush1.bf16.msra.mxu1 %v3514_v37  ;;  %v3013_v46 = vld [vmem:[%s5131_s0 + $0x24] sm:$0xf]  ;;  %v907_v15 = vld [vmem:[#allocation2 + $0xdc] sm:$0x1]  ;;  %606 = vst [vmem:[#allocation2 + $0x44] sm:$0xf] %v605_v29 }
  0xa8   :  { %v3515_v34 = vld [vmem:[%s5132_s1 + $0x134] ss:$8 sps:$4 sm:$0xff]   ;;  %v3470_v20 = vld [vmem:[%s5132_s1 + $0x220] ss:$8 sps:$4 sm:$0xff]   ;;  %906 = vst [vmem:[#allocation2 + $0xc8] sm:$0x1] %v905_v62 }
  0xa9   :  { %3233 = vmatprep.subr.bf16.mxu1 %v3515_v34  ;;  %v938_v31 = vshrl.u32 %v3013_v46, 16  ;;  %v908_v38 = vsel %vm3922_vm5, 0, %v907_v15  ;;  %v607_v53 = vld [vmem:[#allocation2 + $0x58] sm:$0xf]  ;;  %v1159_v44 = vld [vmem:[#allocation2 + $0xe0] sm:$0xf]  ;;  %2703 = vmatpush1.bf16.msra.mxu0 %v3470_v20 }
  0xaa   :  { %v3480_v43 = vld [vmem:[%s5132_s1 + $0x234] ss:$8 sps:$4 sm:$0xff]   ;;  %v941_v36 = vshll.u32 %v3013_v46, 16  ;;  %909 = vst [vmem:[#allocation2 + $0xdc] sm:$0x1] %v908_v38  ;;  %v1109_v14 = vrot.slane %v1108_v30, 4  ;;  %v608_v16 = vsel %vm4459_vm2, %v579_v61, %v607_v53  ;;  %v754_v38 = vpop.permute.xlu1 %753 }
  0xab   :  { %v3014_v6 = vld [vmem:[%s5131_s0 + $0x28] sm:$0xf]  ;;  %176 = vst.msk [vmem:[#allocation2 + $0x50] sm:$0xf] %vm136_vm15, %v159_v39  ;;  %v3454_v18 = vld [vmem:[#allocation2 + $0x2c] ss:$20 sps:$4 sm:$0xff]   ;;  %2704 = vmatprep.subr.bf16.mxu0 %v3480_v43 }
  0xac   :  { %v439_v33 = vld [vmem:[#allocation2 + $0x68] sm:$0xf]  ;;  %1158 = vst [vmem:[#allocation2 + $0xcc] sm:$0xf] %v1157_v12  ;;  %769 = vst.msk [vmem:[#allocation2 + $0x48] sm:$0xf] %vm136_vm15, %v752_v32  ;;  %2514 = vmatprep.mubr.bf16.mxu1 %v3454_v18  ;;  %v1160_v0 = vsel %vm4110_vm13, %v1109_v14, %v1159_v44 }
  0xad   :  { %v3456_v47 = vld [vmem:[#allocation2 + $0x28] ss:$20 sps:$4 sm:$0xff]   ;;  %v3516_v28 = vld [vmem:[%s5132_s1 + $0x130] ss:$8 sps:$4 sm:$0xff]   ;;  %v940_v48 = vrot.slane %v938_v31, 7  ;;  %v945_v27 = vshrl.u32 %v3014_v6, 16  ;;  %v440_v24 = vsel %vm4438_vm1, %v409_v11, %v439_v33 }
  0xae   :  { %3249 = vmatpush1.bf16.msra.mxu1 %v3516_v28  ;;  %v948_v7 = vshll.u32 %v3014_v6, 16  ;;  %v1064_v54 = vld [vmem:[#allocation2 + $0xf4] sm:$0x8]  ;;  %v3517_v49 = vld [vmem:[%s5132_s1 + $0x144] ss:$8 sps:$4 sm:$0xff]  }
  0xaf   :  { %3234 = vmatprep.subr.bf16.mxu1 %v3517_v49  ;;  %v1177_v13 = vld [vmem:[#allocation2 + $0xb8] sm:$0x1]  ;;  %v1065_v52 = vsel %vm4001_vm9, 0, %v1064_v54  ;;  %v3029_v56 = vld [vmem:[%s5131_s0 + $0x2c] sm:$0xf]  ;;  %2515 = vmatmul.mubr.bf16.gmra.mrb[4].mxu1 %v3456_v47  ;;  %v943_v63 = vor.u32 %v941_v36, %v940_v48  ;;  %v947_v3 = vrot.slane %v945_v27, 7  ;;  %v161_v36 = vpop.permute.xlu0 %160 }
  0xb0   :  { %v3478_v5 = vld [vmem:[%s5132_s1 + $0x230] ss:$8 sps:$4 sm:$0xff]   ;;  %v1178_v59 = vsel %vm3962_vm7, 0, %v1177_v13  ;;  %1161 = vst [vmem:[#allocation2 + $0xe0] sm:$0xf] %v1160_v0  ;;  %v1111_v4 = vshrl.u32 %v3029_v56, 16 }
  0xb1   :  { %1066 = vst [vmem:[#allocation2 + $0xf4] sm:$0x8] %v1065_v52  ;;  %v898_v8 = vld [vmem:[#allocation2 + $0xa0] sm:$0x1]  ;;  %1179 = vst [vmem:[#allocation2 + $0xb8] sm:$0x1] %v1178_v59  ;;  %v950_v45 = vor.u32 %v948_v7, %v947_v3  ;;  %2705 = vmatpush1.bf16.msra.mxu0 %v3478_v5  ;;  %v411_v59 = vpop.permute.xlu1 %410 }
  0xb2   :  { %v1114_v41 = vshll.u32 %v3029_v56, 16  ;;  %v899_v1 = vsel %vm3922_vm5, 0, %v898_v8  ;;  %v1067_v9 = vld [vmem:[#allocation2 + $0x108] sm:$0x8]  ;;  %v3030_v22 = vld [vmem:[%s5131_s0 + $0x30] sm:$0xf] }
  0xb3   :  { %609 = vst [vmem:[#allocation2 + $0x58] sm:$0xf] %v608_v16  ;;  %v3518_v19 = vld [vmem:[%s5132_s1 + $0x140] ss:$8 sps:$4 sm:$0xff]   ;;  %v1113_v29 = vrot.slane %v1111_v4, 4  ;;  %v1068_v37 = vsel %vm4001_vm9, 0, %v1067_v9  ;;  %v581_v11 = vpop.permute.xlu0 %580 }
  0xb4   :  { %3250 = vmatpush1.bf16.msra.mxu1 %v3518_v19  ;;  %v990_v42 = vld [vmem:[#allocation2 + $0xc8] sm:$0xf]  ;;  %900 = vst [vmem:[#allocation2 + $0xa0] sm:$0x1] %v899_v1  ;;  %v774_v51 = vld [vmem:[#allocation2 + $0x10] sm:$0x8] }
  0xb5   :  { %441 = vst [vmem:[#allocation2 + $0x68] sm:$0xf] %v440_v24  ;;  %v1762_v62 = vld [vmem:[#allocation2 + $0x30] sm:$0xff]  ;;  %v991_v15 = vsel %vm4013_vm10, %v943_v63, %v990_v42  ;;  %v993_v34 = vld [vmem:[#allocation2 + $0xdc] sm:$0xf]  ;;  %v1116_v20 = vrot.slane %v1114_v41, 5 }
  0xb6   :  { %v3519_v46 = vld [vmem:[%s5132_s1 + $0x154] ss:$8 sps:$4 sm:$0xff]   ;;  %1008 = vst.msk [vmem:[#allocation2 + $0xa0] sm:$0xf] %vm136_vm15, %v3537_v60  ;;  %1069 = vst [vmem:[#allocation2 + $0x108] sm:$0x8] %v1068_v37  ;;  %v994_v12 = vsel %vm4013_vm10, %v950_v45, %v993_v34 }
  0xb7   :  { %3235 = vmatprep.subr.bf16.mxu1 %v3519_v46  ;;  %v1120_v30 = vshrl.u32 %v3030_v22, 16  ;;  %v1123_v31 = vshll.u32 %v3030_v22, 16  ;;  %v442_v39 = vld [vmem:[#allocation2 + $0x7c] sm:$0xf]  ;;  %v1180_v53 = vld [vmem:[#allocation2 + $0xcc] sm:$0x1]  ;;  %v1117_v47 = vor.u32 %v1116_v20, %v1113_v29 }
  0xb8   :  { %992 = vst [vmem:[#allocation2 + $0xc8] sm:$0xf] %v991_v15  ;;  %v775_v44 = vsel %vm4001_vm9, 0, %v774_v51  ;;  %v777_v43 = vld [vmem:[#allocation2 + $0x24] sm:$0x8]  ;;  %v1181_v33 = vsel %vm3962_vm7, 0, %v1180_v53  ;;  %v443_v16 = vsel %vm4438_vm1, %v411_v59, %v442_v39 }
  0xb9   :  { %v1765_v6 = vld [vmem:[#allocation2 + $0x44] sm:$0xff]  ;;  %770 = vst.msk [vmem:[#allocation2 + $0x5c] sm:$0xf] %vm136_vm15, %v754_v38  ;;  %v610_v18 = vld [vmem:[#allocation2 + $0x6c] sm:$0xf]  ;;  %v1122_v14 = vrot.slane %v1120_v30, 4 }
  0xba   :  { %v3457_v32 = vld [vmem:[#allocation2 + $0x34] ss:$20 sps:$4 sm:$0xff]   ;;  %995 = vst [vmem:[#allocation2 + $0xdc] sm:$0xf] %v994_v12  ;;  %v1125_v28 = vrot.slane %v1123_v31, 5  ;;  %v3085_v48 = vcombine.low %v1762_v62, %v1765_v6  ;;  %v778_v7 = vsel %vm4001_vm9, 0, %v777_v43  ;;  %v611_v19 = vsel %vm4459_vm2, %v581_v11, %v610_v18  ;;  %v163_v31 = vpop.permute.xlu1 %162 }
  0xbb   :  { %776 = vst [vmem:[#allocation2 + $0x10] sm:$0x8] %v775_v44  ;;  %177 = vst.msk [vmem:[#allocation2 + $0x64] sm:$0xf] %vm136_vm15, %v161_v36  ;;  %v3520_v27 = vld [vmem:[%s5132_s1 + $0x150] ss:$8 sps:$4 sm:$0xff]   ;;  %2627 = vmatprep.mubr.bf16.mxu0 %v3457_v32  ;;  %v756_v36 = vpop.permute.xlu0 %755 }
  0xbc   :  { %3251 = vmatpush1.bf16.msra.mxu1 %v3520_v27  ;;  %1182 = vst [vmem:[#allocation2 + $0xcc] sm:$0x1] %v1181_v33  ;;  %v3005_v54 = vld [vmem:[%s5131_s0 + $0x4] sm:$0xf]  ;;  %v3006_v49 = vld [vmem:[%s5131_s0 + $0x8] sm:$0xf]  ;;  %v1126_v56 = vor.u32 %v1125_v28, %v1122_v14  ;;  %2628 = vmatmul.mubr.bf16.gmra.mrb[4].mxu0 %v3085_v48 }
  0xbd   :  { %v3521_v13 = vld [vmem:[%s5132_s1 + $0x164] ss:$8 sps:$4 sm:$0xff]   ;;  %v1183_v0 = vld [vmem:[#allocation2 + $0xe0] sm:$0x1]  ;;  %v1118_v5 = vrot.slane %v1117_v47, 4  ;;  %v806_v61 = vshrl.u32 %v3005_v54, 16 }
  0xbe   :  { %3236 = vmatprep.subr.bf16.mxu1 %v3521_v13  ;;  %v1162_v52 = vld [vmem:[#allocation2 + $0xf4] sm:$0xf]  ;;  %779 = vst [vmem:[#allocation2 + $0x24] sm:$0x8] %v778_v7  ;;  %v1184_v63 = vsel %vm3962_vm7, 0, %v1183_v0  ;;  %v809_v3 = vshll.u32 %v3005_v54, 16 }
  0xbf   :  { %v815_v4 = vshrl.u32 %v3006_v49, 16  ;;  %v818_v8 = vshll.u32 %v3006_v49, 16  ;;  %1185 = vst [vmem:[#allocation2 + $0xe0] sm:$0x1] %v1184_v63  ;;  %v1163_v41 = vsel %vm4110_vm13, %v1118_v5, %v1162_v52  ;;  %v1127_v1 = vrot.slane %v1126_v56, 4  ;;  %v583_v5 = vpop.permute.xlu1 %582 }
  0xc0   :  { %v808_v9 = vrot.slane %v806_v61, 4  ;;  %v910_v22 = vld [vmem:[#allocation2 + $0xf0] sm:$0x1]  ;;  %v3015_v24 = vld [vmem:[%s5131_s0 + $0x2c] sm:$0xf]  ;;  %v811_v29 = vrot.slane %v809_v3, 5  ;;  %v413_v3 = vpop.permute.xlu0 %412 }
  0xc1   :  { %444 = vst [vmem:[#allocation2 + $0x7c] sm:$0xf] %v443_v16  ;;  %v3522_v42 = vld [vmem:[%s5132_s1 + $0x160] ss:$8 sps:$4 sm:$0xff]   ;;  %1164 = vst [vmem:[#allocation2 + $0xf4] sm:$0xf] %v1163_v41 }
  0xc2   :  { %3252 = vmatpush1.bf16.msra.mxu1 %v3522_v42  ;;  %v1165_v45 = vld [vmem:[#allocation2 + $0x108] sm:$0xf]  ;;  %v817_v37 = vrot.slane %v815_v4, 4  ;;  %v820_v51 = vrot.slane %v818_v8, 5  ;;  %612 = vst [vmem:[#allocation2 + $0x6c] sm:$0xf] %v611_v19  ;;  %v812_v39 = vor.u32 %v811_v29, %v808_v9 }
  0xc3   :  { %v3523_v62 = vld [vmem:[%s5132_s1 + $0x174] ss:$8 sps:$4 sm:$0xff]   ;;  %v1166_v46 = vsel %vm4110_vm13, %v1127_v1, %v1165_v45  ;;  %v911_v15 = vsel %vm3922_vm5, 0, %v910_v22  ;;  %v952_v34 = vshrl.u32 %v3015_v24, 16  ;;  %v955_v20 = vshll.u32 %v3015_v24, 16 }
  0xc4   :  { %3237 = vmatprep.subr.bf16.mxu1 %v3523_v62  ;;  %v913_v30 = vld [vmem:[#allocation2 + $0x104] sm:$0x1]  ;;  %v613_v38 = vld [vmem:[#allocation2 + $0x80] sm:$0xf]  ;;  %1167 = vst [vmem:[#allocation2 + $0x108] sm:$0xf] %v1166_v46  ;;  %v821_v53 = vor.u32 %v820_v51, %v817_v37 }
  0xc5   :  { %v875_v12 = vld [vmem:[#allocation2 + $0x10] sm:$0xf]  ;;  %912 = vst [vmem:[#allocation2 + $0xf0] sm:$0x1] %v911_v15  ;;  %v914_v44 = vsel %vm3922_vm5, 0, %v913_v30  ;;  %v954_v18 = vrot.slane %v952_v34, 7  ;;  %v614_v4 = vsel %vm4459_vm2, %v583_v5, %v613_v38  ;;  %v758_v34 = vpop.permute.xlu1 %757 }
  0xc6   :  { %v3016_v43 = vld [vmem:[%s5131_s0 + $0x30] sm:$0xf]  ;;  %178 = vst.msk [vmem:[#allocation2 + $0x78] sm:$0xf] %vm136_vm15, %v163_v31  ;;  %v3462_v6 = vld [vmem:[#allocation2 + $0x54] ss:$20 sps:$4 sm:$0xff]  }
  0xc7   :  { %v3464_v32 = vld [vmem:[#allocation2 + $0x50] ss:$20 sps:$4 sm:$0xff]   ;;  %915 = vst [vmem:[#allocation2 + $0x104] sm:$0x1] %v914_v44  ;;  %771 = vst.msk [vmem:[#allocation2 + $0x70] sm:$0xf] %vm136_vm15, %v756_v36  ;;  %2524 = vmatprep.mubr.bf16.mxu1 %v3462_v6  ;;  %v957_v7 = vor.u32 %v955_v20, %v954_v18 }
  0xc8   :  { %v445_v33 = vld [vmem:[#allocation2 + $0x90] sm:$0xf]  ;;  %v813_v14 = vrot.slane %v812_v39, 4  ;;  %v822_v28 = vrot.slane %v821_v53, 4  ;;  %v878_v48 = vld [vmem:[#allocation2 + $0x24] sm:$0xf]  ;;  %2525 = vmatmul.mubr.bf16.gmra.mrb[8].mxu1 %v3464_v32 }
  0xc9   :  { %v3524_v47 = vld [vmem:[%s5132_s1 + $0x170] ss:$8 sps:$4 sm:$0xff]   ;;  %v3525_v27 = vld [vmem:[%s5132_s1 + $0x184] ss:$8 sps:$4 sm:$0xff]   ;;  %v959_v54 = vshrl.u32 %v3016_v43, 16  ;;  %v962_v49 = vshll.u32 %v3016_v43, 16  ;;  %v446_v1 = vsel %vm4438_vm1, %v413_v3, %v445_v33 }
  0xca   :  { %3253 = vmatpush1.bf16.msra.mxu1 %v3524_v47  ;;  %v1070_v13 = vld [vmem:[#allocation2 + $0x11c] sm:$0x8]  ;;  %v3031_v0 = vld [vmem:[%s5131_s0 + $0x34] sm:$0xf]  ;;  %v876_v52 = vsel %vm4110_vm13, %v813_v14, %v875_v12  ;;  %v879_v56 = vsel %vm4110_vm13, %v822_v28, %v878_v48  ;;  %v1073_v63 = vld [vmem:[#allocation2 + $0x130] sm:$0x8]  ;;  %v165_v12 = vpop.permute.xlu0 %164 }
  0xcb   :  { %3238 = vmatprep.subr.bf16.mxu1 %v3525_v27  ;;  %v1071_v61 = vsel %vm4001_vm9, 0, %v1070_v13  ;;  %v1129_v59 = vshrl.u32 %v3031_v0, 16  ;;  %v1186_v8 = vld [vmem:[#allocation2 + $0xf4] sm:$0x1]  ;;  %877 = vst [vmem:[#allocation2 + $0x10] sm:$0xf] %v876_v52  ;;  %v1265_v52 = vpop.permute.xlu1 %1264 }
  0xcc   :  { %880 = vst [vmem:[#allocation2 + $0x24] sm:$0xf] %v879_v56  ;;  %v961_v11 = vrot.slane %v959_v54, 7  ;;  %1072 = vst [vmem:[#allocation2 + $0x11c] sm:$0x8] %v1071_v61  ;;  %v1132_v16 = vshll.u32 %v3031_v0, 16 }
  0xcd   :  { %v1074_v41 = vsel %vm4001_vm9, 0, %v1073_v63  ;;  %615 = vst [vmem:[#allocation2 + $0x80] sm:$0xf] %v614_v4  ;;  %v1187_v9 = vsel %vm3962_vm7, 0, %v1186_v8  ;;  %v3526_v22 = vld [vmem:[%s5132_s1 + $0x180] ss:$8 sps:$4 sm:$0xff]  }
  0xce   :  { %3254 = vmatpush1.bf16.msra.mxu1 %v3526_v22  ;;  %v1131_v24 = vrot.slane %v1129_v59, 4  ;;  %1075 = vst [vmem:[#allocation2 + $0x130] sm:$0x8] %v1074_v41  ;;  %v3032_v19 = vld [vmem:[%s5131_s0 + $0x38] sm:$0xf]  ;;  %v964_v51 = vor.u32 %v962_v49, %v961_v11  ;;  %v1134_v62 = vrot.slane %v1132_v16, 5  ;;  %v585_v59 = vpop.permute.xlu0 %584 }
  0xcf   :  { %v780_v42 = vld [vmem:[#allocation2 + $0x38] sm:$0x8]  ;;  %447 = vst [vmem:[#allocation2 + $0x90] sm:$0xf] %v446_v1  ;;  %1188 = vst [vmem:[#allocation2 + $0xf4] sm:$0x1] %v1187_v9 }
  0xd0   :  { %v1189_v45 = vld [vmem:[#allocation2 + $0x108] sm:$0x1]  ;;  %v996_v29 = vld [vmem:[#allocation2 + $0xf0] sm:$0xf]  ;;  %v3527_v37 = vld [vmem:[%s5132_s1 + $0x194] ss:$8 sps:$4 sm:$0xff]   ;;  %v1135_v6 = vor.u32 %v1134_v62, %v1131_v24 }
  0xd1   :  { %3239 = vmatprep.subr.bf16.mxu1 %v3527_v37  ;;  %v1138_v46 = vshrl.u32 %v3032_v19, 16  ;;  %v1768_v15 = vld [vmem:[#allocation2 + $0x58] sm:$0xff]  ;;  %v1190_v30 = vsel %vm3962_vm7, 0, %v1189_v45  ;;  %v997_v31 = vsel %vm4013_vm10, %v957_v7, %v996_v29  ;;  %v999_v38 = vld [vmem:[#allocation2 + $0x104] sm:$0xf]  ;;  %v1141_v39 = vshll.u32 %v3032_v19, 16 }
  0xd2   :  { %v1289_v20 = vld [vmem:[#allocation2 + $0xb8] sm:$0xf]  ;;  %v781_v53 = vsel %vm4001_vm9, 0, %v780_v42  ;;  %v1771_v44 = vld [vmem:[#allocation2 + $0x6c] sm:$0xff]  ;;  %772 = vst.msk [vmem:[#allocation2 + $0x84] sm:$0xf] %vm136_vm15, %v758_v34  ;;  %v1000_v36 = vsel %vm4013_vm10, %v964_v51, %v999_v38 }
  0xd3   :  { %v3468_v43 = vld [vmem:[#allocation2 + $0x5c] ss:$20 sps:$4 sm:$0xff]   ;;  %1191 = vst [vmem:[#allocation2 + $0x108] sm:$0x1] %v1190_v30  ;;  %998 = vst [vmem:[#allocation2 + $0xf0] sm:$0xf] %v997_v31  ;;  %v3090_v33 = vcombine.low %v1768_v15, %v1771_v44  ;;  %v1290_v3 = vsel %vm4438_vm1, %v1265_v52, %v1289_v20  ;;  %v1263_v30 = vpop.permute.xlu0 %1262 }
  0xd4   :  { %v1140_v32 = vrot.slane %v1138_v46, 4  ;;  %782 = vst [vmem:[#allocation2 + $0x38] sm:$0x8] %v781_v53  ;;  %v783_v18 = vld [vmem:[#allocation2 + $0x4c] sm:$0x8]  ;;  %v1143_v14 = vrot.slane %v1141_v39, 5  ;;  %2637 = vmatprep.mubr.bf16.mxu0 %v3468_v43  ;;  %v1267_v46 = vpop.permute.xlu1 %1266 }
  0xd5   :  { %179 = vst.msk [vmem:[#allocation2 + $0x8c] sm:$0xf] %vm136_vm15, %v165_v12  ;;  %1001 = vst [vmem:[#allocation2 + $0x104] sm:$0xf] %v1000_v36  ;;  %v3528_v47 = vld [vmem:[%s5132_s1 + $0x190] ss:$8 sps:$4 sm:$0xff]   ;;  %2638 = vmatmul.mubr.bf16.gmra.mrb[8].mxu0 %v3090_v33 }
  0xd6   :  { %3255 = vmatpush1.bf16.msra.mxu1 %v3528_v47  ;;  %v784_v28 = vsel %vm4001_vm9, 0, %v783_v18  ;;  %v3007_v48 = vld [vmem:[%s5131_s0 + $0xc] sm:$0xf]  ;;  %v3008_v27 = vld [vmem:[%s5131_s0 + $0x10] sm:$0xf]  ;;  %v1136_v54 = vrot.slane %v1135_v6, 4  ;;  %v1144_v56 = vor.u32 %v1143_v14, %v1140_v32 }
  0xd7   :  { %v616_v7 = vld [vmem:[#allocation2 + $0x94] sm:$0xf]  ;;  %v3529_v49 = vld [vmem:[%s5132_s1 + $0x1a4] ss:$8 sps:$4 sm:$0xff]   ;;  %785 = vst [vmem:[#allocation2 + $0x4c] sm:$0x8] %v784_v28 }
  0xd8   :  { %3240 = vmatprep.subr.bf16.mxu1 %v3529_v49  ;;  %v824_v13 = vshrl.u32 %v3007_v48, 16  ;;  %v827_v0 = vshll.u32 %v3007_v48, 16  ;;  %v833_v5 = vshrl.u32 %v3008_v27, 16  ;;  %v916_v61 = vld [vmem:[#allocation2 + $0x118] sm:$0x1]  ;;  %v617_v41 = vsel %vm4459_vm2, %v585_v59, %v616_v7 }
  0xd9   :  { %v1286_v63 = vld [vmem:[#allocation2 + $0xa4] sm:$0xf]  ;;  %v1168_v4 = vld [vmem:[#allocation2 + $0x11c] sm:$0xf]  ;;  %v1171_v8 = vld [vmem:[#allocation2 + $0x130] sm:$0xf] }
  0xda   :  { %v826_v11 = vrot.slane %v824_v13, 4  ;;  %v829_v16 = vrot.slane %v827_v0, 5  ;;  %1291 = vst [vmem:[#allocation2 + $0xb8] sm:$0xf] %v1290_v3  ;;  %v1292_v1 = vld [vmem:[#allocation2 + $0xcc] sm:$0xf]  ;;  %v1169_v9 = vsel %vm4110_vm13, %v1136_v54, %v1168_v4  ;;  %3256 = vmatpush1.bf16.msra.mxu1 %v4059_v25  ;;  %v1287_v43 = vsel %vm4438_vm1, %v1263_v30, %v1286_v63  ;;  %v1026_v54 = vpop.permute.xlu1 %1025 }
  0xdb   :  { %v1145_v22 = vrot.slane %v1144_v56, 4  ;;  %v835_v24 = vrot.slane %v833_v5, 4  ;;  %v3017_v19 = vld [vmem:[%s5131_s0 + $0x34] sm:$0xf]  ;;  %618 = vst [vmem:[#allocation2 + $0x94] sm:$0xf] %v617_v41  ;;  %v1293_v39 = vsel %vm4438_vm1, %v1267_v46, %v1292_v1  ;;  %v1024_v56 = vpop.permute.xlu0 %1023 }
  0xdc   :  { %1170 = vst [vmem:[#allocation2 + $0x11c] sm:$0xf] %v1169_v9  ;;  %v830_v42 = vor.u32 %v829_v16, %v826_v11  ;;  %v836_v45 = vshll.u32 %v3008_v27, 16  ;;  %v917_v29 = vsel %vm3922_vm5, 0, %v916_v61  ;;  %v966_v37 = vshrl.u32 %v3017_v19, 16  ;;  %v1773_v25 = vld [vmem:[#allocation2 + $0x78] sm:$0xff] }
  0xdd   :  { %v3530_v51 = vld [vmem:[%s5132_s1 + $0x1b4] ss:$8 sps:$4 sm:$0xff]   ;;  %v919_v62 = vld [vmem:[#allocation2 + $0x12c] sm:$0x1]  ;;  %v1172_v15 = vsel %vm4110_vm13, %v1145_v22, %v1171_v8  ;;  %v881_v34 = vld [vmem:[#allocation2 + $0x38] sm:$0xf] }
  0xde   :  { %3241 = vmatprep.subr.bf16.mxu1 %v3530_v51  ;;  %918 = vst [vmem:[#allocation2 + $0x118] sm:$0x1] %v917_v29  ;;  %v969_v20 = vshll.u32 %v3017_v19, 16  ;;  %v1776_v31 = vld [vmem:[#allocation2 + $0x8c] sm:$0xff]  ;;  %1173 = vst [vmem:[#allocation2 + $0x130] sm:$0xf] %v1172_v15 }
  0xdf   :  { %v3473_v38 = vld [vmem:[#allocation2 + $0x7c] ss:$20 sps:$4 sm:$0xff]   ;;  %v831_v53 = vrot.slane %v830_v42, 4  ;;  %v838_v12 = vrot.slane %v836_v45, 5  ;;  %v968_v44 = vrot.slane %v966_v37, 7  ;;  %v3093_v36 = vcombine.low %v1773_v25, %v1776_v31  ;;  %v1269_v25 = vpop.permute.xlu0 %1268 }
  0xe0   :  { %1294 = vst [vmem:[#allocation2 + $0xcc] sm:$0xf] %v1293_v39  ;;  %v884_v6 = vld [vmem:[#allocation2 + $0x4c] sm:$0xf]  ;;  %v920_v32 = vsel %vm3922_vm5, 0, %v919_v62  ;;  %2534 = vmatprep.mubr.bf16.mxu1 %v3473_v38 }
  0xe1   :  { %v3018_v18 = vld [vmem:[%s5131_s0 + $0x38] sm:$0xf]  ;;  %1288 = vst [vmem:[#allocation2 + $0xa4] sm:$0xf] %v1287_v43  ;;  %v839_v47 = vor.u32 %v838_v12, %v835_v24  ;;  %v882_v14 = vsel %vm4110_vm13, %v831_v53, %v881_v34  ;;  %921 = vst [vmem:[#allocation2 + $0x12c] sm:$0x1] %v920_v32  ;;  %2535 = vmatmul.mubr.bf16.gmra.mrb[12].mxu1 %v3093_v36  ;;  %v971_v13 = vor.u32 %v969_v20, %v968_v44 }
  0xe2   :  { %v3531_v33 = vld [vmem:[%s5132_s1 + $0x1b0] ss:$8 sps:$4 sm:$0xff]   ;;  %v973_v28 = vshrl.u32 %v3018_v18, 16  ;;  %v3041_v48 = vld [vmem:[%s5131_s0 + $0x20] sm:$0xf]  ;;  %v976_v0 = vshll.u32 %v3018_v18, 16 }
  0xe3   :  { %3257 = vmatpush1.bf16.msra.mxu1 %v3531_v33  ;;  %v3532_v27 = vld [vmem:[%s5132_s1 + $0x1c4] ss:$8 sps:$4 sm:$0xff]   ;;  %v1298_v49 = vld [vmem:[#allocation2 + $0xf4] sm:$0xf]  ;;  %883 = vst [vmem:[#allocation2 + $0x38] sm:$0xf] %v882_v14  ;;  %v1028_v14 = vpop.permute.xlu0 %1027 }
  0xe4   :  { %3242 = vmatprep.subr.bf16.mxu1 %v3532_v27  ;;  %v3042_v7 = vld [vmem:[%s5131_s0 + $0x24] sm:$0xf]  ;;  %1318 = vst.msk [vmem:[#allocation2 + $0xa8] sm:$0xf] %vm19_vm0, %v3041_v48  ;;  %v786_v5 = vld [vmem:[#allocation2 + $0x60] sm:$0x8] }
  0xe5   :  { %1319 = vst.msk [vmem:[#allocation2 + $0xbc] sm:$0xf] %vm19_vm0, %v3042_v7  ;;  %v789_v52 = vld [vmem:[#allocation2 + $0x74] sm:$0x8]  ;;  %v1295_v61 = vld [vmem:[#allocation2 + $0xe0] sm:$0xf] }
  0xe6   :  { %1045 = vst.msk [vmem:[#allocation2 + $0xc8] sm:$0xf] %vm136_vm15, %v1026_v54  ;;  %v840_v59 = vrot.slane %v839_v47, 4  ;;  %v975_v63 = vrot.slane %v973_v28, 7  ;;  %v787_v3 = vsel %vm4001_vm9, 0, %v786_v5  ;;  %v790_v4 = vsel %vm4001_vm9, 0, %v789_v52 }
  0xe7   :  { %v3009_v8 = vld [vmem:[%s5131_s0 + $0x14] sm:$0xf]  ;;  %1044 = vst.msk [vmem:[#allocation2 + $0xb4] sm:$0xf] %vm136_vm15, %v1024_v56  ;;  %v3475_v11 = vld [vmem:[#allocation2 + $0x84] ss:$20 sps:$4 sm:$0xff]   ;;  %3258 = vmatpush1.bf16.msra.mxu1 %v4141_v21  ;;  %v1271_v21 = vpop.permute.xlu1 %1270  ;;  %v1296_v31 = vsel %vm4438_vm1, %v1269_v25, %v1295_v61 }
  0xe8   :  { %v3477_v16 = vld [vmem:[#allocation2 + $0x80] ss:$20 sps:$4 sm:$0xff]   ;;  %788 = vst [vmem:[#allocation2 + $0x60] sm:$0x8] %v787_v3  ;;  %791 = vst [vmem:[#allocation2 + $0x74] sm:$0x8] %v790_v4  ;;  %v885_v9 = vsel %vm4110_vm13, %v840_v59, %v884_v6  ;;  %v978_v24 = vor.u32 %v976_v0, %v975_v63  ;;  %2647 = vmatprep.mubr.bf16.mxu0 %v3475_v11  ;;  %v1299_v46 = vsel %vm4438_vm1, %v1271_v21, %v1298_v49 }
  0xe9   :  { %v842_v41 = vshrl.u32 %v3009_v8, 16  ;;  %v1192_v1 = vld [vmem:[#allocation2 + $0x11c] sm:$0x1]  ;;  %v1002_v22 = vld [vmem:[#allocation2 + $0x118] sm:$0xf]  ;;  %v845_v62 = vshll.u32 %v3009_v8, 16  ;;  %2648 = vmatmul.mubr.bf16.gmra.mrb[12].mxu0 %v3477_v16  ;;  %v1273_v8 = vpop.permute.xlu0 %1272 }
  0xea   :  { %v3010_v19 = vld [vmem:[%s5131_s0 + $0x18] sm:$0xf]  ;;  %v3533_v42 = vld [vmem:[%s5132_s1 + $0x1d4] ss:$8 sps:$4 sm:$0xff]   ;;  %v1193_v45 = vsel %vm3962_vm7, 0, %v1192_v1  ;;  %v1003_v37 = vsel %vm4013_vm10, %v971_v13, %v1002_v22  ;;  %2730 = vmatprep.mubr.bf16.mxu0 %v3537_v60 }
  0xeb   :  { %3243 = vmatprep.subr.bf16.mxu1 %v3533_v42  ;;  %v1195_v29 = vld [vmem:[#allocation2 + $0x130] sm:$0x1]  ;;  %886 = vst [vmem:[#allocation2 + $0x4c] sm:$0xf] %v885_v9  ;;  %v844_v51 = vrot.slane %v842_v41, 4  ;;  %v851_v34 = vshrl.u32 %v3010_v19, 16  ;;  %v1030_v6 = vpop.permute.xlu1 %1029 }
  0xec   :  { %1194 = vst [vmem:[#allocation2 + $0x11c] sm:$0x1] %v1193_v45  ;;  %v1196_v15 = vsel %vm3962_vm7, 0, %v1195_v29  ;;  %1004 = vst [vmem:[#allocation2 + $0x118] sm:$0xf] %v1003_v37  ;;  %v854_v20 = vshll.u32 %v3010_v19, 16  ;;  %3259 = vmatpush1.bf16.msra.mxu1 %v4182_v10 }
  0xed   :  { %v1480_v30 = vld [vmem:[#allocation2 + $0xac] sm:$0x1]  ;;  %1300 = vst [vmem:[#allocation2 + $0xf4] sm:$0xf] %v1299_v46  ;;  %1197 = vst [vmem:[#allocation2 + $0x130] sm:$0x1] %v1196_v15  ;;  %v1032_v15 = vpop.permute.xlu0 %1031 }
  0xee   :  { %v1005_v38 = vld [vmem:[#allocation2 + $0x12c] sm:$0xf]  ;;  %v847_v39 = vrot.slane %v845_v62, 5  ;;  %v1481_v53 = vsel %vm3922_vm5, 0, %v1480_v30  ;;  %1297 = vst [vmem:[#allocation2 + $0xe0] sm:$0xf] %v1296_v31 }
  0xef   :  { %v3484_v50 = vld [vmem:[#allocation2 + $0x10] ss:$20 sps:$4 sm:$0xff]   ;;  %v1006_v12 = vsel %vm4013_vm10, %v978_v24, %v1005_v38  ;;  %v1326_v44 = vld [vmem:[#allocation2 + $0xa8] sm:$0x8]  ;;  %v1329_v43 = vld [vmem:[#allocation2 + $0xbc] sm:$0x8]  ;;  %v1275_v59 = vpop.permute.xlu1 %1274 }
  0xf0   :  { %1482 = vst [vmem:[#allocation2 + $0xac] sm:$0x1] %v1481_v53  ;;  %v3534_v36 = vld [vmem:[%s5132_s1 + $0x1e4] ss:$8 sps:$4 sm:$0xff]   ;;  %1007 = vst [vmem:[#allocation2 + $0x12c] sm:$0xf] %v1006_v12  ;;  %v848_v18 = vor.u32 %v847_v39, %v844_v51 }
  0xf1   :  { %3244 = vmatprep.subr.bf16.mxu1 %v3534_v36  ;;  %v1327_v32 = vsel %vm4152_vm14, 0, %v1326_v44  ;;  %v1330_v10 = vsel %vm4152_vm14, 0, %v1329_v43  ;;  %v853_v33 = vrot.slane %v851_v34, 4  ;;  %v3057_v47 = vld [vmem:[%s5131_s0 + $0x24] sm:$0xf]  ;;  %v856_v27 = vrot.slane %v854_v20, 5  ;;  %3190 = vmatmul.mubr.msk.bf16.vlgmr.msra.gmra.mrb[0].mxu0 %vm2447_vm3, %v3484_v50 }
  0xf2   :  { %v3481_v28 = vld [vmem:[#allocation2 + $0xa4] ss:$20 sps:$4 sm:$0xff]   ;;  %v3483_v48 = vld [vmem:[#allocation2 + $0xa0] ss:$20 sps:$4 sm:$0xff]   ;;  %1047 = vst.msk [vmem:[#allocation2 + $0xf0] sm:$0xf] %vm136_vm15, %v1030_v6  ;;  %3260 = vmatpush1.bf16.msra.mxu1 %v4225_v58  ;;  %2740 = vmatprep.mubr.bf16.mxu0 %v3537_v60 }
  0xf3   :  { %1328 = vst [vmem:[#allocation2 + $0xa8] sm:$0x8] %v1327_v32  ;;  %1331 = vst [vmem:[#allocation2 + $0xbc] sm:$0x8] %v1330_v10  ;;  %v1301_v7 = vld [vmem:[#allocation2 + $0x108] sm:$0xf]  ;;  %2544 = vmatprep.mubr.bf16.mxu1 %v3481_v28  ;;  %v857_v0 = vor.u32 %v856_v27, %v853_v33  ;;  %v1034_v62 = vpop.permute.xlu1 %1033  ;;  %v1277_v33 = vpop.permute.xlu0 %1276 }
  0xf4   :  { %1046 = vst.msk [vmem:[#allocation2 + $0xdc] sm:$0xf] %vm136_vm15, %v1028_v14  ;;  %v849_v54 = vrot.slane %v848_v18, 4  ;;  %v887_v49 = vld [vmem:[#allocation2 + $0x60] sm:$0xf]  ;;  %v1513_v13 = vshrl.u32 %v3057_v47, 16  ;;  %2545 = vmatmul.mubr.bf16.gmra.mrb[16].mxu1 %v3483_v48  ;;  %v1302_v1 = vsel %vm4438_vm1, %v1273_v8, %v1301_v7 }
  0xf5   :  { %v890_v5 = vld [vmem:[#allocation2 + $0x74] sm:$0xf]  ;;  %v1516_v52 = vshll.u32 %v3057_v47, 16  ;;  %v1304_v61 = vld [vmem:[#allocation2 + $0x11c] sm:$0xf]  ;;  %v858_v11 = vrot.slane %v857_v0, 4 }
  0xf6   :  { %v3535_v56 = vld [vmem:[%s5132_s1 + $0x1f4] ss:$8 sps:$4 sm:$0xff]   ;;  %v888_v63 = vsel %vm4110_vm13, %v849_v54, %v887_v49  ;;  %v1515_v3 = vrot.slane %v1513_v13, 7  ;;  %v1483_v4 = vld [vmem:[#allocation2 + $0xc0] sm:$0x1]  ;;  %v1305_v58 = vsel %vm4438_vm1, %v1275_v59, %v1304_v61 }
  0xf7   :  { %3245 = vmatprep.subr.bf16.mxu1 %v3535_v56  ;;  %889 = vst [vmem:[#allocation2 + $0x60] sm:$0xf] %v888_v63  ;;  %v1484_v16 = vsel %vm3922_vm5, 0, %v1483_v4  ;;  %v3058_v41 = vld [vmem:[%s5131_s0 + $0x28] sm:$0xf]  ;;  %v891_v21 = vsel %vm4110_vm13, %v858_v11, %v890_v5  ;;  %v1431_v6 = vpop.permute.xlu1 %1430 }
  0xf8   :  { %1306 = vst [vmem:[#allocation2 + $0x11c] sm:$0xf] %v1305_v58  ;;  %v1518_v9 = vor.u32 %v1516_v52, %v1515_v3  ;;  %v1568_v22 = vld [vmem:[#allocation2 + $0xac] sm:$0xf]  ;;  %1485 = vst [vmem:[#allocation2 + $0xc0] sm:$0x1] %v1484_v16  ;;  %3261 = vmatpush1.bf16.msra.mxu1 %v4241_v35  ;;  %v1036_v58 = vpop.permute.xlu0 %1035 }
  0xf9   :  { %v1520_v24 = vshrl.u32 %v3058_v41, 16  ;;  %v1523_v19 = vshll.u32 %v3058_v41, 16  ;;  %v3043_v42 = vld [vmem:[%s5131_s0 + $0x28] sm:$0xf]  ;;  %1303 = vst [vmem:[#allocation2 + $0x108] sm:$0xf] %v1302_v1 }
  0xfa   :  { %1320 = vst.msk [vmem:[#allocation2 + $0xd0] sm:$0xf] %vm19_vm0, %v3043_v42  ;;  %v3044_v45 = vld [vmem:[%s5131_s0 + $0x2c] sm:$0xf]  ;;  %v792_v29 = vld [vmem:[#allocation2 + $0x88] sm:$0x8]  ;;  %v1569_v46 = vsel %vm4013_vm10, %v1518_v9, %v1568_v22 }
  0xfb   :  { %v795_v37 = vld [vmem:[#allocation2 + $0x9c] sm:$0x8]  ;;  %v3488_v51 = vld [vmem:[#allocation2 + $0x38] ss:$20 sps:$4 sm:$0xff]   ;;  %v1454_v25 = vld [vmem:[#allocation2 + $0xa8] sm:$0xf]  ;;  %v1605_v59 = vpop.permute.xlu1 %1604 }
  0xfc   :  { %892 = vst [vmem:[#allocation2 + $0x74] sm:$0xf] %v891_v21  ;;  %v1522_v35 = vrot.slane %v1520_v24, 7  ;;  %1321 = vst.msk [vmem:[#allocation2 + $0xe4] sm:$0xf] %vm19_vm0, %v3044_v45  ;;  %v793_v31 = vsel %vm4001_vm9, 0, %v792_v29  ;;  %3191 = vmatmul.mubr.msk.bf16.gmra.mrb[4].mxu0 %vm2447_vm3, %v3488_v51  ;;  %v1455_v47 = vsel %vm4459_vm2, %v1431_v6, %v1454_v25 }
  0xfd   :  { %v3485_v34 = vld [vmem:[#allocation2 + $0xcc] ss:$20 sps:$4 sm:$0xff]   ;;  %v1307_v20 = vld [vmem:[#allocation2 + $0x130] sm:$0xf]  ;;  %v3487_v30 = vld [vmem:[#allocation2 + $0xc8] ss:$20 sps:$4 sm:$0xff]   ;;  %2750 = vmatprep.mubr.bf16.mxu0 %v3537_v60 }
  0xfe   :  { %1049 = vst.msk [vmem:[#allocation2 + $0x118] sm:$0xf] %vm136_vm15, %v1034_v62  ;;  %1570 = vst [vmem:[#allocation2 + $0xac] sm:$0xf] %v1569_v46  ;;  %v1525_v38 = vor.u32 %v1523_v19, %v1522_v35  ;;  %v796_v39 = vsel %vm4001_vm9, 0, %v795_v37  ;;  %2554 = vmatprep.mubr.bf16.mxu1 %v3485_v34  ;;  %v1308_v7 = vsel %vm4438_vm1, %v1277_v33, %v1307_v20  ;;  %v1791_v61 = vld [vmem:[#allocation2 + $0xf0] sm:$0xff]  ;;  %v1433_v20 = vpop.permute.xlu0 %1432 }
  0xff   :  { %1048 = vst.msk [vmem:[#allocation2 + $0x104] sm:$0xf] %vm136_vm15, %v1032_v15  ;;  %794 = vst [vmem:[#allocation2 + $0x88] sm:$0x8] %v793_v31  ;;  %v3011_v53 = vld [vmem:[%s5131_s0 + $0x1c] sm:$0xf]  ;;  %2555 = vmatmul.mubr.bf16.gmra.mrb[20].mxu1 %v3487_v30  ;;  %v1435_v62 = vpop.permute.xlu1 %1434 }
 0x100   :  { %v1486_v50 = vld [vmem:[#allocation2 + $0xd4] sm:$0x1]  ;;  %797 = vst [vmem:[#allocation2 + $0x9c] sm:$0x8] %v796_v39  ;;  %v860_v12 = vshrl.u32 %v3011_v53, 16  ;;  %v863_v44 = vshll.u32 %v3011_v53, 16 }
 0x101   :  { %v1487_v43 = vsel %vm3922_vm5, 0, %v1486_v50  ;;  %v3059_v36 = vld [vmem:[%s5131_s0 + $0x2c] sm:$0xf]  ;;  %v1489_v18 = vld [vmem:[#allocation2 + $0xe8] sm:$0x1] }
 0x102   :  { %1488 = vst [vmem:[#allocation2 + $0xd4] sm:$0x1] %v1487_v43  ;;  %v1527_v32 = vshrl.u32 %v3059_v36, 16  ;;  %v1530_v10 = vshll.u32 %v3059_v36, 16  ;;  %v1571_v14 = vld [vmem:[#allocation2 + $0xc0] sm:$0xf] }
 0x103   :  { %v862_v28 = vrot.slane %v860_v12, 4  ;;  %v865_v48 = vrot.slane %v863_v44, 5  ;;  %v1490_v27 = vsel %vm3922_vm5, 0, %v1489_v18  ;;  %1456 = vst [vmem:[#allocation2 + $0xa8] sm:$0xf] %v1455_v47  ;;  %v1572_v54 = vsel %vm4013_vm10, %v1525_v38, %v1571_v14 }
 0x104   :  { %v1332_v49 = vld [vmem:[#allocation2 + $0xd0] sm:$0x8]  ;;  %v1529_v13 = vrot.slane %v1527_v32, 7  ;;  %1491 = vst [vmem:[#allocation2 + $0xe8] sm:$0x1] %v1490_v27 }
 0x105   :  { %v3060_v0 = vld [vmem:[%s5131_s0 + $0x30] sm:$0xf]  ;;  %1309 = vst [vmem:[#allocation2 + $0x130] sm:$0xf] %v1308_v7  ;;  %v3491_v5 = vld [vmem:[#allocation2 + $0x60] ss:$20 sps:$4 sm:$0xff]   ;;  %v866_v52 = vor.u32 %v865_v48, %v862_v28  ;;  %v1609_v28 = vpop.permute.xlu1 %1608 }
 0x106   :  { %1573 = vst [vmem:[#allocation2 + $0xc0] sm:$0xf] %v1572_v54  ;;  %v1333_v40 = vsel %vm4152_vm14, 0, %v1332_v49  ;;  %v1534_v56 = vshrl.u32 %v3060_v0, 16  ;;  %v1335_v63 = vld [vmem:[#allocation2 + $0xe4] sm:$0x8]  ;;  %v1532_v3 = vor.u32 %v1530_v10, %v1529_v13  ;;  %3192 = vmatmul.mubr.msk.bf16.gmra.mrb[8].mxu0 %vm2447_vm3, %v3491_v5  ;;  %v1607_v49 = vpop.permute.xlu0 %1606 }
 0x107   :  { %1334 = vst [vmem:[#allocation2 + $0xd0] sm:$0x8] %v1333_v40  ;;  %v1537_v4 = vshll.u32 %v3060_v0, 16  ;;  %v3045_v8 = vld [vmem:[%s5131_s0 + $0x30] sm:$0xf]  ;;  %v1794_v11 = vld [vmem:[#allocation2 + $0x104] sm:$0xff]  ;;  %2760 = vmatprep.mubr.bf16.mxu0 %v3537_v60 }
 0x108   :  { %v3489_v16 = vld [vmem:[#allocation2 + $0xf4] ss:$20 sps:$4 sm:$0xff]   ;;  %v1457_v41 = vld [vmem:[#allocation2 + $0xbc] sm:$0xf]  ;;  %1625 = vst.msk [vmem:[#allocation2 + $0xac] sm:$0xf] %vm136_vm15, %v1605_v59  ;;  %v3108_v24 = vcombine.low %v1791_v61, %v1794_v11 }
 0x109   :  { %v1336_v1 = vsel %vm4152_vm14, 0, %v1335_v63  ;;  %v867_v9 = vrot.slane %v866_v52, 4  ;;  %v1536_v22 = vrot.slane %v1534_v56, 7  ;;  %1322 = vst.msk [vmem:[#allocation2 + $0xf8] sm:$0xf] %vm19_vm0, %v3045_v8  ;;  %2564 = vmatprep.mubr.bf16.mxu1 %v3489_v16  ;;  %v1458_v50 = vsel %vm4459_vm2, %v1433_v20, %v1457_v41  ;;  %v1797_v32 = vld [vmem:[#allocation2 + $0x118] sm:$0xff]  ;;  %v1439_v16 = vpop.permute.xlu1 %1438 }
 0x10a   :  { %1050 = vst.msk [vmem:[#allocation2 + $0x12c] sm:$0xf] %vm136_vm15, %v1036_v58  ;;  %1337 = vst [vmem:[#allocation2 + $0xe4] sm:$0x8] %v1336_v1  ;;  %v893_v19 = vld [vmem:[#allocation2 + $0x88] sm:$0xf]  ;;  %2565 = vmatmul.mubr.bf16.gmra.mrb[24].mxu1 %v3108_v24  ;;  %v1437_v24 = vpop.permute.xlu0 %1436 }
 0x10b   :  { %v3046_v42 = vld [vmem:[%s5131_s0 + $0x34] sm:$0xf]  ;;  %v894_v21 = vsel %vm4110_vm13, %v867_v9, %v893_v19  ;;  %v1539_v29 = vor.u32 %v1537_v4, %v1536_v22  ;;  %v1633_v37 = vld [vmem:[#allocation2 + $0xb0] sm:$0x8]  ;;  %v1636_v51 = vld [vmem:[#allocation2 + $0xc4] sm:$0x8] }
 0x10c   :  { %v1574_v45 = vld [vmem:[#allocation2 + $0xd4] sm:$0xf]  ;;  %1323 = vst.msk [vmem:[#allocation2 + $0x10c] sm:$0xf] %vm19_vm0, %v3046_v42  ;;  %895 = vst [vmem:[#allocation2 + $0x88] sm:$0xf] %v894_v21 }
 0x10d   :  { %v1575_v25 = vsel %vm4013_vm10, %v1532_v3, %v1574_v45  ;;  %v1634_v46 = vsel %vm4001_vm9, 0, %v1633_v37  ;;  %v1637_v35 = vsel %vm4001_vm9, 0, %v1636_v51  ;;  %v3071_v15 = vld [vmem:[%s5131_s0 + $0x24] sm:$0xf]  ;;  %v3072_v34 = vld [vmem:[%s5131_s0 + $0x28] sm:$0xf] }
 0x10e   :  { %1576 = vst [vmem:[#allocation2 + $0xd4] sm:$0xf] %v1575_v25  ;;  %v1577_v30 = vld [vmem:[#allocation2 + $0xe8] sm:$0xf]  ;;  %1635 = vst [vmem:[#allocation2 + $0xb0] sm:$0x8] %v1634_v46 }
 0x10f   :  { %1638 = vst [vmem:[#allocation2 + $0xc4] sm:$0x8] %v1637_v35  ;;  %v1665_v31 = vshrl.u32 %v3071_v15, 16  ;;  %v1668_v38 = vshll.u32 %v3071_v15, 16  ;;  %v1674_v39 = vshrl.u32 %v3072_v34, 16  ;;  %v1677_v53 = vshll.u32 %v3072_v34, 16 }
 0x110   :  { %v1578_v12 = vsel %vm4013_vm10, %v1539_v29, %v1577_v30  ;;  %v1492_v44 = vld [vmem:[#allocation2 + $0xfc] sm:$0x1]  ;;  %v3061_v43 = vld [vmem:[%s5131_s0 + $0x34] sm:$0xf]  ;;  %v1495_v36 = vld [vmem:[#allocation2 + $0x110] sm:$0x1] }
 0x111   :  { %1459 = vst [vmem:[#allocation2 + $0xbc] sm:$0xf] %v1458_v50  ;;  %v1460_v6 = vld [vmem:[#allocation2 + $0xd0] sm:$0xf]  ;;  %1579 = vst [vmem:[#allocation2 + $0xe8] sm:$0xf] %v1578_v12  ;;  %v1611_v12 = vpop.permute.xlu0 %1610 }
 0x112   :  { %v1667_v10 = vrot.slane %v1665_v31, 4  ;;  %v1670_v18 = vrot.slane %v1668_v38, 5  ;;  %v1676_v33 = vrot.slane %v1674_v39, 4  ;;  %v1679_v47 = vrot.slane %v1677_v53, 5  ;;  %v1338_v48 = vld [vmem:[#allocation2 + $0xf8] sm:$0x8]  ;;  %v1613_v31 = vpop.permute.xlu1 %1612 }
 0x113   :  { %v1461_v14 = vsel %vm4459_vm2, %v1435_v62, %v1460_v6  ;;  %v1493_v27 = vsel %vm3922_vm5, 0, %v1492_v44  ;;  %v1541_v7 = vshrl.u32 %v3061_v43, 16  ;;  %v1544_v54 = vshll.u32 %v3061_v43, 16  ;;  %v1800_v13 = vld [vmem:[#allocation2 + $0x12c] sm:$0xff]  ;;  %v1463_v5 = vld [vmem:[#allocation2 + $0xe4] sm:$0xf] }
 0x114   :  { %1462 = vst [vmem:[#allocation2 + $0xd0] sm:$0xf] %v1461_v14  ;;  %v3492_v0 = vld [vmem:[#allocation2 + $0x11c] ss:$20 sps:$4 sm:$0xff]   ;;  %1627 = vst.msk [vmem:[#allocation2 + $0xd4] sm:$0xf] %vm136_vm15, %v1609_v28  ;;  %v1671_v52 = vor.u32 %v1670_v18, %v1667_v10  ;;  %v1680_v56 = vor.u32 %v1679_v47, %v1676_v33  ;;  %v3113_v61 = vcombine.low %v1797_v32, %v1800_v13 }
 0x115   :  { %v1339_v40 = vsel %vm4152_vm14, 0, %v1338_v48  ;;  %1494 = vst [vmem:[#allocation2 + $0xfc] sm:$0x1] %v1493_v27  ;;  %1626 = vst.msk [vmem:[#allocation2 + $0xc0] sm:$0xf] %vm136_vm15, %v1607_v49  ;;  %v1543_v63 = vrot.slane %v1541_v7, 7  ;;  %2574 = vmatprep.mubr.bf16.mxu1 %v3492_v0  ;;  %v1464_v37 = vsel %vm4459_vm2, %v1437_v24, %v1463_v5  ;;  %v1441_v5 = vpop.permute.xlu0 %1440 }
 0x116   :  { %1340 = vst [vmem:[#allocation2 + $0xf8] sm:$0x8] %v1339_v40  ;;  %v1341_v59 = vld [vmem:[#allocation2 + $0x10c] sm:$0x8]  ;;  %v1496_v3 = vsel %vm3922_vm5, 0, %v1495_v36  ;;  %v1672_v11 = vrot.slane %v1671_v52, 4  ;;  %2575 = vmatmul.mubr.bf16.gmra.mrb[28].mxu1 %v3113_v61 }
 0x117   :  { %v3062_v4 = vld [vmem:[%s5131_s0 + $0x38] sm:$0xf]  ;;  %v3494_v8 = vld [vmem:[#allocation2 + $0x88] ss:$20 sps:$4 sm:$0xff]   ;;  %v1342_v58 = vsel %vm4152_vm14, 0, %v1341_v59  ;;  %v1681_v41 = vrot.slane %v1680_v56, 4  ;;  %v1546_v42 = vor.u32 %v1544_v54, %v1543_v63 }
 0x118   :  { %1497 = vst [vmem:[#allocation2 + $0x110] sm:$0x1] %v1496_v3  ;;  %1343 = vst [vmem:[#allocation2 + $0x10c] sm:$0x8] %v1342_v58  ;;  %v1734_v1 = vld [vmem:[#allocation2 + $0xb0] sm:$0xf]  ;;  %3193 = vmatmul.mubr.msk.bf16.gmra.mrb[12].mxu0 %vm2447_vm3, %v3494_v8 }
 0x119   :  { %v1737_v9 = vld [vmem:[#allocation2 + $0xc4] sm:$0xf]  ;;  %v1548_v22 = vshrl.u32 %v3062_v4, 16  ;;  %v1735_v19 = vsel %vm4110_vm13, %v1672_v11, %v1734_v1  ;;  %v1551_v21 = vshll.u32 %v3062_v4, 16  ;;  %v3047_v45 = vld [vmem:[%s5131_s0 + $0x38] sm:$0xf]  ;;  %2770 = vmatprep.mubr.bf16.mxu0 %v3537_v60  ;;  %v1443_v4 = vpop.permute.xlu1 %1442 }
 0x11a   :  { %v3048_v29 = vld [vmem:[%s5131_s0 + $0x3c] sm:$0xf]  ;;  %1736 = vst [vmem:[#allocation2 + $0xb0] sm:$0xf] %v1735_v19  ;;  %v1738_v51 = vsel %vm4110_vm13, %v1681_v41, %v1737_v9  ;;  %1324 = vst.msk [vmem:[#allocation2 + $0x120] sm:$0xf] %vm19_vm0, %v3047_v45  ;;  %v1615_v19 = vpop.permute.xlu0 %1614 }
 0x11b   :  { %v1550_v62 = vrot.slane %v1548_v22, 7  ;;  %1325 = vst.msk [vmem:[#allocation2 + $0x134] sm:$0xf] %vm19_vm0, %v3048_v29  ;;  %v1639_v25 = vld [vmem:[#allocation2 + $0xd8] sm:$0x8]  ;;  %v1786_v41 = vld [vmem:[#allocation2 + $0xd0] sm:$0xff] }
 0x11c   :  { %v1642_v46 = vld [vmem:[#allocation2 + $0xec] sm:$0x8]  ;;  %1465 = vst [vmem:[#allocation2 + $0xe4] sm:$0xf] %v1464_v37  ;;  %1739 = vst [vmem:[#allocation2 + $0xc4] sm:$0xf] %v1738_v51 }
 0x11d   :  { %v1640_v35 = vsel %vm4001_vm9, 0, %v1639_v25  ;;  %v1643_v15 = vsel %vm4001_vm9, 0, %v1642_v46  ;;  %v3073_v34 = vld [vmem:[%s5131_s0 + $0x2c] sm:$0xf]  ;;  %v3074_v20 = vld [vmem:[%s5131_s0 + $0x30] sm:$0xf]  ;;  %v1553_v38 = vor.u32 %v1551_v21, %v1550_v62 }
 0x11e   :  { %v1580_v30 = vld [vmem:[#allocation2 + $0xfc] sm:$0xf]  ;;  %1641 = vst [vmem:[#allocation2 + $0xd8] sm:$0x8] %v1640_v35  ;;  %1644 = vst [vmem:[#allocation2 + $0xec] sm:$0x8] %v1643_v15 }
 0x11f   :  { %v1683_v39 = vshrl.u32 %v3073_v34, 16  ;;  %v1686_v53 = vshll.u32 %v3073_v34, 16  ;;  %v1692_v50 = vshrl.u32 %v3074_v20, 16  ;;  %v1466_v44 = vld [vmem:[#allocation2 + $0xf8] sm:$0xf]  ;;  %v1581_v36 = vsel %vm4013_vm10, %v1546_v42, %v1580_v30 }
 0x120   :  { %v3495_v43 = vld [vmem:[#allocation2 + $0xa8] ss:$20 sps:$4 sm:$0xff]   ;;  %v1695_v6 = vshll.u32 %v3074_v20, 16  ;;  %1628 = vst.msk [vmem:[#allocation2 + $0xe8] sm:$0xf] %vm136_vm15, %v1611_v12  ;;  %v1467_v32 = vsel %vm4459_vm2, %v1439_v16, %v1466_v44  ;;  %v1445_v12 = vpop.permute.xlu0 %1444  ;;  %v1617_v44 = vpop.permute.xlu1 %1616 }
 0x121   :  { %v3497_v10 = vld [vmem:[#allocation2 + $0xac] ss:$20 sps:$4 sm:$0xff]   ;;  %1582 = vst [vmem:[#allocation2 + $0xfc] sm:$0xf] %v1581_v36  ;;  %v1583_v18 = vld [vmem:[#allocation2 + $0x110] sm:$0xf] }
 0x122   :  { %v1685_v33 = vrot.slane %v1683_v39, 4  ;;  %v1688_v47 = vrot.slane %v1686_v53, 5  ;;  %1468 = vst [vmem:[#allocation2 + $0xf8] sm:$0xf] %v1467_v32  ;;  %v1469_v14 = vld [vmem:[#allocation2 + $0x10c] sm:$0xf]  ;;  %v1584_v28 = vsel %vm4013_vm10, %v1553_v38, %v1583_v18  ;;  %2657 = vmatprep.mubr.bf16.mxu1 %v3497_v10 }
 0x123   :  { %1629 = vst.msk [vmem:[#allocation2 + $0xfc] sm:$0xf] %vm136_vm15, %v1613_v31  ;;  %v1694_v48 = vrot.slane %v1692_v50, 4  ;;  %v1697_v27 = vrot.slane %v1695_v6, 5  ;;  %v1498_v7 = vld [vmem:[#allocation2 + $0x124] sm:$0x1]  ;;  %2658 = vmatmul.mubr.bf16.vlgmr.msra.gmra.mrb[16].mxu1 %v3495_v43  ;;  %v1470_v61 = vsel %vm4459_vm2, %v1441_v5, %v1469_v14 }
 0x124   :  { %1585 = vst [vmem:[#allocation2 + $0x110] sm:$0xf] %v1584_v28  ;;  %v1689_v54 = vor.u32 %v1688_v47, %v1685_v33  ;;  %v1499_v49 = vsel %vm3922_vm5, 0, %v1498_v7  ;;  %v3063_v13 = vld [vmem:[%s5131_s0 + $0x3c] sm:$0xf] }
 0x125   :  { %v1645_v0 = vld [vmem:[#allocation2 + $0x100] sm:$0x8]  ;;  %v1347_v52 = vld [vmem:[#allocation2 + $0x134] sm:$0x8]  ;;  %v1698_v56 = vor.u32 %v1697_v27, %v1694_v48  ;;  %1500 = vst [vmem:[#allocation2 + $0x124] sm:$0x1] %v1499_v49 }
 0x126   :  { %v1344_v40 = vld [vmem:[#allocation2 + $0x120] sm:$0x8]  ;;  %v3498_v59 = vld [vmem:[#allocation2 + $0xb0] ss:$20 sps:$4 sm:$0xff]   ;;  %v1348_v3 = vsel %vm4152_vm14, 0, %v1347_v52  ;;  %v1690_v8 = vrot.slane %v1689_v54, 4 }
 0x127   :  { %v1345_v63 = vsel %vm4152_vm14, 0, %v1344_v40  ;;  %1471 = vst [vmem:[#allocation2 + $0x10c] sm:$0xf] %v1470_v61  ;;  %1349 = vst [vmem:[#allocation2 + $0x134] sm:$0x8] %v1348_v3  ;;  %v1699_v58 = vrot.slane %v1698_v56, 4  ;;  %3194 = vmatmul.mubr.msk.bf16.gmra.mrb[16].mxu0 %vm2447_vm3, %v3498_v59 }
 0x128   :  { %1346 = vst [vmem:[#allocation2 + $0x120] sm:$0x8] %v1345_v63  ;;  %v1740_v11 = vld [vmem:[#allocation2 + $0xd8] sm:$0xf]  ;;  %v1743_v16 = vld [vmem:[#allocation2 + $0xec] sm:$0xf]  ;;  %2780 = vmatprep.mubr.bf16.mxu0 %v3537_v60 }
 0x129   :  { %v1555_v1 = vshrl.u32 %v3063_v13, 16  ;;  %v1558_v9 = vshll.u32 %v3063_v13, 16  ;;  %v1646_v22 = vsel %vm4001_vm9, 0, %v1645_v0  ;;  %v1648_v24 = vld [vmem:[#allocation2 + $0x114] sm:$0x8]  ;;  %v1789_v23 = vld [vmem:[#allocation2 + $0xe4] sm:$0xff]  ;;  %v1741_v21 = vsel %vm4110_vm13, %v1690_v8, %v1740_v11 }
 0x12a   :  { %v3499_v42 = vld [vmem:[#allocation2 + $0xd4] ss:$20 sps:$4 sm:$0xff]   ;;  %v1744_v45 = vsel %vm4110_vm13, %v1699_v58, %v1743_v16  ;;  %1647 = vst [vmem:[#allocation2 + $0x100] sm:$0x8] %v1646_v22  ;;  %v1649_v29 = vsel %vm4001_vm9, 0, %v1648_v24  ;;  %v3105_v51 = vcombine.low %v1786_v41, %v1789_v23 }
 0x12b   :  { %v3075_v37 = vld [vmem:[%s5131_s0 + $0x34] sm:$0xf]  ;;  %1630 = vst.msk [vmem:[#allocation2 + $0x110] sm:$0xf] %vm136_vm15, %v1615_v19  ;;  %1742 = vst [vmem:[#allocation2 + $0xd8] sm:$0xf] %v1741_v21  ;;  %2667 = vmatprep.mubr.bf16.mxu1 %v3499_v42 }
 0x12c   :  { %1745 = vst [vmem:[#allocation2 + $0xec] sm:$0xf] %v1744_v45  ;;  %v1557_v62 = vrot.slane %v1555_v1, 7  ;;  %1650 = vst [vmem:[#allocation2 + $0x114] sm:$0x8] %v1649_v29  ;;  %v1701_v46 = vshrl.u32 %v3075_v37, 16  ;;  %2668 = vmatmul.mubr.bf16.gmra.mrb[20].mxu1 %v3105_v51 }
 0x12d   :  { %v3076_v25 = vld [vmem:[%s5131_s0 + $0x38] sm:$0xf]  ;;  %v1704_v35 = vshll.u32 %v3075_v37, 16  ;;  %v1651_v30 = vld [vmem:[#allocation2 + $0x128] sm:$0x8]  ;;  %v1877_v37 = vlaneseq }
 0x12e   :  { %v1710_v15 = vshrl.u32 %v3076_v25, 16  ;;  %v1713_v34 = vshll.u32 %v3076_v25, 16  ;;  %v1501_v20 = vld [vmem:[#allocation2 + $0x138] sm:$0x1]  ;;  %v1560_v31 = vor.u32 %v1558_v9, %v1557_v62  ;;  %v1586_v38 = vld [vmem:[#allocation2 + $0x124] sm:$0xf] }
 0x12f   :  { %v1703_v39 = vrot.slane %v1701_v46, 4  ;;  %v1706_v53 = vrot.slane %v1704_v35, 5  ;;  %v1502_v50 = vsel %vm3922_vm5, 0, %v1501_v20  ;;  %v1652_v6 = vsel %vm4001_vm9, 0, %v1651_v30  ;;  %v1654_v32 = vld [vmem:[#allocation2 + $0x13c] sm:$0x8] }
 0x130   :  { %v1712_v43 = vrot.slane %v1710_v15, 4  ;;  %v1715_v36 = vrot.slane %v1713_v34, 5  ;;  %1503 = vst [vmem:[#allocation2 + $0x138] sm:$0x1] %v1502_v50  ;;  %v1472_v10 = vld [vmem:[#allocation2 + $0x120] sm:$0xf]  ;;  %v1587_v33 = vsel %vm4013_vm10, %v1560_v31, %v1586_v38 }
 0x131   :  { %v1475_v18 = vld [vmem:[#allocation2 + $0x134] sm:$0xf]  ;;  %v1707_v47 = vor.u32 %v1706_v53, %v1703_v39  ;;  %1589 = vst.msk [vmem:[#allocation2 + $0x138] sm:$0xf] %vm136_vm15, %v3537_v60  ;;  %1653 = vst [vmem:[#allocation2 + $0x128] sm:$0x8] %v1652_v6  ;;  %v1473_v14 = vsel %vm4459_vm2, %v1443_v4, %v1472_v10 }
 0x132   :  { %v1655_v17 = vsel %vm4001_vm9, 0, %v1654_v32  ;;  %v1476_v28 = vsel %vm4459_vm2, %v1445_v12, %v1475_v18  ;;  %1588 = vst [vmem:[#allocation2 + $0x124] sm:$0xf] %v1587_v33  ;;  %v1716_v48 = vor.u32 %v1715_v36, %v1712_v43  ;;  %v3077_v2 = vld [vmem:[%s5131_s0 + $0x3c] sm:$0xf]  ;;  %v1878_v51 = vshrl.u32 %v1877_v37, 7 }
 0x133   :  { %1656 = vst [vmem:[#allocation2 + $0x13c] sm:$0x8] %v1655_v17  ;;  %1474 = vst [vmem:[#allocation2 + $0x120] sm:$0xf] %v1473_v14  ;;  %v1708_v27 = vrot.slane %v1707_v47, 4  ;;  %v1719_v7 = vshrl.u32 %v3077_v2, 16 }
 0x134   :  { %1477 = vst [vmem:[#allocation2 + $0x134] sm:$0xf] %v1476_v28  ;;  %1631 = vst.msk [vmem:[#allocation2 + $0x124] sm:$0xf] %vm136_vm15, %v1617_v44  ;;  %v1746_v57 = vld [vmem:[#allocation2 + $0x100] sm:$0xf] }
 0x135   :  { %v1722_v54 = vshll.u32 %v3077_v2, 16  ;;  %v3501_v49 = vld [vmem:[#allocation2 + $0xd8] ss:$20 sps:$4 sm:$0xff]   ;;  %v3502_v13 = vld [vmem:[#allocation2 + $0xfc] ss:$20 sps:$4 sm:$0xff]   ;;  %v1717_v26 = vrot.slane %v1716_v48, 4  ;;  %v1747_v5 = vsel %vm4110_vm13, %v1708_v27, %v1746_v57 }
 0x136   :  { %v3504_v0 = vld [vmem:[#allocation2 + $0xf8] ss:$20 sps:$4 sm:$0xff]   ;;  %3195 = vmatmul.mubr.msk.bf16.gmra.mrb[20].mxu0 %vm2447_vm3, %v3501_v49  ;;  %1748 = vst [vmem:[#allocation2 + $0x100] sm:$0xf] %v1747_v5  ;;  %v1749_v40 = vld [vmem:[#allocation2 + $0x114] sm:$0xf]  ;;  %2677 = vmatprep.mubr.bf16.mxu1 %v3502_v13 }
 0x137   :  { %v1721_v52 = vrot.slane %v1719_v7, 4  ;;  %v1724_v56 = vrot.slane %v1722_v54, 5  ;;  %2790 = vmatprep.mubr.bf16.mxu0 %v3537_v60  ;;  %v1750_v61 = vsel %vm4110_vm13, %v1717_v26, %v1749_v40  ;;  %2678 = vmatmul.mubr.bf16.gmra.mrb[24].mxu1 %v3504_v0  ;;  %v1879_v35 = vsub.s32 0, %v1878_v51  ;;  %v1875_v15 = vld [vmem:[%s5133_s2] sm:$0x3] }
 0x138   :  { %1751 = vst [vmem:[#allocation2 + $0x114] sm:$0xf] %v1750_v61  ;;  %v1752_v63 = vld [vmem:[#allocation2 + $0x128] sm:$0xf]  ;;  %v1883_v34 = vsub.s32 1, %v1878_v51 }
 0x139   :  { %v1725_v59 = vor.u32 %v1724_v56, %v1721_v52  ;;  %v5043_v20 = vrot.slane %v1875_v15, %v1879_v35 }
 0x13a   :  { %v5045_v30 = vrot.slane %v1875_v15, %v1883_v34 }
 0x13b   :  { %v3506_v3 = vld [vmem:[#allocation2 + $0x124] ss:$20 sps:$4 sm:$0xff]   ;;  %v1726_v4 = vrot.slane %v1725_v59, 4  ;;  %v3508_v58 = vld [vmem:[#allocation2 + $0x120] ss:$20 sps:$4 sm:$0xff]  }
 0x13c   :  { %2687 = vmatprep.mubr.bf16.mxu1 %v3506_v3 }
 0x13d   :  { %v1753_v8 = vsel %vm4110_vm13, %v1726_v4, %v1752_v63 }
 0x13e   :  { %1754 = vst [vmem:[#allocation2 + $0x128] sm:$0xf] %v1753_v8 }
 0x13f   :  { %v3505_v11 = vld [vmem:[#allocation2 + $0x100] ss:$20 sps:$4 sm:$0xff]   ;;  %2688 = vmatmul.mubr.bf16.gmra.mrb[28].mxu1 %v3508_v58 }
 0x140   :  { %3196 = vmatmul.mubr.msk.bf16.gmra.mrb[24].mxu0 %vm2447_vm3, %v3505_v11 }
 0x141   :  { %2800 = vmatprep.mubr.bf16.mxu0 %v3537_v60 }
 0x145   :  { %v3509_v16 = vld [vmem:[#allocation2 + $0x128] ss:$20 sps:$4 sm:$0xff]  }
 0x148   :  { %3197 = vmatmul.mubr.msk.bf16.gmra.mrb[28].mxu0 %vm2447_vm3, %v3509_v16 }
 0x16a   :  { %v2506_v41 = vpop.f32.mrb[0].mxu1 }
 0x16b   :  { %v2508_v1 = vpop.f32.mrb[1].mxu1  ;;  %v2507_v31 = vadd.f32 %v2506_v41, %v5043_v20 }
 0x16c   :  { %v2510_v9 = vpop.f32.mrb[2].mxu1  ;;  %v2509_v38 = vadd.f32 %v2508_v1, %v5045_v30 }
 0x16d   :  { %v2512_v22 = vpop.f32.mrb[3].mxu1  ;;  %v2511_v53 = vadd.f32 %v2510_v9, %v5043_v20 }
 0x16e   :  { %v2513_v44 = vadd.f32 %v2512_v22, %v5045_v30 }
 0x182   :  { %v2516_v24 = vpop.f32.mrb[4].mxu1 }
 0x183   :  { %v2518_v19 = vpop.f32.mrb[5].mxu1  ;;  %v2517_v28 = vadd.f32 %v2516_v24, %v5043_v20 }
 0x184   :  { %v2520_v23 = vpop.f32.mrb[6].mxu1  ;;  %v2519_v48 = vadd.f32 %v2518_v19, %v5045_v30 }
 0x185   :  { %v2522_v55 = vpop.f32.mrb[7].mxu1  ;;  %v2521_v57 = vadd.f32 %v2520_v23, %v5043_v20 }
 0x186   :  { %v2523_v49 = vadd.f32 %v2522_v55, %v5045_v30 }
 0x19b   :  { %v2526_v42 = vpop.f32.mrb[8].mxu1 }
 0x19c   :  { %v2528_v21 = vpop.f32.mrb[9].mxu1  ;;  %v2527_v3 = vadd.f32 %v2526_v42, %v5043_v20 }
 0x19d   :  { %v2530_v45 = vpop.f32.mrb[10].mxu1  ;;  %v2529_v4 = vadd.f32 %v2528_v21, %v5045_v30 }
 0x19e   :  { %v2532_v29 = vpop.f32.mrb[11].mxu1  ;;  %v2531_v11 = vadd.f32 %v2530_v45, %v5043_v20 }
 0x19f   :  { %v2533_v1 = vadd.f32 %v2532_v29, %v5045_v30 }
 0x1b4   :  { %v5032_v62 = vpop.f32.mrb[12].mxu1 }
 0x1b5   :  { %v5034_v60 = vpop.f32.mrb[13].mxu1  ;;  %v2537_v45 = vadd.f32 %v5032_v62, %v5043_v20 }
 0x1b6   :  { %v5036_v25 = vpop.f32.mrb[14].mxu1  ;;  %v2539_v29 = vadd.f32 %v5034_v60, %v5045_v30 }
 0x1b7   :  { %v5038_v46 = vpop.f32.mrb[15].mxu1  ;;  %v2541_v34 = vadd.f32 %v5036_v25, %v5043_v20 }
 0x1c4   :  { %v2732_v39 = vpop.f32.mrb[0].mxu0 }
 0x1c5   :  { %v3263_v50 = vadd.f32 %v2732_v39, %v2507_v31  ;;  %v2734_v12 = vpop.f32.mrb[1].mxu0  ;;  %v2543_v39 = vadd.f32 %v5038_v46, %v5045_v30 }
 0x1c6   :  { %v3265_v43 = vadd.f32 %v2734_v12, %v2509_v38  ;;  %v2736_v36 = vpop.f32.mrb[2].mxu0 }
 0x1c7   :  { %v2811_v6 = vmax.f32 %v3263_v50, 0.0  ;;  %v3267_v32 = vadd.f32 %v2736_v36, %v2511_v53  ;;  %v2738_v10 = vpop.f32.mrb[3].mxu0 }
 0x1c8   :  { %v2812_v18 = vmax.f32 %v3265_v43, 0.0  ;;  %v3269_v33 = vadd.f32 %v2738_v10, %v2513_v44 }
 0x1c9   :  { %v2813_v47 = vmax.f32 %v3267_v32, 0.0 }
 0x1ca   :  { %v3214_v17 = vpack.c.bf16 %v2812_v18, %v2811_v6  ;;  %v2814_v14 = vmax.f32 %v3269_v33, 0.0 }
 0x1cc   :  { %2971 = vst [vmem:[%s5134_s3] sm:$0xff] %v3214_v17  ;;  %v3215_v2 = vpack.c.bf16 %v2814_v14, %v2813_v47 }
 0x1ce   :  { %2972 = vst [vmem:[%s5134_s3 + $0x8] sm:$0xff] %v3215_v2 }
 0x1cf   :  { %v2742_v27 = vpop.f32.mrb[4].mxu0 }
 0x1d0   :  { %v3271_v7 = vadd.f32 %v2742_v27, %v2517_v28  ;;  %v2744_v54 = vpop.f32.mrb[5].mxu0 }
 0x1d1   :  { %v3273_v13 = vadd.f32 %v2744_v54, %v2519_v48  ;;  %v2746_v0 = vpop.f32.mrb[6].mxu0 }
 0x1d2   :  { %v2815_v26 = vmax.f32 %v3271_v7, 0.0  ;;  %v3275_v5 = vadd.f32 %v2746_v0, %v2521_v57  ;;  %v2748_v40 = vpop.f32.mrb[7].mxu0 }
 0x1d3   :  { %v2816_v52 = vmax.f32 %v3273_v13, 0.0  ;;  %v3277_v56 = vadd.f32 %v2748_v40, %v2523_v49 }
 0x1d4   :  { %v2817_v61 = vmax.f32 %v3275_v5, 0.0 }
 0x1d5   :  { %v3216_v59 = vpack.c.bf16 %v2816_v52, %v2815_v26  ;;  %v2818_v63 = vmax.f32 %v3277_v56, 0.0 }
 0x1d7   :  { %2973 = vst [vmem:[%s5134_s3 + $0x10] sm:$0xff] %v3216_v59  ;;  %v3217_v8 = vpack.c.bf16 %v2818_v63, %v2817_v61 }
 0x1d9   :  { %v2752_v58 = vpop.f32.mrb[8].mxu0  ;;  %2974 = vst [vmem:[%s5134_s3 + $0x18] sm:$0xff] %v3217_v8 }
 0x1da   :  { %v3279_v16 = vadd.f32 %v2752_v58, %v2527_v3  ;;  %v2754_v41 = vpop.f32.mrb[9].mxu0 }
 0x1db   :  { %v3281_v9 = vadd.f32 %v2754_v41, %v2529_v4  ;;  %v2756_v22 = vpop.f32.mrb[10].mxu0 }
 0x1dc   :  { %v2819_v24 = vmax.f32 %v3279_v16, 0.0  ;;  %v3283_v19 = vadd.f32 %v2756_v22, %v2531_v11  ;;  %v2758_v23 = vpop.f32.mrb[11].mxu0 }
 0x1dd   :  { %v2820_v55 = vmax.f32 %v3281_v9, 0.0  ;;  %v3285_v42 = vadd.f32 %v2758_v23, %v2533_v1 }
 0x1de   :  { %v2821_v21 = vmax.f32 %v3283_v19, 0.0 }
 0x1df   :  { %v3218_v37 = vpack.c.bf16 %v2820_v55, %v2819_v24  ;;  %v2822_v51 = vmax.f32 %v3285_v42, 0.0 }
 0x1e1   :  { %2975 = vst [vmem:[%s5134_s3 + $0x20] sm:$0xff] %v3218_v37  ;;  %v3219_v35 = vpack.c.bf16 %v2822_v51, %v2821_v21 }
 0x1e3   :  { %2976 = vst [vmem:[%s5134_s3 + $0x28] sm:$0xff] %v3219_v35 }
 0x1eb   :  { %v2762_v15 = vpop.f32.mrb[12].mxu0 }
 0x1ec   :  { %v3287_v31 = vadd.f32 %v2762_v15, %v2537_v45  ;;  %v2764_v38 = vpop.f32.mrb[13].mxu0 }
 0x1ed   :  { %v3289_v62 = vadd.f32 %v2764_v38, %v2539_v29  ;;  %v2766_v60 = vpop.f32.mrb[14].mxu0 }
 0x1ee   :  { %v2823_v53 = vmax.f32 %v3287_v31, 0.0  ;;  %v3291_v50 = vadd.f32 %v2766_v60, %v2541_v34  ;;  %v2768_v12 = vpop.f32.mrb[15].mxu0 }
 0x1ef   :  { %v2824_v44 = vmax.f32 %v3289_v62, 0.0  ;;  %v3293_v43 = vadd.f32 %v2768_v12, %v2543_v39 }
 0x1f0   :  { %v2825_v36 = vmax.f32 %v3291_v50, 0.0 }
 0x1f1   :  { %v3220_v6 = vpack.c.bf16 %v2824_v44, %v2823_v53  ;;  %v2826_v32 = vmax.f32 %v3293_v43, 0.0 }
 0x1f3   :  { %2977 = vst [vmem:[%s5134_s3 + $0x30] sm:$0xff] %v3220_v6  ;;  %v3221_v25 = vpack.c.bf16 %v2826_v32, %v2825_v36 }
 0x1f5   :  { %2978 = vst [vmem:[%s5134_s3 + $0x38] sm:$0xff] %v3221_v25 }
 0x1f6   :  { %v2659_v46 = vpop.f32.mrb[16].mxu1 }
 0x1f7   :  { %v3294_v10 = vadd.f32 %v2659_v46, %v5043_v20  ;;  %v2661_v18 = vpop.f32.mrb[17].mxu1 }
 0x1f8   :  { %v3296_v33 = vadd.f32 %v2661_v18, %v5045_v30  ;;  %v2663_v47 = vpop.f32.mrb[18].mxu1 }
 0x1f9   :  { %v3298_v14 = vadd.f32 %v2663_v47, %v5043_v20  ;;  %v2665_v28 = vpop.f32.mrb[19].mxu1 }
 0x1fa   :  { %v2772_v17 = vpop.f32.mrb[16].mxu0  ;;  %v3300_v27 = vadd.f32 %v2665_v28, %v5045_v30 }
 0x1fb   :  { %v3295_v48 = vadd.f32 %v3294_v10, %v2772_v17  ;;  %v2774_v2 = vpop.f32.mrb[17].mxu0 }
 0x1fc   :  { %v3297_v57 = vadd.f32 %v3296_v33, %v2774_v2  ;;  %v2776_v7 = vpop.f32.mrb[18].mxu0 }
 0x1fd   :  { %v2827_v54 = vmax.f32 %v3295_v48, 0.0  ;;  %v3299_v49 = vadd.f32 %v3298_v14, %v2776_v7  ;;  %v2778_v13 = vpop.f32.mrb[19].mxu0 }
 0x1fe   :  { %v2828_v0 = vmax.f32 %v3297_v57, 0.0  ;;  %v3301_v26 = vadd.f32 %v3300_v27, %v2778_v13 }
 0x1ff   :  { %v2829_v5 = vmax.f32 %v3299_v49, 0.0  ;;  %v2669_v40 = vpop.f32.mrb[20].mxu1 }
 0x200   :  { %v3222_v52 = vpack.c.bf16 %v2828_v0, %v2827_v54  ;;  %v2830_v56 = vmax.f32 %v3301_v26, 0.0  ;;  %v2671_v61 = vpop.f32.mrb[21].mxu1  ;;  %v3302_v3 = vadd.f32 %v2669_v40, %v5043_v20 }
 0x201   :  { %v2673_v59 = vpop.f32.mrb[22].mxu1  ;;  %v3304_v8 = vadd.f32 %v2671_v61, %v5045_v30 }
 0x202   :  { %2979 = vst [vmem:[%s5134_s3 + $0x40] sm:$0xff] %v3222_v52  ;;  %v3223_v63 = vpack.c.bf16 %v2830_v56, %v2829_v5  ;;  %v2675_v4 = vpop.f32.mrb[23].mxu1  ;;  %v3306_v58 = vadd.f32 %v2673_v59, %v5043_v20 }
 0x203   :  { %v3308_v16 = vadd.f32 %v2675_v4, %v5045_v30 }
 0x204   :  { %2980 = vst [vmem:[%s5134_s3 + $0x48] sm:$0xff] %v3223_v63 }
 0x209   :  { %v2782_v11 = vpop.f32.mrb[20].mxu0 }
 0x20a   :  { %v3303_v41 = vadd.f32 %v3302_v3, %v2782_v11  ;;  %v2784_v1 = vpop.f32.mrb[21].mxu0  ;;  %v2679_v24 = vpop.f32.mrb[24].mxu1 }
 0x20b   :  { %v3305_v9 = vadd.f32 %v3304_v8, %v2784_v1  ;;  %v2786_v22 = vpop.f32.mrb[22].mxu0  ;;  %v2681_v42 = vpop.f32.mrb[25].mxu1  ;;  %v3310_v31 = vadd.f32 %v2679_v24, %v5043_v20 }
 0x20c   :  { %v2831_v19 = vmax.f32 %v3303_v41, 0.0  ;;  %v3307_v23 = vadd.f32 %v3306_v58, %v2786_v22  ;;  %v2788_v55 = vpop.f32.mrb[23].mxu0  ;;  %v2683_v51 = vpop.f32.mrb[26].mxu1  ;;  %v3312_v38 = vadd.f32 %v2681_v42, %v5045_v30 }
 0x20d   :  { %v2832_v21 = vmax.f32 %v3305_v9, 0.0  ;;  %v3309_v37 = vadd.f32 %v3308_v16, %v2788_v55  ;;  %v2685_v29 = vpop.f32.mrb[27].mxu1  ;;  %v3314_v39 = vadd.f32 %v2683_v51, %v5043_v20 }
 0x20e   :  { %v2833_v45 = vmax.f32 %v3307_v23, 0.0  ;;  %v3316_v53 = vadd.f32 %v2685_v29, %v5045_v30 }
 0x20f   :  { %v3224_v35 = vpack.c.bf16 %v2832_v21, %v2831_v19  ;;  %v2834_v15 = vmax.f32 %v3309_v37, 0.0 }
 0x211   :  { %2981 = vst [vmem:[%s5134_s3 + $0x50] sm:$0xff] %v3224_v35  ;;  %v3225_v34 = vpack.c.bf16 %v2834_v15, %v2833_v45 }
 0x212   :  { %v2689_v62 = vpop.f32.mrb[28].mxu1 }
 0x213   :  { %2982 = vst [vmem:[%s5134_s3 + $0x58] sm:$0xff] %v3225_v34  ;;  %v2792_v60 = vpop.f32.mrb[24].mxu0  ;;  %v2691_v50 = vpop.f32.mrb[29].mxu1  ;;  %v3318_v17 = vadd.f32 %v2689_v62, %v5043_v20 }
 0x214   :  { %v3311_v12 = vadd.f32 %v3310_v31, %v2792_v60  ;;  %v2794_v44 = vpop.f32.mrb[25].mxu0  ;;  %v2693_v43 = vpop.f32.mrb[30].mxu1  ;;  %v3320_v48 = vadd.f32 %v2691_v50, %v5045_v30 }
 0x215   :  { %v3313_v36 = vadd.f32 %v3312_v38, %v2794_v44  ;;  %v2796_v6 = vpop.f32.mrb[26].mxu0  ;;  %v2695_v32 = vpop.f32.mrb[31].mxu1  ;;  %v3322_v2 = vadd.f32 %v2693_v43, %v5043_v20 }
 0x216   :  { %v2835_v25 = vmax.f32 %v3311_v12, 0.0  ;;  %v3315_v46 = vadd.f32 %v3314_v39, %v2796_v6  ;;  %v2798_v10 = vpop.f32.mrb[27].mxu0  ;;  %v3324_v7 = vadd.f32 %v2695_v32, %v5045_v30 }
 0x217   :  { %v2836_v18 = vmax.f32 %v3313_v36, 0.0  ;;  %v3317_v33 = vadd.f32 %v3316_v53, %v2798_v10 }
 0x218   :  { %v2837_v47 = vmax.f32 %v3315_v46, 0.0 }
 0x219   :  { %v3226_v14 = vpack.c.bf16 %v2836_v18, %v2835_v25  ;;  %v2838_v28 = vmax.f32 %v3317_v33, 0.0 }
 0x21b   :  { %2983 = vst [vmem:[%s5134_s3 + $0x60] sm:$0xff] %v3226_v14  ;;  %v3227_v27 = vpack.c.bf16 %v2838_v28, %v2837_v47  ;;  %v2802_v57 = vpop.f32.mrb[28].mxu0 }
 0x21c   :  { %v3319_v54 = vadd.f32 %v3318_v17, %v2802_v57  ;;  %v2804_v49 = vpop.f32.mrb[29].mxu0 }
 0x21d   :  { %2984 = vst [vmem:[%s5134_s3 + $0x68] sm:$0xff] %v3227_v27  ;;  %v3321_v13 = vadd.f32 %v3320_v48, %v2804_v49  ;;  %v2806_v0 = vpop.f32.mrb[30].mxu0 }
 0x21e   :  { %v2839_v26 = vmax.f32 %v3319_v54, 0.0  ;;  %v3323_v5 = vadd.f32 %v3322_v2, %v2806_v0  ;;  %v2808_v40 = vpop.f32.mrb[31].mxu0 }
 0x21f   :  { %v2840_v20 = vmax.f32 %v3321_v13, 0.0  ;;  %v3325_v52 = vadd.f32 %v3324_v7, %v2808_v40 }
 0x220   :  { %v2841_v56 = vmax.f32 %v3323_v5, 0.0 }
 0x221   :  { %v3228_v61 = vpack.c.bf16 %v2840_v20, %v2839_v26  ;;  %v2842_v59 = vmax.f32 %v3325_v52, 0.0 }
 0x223   :  { %2985 = vst [vmem:[%s5134_s3 + $0x70] sm:$0xff] %v3228_v61  ;;  %v3229_v30 = vpack.c.bf16 %v2842_v59, %v2841_v56 }
 0x225   :  { %2986 = vst [vmem:[%s5134_s3 + $0x78] sm:$0xff] %v3229_v30 }

// kernel: face_encoder_forward.6
= control target key start
LH: loop header
LB: loop body
LE: loop exit
PB: predicated region body
PF: predicated region fallthrough
CT: control target
= control target key end

     0   :  { %s2696_s16 = smov 32   ;;  %s2697_s27 = smov 64   ;;  %vm21_vm0 = vcmask 253952   ;;  %vm22_vm1 = vsmask.f32 256  ;;  %vm19_vm2 = vcmask 257024   ;;  %s4229_s0 = inlined_call_operand.vmem [shape: bf16[2,8,8,32], index: 0, kind: input, shape index: {}]   ;;  %s4230_s1 = inlined_call_operand.vmem [shape: bf16[288,32], index: 1, kind: input, shape index: {}]   ;;  %s4231_s2 = inlined_call_operand.vmem [shape: f32[1,32], index: 2, kind: input, shape index: {}]   ;;  %s4232_s3 = inlined_call_operand.vmem [shape: bf16[16,8,32], index: 3, kind: output, shape index: {}]  }
   0x1   :  { %v2428_v0 = vld [vmem:[%s4229_s0 + $0x30] sm:$0xf]  ;;  %v138_v1 = vld [vmem:[%s4229_s0] sm:$0xf]  ;;  %v139_v2 = vld [vmem:[%s4229_s0 + $0x4] sm:$0xf] }
   0x2   :  { %1069 = vrot.lane.b32.xlu1 %v2428_v0, %s2696_s16  ;;  %152 = vrot.lane.b32.xlu0 %v138_v1, %s2696_s16  ;;  %v2427_v3 = vld [vmem:[%s4229_s0 + $0x2c] sm:$0xf]  ;;  %v506_v4 = vld [vmem:[%s4229_s0] sm:$0xf]  ;;  %vm2913_vm3 = vmand %vm21_vm0, %vm22_vm1  ;;  %vm113_vm4 = vsmask.f32 7938 }
   0x3   :  { %v209_v5 = vld [vmem:[%s4229_s0] sm:$0xf]  ;;  %v2429_v6 = vld [vmem:[%s4229_s0 + $0x34] sm:$0xf]  ;;  %v515_v7 = vshrl.u32 %v506_v4, 16  ;;  %v518_v8 = vshll.u32 %v506_v4, 16  ;;  %vm2996_vm5 = vmand %vm19_vm2, %vm113_vm4 }
   0x4   :  { %v217_v9 = vshrl.u32 %v209_v5, 16  ;;  %v220_v10 = vshll.u32 %v209_v5, 16  ;;  %v507_v11 = vld [vmem:[%s4229_s0 + $0x4] sm:$0xf]  ;;  %v2459_v14 = vld [vmem:[%s4229_s0 + $0x34] sm:$0xf] }
   0x5   :  { %v524_v12 = vshrl.u32 %v507_v11, 16  ;;  %v527_v13 = vshll.u32 %v507_v11, 16  ;;  %v2458_v15 = vld [vmem:[%s4229_s0 + $0x30] sm:$0xf]  ;;  %v140_v16 = vld [vmem:[%s4229_s0 + $0x8] sm:$0xf] }
   0x6   :  { %154 = vrot.lane.b32.xlu1 %v139_v2, %s2696_s16  ;;  %1067 = vrot.lane.b32.xlu0 %v2427_v3, %s2696_s16  ;;  %v517_v17 = vrot.slane %v515_v7, 4  ;;  %v520_v18 = vrot.slane %v518_v8, 5  ;;  %v219_v19 = vrot.slane %v217_v9, 4  ;;  %v222_v20 = vrot.slane %v220_v10, 5  ;;  %v2435_v28 = vld [vmem:[%s4229_s0 + $0x30] sm:$0xf] }
   0x7   :  { %v526_v21 = vrot.slane %v524_v12, 4  ;;  %v529_v22 = vrot.slane %v527_v13, 5  ;;  %v1456_v23 = vshrl.u32 %v2459_v14, 16  ;;  %v1459_v25 = vshll.u32 %v2459_v14, 16  ;;  %v141_v29 = vld [vmem:[%s4229_s0 + $0xc] sm:$0xf] }
   0x8   :  { %v521_v24 = vor.u32 %v520_v18, %v517_v17  ;;  %v1447_v26 = vshrl.u32 %v2458_v15, 16  ;;  %v1450_v27 = vshll.u32 %v2458_v15, 16  ;;  %v2430_v30 = vld [vmem:[%s4229_s0 + $0x38] sm:$0xf]  ;;  %v2434_v31 = vld [vmem:[%s4229_s0 + $0x2c] sm:$0xf]  ;;  %v223_v32 = vor.u32 %v222_v20, %v219_v19 }
   0x9   :  { %v530_v33 = vor.u32 %v529_v22, %v526_v21  ;;  %v1458_v34 = vrot.slane %v1456_v23, 4  ;;  %v1461_v36 = vrot.slane %v1459_v25, 5  ;;  %v1158_v38 = vshrl.u32 %v2435_v28, 16  ;;  %v142_v43 = vld [vmem:[%s4229_s0 + $0x10] sm:$0xf]  ;;  %s2698_s21 = smov 96  }
   0xa   :  { %1071 = vrot.lane.b32.xlu1 %v2429_v6, %s2696_s16  ;;  %156 = vrot.lane.b32.xlu0 %v140_v16, %s2696_s16  ;;  %v522_v35 = vrot.slane %v521_v24, 4  ;;  %v1449_v37 = vrot.slane %v1447_v26, 4  ;;  %v1452_v39 = vrot.slane %v1450_v27, 5  ;;  %v1161_v40 = vshll.u32 %v2435_v28, 16  ;;  %v509_v44 = vld [vmem:[%s4229_s0 + $0xc] sm:$0xf] }
   0xb   :  { %v1149_v41 = vshrl.u32 %v2434_v31, 16  ;;  %v1152_v42 = vshll.u32 %v2434_v31, 16  ;;  %v508_v45 = vld [vmem:[%s4229_s0 + $0x8] sm:$0xf]  ;;  %v224_v46 = vrot.slane %v223_v32, 4  ;;  %v531_v47 = vrot.slane %v530_v33, 4 }
   0xc   :  { %v1462_v48 = vor.u32 %v1461_v36, %v1458_v34  ;;  %v1160_v49 = vrot.slane %v1158_v38, 4  ;;  %v1453_v50 = vor.u32 %v1452_v39, %v1449_v37  ;;  %v1163_v51 = vrot.slane %v1161_v40, 5  ;;  %v211_v58 = vld [vmem:[%s4229_s0 + $0x8] sm:$0xf]  ;;  %v210_v59 = vld [vmem:[%s4229_s0 + $0x4] sm:$0xf] }
   0xd   :  { %v1151_v52 = vrot.slane %v1149_v41, 4  ;;  %v1154_v53 = vrot.slane %v1152_v42, 5  ;;  %v542_v54 = vshrl.u32 %v509_v44, 16  ;;  %v545_v55 = vshll.u32 %v509_v44, 16  ;;  %v2436_v10 = vld [vmem:[%s4229_s0 + $0x34] sm:$0xf] }
   0xe   :  { %158 = vrot.lane.b32.xlu1 %v141_v29, %s2696_s16  ;;  %1073 = vrot.lane.b32.xlu0 %v2430_v30, %s2696_s16  ;;  %v533_v56 = vshrl.u32 %v508_v45, 16  ;;  %v536_v57 = vshll.u32 %v508_v45, 16  ;;  %v1463_v60 = vrot.slane %v1462_v48, 4  ;;  %v1454_v61 = vrot.slane %v1453_v50, 4  ;;  %v2460_v11 = vld [vmem:[%s4229_s0 + $0x38] sm:$0xf] }
   0xf   :  { %v1164_v62 = vor.u32 %v1163_v51, %v1160_v49  ;;  %v1155_v63 = vor.u32 %v1154_v53, %v1151_v52  ;;  %v544_v0 = vrot.slane %v542_v54, 4  ;;  %v547_v1 = vrot.slane %v545_v55, 5  ;;  %v510_v22 = vld [vmem:[%s4229_s0 + $0x10] sm:$0xf]  ;;  %v144_v23 = vld [vmem:[%s4229_s0 + $0x18] sm:$0xf] }
  0x10   :  { %v535_v2 = vrot.slane %v533_v56, 4  ;;  %v235_v3 = vshrl.u32 %v211_v58, 16  ;;  %v538_v4 = vrot.slane %v536_v57, 5  ;;  %v238_v5 = vshll.u32 %v211_v58, 16  ;;  %v143_v24 = vld [vmem:[%s4229_s0 + $0x14] sm:$0xf] }
  0x11   :  { %v226_v6 = vshrl.u32 %v210_v59, 16  ;;  %v229_v7 = vshll.u32 %v210_v59, 16  ;;  %v1165_v8 = vrot.slane %v1164_v62, 4  ;;  %v1156_v9 = vrot.slane %v1155_v63, 4  ;;  %v2437_v25 = vld [vmem:[%s4229_s0 + $0x38] sm:$0xf] }
  0x12   :  { %586 = vrot.lane.b32.xlu1 %v522_v35, %s2696_s16  ;;  %160 = vrot.lane.b32.xlu0 %v142_v43, %s2696_s16  ;;  %v548_v12 = vor.u32 %v547_v1, %v544_v0  ;;  %v237_v13 = vrot.slane %v235_v3, 4  ;;  %v539_v14 = vor.u32 %v538_v4, %v535_v2  ;;  %v240_v15 = vrot.slane %v238_v5, 5  ;;  %v511_v34 = vld [vmem:[%s4229_s0 + $0x14] sm:$0xf]  ;;  %v213_v39 = vld [vmem:[%s4229_s0 + $0x10] sm:$0xf] }
  0x13   :  { %v228_v16 = vrot.slane %v226_v6, 4  ;;  %v231_v17 = vrot.slane %v229_v7, 5  ;;  %v1167_v18 = vshrl.u32 %v2436_v10, 16  ;;  %v1170_v19 = vshll.u32 %v2436_v10, 16  ;;  %v212_v40 = vld [vmem:[%s4229_s0 + $0xc] sm:$0xf] }
  0x14   :  { %v1465_v20 = vshrl.u32 %v2460_v11, 16  ;;  %v1468_v21 = vshll.u32 %v2460_v11, 16  ;;  %v549_v26 = vrot.slane %v548_v12, 4  ;;  %v540_v27 = vrot.slane %v539_v14, 4  ;;  %v2648_v45 = vld [vmem:[%s4230_s1 + $0x40] sm:$0xff]   ;;  %v2650_v55 = vld [vmem:[%s4230_s1 + $0x48] sm:$0xff]  }
  0x15   :  { %v241_v28 = vor.u32 %v240_v15, %v237_v13  ;;  %v232_v29 = vor.u32 %v231_v17, %v228_v16  ;;  %v1169_v30 = vrot.slane %v1167_v18, 4  ;;  %v1172_v31 = vrot.slane %v1170_v19, 5  ;;  %v2649_v50 = vld [vmem:[%s4230_s1] sm:$0xff]   ;;  %2534 = vmatprep.subr.bf16.mxu0 %v2648_v45  ;;  %2628 = vmatprep.subr.bf16.mxu1 %v2648_v45  ;;  %v2842_v63 = vld [vmem:[%s4229_s0 + $0x8] sm:$0xf]  ;;  %v2652_v5 = vld [vmem:[%s4230_s1 + $0x50] sm:$0xff]  }
  0x16   :  { %279 = vrot.lane.b32.xlu1 %v224_v46, %s2697_s27  ;;  %588 = vrot.lane.b32.xlu0 %v531_v47, %s2696_s16  ;;  %v1467_v32 = vrot.slane %v1465_v20, 4  ;;  %v551_v33 = vshrl.u32 %v510_v22, 16  ;;  %v1470_v35 = vrot.slane %v1468_v21, 5  ;;  %v554_v36 = vshll.u32 %v510_v22, 16  ;;  %v2849_v4 = vld [vmem:[%s4229_s0 + $0x4] sm:$0xf] }
  0x17   :  { %v1176_v37 = vshrl.u32 %v2437_v25, 16  ;;  %v1179_v38 = vshll.u32 %v2437_v25, 16  ;;  %v242_v41 = vrot.slane %v241_v28, 4  ;;  %v233_v42 = vrot.slane %v232_v29, 4  ;;  %2535 = vmatpush3.bf16.msra.mxu0 %v2649_v50  ;;  %2636 = vmatpush3.bf16.msra.mxu1 %v2649_v50  ;;  %v2858_v10 = vld [vmem:[%s4229_s0 + $0x4] sm:$0xf] }
  0x18   :  { %v560_v43 = vshrl.u32 %v511_v34, 16  ;;  %v563_v44 = vshll.u32 %v511_v34, 16  ;;  %v1173_v46 = vor.u32 %v1172_v31, %v1169_v30  ;;  %v553_v47 = vrot.slane %v551_v33, 4  ;;  %2536 = vmatprep.subr.bf16.mxu0 %v2650_v55  ;;  %2629 = vmatprep.subr.bf16.mxu1 %v2650_v55  ;;  %v2863_v11 = vld [vmem:[%s4229_s0] sm:$0xf]  ;;  %v2654_v33 = vld [vmem:[%s4230_s1 + $0x58] sm:$0xff]  }
  0x19   :  { %v253_v48 = vshrl.u32 %v213_v39, 16  ;;  %v256_v49 = vshll.u32 %v213_v39, 16  ;;  %v1471_v51 = vor.u32 %v1470_v35, %v1467_v32  ;;  %v556_v52 = vrot.slane %v554_v36, 5  ;;  %v2869_v14 = vld [vmem:[%s4229_s0 + $0x34] sm:$0xf] }
  0x1a   :  { %1492 = vrot.lane.b32.xlu1 %v1463_v60, %s2696_s16  ;;  %1490 = vrot.lane.b32.xlu0 %v1454_v61, %s2696_s16  ;;  %v1178_v53 = vrot.slane %v1176_v37, 4  ;;  %v1181_v54 = vrot.slane %v1179_v38, 5  ;;  %v244_v56 = vshrl.u32 %v212_v40, 16  ;;  %v247_v57 = vshll.u32 %v212_v40, 16  ;;  %v2651_v60 = vld [vmem:[%s4230_s1 + $0x8] sm:$0xff]  }
  0x1b   :  { %v562_v58 = vrot.slane %v560_v43, 4  ;;  %v565_v59 = vrot.slane %v563_v44, 5  ;;  %v255_v61 = vrot.slane %v253_v48, 4  ;;  %v258_v62 = vrot.slane %v256_v49, 5  ;;  %2537 = vmatpush3.bf16.msra.mxu0 %v2651_v60  ;;  %2637 = vmatpush3.bf16.msra.mxu1 %v2651_v60  ;;  %v2461_v17 = vld [vmem:[%s4229_s0 + $0x3c] sm:$0xf] }
  0x1c   :  { %v1174_v0 = vrot.slane %v1173_v46, 4  ;;  %v1472_v1 = vrot.slane %v1471_v51, 4  ;;  %v557_v2 = vor.u32 %v556_v52, %v553_v47  ;;  %v1182_v3 = vor.u32 %v1181_v54, %v1178_v53  ;;  %2538 = vmatprep.subr.bf16.mxu0 %v2652_v5  ;;  %2630 = vmatprep.subr.bf16.mxu1 %v2652_v5  ;;  %v2882_v22 = vld [vmem:[%s4229_s0 + $0x30] sm:$0xf]  ;;  %v2424_v28 = vld [vmem:[%s4229_s0 + $0x20] sm:$0xf] }
  0x1d   :  { %v246_v6 = vrot.slane %v244_v56, 4  ;;  %v249_v7 = vrot.slane %v247_v57, 5  ;;  %v259_v12 = vor.u32 %v258_v62, %v255_v61  ;;  %v673_v13 = vshrl.u32 %v2849_v4, 16  ;;  %v2908_v38 = vld [vmem:[%s4229_s0 + $0x18] sm:$0xf]  ;;  %v2656_v48 = vld [vmem:[%s4230_s1 + $0x60] sm:$0xff]  }
  0x1e   :  { %1192 = vrot.lane.b32.xlu1 %v1165_v8, %s2697_s27  ;;  %1190 = vrot.lane.b32.xlu0 %v1156_v9, %s2697_s27  ;;  %v566_v8 = vor.u32 %v565_v59, %v562_v58  ;;  %v680_v9 = vshrl.u32 %v2842_v63, 16  ;;  %v558_v15 = vrot.slane %v557_v2, 4  ;;  %v1183_v16 = vrot.slane %v1182_v3, 4  ;;  %v2655_v44 = vld [vmem:[%s4230_s1 + $0x18] sm:$0xff]   ;;  %v2421_v47 = vld [vmem:[%s4229_s0 + $0x30] sm:$0xf] }
  0x1f   :  { %v250_v18 = vor.u32 %v249_v7, %v246_v6  ;;  %v683_v19 = vshll.u32 %v2842_v63, 16  ;;  %v366_v20 = vshrl.u32 %v2858_v10, 16  ;;  %v359_v21 = vshrl.u32 %v2863_v11, 16  ;;  %v951_v46 = vld [vmem:[#allocation2 + $0x9c] sm:$0x1]  ;;  %v2658_v7 = vld [vmem:[%s4230_s1 + $0x68] sm:$0xff]  }
  0x20   :  { %v1593_v25 = vshrl.u32 %v2869_v14, 16  ;;  %v260_v29 = vrot.slane %v259_v12, 4  ;;  %v675_v30 = vrot.slane %v673_v13, 7  ;;  %v676_v31 = vshll.u32 %v2849_v4, 16  ;;  %v27_v52 = vld [vmem:[#allocation2 + $0xc] sm:$0x1] }
  0x21   :  { %v369_v32 = vshll.u32 %v2858_v10, 16  ;;  %v362_v34 = vshll.u32 %v2863_v11, 16  ;;  %v1474_v35 = vshrl.u32 %v2461_v17, 16  ;;  %v1477_v36 = vshll.u32 %v2461_v17, 16  ;;  %v48_v53 = vld [vmem:[%s4229_s0] sm:$0xf] }
  0x22   :  { %164 = vrot.lane.b32.xlu1 %v144_v23, %s2696_s16  ;;  %162 = vrot.lane.b32.xlu0 %v143_v24, %s2696_s16  ;;  %v567_v23 = vrot.slane %v566_v8, 4  ;;  %v682_v24 = vrot.slane %v680_v9, 7  ;;  %v1287_v37 = vshrl.u32 %v2882_v22, 16  ;;  %v251_v39 = vrot.slane %v250_v18, 4  ;;  %v2941_v58 = vld [vmem:[%s4229_s0 + $0x34] sm:$0xf] }
  0x23   :  { %v368_v40 = vrot.slane %v366_v20, 7  ;;  %v2920_v45 = vrot.slane %v1593_v25, 7  ;;  %v1290_v50 = vshll.u32 %v2882_v22, 16  ;;  %v1476_v54 = vrot.slane %v1474_v35, 4  ;;  %v2947_v61 = vld [vmem:[%s4229_s0 + $0x18] sm:$0xf] }
  0x24   :  { %v2928_v49 = vor.u32 %v683_v19, %v682_v24  ;;  %v1479_v55 = vrot.slane %v1477_v36, 5  ;;  %v1289_v56 = vrot.slane %v1287_v37, 7  ;;  %v678_v59 = vor.u32 %v676_v31, %v675_v30  ;;  %v49_v6 = vld [vmem:[%s4229_s0 + $0x4] sm:$0xf]  ;;  %v2975_v17 = vld [vmem:[%s4229_s0 + $0x2c] sm:$0xf] }
  0x25   :  { %v569_v60 = vshrl.u32 %v2908_v38, 16  ;;  %v952_v62 = vsel %vm2913_vm3, 0, %v951_v46  ;;  %v997_v63 = vshrl.u32 %v2421_v47, 16  ;;  %v2954_v2 = vor.u32 %v369_v32, %v368_v40  ;;  %v954_v30 = vld [vmem:[#allocation2 + $0xa8] sm:$0x1]  ;;  %v2660_v31 = vld [vmem:[%s4230_s1 + $0x70] sm:$0xff]  }
  0x26   :  { %592 = vrot.lane.b32.xlu1 %v549_v26, %s2696_s16  ;;  %590 = vrot.lane.b32.xlu0 %v540_v27, %s2696_s16  ;;  %v2888_v26 = vld [vmem:[%s4229_s0 + $0x38] sm:$0xf]  ;;  %v2653_v27 = vld [vmem:[%s4230_s1 + $0x10] sm:$0xff]   ;;  %953 = vst [vmem:[#allocation2 + $0x9c] sm:$0x1] %v952_v62  ;;  %v1000_v3 = vshll.u32 %v2421_v47, 16  ;;  %v1480_v12 = vor.u32 %v1479_v55, %v1476_v54  ;;  %v3020_v40 = vor.u32 %v1290_v50, %v1289_v56 }
  0x27   :  { %2539 = vmatpush3.bf16.msra.mxu0 %v2653_v27  ;;  %2638 = vmatpush3.bf16.msra.mxu1 %v2653_v27  ;;  %v1600_v51 = vshrl.u32 %v2888_v26, 16  ;;  %v1603_v57 = vshll.u32 %v2888_v26, 16  ;;  %v28_v4 = vsel %vm2913_vm3, 0, %v27_v52  ;;  %v56_v5 = vshrl.u32 %v48_v53, 16  ;;  %v2989_v27 = vld [vmem:[%s4229_s0 + $0x14] sm:$0xf] }
  0x28   :  { %2540 = vmatprep.subr.bf16.mxu0 %v2654_v33  ;;  %2631 = vmatprep.subr.bf16.mxu1 %v2654_v33  ;;  %v999_v9 = vrot.slane %v997_v63, 7  ;;  %29 = vst [vmem:[#allocation2 + $0xc] sm:$0x1] %v28_v4  ;;  %v59_v10 = vshll.u32 %v48_v53, 16  ;;  %v2977_v18 = vrot.slane %v569_v60, 4  ;;  %v572_v19 = vshll.u32 %v2908_v38, 16 }
  0x29   :  { %v2964_v8 = vrot.slane %v1600_v51, 7  ;;  %v58_v13 = vrot.slane %v56_v5, 7  ;;  %v1294_v20 = vshrl.u32 %v2941_v58, 16  ;;  %v1297_v24 = vshll.u32 %v2941_v58, 16  ;;  %v3006_v37 = vld [vmem:[%s4229_s0 + $0x34] sm:$0xf] }
  0x2a   :  { %283 = vrot.lane.b32.xlu1 %v242_v41, %s2697_s27  ;;  %281 = vrot.lane.b32.xlu0 %v233_v42, %s2697_s27  ;;  %v361_v41 = vrot.slane %v359_v21, 7  ;;  %v1596_v42 = vshll.u32 %v2869_v14, 16  ;;  %v63_v21 = vshrl.u32 %v49_v6, 16  ;;  %v271_v25 = vshrl.u32 %v2947_v61, 16  ;;  %v3026_v46 = vld [vmem:[%s4229_s0 + $0x8] sm:$0xf] }
  0x2b   :  { %2541 = vmatpush3.bf16.msra.mxu0 %v2655_v44  ;;  %2639 = vmatpush3.bf16.msra.mxu1 %v2655_v44  ;;  %v61_v33 = vor.u32 %v59_v10, %v58_v13  ;;  %v990_v36 = vshrl.u32 %v2975_v17, 16  ;;  %v33_v44 = vld [vmem:[#allocation2 + $0x24] sm:$0x1]  ;;  %v3028_v47 = vrot.slane %v572_v19, 5  ;;  %v3033_v14 = vld [vmem:[%s4229_s0 + $0x10] sm:$0xf] }
  0x2c   :  { %2542 = vmatprep.subr.bf16.mxu0 %v2656_v48  ;;  %2632 = vmatprep.subr.bf16.mxu1 %v2656_v48  ;;  %v2968_v11 = vor.u32 %v362_v34, %v361_v41  ;;  %v65_v34 = vrot.slane %v63_v21, 7  ;;  %v3014_v38 = vor.u32 %v1596_v42, %v2920_v45  ;;  %v993_v41 = vshll.u32 %v2975_v17, 16  ;;  %v2662_v55 = vld [vmem:[%s4230_s1 + $0x78] sm:$0xff]   ;;  %v2404_v56 = vld [vmem:[%s4229_s0 + $0x8] sm:$0xf] }
  0x2d   :  { %v1037_v42 = vld [vmem:[#allocation2 + $0x9c] sm:$0xf]  ;;  %v992_v45 = vrot.slane %v990_v36, 7  ;;  %v955_v48 = vsel %vm2913_vm3, 0, %v954_v30  ;;  %v1296_v50 = vrot.slane %v1294_v20, 7  ;;  %v3040_v51 = vrot.slane %v271_v25, 4 }
  0x2e   :  { %1194 = vrot.lane.b32.xlu1 %v1174_v0, %s2697_s27  ;;  %1494 = vrot.lane.b32.xlu0 %v1472_v1, %s2696_s16  ;;  %v30_v0 = vld [vmem:[#allocation2 + $0x18] sm:$0x1]  ;;  %v2657_v1 = vld [vmem:[%s4230_s1 + $0x20] sm:$0xff]   ;;  %v274_v52 = vshll.u32 %v2947_v61, 16  ;;  %956 = vst [vmem:[#allocation2 + $0xa8] sm:$0x1] %v955_v48 }
  0x2f   :  { %2543 = vmatpush3.bf16.msra.mxu0 %v2657_v1  ;;  %2640 = vmatpush3.bf16.msra.mxu1 %v2657_v1  ;;  %v115_v54 = vld [vmem:[#allocation2 + $0xc] sm:$0xf]  ;;  %v262_v60 = vshrl.u32 %v2989_v27, 16  ;;  %v1004_v63 = vshrl.u32 %v3006_v37, 16  ;;  %v3071_v1 = vor.u32 %v1603_v57, %v2964_v8  ;;  %v995_v4 = vor.u32 %v993_v41, %v992_v45  ;;  %v2663_v8 = vld [vmem:[%s4230_s1 + $0x38] sm:$0xff]  }
  0x30   :  { %2544 = vmatprep.subr.bf16.mxu0 %v2658_v7  ;;  %2633 = vmatprep.subr.bf16.mxu1 %v2658_v7  ;;  %v3058_v61 = vld [vmem:[%s4229_s0 + $0xc] sm:$0xf]  ;;  %v116_v62 = vsel %vm2996_vm5, %v61_v33, %v115_v54  ;;  %v34_v5 = vsel %vm2913_vm3, 0, %v33_v44  ;;  %v36_v7 = vld [vmem:[#allocation2 + $0x30] sm:$0x1]  ;;  %v73_v26 = vshll.u32 %v3026_v46, 16 }
  0x31   :  { %117 = vst [vmem:[#allocation2 + $0xc] sm:$0xf] %v116_v62  ;;  %v1006_v10 = vrot.slane %v1004_v63, 7  ;;  %35 = vst [vmem:[#allocation2 + $0x24] sm:$0x1] %v34_v5  ;;  %v694_v13 = vshrl.u32 %v3033_v14, 16 }
  0x32   :  { %594 = vrot.lane.b32.xlu1 %v558_v15, %s2696_s16  ;;  %1196 = vrot.lane.b32.xlu0 %v1183_v16, %s2697_s27  ;;  %v31_v15 = vsel %vm2913_vm3, 0, %v30_v0  ;;  %v948_v16 = vld [vmem:[#allocation2 + $0x90] sm:$0x1]  ;;  %v1007_v0 = vshll.u32 %v3006_v37, 16  ;;  %v51_v57 = vld [vmem:[%s4229_s0 + $0xc] sm:$0xf] }
  0x33   :  { %32 = vst [vmem:[#allocation2 + $0x18] sm:$0x1] %v31_v15  ;;  %v949_v35 = vsel %vm2913_vm3, 0, %v948_v16  ;;  %v3096_v15 = vld [vmem:[%s4229_s0 + $0xc] sm:$0xf]  ;;  %v276_v19 = vrot.slane %v274_v52, 5 }
  0x34   :  { %950 = vst [vmem:[#allocation2 + $0x90] sm:$0x1] %v949_v35  ;;  %v957_v17 = vld [vmem:[#allocation2 + $0xb4] sm:$0x1]  ;;  %v1009_v21 = vor.u32 %v1007_v0, %v1006_v10  ;;  %v37_v58 = vsel %vm2913_vm3, 0, %v36_v7  ;;  %v3111_v35 = vrot.slane %v262_v60, 4 }
  0x35   :  { %38 = vst [vmem:[#allocation2 + $0x30] sm:$0x1] %v37_v58  ;;  %v958_v33 = vsel %vm2913_vm3, 0, %v957_v17  ;;  %v380_v36 = vshrl.u32 %v3096_v15, 16  ;;  %v3117_v37 = vld [vmem:[%s4229_s0 + $0x8] sm:$0xf] }
  0x36   :  { %1061 = vrot.lane.b32.xlu1 %v2424_v28, %s2696_s16  ;;  %596 = vrot.lane.b32.xlu0 %v567_v23, %s2696_s16  ;;  %v2659_v23 = vld [vmem:[%s4230_s1 + $0x28] sm:$0xff]   ;;  %v1002_v28 = vor.u32 %v1000_v3, %v999_v9  ;;  %v265_v9 = vshll.u32 %v2989_v27, 16  ;;  %v80_v27 = vshll.u32 %v51_v57, 16  ;;  %959 = vst [vmem:[#allocation2 + $0xb4] sm:$0x1] %v958_v33  ;;  %vm480_vm7 = vcmask 519427  }
  0x37   :  { %2545 = vmatpush3.bf16.msra.mxu0 %v2659_v23  ;;  %2641 = vmatpush3.bf16.msra.mxu1 %v2659_v23  ;;  %v697_v23 = vshll.u32 %v3033_v14, 16  ;;  %v3130_v45 = vld [vmem:[%s4229_s0 + $0x38] sm:$0xf]  ;;  %v3135_v48 = vld [vmem:[%s4229_s0 + $0x3c] sm:$0xf]  ;;  %v376_v5 = vshll.u32 %v3117_v37, 16 }
  0x38   :  { %v1038_v53 = vsel %vm2996_vm5, %v1002_v28, %v1037_v42  ;;  %2546 = vmatprep.subr.bf16.mxu0 %v2660_v31  ;;  %2634 = vmatprep.subr.bf16.mxu1 %v2660_v31  ;;  %v2423_v28 = vld [vmem:[%s4229_s0 + $0x38] sm:$0xf]  ;;  %v277_v42 = vor.u32 %v276_v19, %v3040_v51  ;;  %v3142_v51 = vrot.slane %v694_v13, 7  ;;  %v121_v54 = vld [vmem:[#allocation2 + $0x24] sm:$0xf]  ;;  %v2699_v33 = vmov 0  }
  0x39   :  { %1039 = vst [vmem:[#allocation2 + $0x9c] sm:$0xf] %v1038_v53  ;;  %v1014_v44 = vshll.u32 %v2423_v28, 16  ;;  %v690_v53 = vshll.u32 %v3058_v61, 16  ;;  %vm183_vm6 = vsmask.f32 7950 }
  0x3a   :  { %287 = vrot.lane.b32.xlu1 %v260_v29, %s2697_s27  ;;  %285 = vrot.lane.b32.xlu0 %v251_v39, %s2697_s27  ;;  %v66_v29 = vshll.u32 %v49_v6, 16  ;;  %v3016_v39 = vrot.slane %v1480_v12, 4  ;;  %v118_v3 = vld [vmem:[#allocation2 + $0x18] sm:$0xf]  ;;  %v70_v6 = vshrl.u32 %v3026_v46, 16  ;;  %v3090_v12 = vor.u32 %v1297_v24, %v1296_v50  ;;  %vm3176_vm8 = vmand %vm480_vm7, %vm183_vm6 }
  0x3b   :  { %v1034_v20 = vld [vmem:[#allocation2 + $0x90] sm:$0xf]  ;;  %v687_v24 = vshrl.u32 %v3058_v61, 16  ;;  %v464_v46 = vld [vmem:[%s4229_s0] sm:$0xf]  ;;  %vm136_vm9 = vcmask 519424  }
  0x3c   :  { %v68_v22 = vor.u32 %v66_v29, %v65_v34  ;;  %v72_v16 = vrot.slane %v70_v6, 7  ;;  %v1035_v25 = vsel %vm2996_vm5, %v995_v4, %v1034_v20  ;;  %v1040_v29 = vld [vmem:[#allocation2 + $0xa8] sm:$0xf]  ;;  %v1011_v34 = vshrl.u32 %v2423_v28, 16  ;;  %472 = vst.msk [vmem:[#allocation2 + $0x4] sm:$0xf] %vm19_vm2, %v464_v46 }
  0x3d   :  { %1036 = vst [vmem:[#allocation2 + $0x90] sm:$0xf] %v1035_v25  ;;  %v1041_v41 = vsel %vm2996_vm5, %v1009_v21, %v1040_v29  ;;  %v39_v50 = vld [vmem:[#allocation2 + $0x3c] sm:$0x1]  ;;  %v3144_v52 = vrot.slane %v687_v24, 7  ;;  %v373_v4 = vshrl.u32 %v3117_v37, 16 }
  0x3e   :  { %723 = vrot.lane.b32.xlu1 %v2928_v49, %s2697_s27  ;;  %721 = vrot.lane.b32.xlu0 %v678_v59, %s2697_s27  ;;  %v2661_v49 = vld [vmem:[%s4230_s1 + $0x30] sm:$0xff]   ;;  %v2403_v59 = vld [vmem:[%s4229_s0 + $0x4] sm:$0xf]  ;;  %v75_v30 = vor.u32 %v73_v26, %v72_v16  ;;  %1042 = vst [vmem:[#allocation2 + $0xa8] sm:$0xf] %v1041_v41  ;;  %v40_v63 = vsel %vm2913_vm3, 0, %v39_v50 }
  0x3f   :  { %2547 = vmatpush3.bf16.msra.mxu0 %v2661_v49  ;;  %2642 = vmatpush3.bf16.msra.mxu1 %v2661_v49  ;;  %v1013_v49 = vrot.slane %v1011_v34, 7  ;;  %v3158_v60 = vld [vmem:[%s4229_s0 + $0x1c] sm:$0xf]  ;;  %v124_v6 = vld [vmem:[#allocation2 + $0x30] sm:$0xf]  ;;  %vm182_vm10 = vcmask 781827  }
  0x40   :  { %2548 = vmatprep.subr.bf16.mxu0 %v2662_v55  ;;  %2635 = vmatprep.subr.bf16.mxu1 %v2662_v55  ;;  %41 = vst [vmem:[#allocation2 + $0x3c] sm:$0x1] %v40_v63  ;;  %v1043_v13 = vld [vmem:[#allocation2 + $0xb4] sm:$0xf]  ;;  %v2431_v16 = vld [vmem:[%s4229_s0 + $0x20] sm:$0xf]  ;;  %vm3483_vm13 = vmand %vm182_vm10, %vm183_vm6 }
  0x41   :  { %v1016_v62 = vor.u32 %v1014_v44, %v1013_v49  ;;  %v2451_v20 = vld [vmem:[%s4229_s0 + $0x34] sm:$0xf]  ;;  %v2426_v21 = vld [vmem:[%s4229_s0 + $0x28] sm:$0xf]  ;;  %v578_v58 = vshrl.u32 %v3158_v60, 16  ;;  %v1125_v41 = vshll.u32 %v2431_v16, 16 }
  0x42   :  { %416 = vrot.lane.b32.xlu1 %v2954_v2, %s2698_s21  ;;  %414 = vrot.lane.b32.xlu0 %v2968_v11, %s2698_s21  ;;  %v119_v2 = vsel %vm2996_vm5, %v68_v22, %v118_v3  ;;  %v575_v11 = vor.u32 %v3028_v47, %v2977_v18  ;;  %v77_v18 = vshrl.u32 %v51_v57, 16  ;;  %v3125_v22 = vrot.slane %v265_v9, 5  ;;  %1375 = vst.msk [vmem:[#allocation2 + $0xa0] sm:$0xf] %vm19_vm2, %v2451_v20  ;;  %v2450_v25 = vld [vmem:[%s4229_s0 + $0x30] sm:$0xf] }
  0x43   :  { %120 = vst [vmem:[#allocation2 + $0x18] sm:$0xf] %v119_v2  ;;  %2549 = vmatpush3.bf16.msra.mxu0 %v2663_v8  ;;  %2643 = vmatpush3.bf16.msra.mxu1 %v2663_v8  ;;  %v3162_v3 = vrot.slane %v277_v42, 4  ;;  %v1301_v9 = vshrl.u32 %v3130_v45, 16  ;;  %v1607_v2 = vshrl.u32 %v3135_v48, 16  ;;  %v1044_v17 = vsel %vm2996_vm5, %v1016_v62, %v1043_v13 }
  0x44   :  { %v79_v31 = vrot.slane %v77_v18, 7  ;;  %v576_v47 = vrot.slane %v575_v11, 4  ;;  %v2455_v8 = vld [vmem:[%s4229_s0 + $0x24] sm:$0xf]  ;;  %v2454_v11 = vld [vmem:[%s4229_s0 + $0x20] sm:$0xf]  ;;  %v699_v13 = vor.u32 %v697_v23, %v3142_v51 }
  0x45   :  { %v482_v19 = vld [vmem:[#allocation2 + $0x4] sm:$0x8]  ;;  %1045 = vst [vmem:[#allocation2 + $0xb4] sm:$0xf] %v1044_v17  ;;  %v3217_v28 = vld [vmem:[%s4229_s0 + $0x3c] sm:$0xf] }
  0x46   :  { %782 = vrot.lane.b32.xlu1 %v2404_v56, %s2698_s21  ;;  %780 = vrot.lane.b32.xlu0 %v2403_v59, %s2698_s21  ;;  %v82_v55 = vor.u32 %v80_v27, %v79_v31  ;;  %v383_v56 = vshll.u32 %v3096_v15, 16  ;;  %v122_v59 = vsel %vm2996_vm5, %v75_v30, %v121_v54  ;;  %v483_v18 = vsel %vm3176_vm8, 0, %v482_v19  ;;  %1374 = vst.msk [vmem:[#allocation2 + $0x94] sm:$0xf] %vm19_vm2, %v2450_v25  ;;  %v2474_v49 = vld [vmem:[%s4229_s0 + $0x38] sm:$0xf] }
  0x47   :  { %123 = vst [vmem:[#allocation2 + $0x24] sm:$0xf] %v122_v59  ;;  %v581_v27 = vshll.u32 %v3158_v60, 16  ;;  %v1420_v29 = vshrl.u32 %v2455_v8, 16  ;;  %v1423_v30 = vshll.u32 %v2455_v8, 16  ;;  %v1411_v31 = vshrl.u32 %v2454_v11, 16 }
  0x48   :  { %v125_v10 = vsel %vm2996_vm5, %v82_v55, %v124_v6  ;;  %484 = vst [vmem:[#allocation2 + $0x4] sm:$0x8] %v483_v18  ;;  %20 = vst.msk [vmem:[#allocation2] sm:$0xf] %vm19_vm2, %v2699_v33  ;;  %v3233_v44 = vrot.slane %v373_v4, 7  ;;  %v3235_v46 = vrot.slane %v1301_v9, 7 }
  0x49   :  { %126 = vst [vmem:[#allocation2 + $0x30] sm:$0xf] %v125_v10  ;;  %808 = vst.msk [vmem:[#allocation2 + $0x5c] sm:$0xf] %vm19_vm2, %v2699_v33  ;;  %v1610_v42 = vshll.u32 %v3135_v48, 16  ;;  %v3245_v54 = vrot.slane %v1607_v2, 7 }
  0x4a   :  { %1621 = vrot.lane.b32.xlu1 %v3014_v38, %s2697_s27  ;;  %1496 = vrot.lane.b32.xlu0 %v3016_v39, %s2696_s16  ;;  %v52_v38 = vld [vmem:[%s4229_s0 + $0x10] sm:$0xf]  ;;  %v3153_v39 = vrot.slane %v380_v36, 7  ;;  %935 = vst.msk [vmem:[#allocation2 + $0x60] sm:$0xf] %vm19_vm2, %v2699_v33  ;;  %v1122_v36 = vshrl.u32 %v2431_v16, 16 }
  0x4b   :  { %v84_v0 = vshrl.u32 %v52_v38, 16  ;;  %v87_v7 = vshll.u32 %v52_v38, 16  ;;  %1698 = vst.msk [vmem:[#allocation2 + $0xbc] sm:$0xf] %vm19_vm2, %v2699_v33  ;;  %v2473_v50 = vld [vmem:[%s4229_s0 + $0x34] sm:$0xf] }
  0x4c   :  { %v3247_v55 = vrot.slane %v578_v58, 4  ;;  %v1308_v59 = vshrl.u32 %v3217_v28, 16  ;;  %v583_v60 = vrot.slane %v581_v27, 5  ;;  %v1422_v62 = vrot.slane %v1420_v29, 4  ;;  %v3257_v2 = vld [vmem:[%s4229_s0 + $0x18] sm:$0xf] }
  0x4d   :  { %v86_v57 = vrot.slane %v84_v0, 7  ;;  %v1425_v63 = vrot.slane %v1423_v30, 5  ;;  %v1413_v0 = vrot.slane %v1411_v31, 4  ;;  %v1127_v9 = vrot.slane %v1125_v41, 5  ;;  %v3275_v17 = vld [vmem:[%s4229_s0 + $0x14] sm:$0xf] }
  0x4e   :  { %1322 = vrot.lane.b32.xlu1 %v3020_v40, %s2698_s21  ;;  %1623 = vrot.lane.b32.xlu0 %v3071_v1, %s2697_s27  ;;  %v465_v40 = vld [vmem:[%s4229_s0 + $0x4] sm:$0xf]  ;;  %v268_v1 = vor.u32 %v3125_v22, %v3111_v35  ;;  %v1414_v35 = vshll.u32 %v2454_v11, 16  ;;  %v127_v22 = vld [vmem:[#allocation2 + $0x3c] sm:$0xf]  ;;  %v3270_v16 = vrot.slane %v1308_v59, 7 }
  0x4f   :  { %473 = vst.msk [vmem:[#allocation2 + $0x10] sm:$0xf] %vm19_vm2, %v465_v40  ;;  %v89_v24 = vor.u32 %v87_v7, %v86_v57  ;;  %v1124_v7 = vrot.slane %v1122_v36, 4  ;;  %v45_v57 = vld [vmem:[#allocation2 + $0x54] sm:$0x1]  ;;  %v1311_v40 = vshll.u32 %v3217_v28, 16  ;;  %v1426_v14 = vor.u32 %v1425_v63, %v1422_v62 }
  0x50   :  { %v3231_v34 = vrot.slane %v268_v1, 4  ;;  %v1416_v6 = vrot.slane %v1414_v35, 5  ;;  %v1393_v1 = vld [vmem:[#allocation2 + $0xa0] sm:$0x8]  ;;  %v46_v8 = vsel %vm2913_vm3, 0, %v45_v57  ;;  %v378_v62 = vor.u32 %v376_v5, %v3233_v44 }
  0x51   :  { %v128_v38 = vsel %vm2996_vm5, %v89_v24, %v127_v22  ;;  %v54_v11 = vld [vmem:[%s4229_s0 + $0x18] sm:$0xf]  ;;  %v1394_v19 = vsel %vm3176_vm8, 0, %v1393_v1  ;;  %v1390_v20 = vld [vmem:[#allocation2 + $0x94] sm:$0x8]  ;;  %v1128_v25 = vor.u32 %v1127_v9, %v1124_v7  ;;  %v692_v22 = vor.u32 %v690_v53, %v3144_v52 }
  0x52   :  { %598 = vrot.lane.b32.xlu1 %v576_v47, %s2696_s16  ;;  %1324 = vrot.lane.b32.xlu0 %v3090_v12, %s2698_s21  ;;  %v2425_v12 = vld [vmem:[%s4229_s0 + $0x24] sm:$0xf]  ;;  %v1304_v47 = vshll.u32 %v3130_v45, 16  ;;  %129 = vst [vmem:[#allocation2 + $0x3c] sm:$0xf] %v128_v38  ;;  %v1391_v51 = vsel %vm3176_vm8, 0, %v1390_v20  ;;  %v1417_v24 = vor.u32 %v1416_v6, %v1413_v0 }
  0x53   :  { %47 = vst [vmem:[#allocation2 + $0x54] sm:$0x1] %v46_v8  ;;  %v2457_v23 = vld [vmem:[%s4229_s0 + $0x2c] sm:$0xf]  ;;  %1395 = vst [vmem:[#allocation2 + $0xa0] sm:$0x8] %v1394_v19 }
  0x54   :  { %v98_v58 = vshrl.u32 %v54_v11, 16  ;;  %v42_v18 = vld [vmem:[#allocation2 + $0x48] sm:$0x1]  ;;  %1392 = vst [vmem:[#allocation2 + $0x94] sm:$0x8] %v1391_v51  ;;  %v101_v29 = vshll.u32 %v54_v11, 16 }
  0x55   :  { %v2456_v27 = vld [vmem:[%s4229_s0 + $0x28] sm:$0xf]  ;;  %v43_v30 = vsel %vm2913_vm3, 0, %v42_v18  ;;  %v53_v31 = vld [vmem:[%s4229_s0 + $0x14] sm:$0xf]  ;;  %v1441_v61 = vshll.u32 %v2457_v23, 16 }
  0x56   :  { %1065 = vrot.lane.b32.xlu1 %v2426_v21, %s2696_s16  ;;  %1063 = vrot.lane.b32.xlu0 %v2425_v12, %s2696_s16  ;;  %v485_v4 = vld [vmem:[#allocation2 + $0x10] sm:$0x8]  ;;  %v584_v21 = vor.u32 %v583_v60, %v3247_v55  ;;  %v708_v12 = vshrl.u32 %v3257_v2, 16  ;;  %v100_v35 = vrot.slane %v98_v58, 7  ;;  %44 = vst [vmem:[#allocation2 + $0x48] sm:$0x1] %v43_v30 }
  0x57   :  { %v486_v10 = vsel %vm3176_vm8, 0, %v485_v4  ;;  %v91_v36 = vshrl.u32 %v53_v31, 16  ;;  %v94_v41 = vshll.u32 %v53_v31, 16  ;;  %v1438_v55 = vshrl.u32 %v2457_v23, 16  ;;  %v467_v59 = vld [vmem:[%s4229_s0 + $0xc] sm:$0xf] }
  0x58   :  { %487 = vst [vmem:[#allocation2 + $0x10] sm:$0x8] %v486_v10  ;;  %v466_v38 = vld [vmem:[%s4229_s0 + $0x8] sm:$0xf]  ;;  %v1429_v15 = vshrl.u32 %v2456_v27, 16  ;;  %v103_v52 = vor.u32 %v101_v29, %v100_v35  ;;  %v3319_v60 = vrot.slane %v1417_v24, 4 }
  0x59   :  { %v93_v53 = vrot.slane %v91_v36, 7  ;;  %475 = vst.msk [vmem:[#allocation2 + $0x28] sm:$0xf] %vm19_vm2, %v467_v59  ;;  %474 = vst.msk [vmem:[#allocation2 + $0x1c] sm:$0xf] %vm19_vm2, %v466_v38  ;;  %v3329_v63 = vrot.slane %v1128_v25, 4  ;;  %v1306_v59 = vor.u32 %v1304_v47, %v3235_v46  ;;  %v1612_v38 = vor.u32 %v1610_v42, %v3245_v54 }
  0x5a   :  { %1680 = vrot.lane.b32.xlu1 %v2474_v49, %s2698_s21  ;;  %1678 = vrot.lane.b32.xlu0 %v2473_v50, %s2698_s21  ;;  %v385_v49 = vor.u32 %v383_v56, %v3153_v39  ;;  %v701_v50 = vshrl.u32 %v3275_v17, 16  ;;  %v3315_v56 = vrot.slane %v584_v21, 4  ;;  %v3317_v39 = vrot.slane %v1426_v14, 4  ;;  %v2433_v4 = vld [vmem:[%s4229_s0 + $0x28] sm:$0xf] }
  0x5b   :  { %v711_v0 = vshll.u32 %v3257_v2, 16  ;;  %v133_v6 = vld [vmem:[#allocation2 + $0x54] sm:$0xf]  ;;  %v96_v7 = vor.u32 %v94_v41, %v93_v53  ;;  %v3335_v9 = vrot.slane %v708_v12, 7  ;;  %v704_v57 = vshll.u32 %v3275_v17, 16  ;;  %v2674_v17 = vld [vmem:[%s4230_s1 + $0x80] sm:$0xff]  }
  0x5c   :  { %v3337_v10 = vrot.slane %v701_v50, 7  ;;  %v2432_v37 = vld [vmem:[%s4229_s0 + $0x24] sm:$0xf]  ;;  %v134_v5 = vsel %vm2996_vm5, %v103_v52, %v133_v6  ;;  %v3351_v1 = vld [vmem:[%s4229_s0 + $0x10] sm:$0xf]  ;;  %v3353_v8 = vrot.slane %v1438_v55, 4  ;;  %2608 = vmatprep.subr.bf16.mxu1 %v2674_v17 }
  0x5d   :  { %v3355_v11 = vrot.slane %v1441_v61, 5  ;;  %v3357_v19 = vrot.slane %v1429_v15, 4  ;;  %135 = vst [vmem:[#allocation2 + $0x54] sm:$0xf] %v134_v5  ;;  %v1140_v21 = vshrl.u32 %v2433_v4, 16  ;;  %v1143_v23 = vshll.u32 %v2433_v4, 16 }
  0x5e   :  { %291 = vrot.lane.b32.xlu1 %v3162_v3, %s2697_s27  ;;  %289 = vrot.lane.b32.xlu0 %v3231_v34, %s2697_s27  ;;  %v3324_v3 = vld [vmem:[%s4229_s0 + $0x14] sm:$0xf]  ;;  %v1432_v34 = vshll.u32 %v2456_v27, 16  ;;  %v130_v14 = vld [vmem:[#allocation2 + $0x48] sm:$0xf]  ;;  %v1131_v51 = vshrl.u32 %v2432_v37, 16 }
  0x5f   :  { %v394_v44 = vshrl.u32 %v3324_v3, 16  ;;  %v1134_v58 = vshll.u32 %v2432_v37, 16  ;;  %v131_v18 = vsel %vm2996_vm5, %v96_v7, %v130_v14  ;;  %v2406_v24 = vld [vmem:[%s4229_s0 + $0x10] sm:$0xf]  ;;  %v2405_v25 = vld [vmem:[%s4229_s0 + $0xc] sm:$0xf]  ;;  %v1444_v52 = vor.u32 %v3355_v11, %v3353_v8 }
  0x60   :  { %v1434_v20 = vrot.slane %v1432_v34, 5  ;;  %132 = vst [vmem:[#allocation2 + $0x48] sm:$0xf] %v131_v18  ;;  %v491_v27 = vld [vmem:[#allocation2 + $0x28] sm:$0x8]  ;;  %v397_v35 = vshll.u32 %v3324_v3, 16  ;;  %v1313_v34 = vor.u32 %v1311_v40, %v3270_v16 }
  0x61   :  { %v488_v29 = vld [vmem:[#allocation2 + $0x1c] sm:$0x8]  ;;  %v492_v30 = vsel %vm3176_vm8, 0, %v491_v27  ;;  %v468_v12 = vld [vmem:[%s4229_s0 + $0x10] sm:$0xf]  ;;  %v387_v36 = vshrl.u32 %v3351_v1, 16 }
  0x62   :  { %727 = vrot.lane.b32.xlu1 %v699_v13, %s2697_s27  ;;  %725 = vrot.lane.b32.xlu0 %v692_v22, %s2697_s27  ;;  %v2452_v13 = vld [vmem:[%s4229_s0 + $0x38] sm:$0xf]  ;;  %v489_v31 = vsel %vm3176_vm8, 0, %v488_v29  ;;  %493 = vst [vmem:[#allocation2 + $0x28] sm:$0x8] %v492_v30  ;;  %v1142_v22 = vrot.slane %v1140_v21, 4  ;;  %v1435_v45 = vor.u32 %v1434_v20, %v3357_v19 }
  0x63   :  { %1376 = vst.msk [vmem:[#allocation2 + $0xac] sm:$0xf] %vm19_vm2, %v2452_v13  ;;  %v3385_v41 = vld [vmem:[%s4229_s0 + $0x18] sm:$0xf]  ;;  %490 = vst [vmem:[#allocation2 + $0x1c] sm:$0x8] %v489_v31 }
  0x64   :  { %476 = vst.msk [vmem:[#allocation2 + $0x34] sm:$0xf] %vm19_vm2, %v468_v12  ;;  %v1133_v50 = vrot.slane %v1131_v51, 4  ;;  %v1136_v55 = vrot.slane %v1134_v58, 5  ;;  %v939_v61 = vld [vmem:[#allocation2 + $0x6c] sm:$0x1] }
  0x65   :  { %v2417_v15 = vld [vmem:[%s4229_s0 + $0x20] sm:$0xf]  ;;  %v940_v46 = vsel %vm2913_vm3, 0, %v939_v61  ;;  %v469_v47 = vld [vmem:[%s4229_s0 + $0x14] sm:$0xf]  ;;  %v401_v42 = vshrl.u32 %v3385_v41, 16 }
  0x66   :  { %420 = vrot.lane.b32.xlu1 %v385_v49, %s2698_s21  ;;  %418 = vrot.lane.b32.xlu0 %v378_v62, %s2698_s21  ;;  %v1145_v49 = vrot.slane %v1143_v23, 5  ;;  %v969_v48 = vshrl.u32 %v2417_v15, 16  ;;  %941 = vst [vmem:[#allocation2 + $0x6c] sm:$0x1] %v940_v46  ;;  %v972_v53 = vshll.u32 %v2417_v15, 16  ;;  %v3419_v7 = vrot.slane %v394_v44, 7 }
  0x67   :  { %477 = vst.msk [vmem:[#allocation2 + $0x40] sm:$0xf] %vm19_vm2, %v469_v47  ;;  %v3415_v62 = vld [vmem:[%s4229_s0 + $0x1c] sm:$0xf]  ;;  %v390_v37 = vshll.u32 %v3351_v1, 16  ;;  %v1137_v8 = vor.u32 %v1136_v55, %v1133_v50  ;;  %v3429_v40 = vrot.slane %v387_v36, 7  ;;  %v713_v46 = vor.u32 %v711_v0, %v3335_v9 }
  0x68   :  { %v971_v6 = vrot.slane %v969_v48, 7  ;;  %v1146_v5 = vor.u32 %v1145_v49, %v1142_v22  ;;  %v3425_v28 = vld [vmem:[%s4229_s0 + $0x1c] sm:$0xf]  ;;  %v3431_v16 = vrot.slane %v1444_v52, 4  ;;  %v3433_v44 = vrot.slane %v1435_v45, 4 }
  0x69   :  { %v404_v11 = vshll.u32 %v3385_v41, 16  ;;  %v3436_v20 = vrot.slane %v401_v42, 7  ;;  %v715_v21 = vshrl.u32 %v3415_v62, 16  ;;  %vm180_vm11 = vcmask 781824   ;;  %v2475_v50 = vld [vmem:[%s4229_s0 + $0x3c] sm:$0xf] }
  0x6a   :  { %786 = vrot.lane.b32.xlu1 %v2406_v24, %s2698_s21  ;;  %784 = vrot.lane.b32.xlu0 %v2405_v25, %s2698_s21  ;;  %v1396_v54 = vld [vmem:[#allocation2 + $0xac] sm:$0x8]  ;;  %v974_v13 = vor.u32 %v972_v53, %v971_v6  ;;  %v718_v23 = vshll.u32 %v3415_v62, 16  ;;  %v408_v51 = vshrl.u32 %v3425_v28, 16  ;;  %v3443_v58 = vrot.slane %v1146_v5, 4 }
  0x6b   :  { %v1397_v4 = vsel %vm3176_vm8, 0, %v1396_v54  ;;  %v494_v19 = vld [vmem:[#allocation2 + $0x34] sm:$0x8]  ;;  %v3445_v18 = vrot.slane %v1137_v8, 4  ;;  %v3450_v24 = vld [vmem:[%s4229_s0 + $0x28] sm:$0xf]  ;;  %v706_v48 = vor.u32 %v704_v57, %v3337_v10  ;;  %v399_v10 = vor.u32 %v397_v35, %v3419_v7 }
  0x6c   :  { %1398 = vst [vmem:[#allocation2 + $0xac] sm:$0x8] %v1397_v4  ;;  %v495_v14 = vsel %vm3176_vm8, 0, %v494_v19  ;;  %v3458_v25 = vld [vmem:[%s4229_s0 + $0x24] sm:$0xf]  ;;  %v3460_v30 = vrot.slane %v715_v21, 7  ;;  %v392_v57 = vor.u32 %v390_v37, %v3429_v40 }
  0x6d   :  { %496 = vst [vmem:[#allocation2 + $0x34] sm:$0x8] %v495_v14  ;;  %v1025_v27 = vld [vmem:[#allocation2 + $0x6c] sm:$0xf]  ;;  %v411_v49 = vshll.u32 %v3425_v28, 16  ;;  %vm324_vm12 = vcmask 1041152  }
  0x6e   :  { %1326 = vrot.lane.b32.xlu1 %v1306_v59, %s2698_s21  ;;  %1625 = vrot.lane.b32.xlu0 %v1612_v38, %s2697_s27  ;;  %v497_v29 = vld [vmem:[#allocation2 + $0x40] sm:$0x8]  ;;  %v1026_v31 = vsel %vm2996_vm5, %v974_v13, %v1025_v27  ;;  %v24_v55 = vld [vmem:[#allocation2] sm:$0x1]  ;;  %v1572_v59 = vshrl.u32 %v3450_v24, 16  ;;  %v1575_v15 = vshll.u32 %v3450_v24, 16  ;;  %vm3576_vm0 = vmand %vm324_vm12, %vm22_vm1 }
  0x6f   :  { %v498_v12 = vsel %vm3176_vm8, 0, %v497_v29  ;;  %1027 = vst [vmem:[#allocation2 + $0x6c] sm:$0xf] %v1026_v31  ;;  %v25_v38 = vsel %vm2913_vm3, 0, %v24_v55  ;;  %vm301_vm14 = vsmask.f32 3328 }
  0x70   :  { %499 = vst [vmem:[#allocation2 + $0x40] sm:$0x8] %v498_v12  ;;  %26 = vst [vmem:[#allocation2] sm:$0x1] %v25_v38  ;;  %v2453_v45 = vld [vmem:[%s4229_s0 + $0x3c] sm:$0xf] }
  0x71   :  { %137 = vst.msk [vmem:[#allocation2] sm:$0xf] %vm136_vm9, %v2699_v33  ;;  %v945_v47 = vld [vmem:[#allocation2 + $0x84] sm:$0x1]  ;;  %v3508_v42 = vrot.slane %v1572_v59, 7  ;;  %v1568_v54 = vshll.u32 %v3458_v25, 16  ;;  %vm3586_vm7 = vmand %vm136_vm9, %vm301_vm14 }
  0x72   :  { %600 = vrot.lane.b32.xlu1 %v3315_v56, %s2696_s16  ;;  %1328 = vrot.lane.b32.xlu0 %v1313_v34, %s2698_s21  ;;  %v3466_v56 = vrot.slane %v408_v51, 7  ;;  %181 = vst.msk [vmem:[#allocation2] sm:$0xf] %vm180_vm11, %v2699_v33  ;;  %v470_v53 = vld [vmem:[%s4229_s0 + $0x18] sm:$0xf]  ;;  %v946_v2 = vsel %vm2913_vm3, 0, %v945_v47  ;;  %vm3611_vm10 = vmand %vm180_vm11, %vm301_vm14 }
  0x73   :  { %1377 = vst.msk [vmem:[#allocation2 + $0xb8] sm:$0xf] %vm19_vm2, %v2453_v45  ;;  %478 = vst.msk [vmem:[#allocation2 + $0x4c] sm:$0xf] %vm19_vm2, %v470_v53  ;;  %v2419_v5 = vld [vmem:[%s4229_s0 + $0x28] sm:$0xf] }
  0x74   :  { %v1070_v36 = vpop.permute.xlu1 %1069  ;;  %v153_v22 = vpop.permute.xlu0 %152  ;;  %947 = vst [vmem:[#allocation2 + $0x84] sm:$0x1] %v946_v2  ;;  %v942_v8 = vld [vmem:[#allocation2 + $0x78] sm:$0x1]  ;;  %v3542_v3 = vld [vmem:[%s4229_s0 + $0x24] sm:$0xf] }
  0x75   :  { %1086 = vst.msk [vmem:[#allocation2 + $0x9c] sm:$0xf] %vm136_vm9, %v1070_v36  ;;  %173 = vst.msk [vmem:[#allocation2 + $0xc] sm:$0xf] %vm136_vm9, %v153_v22  ;;  %v983_v1 = vshrl.u32 %v2419_v5, 16  ;;  %v986_v35 = vshll.u32 %v2419_v5, 16 }
  0x76   :  { %1484 = vrot.lane.b32.xlu1 %v3317_v39, %s2696_s16  ;;  %1482 = vrot.lane.b32.xlu0 %v3319_v60, %s2696_s16  ;;  %v1565_v39 = vshrl.u32 %v3458_v25, 16  ;;  %v943_v7 = vsel %vm2913_vm3, 0, %v942_v8  ;;  %v2418_v37 = vld [vmem:[%s4229_s0 + $0x24] sm:$0xf]  ;;  %v3552_v40 = vld [vmem:[%s4229_s0 + $0x20] sm:$0xf] }
  0x77   :  { %944 = vst [vmem:[#allocation2 + $0x78] sm:$0x1] %v943_v7  ;;  %v976_v21 = vshrl.u32 %v2418_v37, 16  ;;  %v979_v14 = vshll.u32 %v2418_v37, 16  ;;  %v471_v13 = vld [vmem:[%s4229_s0 + $0x1c] sm:$0xf] }
  0x78   :  { %v155_v52 = vpop.permute.xlu1 %154  ;;  %v1068_v60 = vpop.permute.xlu0 %1067  ;;  %v3537_v19 = vrot.slane %v1565_v39, 7  ;;  %v2447_v51 = vld [vmem:[%s4229_s0 + $0x24] sm:$0xf]  ;;  %vm638_vm15 = vcmask 778752   ;;  %479 = vst.msk [vmem:[#allocation2 + $0x58] sm:$0xf] %vm19_vm2, %v471_v13 }
  0x79   :  { %174 = vst.msk [vmem:[#allocation2 + $0x18] sm:$0xf] %vm136_vm9, %v155_v52  ;;  %1085 = vst.msk [vmem:[#allocation2 + $0x90] sm:$0xf] %vm136_vm9, %v1068_v60  ;;  %v612_v36 = vld [vmem:[#allocation2 + $0x4] sm:$0xf] }
  0x7a   :  { %1184 = vrot.lane.b32.xlu1 %v3329_v63, %s2697_s27  ;;  %1682 = vrot.lane.b32.xlu0 %v2475_v50, %s2698_s21  ;;  %v185_v22 = vld [vmem:[#allocation2] sm:$0x8]  ;;  %1371 = vst.msk [vmem:[#allocation2 + $0x70] sm:$0xf] %vm19_vm2, %v2447_v51  ;;  %v2408_v59 = vld [vmem:[%s4229_s0 + $0x18] sm:$0xf] }
  0x7b   :  { %v2407_v38 = vld [vmem:[%s4229_s0 + $0x14] sm:$0xf]  ;;  %v186_v52 = vsel %vm3483_vm13, 0, %v185_v22  ;;  %v326_v60 = vld [vmem:[#allocation2] sm:$0x1]  ;;  %v985_v45 = vrot.slane %v983_v1, 7 }
  0x7c   :  { %v1105_v63 = vld [vmem:[#allocation2 + $0x9c] sm:$0x8]  ;;  %v188_v34 = vld [vmem:[#allocation2 + $0xc] sm:$0x8]  ;;  %v1072_v4 = vpop.permute.xlu1 %1071  ;;  %v157_v6 = vpop.permute.xlu0 %156  ;;  %187 = vst [vmem:[#allocation2] sm:$0x8] %v186_v52 }
  0x7d   :  { %v1106_v0 = vsel %vm3483_vm13, 0, %v1105_v63  ;;  %v189_v9 = vsel %vm3483_vm13, 0, %v188_v34  ;;  %1087 = vst.msk [vmem:[#allocation2 + $0xa8] sm:$0xf] %vm136_vm9, %v1072_v4  ;;  %175 = vst.msk [vmem:[#allocation2 + $0x24] sm:$0xf] %vm136_vm9, %v157_v6  ;;  %v988_v2 = vor.u32 %v986_v35, %v985_v45 }
  0x7e   :  { %1107 = vst [vmem:[#allocation2 + $0x9c] sm:$0x8] %v1106_v0  ;;  %190 = vst [vmem:[#allocation2 + $0xc] sm:$0x8] %v189_v9  ;;  %731 = vrot.lane.b32.xlu1 %v713_v46, %s2697_s27  ;;  %729 = vrot.lane.b32.xlu0 %v706_v48, %s2697_s27  ;;  %v327_v48 = vsel %vm3576_vm0, 0, %v326_v60  ;;  %v978_v53 = vrot.slane %v976_v21, 7 }
  0x7f   :  { %v1399_v47 = vld [vmem:[#allocation2 + $0xb8] sm:$0x8]  ;;  %v2446_v63 = vld [vmem:[%s4229_s0 + $0x20] sm:$0xf]  ;;  %v1266_v34 = vshrl.u32 %v3542_v3, 16  ;;  %vm809_vm12 = vcmask 257027  }
  0x80   :  { %v191_v27 = vld [vmem:[#allocation2 + $0x18] sm:$0x8]  ;;  %v1102_v29 = vld [vmem:[#allocation2 + $0x90] sm:$0x8]  ;;  %v159_v31 = vpop.permute.xlu1 %158  ;;  %v1074_v12 = vpop.permute.xlu0 %1073  ;;  %328 = vst [vmem:[#allocation2] sm:$0x1] %v327_v48  ;;  %v981_v8 = vor.u32 %v979_v14, %v978_v53 }
  0x81   :  { %v192_v50 = vsel %vm3483_vm13, 0, %v191_v27  ;;  %v1103_v55 = vsel %vm3483_vm13, 0, %v1102_v29  ;;  %176 = vst.msk [vmem:[#allocation2 + $0x30] sm:$0xf] %vm136_vm9, %v159_v31  ;;  %1088 = vst.msk [vmem:[#allocation2 + $0xb4] sm:$0xf] %vm136_vm9, %v1074_v12 }
  0x82   :  { %193 = vst [vmem:[#allocation2 + $0x18] sm:$0x8] %v192_v50  ;;  %1104 = vst [vmem:[#allocation2 + $0x90] sm:$0x8] %v1103_v55  ;;  %424 = vrot.lane.b32.xlu1 %v399_v10, %s2698_s21  ;;  %422 = vrot.lane.b32.xlu0 %v392_v57, %s2698_s21  ;;  %v1400_v4 = vsel %vm3176_vm8, 0, %v1399_v47  ;;  %v1259_v57 = vshrl.u32 %v3552_v40, 16 }
  0x83   :  { %v500_v6 = vld [vmem:[#allocation2 + $0x4c] sm:$0x8]  ;;  %1370 = vst.msk [vmem:[#allocation2 + $0x64] sm:$0xf] %vm19_vm2, %v2446_v63  ;;  %1401 = vst [vmem:[#allocation2 + $0xb8] sm:$0x8] %v1400_v4 }
  0x84   :  { %v1108_v17 = vld [vmem:[#allocation2 + $0xa8] sm:$0x8]  ;;  %v194_v0 = vld [vmem:[#allocation2 + $0x24] sm:$0x8]  ;;  %v587_v9 = vpop.permute.xlu1 %586  ;;  %v161_v10 = vpop.permute.xlu0 %160  ;;  %v501_v5 = vsel %vm3176_vm8, 0, %v500_v6  ;;  %v1269_v6 = vshll.u32 %v3542_v3, 16 }
  0x85   :  { %v1109_v1 = vsel %vm3483_vm13, 0, %v1108_v17  ;;  %v195_v7 = vsel %vm3483_vm13, 0, %v194_v0  ;;  %v613_v35 = vsel %vm3586_vm7, %v587_v9, %v612_v36  ;;  %177 = vst.msk [vmem:[#allocation2 + $0x3c] sm:$0xf] %vm136_vm9, %v161_v10  ;;  %v615_v21 = vld [vmem:[#allocation2 + $0x10] sm:$0xf] }
  0x86   :  { %502 = vst [vmem:[#allocation2 + $0x4c] sm:$0x8] %v501_v5  ;;  %1110 = vst [vmem:[#allocation2 + $0xa8] sm:$0x8] %v1109_v1  ;;  %790 = vrot.lane.b32.xlu1 %v2408_v59, %s2698_s21  ;;  %788 = vrot.lane.b32.xlu0 %v2407_v38, %s2698_s21  ;;  %v303_v14 = vld [vmem:[#allocation2 + $0xc] sm:$0xf] }
  0x87   :  { %196 = vst [vmem:[#allocation2 + $0x24] sm:$0x8] %v195_v7  ;;  %614 = vst [vmem:[#allocation2 + $0x4] sm:$0xf] %v613_v35  ;;  %v1031_v13 = vld [vmem:[#allocation2 + $0x84] sm:$0xf] }
  0x88   :  { %v1028_v51 = vld [vmem:[#allocation2 + $0x78] sm:$0xf]  ;;  %v1032_v27 = vsel %vm2996_vm5, %v988_v2, %v1031_v13  ;;  %v1381_v12 = vld [vmem:[#allocation2 + $0x70] sm:$0x8]  ;;  %v2449_v36 = vld [vmem:[%s4229_s0 + $0x2c] sm:$0xf]  ;;  %v280_v55 = vpop.permute.xlu1 %279  ;;  %v589_v59 = vpop.permute.xlu0 %588 }
  0x89   :  { %v1029_v29 = vsel %vm2996_vm5, %v981_v8, %v1028_v51  ;;  %v503_v31 = vld [vmem:[#allocation2 + $0x58] sm:$0x8]  ;;  %v197_v22 = vld [vmem:[#allocation2 + $0x30] sm:$0x8]  ;;  %v1111_v50 = vld [vmem:[#allocation2 + $0xb4] sm:$0x8]  ;;  %v304_v45 = vsel %vm3611_vm10, %v280_v55, %v303_v14  ;;  %v616_v48 = vsel %vm3586_vm7, %v589_v59, %v615_v21  ;;  %v720_v51 = vor.u32 %v718_v23, %v3460_v30 }
  0x8a   :  { %1033 = vst [vmem:[#allocation2 + $0x84] sm:$0xf] %v1032_v27  ;;  %1030 = vst [vmem:[#allocation2 + $0x78] sm:$0xf] %v1029_v29  ;;  %v504_v38 = vsel %vm3176_vm8, 0, %v503_v31  ;;  %v1382_v52 = vsel %vm3176_vm8, 0, %v1381_v12  ;;  %1488 = vrot.lane.b32.xlu1 %v3431_v16, %s2696_s16  ;;  %1486 = vrot.lane.b32.xlu0 %v3433_v44, %s2696_s16  ;;  %v413_v30 = vor.u32 %v411_v49, %v3466_v56 }
  0x8b   :  { %1373 = vst.msk [vmem:[#allocation2 + $0x88] sm:$0xf] %vm19_vm2, %v2449_v36  ;;  %v198_v32 = vsel %vm3483_vm13, 0, %v197_v22  ;;  %v1112_v60 = vsel %vm3483_vm13, 0, %v1111_v50  ;;  %v1521_v47 = vld [vmem:[#allocation2 + $0xa0] sm:$0xf]  ;;  %vm3643_vm5 = vmand %vm638_vm15, %vm22_vm1 }
  0x8c   :  { %505 = vst [vmem:[#allocation2 + $0x58] sm:$0x8] %v504_v38  ;;  %1383 = vst [vmem:[#allocation2 + $0x70] sm:$0x8] %v1382_v52  ;;  %v1518_v53 = vld [vmem:[#allocation2 + $0x94] sm:$0xf]  ;;  %v1493_v44 = vpop.permute.xlu1 %1492  ;;  %v1491_v0 = vpop.permute.xlu0 %1490 }
  0x8d   :  { %199 = vst [vmem:[#allocation2 + $0x30] sm:$0x8] %v198_v32  ;;  %1113 = vst [vmem:[#allocation2 + $0xb4] sm:$0x8] %v1112_v60  ;;  %v1378_v63 = vld [vmem:[#allocation2 + $0x64] sm:$0x8]  ;;  %v1519_v35 = vsel %vm3586_vm7, %v1491_v0, %v1518_v53 }
  0x8e   :  { %305 = vst [vmem:[#allocation2 + $0xc] sm:$0xf] %v304_v45  ;;  %617 = vst [vmem:[#allocation2 + $0x10] sm:$0xf] %v616_v48  ;;  %v3651_v2 = vld [vmem:[%s4229_s0 + $0x30] sm:$0xf]  ;;  %1188 = vrot.lane.b32.xlu1 %v3443_v58, %s2697_s27  ;;  %1186 = vrot.lane.b32.xlu0 %v3445_v18, %s2697_s27 }
  0x8f   :  { %v1379_v16 = vsel %vm3176_vm8, 0, %v1378_v63  ;;  %v200_v17 = vld [vmem:[#allocation2 + $0x3c] sm:$0x8]  ;;  %v3657_v9 = vrot.slane %v1266_v34, 7  ;;  %v1262_v10 = vshll.u32 %v3552_v40, 16  ;;  %vm3665_vm1 = vmand %vm809_vm12, %vm183_vm6  ;;  %v1522_v34 = vsel %vm3586_vm7, %v1493_v44, %v1521_v47 }
  0x90   :  { %1380 = vst [vmem:[#allocation2 + $0x64] sm:$0x8] %v1379_v16  ;;  %v2448_v5 = vld [vmem:[%s4229_s0 + $0x28] sm:$0xf]  ;;  %v640_v1 = vld [vmem:[#allocation2 + $0x4] sm:$0x1]  ;;  %v1193_v12 = vpop.permute.xlu1 %1192  ;;  %v1191_v23 = vpop.permute.xlu0 %1190  ;;  %vm3787_vm6 = vmand %vm19_vm2, %vm301_vm14 }
  0x91   :  { %v201_v7 = vsel %vm3483_vm13, 0, %v200_v17  ;;  %v3677_v21 = vrot.slane %v1259_v57, 7  ;;  %v3682_v14 = vld [vmem:[%s4229_s0 + $0x2c] sm:$0xf]  ;;  %1372 = vst.msk [vmem:[#allocation2 + $0x7c] sm:$0xf] %vm19_vm2, %v2448_v5  ;;  %v406_v57 = vor.u32 %v404_v11, %v3436_v20  ;;  %vm3894_vm14 = vmand %vm180_vm11, %vm113_vm4 }
  0x92   :  { %v641_v13 = vsel %vm3643_vm5, 0, %v640_v1  ;;  %202 = vst [vmem:[#allocation2 + $0x3c] sm:$0x8] %v201_v7  ;;  %1523 = vst [vmem:[#allocation2 + $0xa0] sm:$0xf] %v1522_v34  ;;  %v1586_v27 = vshrl.u32 %v3651_v2, 16  ;;  %733 = vrot.lane.b32.xlu0 %v720_v51, %s2697_s27  ;;  %v1570_v51 = vor.u32 %v1568_v54, %v3537_v19 }
  0x93   :  { %1520 = vst [vmem:[#allocation2 + $0x94] sm:$0xf] %v1519_v35  ;;  %v3701_v29 = vld [vmem:[%s4229_s0 + $0x2c] sm:$0xf]  ;;  %v811_v31 = vld [vmem:[#allocation2 + $0x8] sm:$0x8]  ;;  %426 = vrot.lane.b32.xlu1 %v406_v57, %s2698_s21  ;;  %v1577_v57 = vor.u32 %v1575_v15, %v3508_v42 }
  0x94   :  { %642 = vst [vmem:[#allocation2 + $0x4] sm:$0x1] %v641_v13  ;;  %v1589_v58 = vshll.u32 %v3651_v2, 16  ;;  %v1387_v18 = vld [vmem:[#allocation2 + $0x88] sm:$0x8]  ;;  %v812_v41 = vsel %vm3665_vm1, 0, %v811_v31  ;;  %v165_v17 = vpop.permute.xlu1 %164  ;;  %v163_v44 = vpop.permute.xlu0 %162 }
  0x95   :  { %v814_v11 = vld [vmem:[#allocation2 + $0x14] sm:$0x8]  ;;  %v1217_v20 = vld [vmem:[#allocation2 + $0x9c] sm:$0xf]  ;;  %v1214_v62 = vld [vmem:[#allocation2 + $0x90] sm:$0xf] }
  0x96   :  { %v1388_v36 = vsel %vm3176_vm8, 0, %v1387_v18  ;;  %813 = vst [vmem:[#allocation2 + $0x8] sm:$0x8] %v812_v41  ;;  %v815_v22 = vsel %vm3665_vm1, 0, %v814_v11  ;;  %v329_v50 = vld [vmem:[#allocation2 + $0xc] sm:$0x1]  ;;  %v1218_v59 = vsel %vm3611_vm10, %v1193_v12, %v1217_v20  ;;  %v1215_v38 = vsel %vm3611_vm10, %v1191_v23, %v1214_v62  ;;  %428 = vrot.lane.b32.xlu0 %v413_v30, %s2698_s21 }
  0x97   :  { %v643_v55 = vld [vmem:[#allocation2 + $0x10] sm:$0x1]  ;;  %v2409_v28 = vld [vmem:[%s4229_s0 + $0x1c] sm:$0xf]  ;;  %v1579_v56 = vshrl.u32 %v3682_v14, 16  ;;  %v1582_v49 = vshll.u32 %v3682_v14, 16 }
  0x98   :  { %1389 = vst [vmem:[#allocation2 + $0x88] sm:$0x8] %v1388_v36  ;;  %816 = vst [vmem:[#allocation2 + $0x14] sm:$0x8] %v815_v22  ;;  %v330_v52 = vsel %vm3576_vm0, 0, %v329_v50  ;;  %v644_v32 = vsel %vm3643_vm5, 0, %v643_v55  ;;  %792 = vrot.lane.b32.xlu1 %v2409_v28, %s2698_s21  ;;  %v593_v19 = vpop.permute.xlu1 %592  ;;  %v591_v11 = vpop.permute.xlu0 %590 }
  0x99   :  { %1219 = vst [vmem:[#allocation2 + $0x9c] sm:$0xf] %v1218_v59  ;;  %1216 = vst [vmem:[#allocation2 + $0x90] sm:$0xf] %v1215_v38  ;;  %v3728_v60 = vrot.slane %v1586_v27, 7  ;;  %v1280_v45 = vshrl.u32 %v3701_v29, 16 }
  0x9a   :  { %v2410_v48 = vld [vmem:[%s4229_s0 + $0x4] sm:$0xf]  ;;  %331 = vst [vmem:[#allocation2 + $0xc] sm:$0x1] %v330_v52  ;;  %645 = vst [vmem:[#allocation2 + $0x10] sm:$0x1] %v644_v32  ;;  %1613 = vrot.lane.b32.xlu0 %v1570_v51, %s2697_s27 }
  0x9b   :  { %v3737_v47 = vld [vmem:[%s4229_s0 + $0x28] sm:$0xf]  ;;  %v843_v63 = vshrl.u32 %v2410_v48, 16  ;;  %v846_v16 = vshll.u32 %v2410_v48, 16  ;;  %v1384_v0 = vld [vmem:[#allocation2 + $0x7c] sm:$0x8]  ;;  %v1264_v48 = vor.u32 %v1262_v10, %v3677_v21 }
  0x9c   :  { %v2411_v53 = vld [vmem:[%s4229_s0 + $0x8] sm:$0xf]  ;;  %v817_v7 = vld [vmem:[#allocation2 + $0x20] sm:$0x8]  ;;  %v1547_v34 = vld [vmem:[#allocation2 + $0xa0] sm:$0x1]  ;;  %1615 = vrot.lane.b32.xlu1 %v1577_v57, %s2697_s27  ;;  %v284_v21 = vpop.permute.xlu1 %283 }
  0x9d   :  { %v852_v5 = vshrl.u32 %v2411_v53, 16  ;;  %v855_v1 = vshll.u32 %v2411_v53, 16  ;;  %v1544_v35 = vld [vmem:[#allocation2 + $0x94] sm:$0x1]  ;;  %179 = vst.msk [vmem:[#allocation2 + $0x54] sm:$0xf] %vm136_vm9, %v165_v17 }
  0x9e   :  { %178 = vst.msk [vmem:[#allocation2 + $0x48] sm:$0xf] %vm136_vm9, %v163_v44  ;;  %v621_v13 = vld [vmem:[#allocation2 + $0x28] sm:$0xf]  ;;  %v1548_v27 = vsel %vm3643_vm5, 0, %v1547_v34  ;;  %v1545_v31 = vsel %vm3643_vm5, 0, %v1544_v35  ;;  %1314 = vrot.lane.b32.xlu0 %v1264_v48, %s2698_s21 }
  0x9f   :  { %v618_v18 = vld [vmem:[#allocation2 + $0x1c] sm:$0xf]  ;;  %v1385_v41 = vsel %vm3176_vm8, 0, %v1384_v0  ;;  %v845_v24 = vrot.slane %v843_v63, 4  ;;  %1549 = vst [vmem:[#allocation2 + $0xa0] sm:$0x1] %v1548_v27  ;;  %v622_v22 = vsel %vm3586_vm7, %v593_v19, %v621_v13  ;;  %v282_v0 = vpop.permute.xlu0 %281 }
  0xa0   :  { %1546 = vst [vmem:[#allocation2 + $0x94] sm:$0x1] %v1545_v31  ;;  %1386 = vst [vmem:[#allocation2 + $0x7c] sm:$0x8] %v1385_v41  ;;  %v848_v25 = vrot.slane %v846_v16, 5  ;;  %v854_v15 = vrot.slane %v852_v5, 4  ;;  %v619_v50 = vsel %vm3586_vm7, %v591_v11, %v618_v18 }
  0xa1   :  { %v857_v42 = vrot.slane %v855_v1, 5  ;;  %v818_v54 = vsel %vm3665_vm1, 0, %v817_v7  ;;  %v3760_v20 = vrot.slane %v1579_v56, 7  ;;  %v3762_v12 = vrot.slane %v1280_v45, 7  ;;  %v820_v23 = vld [vmem:[#allocation2 + $0x2c] sm:$0x8] }
  0xa2   :  { %v1283_v62 = vshll.u32 %v3701_v29, 16  ;;  %v1273_v26 = vshrl.u32 %v3737_v47, 16  ;;  %819 = vst [vmem:[#allocation2 + $0x20] sm:$0x8] %v818_v54  ;;  %v1241_v30 = vld [vmem:[#allocation2 + $0x9c] sm:$0x1]  ;;  %v849_v55 = vor.u32 %v848_v25, %v845_v24  ;;  %v1271_v45 = vor.u32 %v1269_v6, %v3657_v9 }
  0xa3   :  { %v1238_v36 = vld [vmem:[#allocation2 + $0x90] sm:$0x1]  ;;  %v858_v59 = vor.u32 %v857_v42, %v854_v15  ;;  %v2412_v38 = vld [vmem:[%s4229_s0 + $0xc] sm:$0xf]  ;;  %v1242_v28 = vsel %vm3576_vm0, 0, %v1241_v30  ;;  %v821_v3 = vsel %vm3665_vm1, 0, %v820_v23  ;;  %v1195_v30 = vpop.permute.xlu1 %1194 }
  0xa4   :  { %v1239_v56 = vsel %vm3576_vm0, 0, %v1238_v36  ;;  %623 = vst [vmem:[#allocation2 + $0x28] sm:$0xf] %v622_v22  ;;  %620 = vst [vmem:[#allocation2 + $0x1c] sm:$0xf] %v619_v50  ;;  %v850_v17 = vrot.slane %v849_v55, 4  ;;  %1316 = vrot.lane.b32.xlu1 %v1271_v45, %s2698_s21  ;;  %v1495_v36 = vpop.permute.xlu0 %1494 }
  0xa5   :  { %v309_v52 = vld [vmem:[#allocation2 + $0x24] sm:$0xf]  ;;  %v306_v32 = vld [vmem:[#allocation2 + $0x18] sm:$0xf]  ;;  %v913_v53 = vld [vmem:[#allocation2 + $0x8] sm:$0xf] }
  0xa6   :  { %v916_v63 = vld [vmem:[#allocation2 + $0x14] sm:$0xf]  ;;  %1243 = vst [vmem:[#allocation2 + $0x9c] sm:$0x1] %v1242_v28  ;;  %1240 = vst [vmem:[#allocation2 + $0x90] sm:$0x1] %v1239_v56  ;;  %v310_v35 = vsel %vm3611_vm10, %v284_v21, %v309_v52  ;;  %v307_v13 = vsel %vm3611_vm10, %v282_v0, %v306_v32  ;;  %v914_v25 = vsel %vm3787_vm6, %v850_v17, %v913_v53 }
  0xa7   :  { %v859_v44 = vrot.slane %v858_v59, 4  ;;  %v2413_v40 = vld [vmem:[%s4229_s0 + $0x10] sm:$0xf]  ;;  %v861_v6 = vshrl.u32 %v2412_v38, 16  ;;  %v206_v9 = vld [vmem:[#allocation2 + $0x54] sm:$0x8]  ;;  %v1591_v53 = vor.u32 %v1589_v58, %v3728_v60 }
  0xa8   :  { %v203_v10 = vld [vmem:[#allocation2 + $0x48] sm:$0x8]  ;;  %822 = vst [vmem:[#allocation2 + $0x2c] sm:$0x8] %v821_v3  ;;  %v864_v5 = vshll.u32 %v2412_v38, 16  ;;  %v870_v1 = vshrl.u32 %v2413_v40, 16 }
  0xa9   :  { %v207_v7 = vsel %vm3483_vm13, 0, %v206_v9  ;;  %v204_v34 = vsel %vm3483_vm13, 0, %v203_v10  ;;  %v2470_v57 = vld [vmem:[%s4229_s0 + $0x28] sm:$0xf]  ;;  %v823_v51 = vld [vmem:[#allocation2 + $0x38] sm:$0x8]  ;;  %v917_v15 = vsel %vm3787_vm6, %v859_v44, %v916_v63  ;;  %v1584_v63 = vor.u32 %v1582_v49, %v3760_v20  ;;  %v1197_v10 = vpop.permute.xlu0 %1196 }
  0xaa   :  { %v826_v27 = vld [vmem:[#allocation2 + $0x44] sm:$0x8]  ;;  %208 = vst [vmem:[#allocation2 + $0x54] sm:$0x8] %v207_v7  ;;  %205 = vst [vmem:[#allocation2 + $0x48] sm:$0x8] %v204_v34  ;;  %1672 = vrot.lane.b32.xlu1 %v2470_v57, %s2698_s21 }
  0xab   :  { %311 = vst [vmem:[#allocation2 + $0x24] sm:$0xf] %v310_v35  ;;  %308 = vst [vmem:[#allocation2 + $0x18] sm:$0xf] %v307_v13  ;;  %v1524_v31 = vld [vmem:[#allocation2 + $0xac] sm:$0xf]  ;;  %v1285_v35 = vor.u32 %v1283_v62, %v3762_v12 }
  0xac   :  { %v2469_v18 = vld [vmem:[%s4229_s0 + $0x24] sm:$0xf]  ;;  %v1275_v41 = vrot.slane %v1273_v26, 7  ;;  %v1276_v24 = vshll.u32 %v3737_v47, 16  ;;  %v1220_v42 = vld [vmem:[#allocation2 + $0xa8] sm:$0xf]  ;;  %v1525_v28 = vsel %vm3586_vm7, %v1495_v36, %v1524_v31 }
  0xad   :  { %915 = vst [vmem:[#allocation2 + $0x8] sm:$0xf] %v914_v25  ;;  %918 = vst [vmem:[#allocation2 + $0x14] sm:$0xf] %v917_v15  ;;  %v863_v54 = vrot.slane %v861_v6, 4  ;;  %v866_v19 = vrot.slane %v864_v5, 5  ;;  %v1221_v38 = vsel %vm3611_vm10, %v1195_v30, %v1220_v42  ;;  %1670 = vrot.lane.b32.xlu0 %v2469_v18, %s2698_s21  ;;  %v595_v6 = vpop.permute.xlu1 %594  ;;  %v597_v18 = vpop.permute.xlu0 %596 }
  0xae   :  { %v872_v11 = vrot.slane %v870_v1, 4  ;;  %v873_v23 = vshll.u32 %v2413_v40, 16  ;;  %v824_v26 = vsel %vm3665_vm1, 0, %v823_v51  ;;  %v827_v47 = vsel %vm3665_vm1, 0, %v826_v27  ;;  %v2414_v22 = vld [vmem:[%s4229_s0 + $0x14] sm:$0xf]  ;;  %1619 = vrot.lane.b32.xlu1 %v1591_v53, %s2697_s27 }
  0xaf   :  { %v2415_v50 = vld [vmem:[%s4229_s0 + $0x18] sm:$0xf]  ;;  %v649_v55 = vld [vmem:[#allocation2 + $0x28] sm:$0x1]  ;;  %v646_v59 = vld [vmem:[#allocation2 + $0x1c] sm:$0x1]  ;;  %v867_v56 = vor.u32 %v866_v19, %v863_v54  ;;  %v1278_v13 = vor.u32 %v1276_v24, %v1275_v41 }
  0xb0   :  { %v875_v52 = vrot.slane %v873_v23, 5  ;;  %825 = vst [vmem:[#allocation2 + $0x38] sm:$0x8] %v824_v26  ;;  %828 = vst [vmem:[#allocation2 + $0x44] sm:$0x8] %v827_v47  ;;  %v650_v32 = vsel %vm3643_vm5, 0, %v649_v55 }
  0xb1   :  { %v647_v45 = vsel %vm3643_vm5, 0, %v646_v59  ;;  %1222 = vst [vmem:[#allocation2 + $0xa8] sm:$0xf] %v1221_v38  ;;  %1526 = vst [vmem:[#allocation2 + $0xac] sm:$0xf] %v1525_v28  ;;  %v868_v44 = vrot.slane %v867_v56, 4  ;;  %1617 = vrot.lane.b32.xlu0 %v1584_v63, %s2697_s27  ;;  %v1062_v31 = vpop.permute.xlu1 %1061 }
  0xb2   :  { %v624_v48 = vld [vmem:[#allocation2 + $0x34] sm:$0xf]  ;;  %v919_v17 = vld [vmem:[#allocation2 + $0x20] sm:$0xf]  ;;  %651 = vst [vmem:[#allocation2 + $0x28] sm:$0x1] %v650_v32  ;;  %v876_v3 = vor.u32 %v875_v52, %v872_v11  ;;  %1320 = vrot.lane.b32.xlu1 %v1285_v35, %s2698_s21  ;;  %v286_v52 = vpop.permute.xlu0 %285 }
  0xb3   :  { %648 = vst [vmem:[#allocation2 + $0x1c] sm:$0x1] %v647_v45  ;;  %v879_v40 = vshrl.u32 %v2414_v22, 16  ;;  %v1223_v9 = vld [vmem:[#allocation2 + $0xb4] sm:$0xf]  ;;  %v882_v0 = vshll.u32 %v2414_v22, 16  ;;  %v625_v58 = vsel %vm3586_vm7, %v595_v6, %v624_v48  ;;  %v920_v49 = vsel %vm3787_vm6, %v868_v44, %v919_v17 }
  0xb4   :  { %v627_v21 = vld [vmem:[#allocation2 + $0x40] sm:$0xf]  ;;  %v888_v5 = vshrl.u32 %v2415_v50, 16  ;;  %v891_v1 = vshll.u32 %v2415_v50, 16  ;;  %v335_v7 = vld [vmem:[#allocation2 + $0x24] sm:$0x1]  ;;  %v1224_v14 = vsel %vm3611_vm10, %v1197_v10, %v1223_v9 }
  0xb5   :  { %v332_v2 = vld [vmem:[#allocation2 + $0x18] sm:$0x1]  ;;  %v829_v60 = vld [vmem:[#allocation2 + $0x50] sm:$0x8]  ;;  %v336_v20 = vsel %vm3576_vm0, 0, %v335_v7  ;;  %v877_v51 = vrot.slane %v876_v3, 4  ;;  %v628_v29 = vsel %vm3586_vm7, %v597_v18, %v627_v21  ;;  %1318 = vrot.lane.b32.xlu0 %v1278_v13, %s2698_s21  ;;  %v288_v56 = vpop.permute.xlu1 %287 }
  0xb6   :  { %v333_v34 = vsel %vm3576_vm0, 0, %v332_v2  ;;  %626 = vst [vmem:[#allocation2 + $0x34] sm:$0xf] %v625_v58  ;;  %1225 = vst [vmem:[#allocation2 + $0xb4] sm:$0xf] %v1224_v14  ;;  %v881_v27 = vrot.slane %v879_v40, 4 }
  0xb7   :  { %921 = vst [vmem:[#allocation2 + $0x20] sm:$0xf] %v920_v49  ;;  %v922_v57 = vld [vmem:[#allocation2 + $0x2c] sm:$0xf]  ;;  %337 = vst [vmem:[#allocation2 + $0x24] sm:$0x1] %v336_v20 }
  0xb8   :  { %334 = vst [vmem:[#allocation2 + $0x18] sm:$0x1] %v333_v34  ;;  %v884_v25 = vrot.slane %v882_v0, 5  ;;  %v890_v15 = vrot.slane %v888_v5, 4  ;;  %v893_v42 = vrot.slane %v891_v1, 5  ;;  %v830_v54 = vsel %vm3665_vm1, 0, %v829_v60  ;;  %v722_v34 = vpop.permute.xlu0 %721 }
  0xb9   :  { %v832_v19 = vld [vmem:[#allocation2 + $0x5c] sm:$0x8]  ;;  %v1244_v11 = vld [vmem:[#allocation2 + $0xa8] sm:$0x1]  ;;  %v1550_v23 = vld [vmem:[#allocation2 + $0xac] sm:$0x1]  ;;  %v923_v41 = vsel %vm3787_vm6, %v877_v51, %v922_v57  ;;  %v724_v60 = vpop.permute.xlu1 %723 }
  0xba   :  { %1082 = vst.msk [vmem:[#allocation2 + $0x6c] sm:$0xf] %vm136_vm9, %v1062_v31  ;;  %v2472_v12 = vld [vmem:[%s4229_s0 + $0x30] sm:$0xf]  ;;  %v2471_v62 = vld [vmem:[%s4229_s0 + $0x2c] sm:$0xf]  ;;  %v885_v47 = vor.u32 %v884_v25, %v881_v27  ;;  %v894_v22 = vor.u32 %v893_v42, %v890_v15 }
  0xbb   :  { %831 = vst [vmem:[#allocation2 + $0x50] sm:$0x8] %v830_v54  ;;  %v1245_v24 = vsel %vm3576_vm0, 0, %v1244_v11  ;;  %v1551_v30 = vsel %vm3643_vm5, 0, %v1550_v23  ;;  %629 = vst [vmem:[#allocation2 + $0x40] sm:$0xf] %v628_v29  ;;  %1676 = vrot.lane.b32.xlu1 %v2472_v12, %s2698_s21  ;;  %1674 = vrot.lane.b32.xlu0 %v2471_v62, %s2698_s21 }
  0xbc   :  { %v315_v36 = vld [vmem:[#allocation2 + $0x3c] sm:$0xf]  ;;  %v312_v26 = vld [vmem:[#allocation2 + $0x30] sm:$0xf]  ;;  %924 = vst [vmem:[#allocation2 + $0x2c] sm:$0xf] %v923_v41  ;;  %v415_v12 = vpop.permute.xlu0 %414 }
  0xbd   :  { %v925_v50 = vld [vmem:[#allocation2 + $0x38] sm:$0xf]  ;;  %v928_v55 = vld [vmem:[#allocation2 + $0x44] sm:$0xf]  ;;  %1246 = vst [vmem:[#allocation2 + $0xa8] sm:$0x1] %v1245_v24  ;;  %v316_v3 = vsel %vm3611_vm10, %v288_v56, %v315_v36  ;;  %v313_v40 = vsel %vm3611_vm10, %v286_v52, %v312_v26  ;;  %v417_v23 = vpop.permute.xlu1 %416 }
  0xbe   :  { %1552 = vst [vmem:[#allocation2 + $0xac] sm:$0x1] %v1551_v30  ;;  %vm438_vm8 = vcmask 1044224   ;;  %v833_v59 = vsel %vm3665_vm1, 0, %v832_v19  ;;  %v2416_v38 = vld [vmem:[%s4229_s0 + $0x1c] sm:$0xf] }
  0xbf   :  { %v1699_v28 = vld [vmem:[#allocation2 + $0x68] sm:$0x8]  ;;  %v886_v32 = vrot.slane %v885_v47, 4  ;;  %v895_v45 = vrot.slane %v894_v22, 4  ;;  %834 = vst [vmem:[#allocation2 + $0x5c] sm:$0x8] %v833_v59  ;;  %vm3922_vm15 = vmand %vm438_vm8, %vm113_vm4 }
  0xc0   :  { %v897_v48 = vshrl.u32 %v2416_v38, 16  ;;  %v900_v53 = vshll.u32 %v2416_v38, 16  ;;  %v1702_v63 = vld [vmem:[#allocation2 + $0x74] sm:$0x8]  ;;  %v652_v17 = vld [vmem:[#allocation2 + $0x34] sm:$0x1]  ;;  %v781_v52 = vpop.permute.xlu0 %780 }
  0xc1   :  { %v1247_v44 = vld [vmem:[#allocation2 + $0xb4] sm:$0x1]  ;;  %v653_v6 = vsel %vm3643_vm5, 0, %v652_v17  ;;  %317 = vst [vmem:[#allocation2 + $0x3c] sm:$0xf] %v316_v3  ;;  %v926_v0 = vsel %vm3787_vm6, %v886_v32, %v925_v50  ;;  %v929_v5 = vsel %vm3787_vm6, %v895_v45, %v928_v55  ;;  %v1700_v2 = vsel %vm3665_vm1, 0, %v1699_v28  ;;  %v783_v56 = vpop.permute.xlu1 %782 }
  0xc2   :  { %v1248_v9 = vsel %vm3576_vm0, 0, %v1247_v44  ;;  %314 = vst [vmem:[#allocation2 + $0x30] sm:$0xf] %v313_v40  ;;  %v743_v21 = vld [vmem:[#allocation2 + $0x4] sm:$0xf]  ;;  %v899_v1 = vrot.slane %v897_v48, 4 }
  0xc3   :  { %654 = vst [vmem:[#allocation2 + $0x34] sm:$0x1] %v653_v6  ;;  %1249 = vst [vmem:[#allocation2 + $0xb4] sm:$0x1] %v1248_v9  ;;  %v902_v7 = vrot.slane %v900_v53, 5  ;;  %v1703_v58 = vsel %vm3665_vm1, 0, %v1702_v63  ;;  %v744_v27 = vsel %vm3894_vm14, %v722_v34, %v743_v21 }
  0xc4   :  { %927 = vst [vmem:[#allocation2 + $0x38] sm:$0xf] %v926_v0  ;;  %930 = vst [vmem:[#allocation2 + $0x44] sm:$0xf] %v929_v5  ;;  %v2476_v14 = vld [vmem:[%s4229_s0 + $0x24] sm:$0xf] }
  0xc5   :  { %v1093_v49 = vld [vmem:[#allocation2 + $0x6c] sm:$0x8]  ;;  %v746_v20 = vld [vmem:[#allocation2 + $0x10] sm:$0xf]  ;;  %1701 = vst [vmem:[#allocation2 + $0x68] sm:$0x8] %v1700_v2  ;;  %v903_v31 = vor.u32 %v902_v7, %v899_v1 }
  0xc6   :  { %1704 = vst [vmem:[#allocation2 + $0x74] sm:$0x8] %v1703_v58  ;;  %v2477_v35 = vld [vmem:[%s4229_s0 + $0x28] sm:$0xf]  ;;  %v1094_v13 = vsel %vm3483_vm13, 0, %v1093_v49  ;;  %v747_v51 = vsel %vm3894_vm14, %v724_v60, %v746_v20  ;;  %v1731_v54 = vshrl.u32 %v2476_v14, 16  ;;  %v1622_v58 = vpop.permute.xlu1 %1621 }
  0xc7   :  { %v655_v57 = vld [vmem:[#allocation2 + $0x40] sm:$0x1]  ;;  %1095 = vst [vmem:[#allocation2 + $0x6c] sm:$0x8] %v1094_v13  ;;  %748 = vst [vmem:[#allocation2 + $0x10] sm:$0xf] %v747_v51 }
  0xc8   :  { %v656_v18 = vsel %vm3643_vm5, 0, %v655_v57  ;;  %745 = vst [vmem:[#allocation2 + $0x4] sm:$0xf] %v744_v27  ;;  %v440_v15 = vld [vmem:[#allocation2] sm:$0xf]  ;;  %v904_v19 = vrot.slane %v903_v31, 4 }
  0xc9   :  { %v931_v42 = vld [vmem:[#allocation2 + $0x50] sm:$0xf]  ;;  %657 = vst [vmem:[#allocation2 + $0x40] sm:$0x1] %v656_v18  ;;  %v1734_v11 = vshll.u32 %v2476_v14, 16  ;;  %v1733_v62 = vrot.slane %v1731_v54, 4  ;;  %v441_v47 = vsel %vm3922_vm15, %v415_v12, %v440_v15  ;;  %v1497_v14 = vpop.permute.xlu0 %1496 }
  0xca   :  { %v443_v29 = vld [vmem:[#allocation2 + $0xc] sm:$0xf]  ;;  %v1740_v41 = vshrl.u32 %v2477_v35, 16  ;;  %v1743_v24 = vshll.u32 %v2477_v35, 16  ;;  %v341_v30 = vld [vmem:[#allocation2 + $0x3c] sm:$0x1]  ;;  %v932_v22 = vsel %vm3787_vm6, %v904_v19, %v931_v42 }
  0xcb   :  { %v338_v36 = vld [vmem:[#allocation2 + $0x30] sm:$0x1]  ;;  %v444_v26 = vsel %vm3922_vm15, %v417_v23, %v443_v29  ;;  %v1736_v50 = vrot.slane %v1734_v11, 5  ;;  %v342_v55 = vsel %vm3576_vm0, 0, %v341_v30  ;;  %442 = vst [vmem:[#allocation2] sm:$0xf] %v441_v47  ;;  %v1323_v29 = vpop.permute.xlu1 %1322 }
  0xcc   :  { %v339_v59 = vsel %vm3576_vm0, 0, %v338_v36  ;;  %445 = vst [vmem:[#allocation2 + $0xc] sm:$0xf] %v444_v26  ;;  %933 = vst [vmem:[#allocation2 + $0x50] sm:$0xf] %v932_v22  ;;  %v1742_v32 = vrot.slane %v1740_v41, 4 }
  0xcd   :  { %v1705_v38 = vld [vmem:[#allocation2 + $0x80] sm:$0x8]  ;;  %343 = vst [vmem:[#allocation2 + $0x3c] sm:$0x1] %v342_v55  ;;  %340 = vst [vmem:[#allocation2 + $0x30] sm:$0x1] %v339_v59  ;;  %v1737_v28 = vor.u32 %v1736_v50, %v1733_v62  ;;  %v1624_v12 = vpop.permute.xlu0 %1623 }
  0xce   :  { %v1745_v45 = vrot.slane %v1743_v24, 5  ;;  %v1800_v48 = vld [vmem:[#allocation2 + $0x68] sm:$0xf]  ;;  %802 = vst.msk [vmem:[#allocation2 + $0x10] sm:$0xf] %vm438_vm8, %v783_v56  ;;  %v1706_v17 = vsel %vm3665_vm1, 0, %v1705_v38 }
  0xcf   :  { %801 = vst.msk [vmem:[#allocation2 + $0x4] sm:$0xf] %vm438_vm8, %v781_v52  ;;  %v1527_v53 = vld [vmem:[#allocation2 + $0xb8] sm:$0xf]  ;;  %v1738_v63 = vrot.slane %v1737_v28, 4  ;;  %v2675_v16 = vld [vmem:[%s4230_s1 + $0x88] sm:$0xff]  }
  0xd0   :  { %v1708_v44 = vld [vmem:[#allocation2 + $0x8c] sm:$0x8]  ;;  %v1646_v3 = vld [vmem:[#allocation2 + $0x94] sm:$0xf]  ;;  %v1746_v40 = vor.u32 %v1745_v45, %v1742_v32  ;;  %1707 = vst [vmem:[#allocation2 + $0x80] sm:$0x8] %v1706_v17  ;;  %v1528_v57 = vsel %vm3586_vm7, %v1497_v14, %v1527_v53  ;;  %v599_v53 = vpop.permute.xlu1 %598 }
  0xd1   :  { %v1803_v6 = vld [vmem:[#allocation2 + $0x74] sm:$0xf]  ;;  %v1709_v9 = vsel %vm3665_vm1, 0, %v1708_v44  ;;  %v2478_v21 = vld [vmem:[%s4229_s0 + $0x2c] sm:$0xf]  ;;  %v1801_v0 = vsel %vm3787_vm6, %v1738_v63, %v1800_v48  ;;  %v1647_v13 = vsel %vm3894_vm14, %v1622_v58, %v1646_v3  ;;  %v1325_v17 = vpop.permute.xlu0 %1324 }
  0xd2   :  { %1710 = vst [vmem:[#allocation2 + $0x8c] sm:$0x8] %v1709_v9  ;;  %v2479_v5 = vld [vmem:[%s4229_s0 + $0x30] sm:$0xf]  ;;  %v1749_v1 = vshrl.u32 %v2478_v21, 16  ;;  %v1752_v7 = vshll.u32 %v2478_v21, 16 }
  0xd3   :  { %v936_v2 = vld [vmem:[#allocation2 + $0x60] sm:$0x1]  ;;  %v1747_v49 = vrot.slane %v1746_v40, 4  ;;  %1802 = vst [vmem:[#allocation2 + $0x68] sm:$0xf] %v1801_v0  ;;  %v1758_v60 = vshrl.u32 %v2479_v5, 16 }
  0xd4   :  { %v1761_v20 = vshll.u32 %v2479_v5, 16  ;;  %v937_v34 = vsel %vm2913_vm3, 0, %v936_v2  ;;  %v1711_v35 = vld [vmem:[#allocation2 + $0x98] sm:$0x8]  ;;  %v1751_v51 = vrot.slane %v1749_v1, 4  ;;  %v1754_v27 = vrot.slane %v1752_v7, 5 }
  0xd5   :  { %938 = vst [vmem:[#allocation2 + $0x60] sm:$0x1] %v937_v34  ;;  %1648 = vst [vmem:[#allocation2 + $0x94] sm:$0xf] %v1647_v13  ;;  %v1350_v31 = vld [vmem:[#allocation2 + $0x90] sm:$0xf]  ;;  %v1804_v15 = vsel %vm3787_vm6, %v1747_v49, %v1803_v6 }
  0xd6   :  { %1529 = vst [vmem:[#allocation2 + $0xb8] sm:$0xf] %v1528_v57  ;;  %v1649_v18 = vld [vmem:[#allocation2 + $0xa0] sm:$0xf]  ;;  %v1760_v42 = vrot.slane %v1758_v60, 4  ;;  %v1763_v43 = vrot.slane %v1761_v20, 5  ;;  %v1755_v54 = vor.u32 %v1754_v27, %v1751_v51  ;;  %v1351_v26 = vsel %vm3922_vm15, %v1323_v29, %v1350_v31  ;;  %v1066_v60 = vpop.permute.xlu1 %1065  ;;  %v1064_v20 = vpop.permute.xlu0 %1063 }
  0xd7   :  { %1046 = vst.msk [vmem:[#allocation2 + $0x60] sm:$0xf] %vm136_vm9, %v2699_v33  ;;  %1805 = vst [vmem:[#allocation2 + $0x74] sm:$0xf] %v1804_v15  ;;  %v1712_v19 = vsel %vm3665_vm1, 0, %v1711_v35  ;;  %v1650_v47 = vsel %vm3894_vm14, %v1624_v12, %v1649_v18  ;;  %vm2124_vm3 = vcmask 261120  }
  0xd8   :  { %1531 = vst.msk [vmem:[#allocation2 + $0xb8] sm:$0xf] %vm180_vm11, %v2699_v33  ;;  %1089 = vst.msk [vmem:[#allocation2 + $0x60] sm:$0xf] %vm180_vm11, %v2699_v33  ;;  %v1714_v11 = vld [vmem:[#allocation2 + $0xa4] sm:$0x8]  ;;  %v1764_v24 = vor.u32 %v1763_v43, %v1760_v42 }
  0xd9   :  { %v2480_v23 = vld [vmem:[%s4229_s0 + $0x34] sm:$0xf]  ;;  %v2664_v62 = vld [vmem:[#allocation2] ss:$12 sps:$4 sm:$0xff]   ;;  %1713 = vst [vmem:[#allocation2 + $0x98] sm:$0x8] %v1712_v19 }
  0xda   :  { %v630_v41 = vld [vmem:[#allocation2 + $0x4c] sm:$0xf]  ;;  %v1715_v30 = vsel %vm3665_vm1, 0, %v1714_v11  ;;  %v1767_v36 = vshrl.u32 %v2480_v23, 16  ;;  %v2666_v22 = vld [vmem:[#allocation2 + $0x4] ss:$12 sps:$4 sm:$0xff]   ;;  %v1681_v11 = vpop.permute.xlu1 %1680 }
  0xdb   :  { %v1756_v50 = vrot.slane %v1755_v54, 4  ;;  %v1806_v55 = vld [vmem:[#allocation2 + $0x80] sm:$0xf]  ;;  %1716 = vst [vmem:[#allocation2 + $0xa4] sm:$0x8] %v1715_v30  ;;  %v1770_v59 = vshll.u32 %v2480_v23, 16  ;;  %2181 = vmatprep.mubr.bf16.mxu0 %v2666_v22  ;;  %v631_v40 = vsel %vm3586_vm7, %v599_v53, %v630_v41  ;;  %v1679_v23 = vpop.permute.xlu0 %1678 }
  0xdc   :  { %1352 = vst [vmem:[#allocation2 + $0x90] sm:$0xf] %v1351_v26  ;;  %1651 = vst [vmem:[#allocation2 + $0xa0] sm:$0xf] %v1650_v47  ;;  %v1765_v38 = vrot.slane %v1764_v24, 4  ;;  %v1769_v52 = vrot.slane %v1767_v36, 4  ;;  %2182 = vmatmul.mubr.bf16.vlgmr.msra.gmra.mrb[0].mxu0 %v2664_v62 }
  0xdd   :  { %v1809_v28 = vld [vmem:[#allocation2 + $0x8c] sm:$0xf]  ;;  %v2481_v56 = vld [vmem:[%s4229_s0 + $0x38] sm:$0xf]  ;;  %v1807_v32 = vsel %vm3787_vm6, %v1756_v50, %v1806_v55  ;;  %v1772_v45 = vrot.slane %v1770_v59, 5 }
  0xde   :  { %v1776_v48 = vshrl.u32 %v2481_v56, 16  ;;  %v1353_v63 = vld [vmem:[#allocation2 + $0x9c] sm:$0xf]  ;;  %1808 = vst [vmem:[#allocation2 + $0x80] sm:$0xf] %v1807_v32  ;;  %v1810_v44 = vsel %vm3787_vm6, %v1765_v38, %v1809_v28  ;;  %v1779_v3 = vshll.u32 %v2481_v56, 16  ;;  %v292_v47 = vpop.permute.xlu1 %291 }
  0xdf   :  { %v1354_v6 = vsel %vm3922_vm15, %v1325_v17, %v1353_v63  ;;  %1811 = vst [vmem:[#allocation2 + $0x8c] sm:$0xf] %v1810_v44  ;;  %v1773_v9 = vor.u32 %v1772_v45, %v1769_v52  ;;  %v1717_v21 = vld [vmem:[#allocation2 + $0xb0] sm:$0x8]  ;;  %v1720_v0 = vld [vmem:[#allocation2 + $0xbc] sm:$0x8]  ;;  %v290_v22 = vpop.permute.xlu0 %289 }
  0xe0   :  { %v2482_v5 = vld [vmem:[%s4229_s0 + $0x3c] sm:$0xf]  ;;  %v1553_v1 = vld [vmem:[#allocation2 + $0xb8] sm:$0x1]  ;;  %632 = vst [vmem:[#allocation2 + $0x4c] sm:$0xf] %v631_v40 }
  0xe1   :  { %1355 = vst [vmem:[#allocation2 + $0x9c] sm:$0xf] %v1354_v6  ;;  %v1778_v7 = vrot.slane %v1776_v48, 4  ;;  %v1554_v2 = vsel %vm3643_vm5, 0, %v1553_v1  ;;  %v1090_v58 = vld [vmem:[#allocation2 + $0x60] sm:$0x8] }
  0xe2   :  { %v1226_v14 = vld [vmem:[#allocation2 + $0x60] sm:$0x1]  ;;  %v1774_v49 = vrot.slane %v1773_v9, 4  ;;  %1555 = vst [vmem:[#allocation2 + $0xb8] sm:$0x1] %v1554_v2  ;;  %v1091_v34 = vsel %vm3483_vm13, 0, %v1090_v58  ;;  %v728_v48 = vpop.permute.xlu1 %727 }
  0xe3   :  { %v1227_v35 = vsel %vm3576_vm0, 0, %v1226_v14  ;;  %v1781_v13 = vrot.slane %v1779_v3, 5  ;;  %v1812_v57 = vld [vmem:[#allocation2 + $0x98] sm:$0xf]  ;;  %v1718_v51 = vsel %vm3665_vm1, 0, %v1717_v21  ;;  %v1721_v31 = vsel %vm3665_vm1, 0, %v1720_v0  ;;  %v726_v61 = vpop.permute.xlu0 %725 }
  0xe4   :  { %1655 = vst.msk [vmem:[#allocation2 + $0xb8] sm:$0xf] %vm438_vm8, %v2699_v33  ;;  %1092 = vst [vmem:[#allocation2 + $0x60] sm:$0x8] %v1091_v34  ;;  %v1813_v27 = vsel %vm3787_vm6, %v1774_v49, %v1812_v57  ;;  %v1785_v18 = vshrl.u32 %v2482_v5, 16  ;;  %v1788_v15 = vshll.u32 %v2482_v5, 16 }
  0xe5   :  { %1084 = vst.msk [vmem:[#allocation2 + $0x84] sm:$0xf] %vm136_vm9, %v1066_v60  ;;  %1083 = vst.msk [vmem:[#allocation2 + $0x78] sm:$0xf] %vm136_vm9, %v1064_v20  ;;  %v1782_v42 = vor.u32 %v1781_v13, %v1778_v7  ;;  %v1815_v43 = vld [vmem:[#allocation2 + $0xa4] sm:$0xf] }
  0xe6   :  { %1228 = vst [vmem:[#allocation2 + $0x60] sm:$0x1] %v1227_v35  ;;  %1719 = vst [vmem:[#allocation2 + $0xb0] sm:$0x8] %v1718_v51  ;;  %v1787_v54 = vrot.slane %v1785_v18, 4  ;;  %v1790_v19 = vrot.slane %v1788_v15, 5  ;;  %v421_v3 = vpop.permute.xlu1 %420 }
  0xe7   :  { %1814 = vst [vmem:[#allocation2 + $0x98] sm:$0xf] %v1813_v27  ;;  %1722 = vst [vmem:[#allocation2 + $0xbc] sm:$0x8] %v1721_v31  ;;  %v1783_v29 = vrot.slane %v1782_v42, 4  ;;  %v419_v6 = vpop.permute.xlu0 %418  ;;  %v2695_v7 = vld [vmem:[%s4230_s1 + $0x80] sm:$0xff]  }
  0xe8   :  { %v658_v12 = vld [vmem:[#allocation2 + $0x4c] sm:$0x1]  ;;  %1696 = vst.msk [vmem:[#allocation2 + $0xa0] sm:$0xf] %vm438_vm8, %v1681_v11  ;;  %1695 = vst.msk [vmem:[#allocation2 + $0x94] sm:$0xf] %vm438_vm8, %v1679_v23  ;;  %v1791_v62 = vor.u32 %v1790_v19, %v1787_v54 }
  0xe9   :  { %v659_v8 = vsel %vm3643_vm5, 0, %v658_v12  ;;  %v1816_v41 = vsel %vm3787_vm6, %v1783_v29, %v1815_v43  ;;  %v321_v24 = vld [vmem:[#allocation2 + $0x54] sm:$0xf]  ;;  %v318_v50 = vld [vmem:[#allocation2 + $0x48] sm:$0xf] }
  0xea   :  { %660 = vst [vmem:[#allocation2 + $0x4c] sm:$0x1] %v659_v8  ;;  %1817 = vst [vmem:[#allocation2 + $0xa4] sm:$0xf] %v1816_v41  ;;  %v1792_v30 = vrot.slane %v1791_v62, 4  ;;  %v322_v38 = vsel %vm3611_vm10, %v292_v47, %v321_v24  ;;  %v319_v28 = vsel %vm3611_vm10, %v290_v22, %v318_v50  ;;  %v787_v14 = vpop.permute.xlu1 %786 }
  0xeb   :  { %323 = vst [vmem:[#allocation2 + $0x54] sm:$0xf] %v322_v38  ;;  %320 = vst [vmem:[#allocation2 + $0x48] sm:$0xf] %v319_v28  ;;  %v752_v32 = vld [vmem:[#allocation2 + $0x28] sm:$0xf]  ;;  %v785_v49 = vpop.permute.xlu0 %784 }
  0xec   :  { %v1099_v36 = vld [vmem:[#allocation2 + $0x84] sm:$0x8]  ;;  %v1096_v26 = vld [vmem:[#allocation2 + $0x78] sm:$0x8]  ;;  %v749_v45 = vld [vmem:[#allocation2 + $0x1c] sm:$0xf]  ;;  %v753_v63 = vsel %vm3894_vm14, %v728_v48, %v752_v32 }
  0xed   :  { %v1100_v55 = vsel %vm3483_vm13, 0, %v1099_v36  ;;  %v1097_v59 = vsel %vm3483_vm13, 0, %v1096_v26  ;;  %v1818_v56 = vld [vmem:[#allocation2 + $0xb0] sm:$0xf]  ;;  %v750_v17 = vsel %vm3894_vm14, %v726_v61, %v749_v45  ;;  %754 = vst [vmem:[#allocation2 + $0x28] sm:$0xf] %v753_v63 }
  0xee   :  { %1101 = vst [vmem:[#allocation2 + $0x84] sm:$0x8] %v1100_v55  ;;  %1098 = vst [vmem:[#allocation2 + $0x78] sm:$0x8] %v1097_v59  ;;  %v1819_v52 = vsel %vm3787_vm6, %v1792_v30, %v1818_v56  ;;  %v2667_v53 = vld [vmem:[#allocation2 + $0x90] ss:$12 sps:$4 sm:$0xff]   ;;  %v1327_v20 = vpop.permute.xlu1 %1326 }
  0xef   :  { %1820 = vst [vmem:[#allocation2 + $0xb0] sm:$0xf] %v1819_v52  ;;  %v2669_v44 = vld [vmem:[#allocation2 + $0x94] ss:$12 sps:$4 sm:$0xff]   ;;  %751 = vst [vmem:[#allocation2 + $0x1c] sm:$0xf] %v750_v17  ;;  %v1626_v35 = vpop.permute.xlu0 %1625 }
  0xf0   :  { %2229 = vmatprep.mubr.bf16.mxu1 %v2669_v44  ;;  %v449_v40 = vld [vmem:[#allocation2 + $0x24] sm:$0xf]  ;;  %v446_v9 = vld [vmem:[#allocation2 + $0x18] sm:$0xf]  ;;  %804 = vst.msk [vmem:[#allocation2 + $0x28] sm:$0xf] %vm438_vm8, %v787_v14 }
  0xf1   :  { %2230 = vmatmul.mubr.bf16.vlgmr.msra.gmra.mrb[0].mxu1 %v2667_v53  ;;  %v450_v5 = vsel %vm3922_vm15, %v421_v3, %v449_v40  ;;  %v447_v1 = vsel %vm3922_vm15, %v419_v6, %v446_v9  ;;  %803 = vst.msk [vmem:[#allocation2 + $0x1c] sm:$0xf] %vm438_vm8, %v785_v49  ;;  %v1356_v60 = vld [vmem:[#allocation2 + $0xa8] sm:$0xf]  ;;  %v1652_v34 = vld [vmem:[#allocation2 + $0xac] sm:$0xf] }
  0xf2   :  { %v347_v21 = vld [vmem:[#allocation2 + $0x54] sm:$0x1]  ;;  %v344_v0 = vld [vmem:[#allocation2 + $0x48] sm:$0x1]  ;;  %2609 = vmatpush3.bf16.msra.mxu1 %v2695_v7  ;;  %451 = vst [vmem:[#allocation2 + $0x24] sm:$0xf] %v450_v5  ;;  %v1357_v13 = vsel %vm3922_vm15, %v1327_v20, %v1356_v60  ;;  %v1653_v57 = vsel %vm3894_vm14, %v1626_v35, %v1652_v34  ;;  %v601_v31 = vpop.permute.xlu1 %600 }
  0xf3   :  { %v348_v2 = vsel %vm3576_vm0, 0, %v347_v21  ;;  %v345_v58 = vsel %vm3576_vm0, 0, %v344_v0  ;;  %448 = vst [vmem:[#allocation2 + $0x18] sm:$0xf] %v447_v1  ;;  %2610 = vmatprep.subr.bf16.mxu1 %v2675_v16  ;;  %1358 = vst [vmem:[#allocation2 + $0xa8] sm:$0xf] %v1357_v13  ;;  %v1329_v18 = vpop.permute.xlu0 %1328 }
  0xf4   :  { %349 = vst [vmem:[#allocation2 + $0x54] sm:$0x1] %v348_v2  ;;  %346 = vst [vmem:[#allocation2 + $0x48] sm:$0x1] %v345_v58  ;;  %v633_v51 = vld [vmem:[#allocation2 + $0x58] sm:$0xf] }
  0xf5   :  { %1654 = vst [vmem:[#allocation2 + $0xac] sm:$0xf] %v1653_v57  ;;  %v1359_v27 = vld [vmem:[#allocation2 + $0xb4] sm:$0xf]  ;;  %v634_v54 = vsel %vm3586_vm7, %v601_v31, %v633_v51  ;;  %v1509_v23 = vld [vmem:[#allocation2 + $0x70] sm:$0xf] }
  0xf6   :  { %2611 = vmatpush3.bf16.msra.mxu1 %v2675_v16  ;;  %v1360_v19 = vsel %vm3922_vm15, %v1329_v18, %v1359_v27  ;;  %635 = vst [vmem:[#allocation2 + $0x58] sm:$0xf] %v634_v54  ;;  %v1506_v29 = vld [vmem:[#allocation2 + $0x64] sm:$0xf]  ;;  %v1485_v12 = vpop.permute.xlu1 %1484  ;;  %v1205_v24 = vld [vmem:[#allocation2 + $0x6c] sm:$0xf] }
  0xf7   :  { %1361 = vst [vmem:[#allocation2 + $0xb4] sm:$0xf] %v1360_v19  ;;  %637 = vst.msk [vmem:[#allocation2 + $0x58] sm:$0xf] %vm180_vm11, %v2699_v33  ;;  %v1483_v62 = vpop.permute.xlu0 %1482  ;;  %v1510_v8 = vsel %vm3586_vm7, %v1485_v12, %v1509_v23  ;;  %v758_v55 = vld [vmem:[#allocation2 + $0x40] sm:$0xf] }
  0xf8   :  { %v2670_v43 = vld [vmem:[#allocation2 + $0x1c] ss:$12 sps:$4 sm:$0xff]   ;;  %v1507_v41 = vsel %vm3586_vm7, %v1483_v62, %v1506_v29  ;;  %1511 = vst [vmem:[#allocation2 + $0x70] sm:$0xf] %v1510_v8  ;;  %v755_v59 = vld [vmem:[#allocation2 + $0x34] sm:$0xf] }
  0xf9   :  { %v1827_v42 = vld [vmem:[#allocation2 + $0x24] sm:$0xff]  ;;  %2189 = vmatprep.mubr.bf16.mxu0 %v2670_v43  ;;  %1508 = vst [vmem:[#allocation2 + $0x64] sm:$0xf] %v1507_v41  ;;  %v455_v61 = vld [vmem:[#allocation2 + $0x3c] sm:$0xf] }
  0xfa   :  { %v1825_v15 = vld [vmem:[#allocation2 + $0x18] sm:$0xff]  ;;  %v1185_v30 = vpop.permute.xlu1 %1184  ;;  %v2676_v53 = vld [vmem:[#allocation2 + $0x8] ss:$12 sps:$4 sm:$0xff]   ;;  %v2677_v58 = vld [vmem:[#allocation2 + $0x20] ss:$12 sps:$4 sm:$0xff]  }
  0xfb   :  { %v2487_v11 = vcombine.low %v1825_v15, %v1827_v42  ;;  %v1683_v36 = vpop.permute.xlu0 %1682  ;;  %v1206_v26 = vsel %vm3611_vm10, %v1185_v30, %v1205_v24  ;;  %v1515_v7 = vld [vmem:[#allocation2 + $0x88] sm:$0xf]  ;;  %v1512_v2 = vld [vmem:[#allocation2 + $0x7c] sm:$0xf]  ;;  %v2681_v60 = vld [vmem:[#allocation2 + $0x38] ss:$12 sps:$4 sm:$0xff]  }
  0xfc   :  { %1697 = vst.msk [vmem:[#allocation2 + $0xac] sm:$0xf] %vm438_vm8, %v1683_v36  ;;  %1207 = vst [vmem:[#allocation2 + $0x6c] sm:$0xf] %v1206_v26  ;;  %v1211_v35 = vld [vmem:[#allocation2 + $0x84] sm:$0xf] }
  0xfd   :  { %2190 = vmatmul.mubr.bf16.gmra.mrb[4].mxu0 %v2487_v11  ;;  %v1208_v13 = vld [vmem:[#allocation2 + $0x78] sm:$0xf]  ;;  %v2682_v46 = vld [vmem:[#allocation2 + $0x50] ss:$12 sps:$4 sm:$0xff]   ;;  %v458_v43 = vld [vmem:[#allocation2 + $0x48] sm:$0xf] }
  0xfe   :  { %v661_v47 = vld [vmem:[#allocation2 + $0x58] sm:$0x1]  ;;  %v732_v50 = vpop.permute.xlu1 %731  ;;  %v761_v54 = vld [vmem:[#allocation2 + $0x4c] sm:$0xf]  ;;  %v2683_v11 = vld [vmem:[#allocation2 + $0x68] ss:$12 sps:$4 sm:$0xff]  }
  0xff   :  { %v662_v22 = vsel %vm3643_vm5, 0, %v661_v47  ;;  %v730_v38 = vpop.permute.xlu0 %729  ;;  %v1535_v28 = vld [vmem:[#allocation2 + $0x70] sm:$0x1]  ;;  %v759_v52 = vsel %vm3894_vm14, %v732_v50, %v758_v55  ;;  %v1851_v16 = vld [vmem:[#allocation2 + $0xb4] sm:$0xff]  ;;  %v2684_v50 = vld [vmem:[#allocation2 + $0x80] ss:$12 sps:$4 sm:$0xff]  }
 0x100   :  { %663 = vst [vmem:[#allocation2 + $0x58] sm:$0x1] %v662_v22  ;;  %v1532_v56 = vld [vmem:[#allocation2 + $0x64] sm:$0x1]  ;;  %v756_v32 = vsel %vm3894_vm14, %v730_v38, %v755_v59  ;;  %v1536_v45 = vsel %vm3643_vm5, 0, %v1535_v28 }
 0x101   :  { %765 = vst.msk [vmem:[#allocation2 + $0x58] sm:$0xf] %vm438_vm8, %v2699_v33  ;;  %v1533_v48 = vsel %vm3643_vm5, 0, %v1532_v56  ;;  %760 = vst [vmem:[#allocation2 + $0x40] sm:$0xf] %v759_v52 }
 0x102   :  { %757 = vst [vmem:[#allocation2 + $0x34] sm:$0xf] %v756_v32  ;;  %1537 = vst [vmem:[#allocation2 + $0x70] sm:$0x1] %v1536_v45  ;;  %v452_v33 = vld [vmem:[#allocation2 + $0x30] sm:$0xf]  ;;  %v425_v63 = vpop.permute.xlu1 %424 }
 0x103   :  { %1534 = vst [vmem:[#allocation2 + $0x64] sm:$0x1] %v1533_v48  ;;  %v423_v17 = vpop.permute.xlu0 %422  ;;  %v1849_v44 = vld [vmem:[#allocation2 + $0xa8] sm:$0xff]  ;;  %v456_v6 = vsel %vm3922_vm15, %v425_v63, %v455_v61  ;;  %v461_v30 = vld [vmem:[#allocation2 + $0x54] sm:$0xf] }
 0x104   :  { %v2672_v3 = vld [vmem:[#allocation2 + $0xac] ss:$12 sps:$4 sm:$0xff]   ;;  %v453_v9 = vsel %vm3922_vm15, %v423_v17, %v452_v33  ;;  %v2505_v21 = vcombine.low %v1849_v44, %v1851_v16  ;;  %457 = vst [vmem:[#allocation2 + $0x3c] sm:$0xf] %v456_v6  ;;  %v1338_v45 = vld [vmem:[#allocation2 + $0x60] sm:$0xf] }
 0x105   :  { %v1229_v40 = vld [vmem:[#allocation2 + $0x6c] sm:$0x1]  ;;  %454 = vst [vmem:[#allocation2 + $0x30] sm:$0xf] %v453_v9  ;;  %2237 = vmatprep.mubr.bf16.mxu1 %v2672_v3  ;;  %v2688_v56 = vld [vmem:[#allocation2 + $0x98] ss:$12 sps:$4 sm:$0xff]  }
 0x106   :  { %v1230_v0 = vsel %vm3576_vm0, 0, %v1229_v40  ;;  %2238 = vmatmul.mubr.bf16.gmra.mrb[4].mxu1 %v2505_v21  ;;  %v791_v5 = vpop.permute.xlu1 %790  ;;  %v2689_v44 = vld [vmem:[#allocation2 + $0xb0] ss:$12 sps:$4 sm:$0xff]  }
 0x107   :  { %1231 = vst [vmem:[#allocation2 + $0x6c] sm:$0x1] %v1230_v0  ;;  %v789_v1 = vpop.permute.xlu0 %788  ;;  %2612 = vmatprep.mubr.msk.bf16.mxu1 %vm2124_vm3, %v2676_v53  ;;  %806 = vst.msk [vmem:[#allocation2 + $0x40] sm:$0xf] %vm438_vm8, %v791_v5 }
 0x108   :  { %805 = vst.msk [vmem:[#allocation2 + $0x34] sm:$0xf] %vm438_vm8, %v789_v1 }
 0x109   :  { %v1637_v55 = vld [vmem:[#allocation2 + $0x70] sm:$0xf] }
 0x10a   :  { %v1489_v14 = vpop.permute.xlu1 %1488  ;;  %v1634_v38 = vld [vmem:[#allocation2 + $0x64] sm:$0xf] }
 0x10b   :  { %v1487_v49 = vpop.permute.xlu0 %1486  ;;  %v1516_v20 = vsel %vm3586_vm7, %v1489_v14, %v1515_v7 }
 0x10c   :  { %v1513_v34 = vsel %vm3586_vm7, %v1487_v49, %v1512_v2  ;;  %1517 = vst [vmem:[#allocation2 + $0x88] sm:$0xf] %v1516_v20  ;;  %v2680_v15 = vld [vmem:[#allocation2 + $0x30] ss:$12 sps:$4 sm:$0xff]  }
 0x10d   :  { %1514 = vst [vmem:[#allocation2 + $0x7c] sm:$0xf] %v1513_v34 }
 0x10e   :  { %2613 = vmatmul.mubr.msk.bf16.vlgmr.msra.gmra.mrb[8].mxu1 %vm2124_vm3, %v2677_v58  ;;  %v1189_v57 = vpop.permute.xlu1 %1188  ;;  %v1341_v39 = vld [vmem:[#allocation2 + $0x6c] sm:$0xf] }
 0x10f   :  { %v1187_v51 = vpop.permute.xlu0 %1186  ;;  %v2678_v27 = vld [vmem:[#allocation2 + $0x34] ss:$12 sps:$4 sm:$0xff]   ;;  %2616 = vmatprep.mubr.msk.bf16.mxu1 %vm2124_vm3, %v2681_v60  ;;  %v1212_v31 = vsel %vm3611_vm10, %v1189_v57, %v1211_v35 }
 0x110   :  { %v1209_v18 = vsel %vm3611_vm10, %v1187_v51, %v1208_v13  ;;  %1213 = vst [vmem:[#allocation2 + $0x84] sm:$0xf] %v1212_v31  ;;  %2197 = vmatprep.mubr.bf16.mxu0 %v2678_v27 }
 0x111   :  { %1210 = vst [vmem:[#allocation2 + $0x78] sm:$0xf] %v1209_v18  ;;  %2198 = vmatmul.mubr.bf16.gmra.mrb[8].mxu0 %v2680_v15 }
 0x112   :  { %v427_v42 = vpop.permute.xlu1 %426 }
 0x113   :  { %v734_v19 = vpop.permute.xlu0 %733  ;;  %v1541_v23 = vld [vmem:[#allocation2 + $0x88] sm:$0x1]  ;;  %v459_v12 = vsel %vm3922_vm15, %v427_v42, %v458_v43 }
 0x114   :  { %v1538_v29 = vld [vmem:[#allocation2 + $0x7c] sm:$0x1]  ;;  %v762_v37 = vsel %vm3894_vm14, %v734_v19, %v761_v54  ;;  %v1542_v62 = vsel %vm3643_vm5, 0, %v1541_v23  ;;  %460 = vst [vmem:[#allocation2 + $0x48] sm:$0xf] %v459_v12 }
 0x115   :  { %v1539_v8 = vsel %vm3643_vm5, 0, %v1538_v29  ;;  %763 = vst [vmem:[#allocation2 + $0x4c] sm:$0xf] %v762_v37  ;;  %1543 = vst [vmem:[#allocation2 + $0x88] sm:$0x1] %v1542_v62 }
 0x116   :  { %1540 = vst [vmem:[#allocation2 + $0x7c] sm:$0x1] %v1539_v8  ;;  %2617 = vmatmul.mubr.msk.bf16.gmra.mrb[12].mxu1 %vm2124_vm3, %v2682_v46  ;;  %v793_v41 = vpop.permute.xlu1 %792 }
 0x117   :  { %v429_v24 = vpop.permute.xlu0 %428  ;;  %2620 = vmatprep.mubr.msk.bf16.mxu1 %vm2124_vm3, %v2683_v11  ;;  %v1235_v36 = vld [vmem:[#allocation2 + $0x84] sm:$0x1]  ;;  %807 = vst.msk [vmem:[#allocation2 + $0x4c] sm:$0xf] %vm438_vm8, %v793_v41 }
 0x118   :  { %v1232_v26 = vld [vmem:[#allocation2 + $0x78] sm:$0x1]  ;;  %v462_v47 = vsel %vm3922_vm15, %v429_v24, %v461_v30  ;;  %v1236_v4 = vsel %vm3576_vm0, 0, %v1235_v36 }
 0x119   :  { %v1233_v22 = vsel %vm3576_vm0, 0, %v1232_v26  ;;  %463 = vst [vmem:[#allocation2 + $0x54] sm:$0xf] %v462_v47  ;;  %1237 = vst [vmem:[#allocation2 + $0x84] sm:$0x1] %v1236_v4 }
 0x11a   :  { %1234 = vst [vmem:[#allocation2 + $0x78] sm:$0x1] %v1233_v22  ;;  %v1616_v59 = vpop.permute.xlu1 %1615  ;;  %v4138_v22 = vld [vmem:[%s4231_s2] ss:$0 sm:$0xff] }
 0x11b   :  { %v1614_v28 = vpop.permute.xlu0 %1613  ;;  %v1638_v52 = vsel %vm3894_vm14, %v1616_v59, %v1637_v55 }
 0x11c   :  { %v1635_v32 = vsel %vm3894_vm14, %v1614_v28, %v1634_v38  ;;  %1639 = vst [vmem:[#allocation2 + $0x70] sm:$0xf] %v1638_v52  ;;  %v1643_v40 = vld [vmem:[#allocation2 + $0x88] sm:$0xf] }
 0x11d   :  { %1636 = vst [vmem:[#allocation2 + $0x64] sm:$0xf] %v1635_v32  ;;  %v1640_v9 = vld [vmem:[#allocation2 + $0x7c] sm:$0xf] }
 0x11e   :  { %2621 = vmatmul.mubr.msk.bf16.gmra.mrb[16].mxu1 %vm2124_vm3, %v2684_v50  ;;  %v1317_v48 = vpop.permute.xlu1 %1316  ;;  %v2685_v63 = vld [vmem:[#allocation2 + $0x4c] ss:$12 sps:$4 sm:$0xff]  }
 0x11f   :  { %v1315_v61 = vpop.permute.xlu0 %1314  ;;  %2624 = vmatprep.mubr.msk.bf16.mxu1 %vm2124_vm3, %v2688_v56  ;;  %v1342_v33 = vsel %vm3922_vm15, %v1317_v48, %v1341_v39  ;;  %2205 = vmatprep.mubr.bf16.mxu0 %v2685_v63 }
 0x120   :  { %v1339_v53 = vsel %vm3922_vm15, %v1315_v61, %v1338_v45  ;;  %v2687_v17 = vld [vmem:[#allocation2 + $0x48] ss:$12 sps:$4 sm:$0xff]   ;;  %1343 = vst [vmem:[#allocation2 + $0x6c] sm:$0xf] %v1342_v33  ;;  %v1347_v1 = vld [vmem:[#allocation2 + $0x84] sm:$0xf] }
 0x121   :  { %1340 = vst [vmem:[#allocation2 + $0x60] sm:$0xf] %v1339_v53  ;;  %2206 = vmatmul.mubr.bf16.gmra.mrb[12].mxu0 %v2687_v17  ;;  %v1344_v7 = vld [vmem:[#allocation2 + $0x78] sm:$0xf] }
 0x122   :  { %v1673_v16 = vpop.permute.xlu1 %1672 }
 0x123   :  { %v1671_v3 = vpop.permute.xlu0 %1670  ;;  %1692 = vst.msk [vmem:[#allocation2 + $0x70] sm:$0xf] %vm438_vm8, %v1673_v16 }
 0x124   :  { %1691 = vst.msk [vmem:[#allocation2 + $0x64] sm:$0xf] %vm438_vm8, %v1671_v3 }
 0x126   :  { %2625 = vmatmul.mubr.msk.bf16.gmra.mrb[20].mxu1 %vm2124_vm3, %v2689_v44  ;;  %v1620_v6 = vpop.permute.xlu1 %1619 }
 0x127   :  { %v1618_v21 = vpop.permute.xlu0 %1617  ;;  %v1644_v0 = vsel %vm3894_vm14, %v1620_v6, %v1643_v40 }
 0x128   :  { %v1641_v5 = vsel %vm3894_vm14, %v1618_v21, %v1640_v9  ;;  %1645 = vst [vmem:[#allocation2 + $0x88] sm:$0xf] %v1644_v0 }
 0x129   :  { %1642 = vst [vmem:[#allocation2 + $0x7c] sm:$0xf] %v1641_v5 }
 0x12a   :  { %v1321_v2 = vpop.permute.xlu1 %1320  ;;  %v1839_v49 = vld [vmem:[#allocation2 + $0x6c] sm:$0xff] }
 0x12b   :  { %v1319_v58 = vpop.permute.xlu0 %1318  ;;  %v1837_v14 = vld [vmem:[#allocation2 + $0x60] sm:$0xff]  ;;  %v1348_v20 = vsel %vm3922_vm15, %v1321_v2, %v1347_v1 }
 0x12c   :  { %v2690_v60 = vld [vmem:[#allocation2 + $0x64] ss:$12 sps:$4 sm:$0xff]   ;;  %v1345_v34 = vsel %vm3922_vm15, %v1319_v58, %v1344_v7  ;;  %v2496_v35 = vcombine.low %v1837_v14, %v1839_v49  ;;  %1349 = vst [vmem:[#allocation2 + $0x84] sm:$0xf] %v1348_v20 }
 0x12d   :  { %1346 = vst [vmem:[#allocation2 + $0x78] sm:$0xf] %v1345_v34  ;;  %2213 = vmatprep.mubr.bf16.mxu0 %v2690_v60 }
 0x12e   :  { %2214 = vmatmul.mubr.bf16.gmra.mrb[16].mxu0 %v2496_v35  ;;  %v1677_v10 = vpop.permute.xlu1 %1676 }
 0x12f   :  { %v1675_v13 = vpop.permute.xlu0 %1674  ;;  %1694 = vst.msk [vmem:[#allocation2 + $0x88] sm:$0xf] %vm438_vm8, %v1677_v10 }
 0x130   :  { %1693 = vst.msk [vmem:[#allocation2 + $0x7c] sm:$0xf] %vm438_vm8, %v1675_v13 }
 0x134   :  { %v2694_v51 = vld [vmem:[#allocation2 + $0x78] ss:$12 sps:$4 sm:$0xff]  }
 0x137   :  { %v2692_v57 = vld [vmem:[#allocation2 + $0x7c] ss:$12 sps:$4 sm:$0xff]  }
 0x138   :  { %2221 = vmatprep.mubr.bf16.mxu0 %v2692_v57 }
 0x139   :  { %2222 = vmatmul.mubr.bf16.gmra.mrb[20].mxu0 %v2694_v51 }
 0x1af   :  { %v2550_v27 = vpop.f32.mrb[0].mxu0 }
 0x1b0   :  { %v2551_v31 = vpop.f32.mrb[1].mxu0 }
 0x1b1   :  { %v2552_v18 = vadd.f32 %v2551_v31, %v2550_v27  ;;  %v2553_v25 = vpop.f32.mrb[2].mxu0 }
 0x1b2   :  { %v2554_v15 = vpop.f32.mrb[3].mxu0 }
 0x1b3   :  { %v2555_v46 = vadd.f32 %v2554_v15, %v2553_v25  ;;  %v2184_v59 = vadd.f32 %v2552_v18, %v4138_v22 }
 0x1b5   :  { %v2187_v45 = vadd.f32 %v2555_v46, %v4138_v22 }
 0x1c4   :  { %v2586_v42 = vpop.f32.mrb[0].mxu1 }
 0x1c5   :  { %v2587_v43 = vpop.f32.mrb[1].mxu1 }
 0x1c6   :  { %v4129_v54 = vadd.f32 %v2587_v43, %v2586_v42  ;;  %v2589_v19 = vpop.f32.mrb[2].mxu1 }
 0x1c7   :  { %v2590_v11 = vpop.f32.mrb[3].mxu1 }
 0x1c8   :  { %v4131_v23 = vadd.f32 %v2590_v11, %v2589_v19 }
 0x1d0   :  { %v2556_v29 = vpop.f32.mrb[4].mxu0 }
 0x1d1   :  { %v2557_v12 = vpop.f32.mrb[5].mxu0 }
 0x1d2   :  { %v2558_v37 = vadd.f32 %v2557_v12, %v2556_v29  ;;  %v2559_v62 = vpop.f32.mrb[6].mxu0  ;;  %v2232_v29 = vadd.f32 %v4129_v54, %v4138_v22 }
 0x1d3   :  { %v2560_v8 = vpop.f32.mrb[7].mxu0 }
 0x1d4   :  { %v2561_v41 = vadd.f32 %v2560_v8, %v2559_v62  ;;  %v2192_v50 = vadd.f32 %v2558_v37, %v4138_v22 }
 0x1d6   :  { %v2195_v56 = vadd.f32 %v2561_v41, %v4138_v22 }
 0x1d9   :  { %v2592_v24 = vpop.f32.mrb[4].mxu1 }
 0x1da   :  { %v2593_v30 = vpop.f32.mrb[5].mxu1 }
 0x1db   :  { %v2594_v36 = vadd.f32 %v2593_v30, %v2592_v24  ;;  %v2595_v26 = vpop.f32.mrb[6].mxu1 }
 0x1dc   :  { %v2596_v47 = vpop.f32.mrb[7].mxu1 }
 0x1dd   :  { %v4133_v4 = vadd.f32 %v2596_v47, %v2595_v26  ;;  %v2240_v43 = vadd.f32 %v2594_v36, %v4138_v22  ;;  %v2235_v26 = vadd.f32 %v4131_v23, %v4138_v22 }
 0x1df   :  { %v2243_v41 = vadd.f32 %v4133_v4, %v4138_v22 }
 0x1e1   :  { %v2614_v55 = vpop.f32.mrb[8].mxu1 }
 0x1e2   :  { %v2289_v38 = vadd.f32 %v2614_v55, %v2192_v50  ;;  %v2280_v28 = vpop.f32.mrb[9].mxu1 }
 0x1e3   :  { %v2281_v52 = vadd.f32 %v2280_v28, %v2184_v59  ;;  %v2615_v32 = vpop.f32.mrb[10].mxu1 }
 0x1e4   :  { %v2345_v39 = vmax.f32 %v2289_v38, 0.0  ;;  %v2292_v48 = vadd.f32 %v2615_v32, %v2195_v56  ;;  %v2283_v61 = vpop.f32.mrb[11].mxu1  ;;  %v2562_v63 = vpop.f32.mrb[8].mxu0 }
 0x1e5   :  { %v2343_v33 = vmax.f32 %v2281_v52, 0.0  ;;  %v2284_v53 = vadd.f32 %v2283_v61, %v2187_v45  ;;  %v2563_v16 = vpop.f32.mrb[9].mxu0 }
 0x1e6   :  { %v2361_v17 = vpack.c.bf16 %v2345_v39, %v2345_v39  ;;  %v2346_v44 = vmax.f32 %v2292_v48, 0.0  ;;  %v2564_v6 = vadd.f32 %v2563_v16, %v2562_v63  ;;  %v2565_v9 = vpop.f32.mrb[10].mxu0 }
 0x1e7   :  { %v2359_v3 = vpack.c.bf16 %v2343_v33, %v2343_v33  ;;  %v2344_v40 = vmax.f32 %v2284_v53, 0.0  ;;  %v2566_v0 = vpop.f32.mrb[11].mxu0 }
 0x1e8   :  { %2378 = vst.msk [vmem:[%s4232_s3 + $0x8] sm:$0xf] %vm19_vm2, %v2361_v17  ;;  %v2362_v21 = vpack.c.bf16 %v2346_v44, %v2346_v44  ;;  %v2567_v1 = vadd.f32 %v2566_v0, %v2565_v9  ;;  %v2200_v2 = vadd.f32 %v2564_v6, %v4138_v22 }
 0x1e9   :  { %2376 = vst.msk [vmem:[%s4232_s3] sm:$0xf] %vm19_vm2, %v2359_v3  ;;  %v2360_v5 = vpack.c.bf16 %v2344_v40, %v2344_v40  ;;  %v2618_v7 = vpop.f32.mrb[12].mxu1 }
 0x1ea   :  { %2379 = vst.msk [vmem:[%s4232_s3 + $0xc] sm:$0xf] %vm19_vm2, %v2362_v21  ;;  %v2296_v58 = vpop.f32.mrb[13].mxu1  ;;  %v2203_v60 = vadd.f32 %v2567_v1, %v4138_v22 }
 0x1eb   :  { %2377 = vst.msk [vmem:[%s4232_s3 + $0x4] sm:$0xf] %vm19_vm2, %v2360_v5  ;;  %v2297_v14 = vadd.f32 %v2296_v58, %v2200_v2  ;;  %v2619_v49 = vpop.f32.mrb[14].mxu1 }
 0x1ec   :  { %v2299_v20 = vpop.f32.mrb[15].mxu1 }
 0x1ed   :  { %v2347_v34 = vmax.f32 %v2297_v14, 0.0  ;;  %v2300_v35 = vadd.f32 %v2299_v20, %v2203_v60 }
 0x1ef   :  { %v2363_v10 = vpack.c.bf16 %v2347_v34, %v2347_v34  ;;  %v2348_v13 = vmax.f32 %v2300_v35, 0.0 }
 0x1f1   :  { %2380 = vst.msk [vmem:[%s4232_s3 + $0x10] sm:$0xf] %vm19_vm2, %v2363_v10  ;;  %v2364_v57 = vpack.c.bf16 %v2348_v13, %v2348_v13  ;;  %v4166_v51 = vpop.f32.mrb[16].mxu1 }
 0x1f2   :  { %v2312_v27 = vpop.f32.mrb[17].mxu1 }
 0x1f3   :  { %2381 = vst.msk [vmem:[%s4232_s3 + $0x14] sm:$0xf] %vm19_vm2, %v2364_v57  ;;  %v4172_v31 = vpop.f32.mrb[18].mxu1 }
 0x1f4   :  { %v2315_v18 = vpop.f32.mrb[19].mxu1  ;;  %v2568_v25 = vpop.f32.mrb[12].mxu0 }
 0x1f5   :  { %v2569_v15 = vpop.f32.mrb[13].mxu0 }
 0x1f6   :  { %v2570_v46 = vadd.f32 %v2569_v15, %v2568_v25  ;;  %v2571_v42 = vpop.f32.mrb[14].mxu0 }
 0x1f7   :  { %v2572_v19 = vpop.f32.mrb[15].mxu0 }
 0x1f8   :  { %v2208_v12 = vadd.f32 %v2570_v46, %v4138_v22  ;;  %v2573_v37 = vadd.f32 %v2572_v19, %v2571_v42 }
 0x1f9   :  { %v2626_v11 = vpop.f32.mrb[20].mxu1 }
 0x1fa   :  { %v2337_v62 = vadd.f32 %v2626_v11, %v2240_v43  ;;  %v2328_v8 = vpop.f32.mrb[21].mxu1  ;;  %v2305_v47 = vadd.f32 %v2618_v7, %v2208_v12  ;;  %v2211_v36 = vadd.f32 %v2573_v37, %v4138_v22 }
 0x1fb   :  { %v2329_v24 = vadd.f32 %v2328_v8, %v2232_v29  ;;  %v2627_v30 = vpop.f32.mrb[22].mxu1 }
 0x1fc   :  { %v2357_v50 = vmax.f32 %v2337_v62, 0.0  ;;  %v2340_v55 = vadd.f32 %v2627_v30, %v2243_v41  ;;  %v2331_v59 = vpop.f32.mrb[23].mxu1  ;;  %v2349_v28 = vmax.f32 %v2305_v47, 0.0  ;;  %v2308_v56 = vadd.f32 %v2619_v49, %v2211_v36 }
 0x1fd   :  { %v2355_v54 = vmax.f32 %v2329_v24, 0.0  ;;  %v2332_v38 = vadd.f32 %v2331_v59, %v2235_v26 }
 0x1fe   :  { %v2373_v52 = vpack.c.bf16 %v2357_v50, %v2357_v50  ;;  %v2358_v32 = vmax.f32 %v2340_v55, 0.0  ;;  %v2365_v4 = vpack.c.bf16 %v2349_v28, %v2349_v28  ;;  %v2350_v48 = vmax.f32 %v2308_v56, 0.0 }
 0x1ff   :  { %v2371_v45 = vpack.c.bf16 %v2355_v54, %v2355_v54  ;;  %v2356_v39 = vmax.f32 %v2332_v38, 0.0 }
 0x200   :  { %2390 = vst.msk [vmem:[%s4232_s3 + $0x38] sm:$0xf] %vm19_vm2, %v2373_v52  ;;  %v2374_v23 = vpack.c.bf16 %v2358_v32, %v2358_v32  ;;  %2382 = vst.msk [vmem:[%s4232_s3 + $0x18] sm:$0xf] %vm19_vm2, %v2365_v4  ;;  %v2366_v53 = vpack.c.bf16 %v2350_v48, %v2350_v48 }
 0x201   :  { %2388 = vst.msk [vmem:[%s4232_s3 + $0x30] sm:$0xf] %vm19_vm2, %v2371_v45  ;;  %v2372_v61 = vpack.c.bf16 %v2356_v39, %v2356_v39  ;;  %v2574_v33 = vpop.f32.mrb[16].mxu0 }
 0x202   :  { %2391 = vst.msk [vmem:[%s4232_s3 + $0x3c] sm:$0xf] %vm19_vm2, %v2374_v23  ;;  %v2575_v63 = vpop.f32.mrb[17].mxu0  ;;  %2383 = vst.msk [vmem:[%s4232_s3 + $0x1c] sm:$0xf] %vm19_vm2, %v2366_v53 }
 0x203   :  { %2389 = vst.msk [vmem:[%s4232_s3 + $0x34] sm:$0xf] %vm19_vm2, %v2372_v61  ;;  %v2576_v17 = vadd.f32 %v2575_v63, %v2574_v33  ;;  %v2577_v44 = vpop.f32.mrb[18].mxu0 }
 0x204   :  { %v2578_v16 = vpop.f32.mrb[19].mxu0 }
 0x205   :  { %v2216_v3 = vadd.f32 %v2576_v17, %v4138_v22  ;;  %v2579_v40 = vadd.f32 %v2578_v16, %v2577_v44 }
 0x207   :  { %v2313_v6 = vadd.f32 %v2312_v27, %v2216_v3  ;;  %v2219_v9 = vadd.f32 %v2579_v40, %v4138_v22 }
 0x209   :  { %v2351_v21 = vmax.f32 %v2313_v6, 0.0  ;;  %v2316_v0 = vadd.f32 %v2315_v18, %v2219_v9 }
 0x20b   :  { %v2367_v5 = vpack.c.bf16 %v2351_v21, %v2351_v21  ;;  %v2352_v1 = vmax.f32 %v2316_v0, 0.0 }
 0x20c   :  { %v2580_v2 = vpop.f32.mrb[20].mxu0 }
 0x20d   :  { %2384 = vst.msk [vmem:[%s4232_s3 + $0x20] sm:$0xf] %vm19_vm2, %v2367_v5  ;;  %v2368_v7 = vpack.c.bf16 %v2352_v1, %v2352_v1  ;;  %v2581_v58 = vpop.f32.mrb[21].mxu0 }
 0x20e   :  { %v2582_v14 = vadd.f32 %v2581_v58, %v2580_v2  ;;  %v2583_v49 = vpop.f32.mrb[22].mxu0 }
 0x20f   :  { %2385 = vst.msk [vmem:[%s4232_s3 + $0x24] sm:$0xf] %vm19_vm2, %v2368_v7  ;;  %v2584_v60 = vpop.f32.mrb[23].mxu0 }
 0x210   :  { %v2224_v20 = vadd.f32 %v2582_v14, %v4138_v22  ;;  %v2585_v34 = vadd.f32 %v2584_v60, %v2583_v49 }
 0x212   :  { %v2321_v35 = vadd.f32 %v4166_v51, %v2224_v20  ;;  %v2227_v10 = vadd.f32 %v2585_v34, %v4138_v22 }
 0x214   :  { %v2353_v13 = vmax.f32 %v2321_v35, 0.0  ;;  %v2324_v57 = vadd.f32 %v4172_v31, %v2227_v10 }
 0x216   :  { %v2369_v27 = vpack.c.bf16 %v2353_v13, %v2353_v13  ;;  %v2354_v18 = vmax.f32 %v2324_v57, 0.0 }
 0x218   :  { %2386 = vst.msk [vmem:[%s4232_s3 + $0x28] sm:$0xf] %vm19_vm2, %v2369_v27  ;;  %v2370_v25 = vpack.c.bf16 %v2354_v18, %v2354_v18 }
 0x21a   :  { %2387 = vst.msk [vmem:[%s4232_s3 + $0x2c] sm:$0xf] %vm19_vm2, %v2370_v25 }

// kernel: face_encoder_forward.5
= control target key start
LH: loop header
LB: loop body
LE: loop exit
PB: predicated region body
PF: predicated region fallthrough
CT: control target
= control target key end

     0   :  { %v5690_v1 = vmov 0   ;;  %vm20_vm0 = vcmask 1040384   ;;  %vm21_vm1 = vsmask.f32 256  ;;  %vm23_vm2 = vcmask 1044484   ;;  %s7930_s1 = inlined_call_operand.vmem [shape: bf16[2304,32], index: 1, kind: input, shape index: {}]   ;;  %s7931_s0 = inlined_call_operand.vmem [shape: bf16[2,8,8,256], index: 0, kind: input, shape index: {}]   ;;  %s7932_s2 = inlined_call_operand.vmem [shape: f32[1,32], index: 2, kind: input, shape index: {}]   ;;  %s7933_s3 = inlined_call_operand.vmem [shape: bf16[16,8,32], index: 3, kind: output, shape index: {}]  }
   0x1   :  { %v5503_v0 = vld [vmem:[%s7930_s1 + $0x40] sm:$0xff]   ;;  %19 = vst [vmem:[#allocation2] sm:$0xff] %v5690_v1  ;;  %143 = vst [vmem:[#allocation2 + $0x8] sm:$0xff] %v5690_v1  ;;  %v5505_v3 = vld [vmem:[%s7930_s1 + $0x48] sm:$0xff]   ;;  %vm24_vm4 = vsmask.f32 4352 }
   0x2   :  { %158 = vst [vmem:[#allocation2 + $0x10] sm:$0xff] %v5690_v1  ;;  %566 = vst [vmem:[#allocation2 + $0x228] sm:$0xff] %v5690_v1  ;;  %v5504_v2 = vld [vmem:[%s7930_s1] sm:$0xff]   ;;  %4910 = vmatprep.subr.bf16.mxu0 %v5503_v0  ;;  %5486 = vmatprep.subr.bf16.mxu1 %v5503_v0  ;;  %v5506_v4 = vld [vmem:[%s7930_s1 + $0x8] sm:$0xff]   ;;  %vm115_vm6 = vcmask 1043456   ;;  %vm118_vm7 = vcmask 1047556  }
   0x3   :  { %691 = vst [vmem:[#allocation2 + $0x238] sm:$0xff] %v5690_v1  ;;  %815 = vst [vmem:[#allocation2 + $0x240] sm:$0xff] %v5690_v1  ;;  %4911 = vmatpush3.bf16.msra.mxu0 %v5504_v2  ;;  %5494 = vmatpush3.bf16.msra.mxu1 %v5504_v2  ;;  %v5507_v5 = vld [vmem:[%s7930_s1 + $0x50] sm:$0xff]   ;;  %v5509_v7 = vld [vmem:[%s7930_s1 + $0x58] sm:$0xff]   ;;  %vm116_vm9 = vsmask.f32 7938 }
   0x4   :  { %941 = vst [vmem:[#allocation2 + $0x250] sm:$0xff] %v5690_v1  ;;  %1337 = vst [vmem:[#allocation2 + $0x468] sm:$0xff] %v5690_v1  ;;  %4912 = vmatprep.subr.bf16.mxu0 %v5505_v3  ;;  %5487 = vmatprep.subr.bf16.mxu1 %v5505_v3  ;;  %v5508_v6 = vld [vmem:[%s7930_s1 + $0x10] sm:$0xff]   ;;  %v5510_v8 = vld [vmem:[%s7930_s1 + $0x18] sm:$0xff]   ;;  %vm119_vm10 = vsmask.f32 7954 }
   0x5   :  { %1462 = vst [vmem:[#allocation2 + $0x478] sm:$0xff] %v5690_v1  ;;  %v5511_v9 = vld [vmem:[%s7930_s1 + $0x60] sm:$0xff]   ;;  %v5513_v11 = vld [vmem:[%s7930_s1 + $0x68] sm:$0xff]   ;;  %vm22_vm3 = vmand %vm20_vm0, %vm21_vm1  ;;  %vm160_vm14 = vsmask.f32 7950  ;;  %vm159_vm0 = vcmask 1043459  }
   0x6   :  { %v5512_v10 = vld [vmem:[%s7930_s1 + $0x20] sm:$0xff]   ;;  %v30_v13 = vld [vmem:[#allocation2 + $0x48] sm:$0x11]  ;;  %vm25_vm5 = vmand %vm23_vm2, %vm24_vm4  ;;  %vm163_vm15 = vsmask.f32 7966  ;;  %vm162_vm1 = vcmask 1047559  }
   0x7   :  { %4913 = vmatpush3.bf16.msra.mxu0 %v5506_v4  ;;  %5495 = vmatpush3.bf16.msra.mxu1 %v5506_v4  ;;  %v5514_v14 = vld [vmem:[%s7930_s1 + $0x28] sm:$0xff]   ;;  %v5759_v15 = vld [vmem:[%s7931_s0] sm:$0xff]  ;;  %v5515_v17 = vld [vmem:[%s7930_s1 + $0x70] sm:$0xff]   ;;  %vm267_vm4 = vsmask.f32 3328 }
   0x8   :  { %4914 = vmatprep.subr.bf16.mxu0 %v5507_v5  ;;  %5488 = vmatprep.subr.bf16.mxu1 %v5507_v5  ;;  %v27_v12 = vld [vmem:[#allocation2] sm:$0x11]  ;;  %vm5767_vm8 = vmor %vm25_vm5, %vm22_vm3  ;;  %v59_v19 = vshrl.u32 %v5759_v15, 16  ;;  %v62_v20 = vshll.u32 %v5759_v15, 16  ;;  %v819_v24 = vld [vmem:[#allocation2 + $0x288] sm:$0x11] }
   0x9   :  { %v4555_v16 = vld [vmem:[%s7931_s0 + $0x40] sm:$0xff]  ;;  %v28_v21 = vsel %vm5767_vm8, 0, %v27_v12  ;;  %v31_v22 = vsel %vm5767_vm8, 0, %v30_v13  ;;  %v820_v27 = vsel %vm5767_vm8, 0, %v819_v24  ;;  %vm117_vm11 = vmand %vm115_vm6, %vm116_vm9  ;;  %v5516_v31 = vld [vmem:[%s7930_s1 + $0x30] sm:$0xff]  }
   0xa   :  { %v816_v23 = vld [vmem:[#allocation2 + $0x240] sm:$0x11]  ;;  %29 = vst [vmem:[#allocation2] sm:$0x11] %v28_v21  ;;  %32 = vst [vmem:[#allocation2 + $0x48] sm:$0x11] %v31_v22 }
   0xb   :  { %4915 = vmatpush3.bf16.msra.mxu0 %v5508_v6  ;;  %5496 = vmatpush3.bf16.msra.mxu1 %v5508_v6  ;;  %v61_v25 = vrot.slane %v59_v19, 7  ;;  %v817_v26 = vsel %vm5767_vm8, 0, %v816_v23  ;;  %v849_v28 = vshrl.u32 %v4555_v16, 16  ;;  %821 = vst [vmem:[#allocation2 + $0x288] sm:$0x11] %v820_v27  ;;  %v852_v29 = vshll.u32 %v4555_v16, 16  ;;  %vm120_vm12 = vmand %vm118_vm7, %vm119_vm10 }
   0xc   :  { %4916 = vmatprep.subr.bf16.mxu0 %v5509_v7  ;;  %5489 = vmatprep.subr.bf16.mxu1 %v5509_v7  ;;  %818 = vst [vmem:[#allocation2 + $0x240] sm:$0x11] %v817_v26  ;;  %v5517_v32 = vld [vmem:[%s7930_s1 + $0x78] sm:$0xff]   ;;  %vm5795_vm13 = vmor %vm120_vm12, %vm117_vm11  ;;  %v5519_v39 = vld [vmem:[%s7930_s1 + $0xc0] sm:$0xff]   ;;  %vm269_vm5 = vsmask.f32 7424 }
   0xd   :  { %v851_v30 = vrot.slane %v849_v28, 7  ;;  %v64_v33 = vor.u32 %v62_v20, %v61_v25  ;;  %v5518_v36 = vld [vmem:[%s7930_s1 + $0x38] sm:$0xff]   ;;  %v5520_v43 = vld [vmem:[%s7930_s1 + $0x140] sm:$0xff]   ;;  %v5523_v51 = vld [vmem:[%s7930_s1 + $0xc8] sm:$0xff]  }
   0xe   :  { %v5521_v46 = vld [vmem:[%s7930_s1 + $0x80] sm:$0xff]   ;;  %v5524_v52 = vld [vmem:[%s7930_s1 + $0x148] sm:$0xff]   ;;  %v33_v53 = vld [vmem:[#allocation2 + $0x90] sm:$0x11] }
   0xf   :  { %4917 = vmatpush3.bf16.msra.mxu0 %v5510_v8  ;;  %5497 = vmatpush3.bf16.msra.mxu1 %v5510_v8  ;;  %v854_v35 = vor.u32 %v852_v29, %v851_v30  ;;  %v5522_v47 = vld [vmem:[%s7930_s1 + $0x100] sm:$0xff]   ;;  %v36_v54 = vld [vmem:[#allocation2 + $0xd8] sm:$0x11]  ;;  %v5827_v55 = vld [vmem:[%s7931_s0 + $0x8] sm:$0xff]  ;;  %v34_v56 = vsel %vm5767_vm8, 0, %v33_v53 }
  0x10   :  { %4918 = vmatprep.subr.bf16.mxu0 %v5511_v9  ;;  %5490 = vmatprep.subr.bf16.mxu1 %v5511_v9  ;;  %v37_v57 = vsel %vm5767_vm8, 0, %v36_v54  ;;  %v5836_v58 = vld [vmem:[%s7931_s0 + $0x10] sm:$0xff]  ;;  %v66_v59 = vshrl.u32 %v5827_v55, 16  ;;  %v69_v60 = vshll.u32 %v5827_v55, 16  ;;  %v5843_v61 = vld [vmem:[%s7931_s0 + $0x48] sm:$0xff]  ;;  %vm5973_vm2 = vmand %vm159_vm0, %vm160_vm14 }
  0x11   :  { %v122_v37 = vld [vmem:[#allocation2 + $0x48] sm:$0xff]  ;;  %v1585_v38 = vld [vmem:[#allocation2] sm:$0xff]  ;;  %35 = vst [vmem:[#allocation2 + $0x90] sm:$0x11] %v34_v56  ;;  %38 = vst [vmem:[#allocation2 + $0xd8] sm:$0x11] %v37_v57 }
  0x12   :  { %v123_v40 = vsel %vm5795_vm13, %v64_v33, %v122_v37  ;;  %v905_v41 = vld [vmem:[#allocation2 + $0x288] sm:$0xff]  ;;  %v73_v0 = vshrl.u32 %v5836_v58, 16  ;;  %v76_v2 = vshll.u32 %v5836_v58, 16  ;;  %v822_v3 = vld [vmem:[#allocation2 + $0x2d0] sm:$0x11]  ;;  %v68_v5 = vrot.slane %v66_v59, 7  ;;  %vm5979_vm3 = vmand %vm162_vm1, %vm163_vm15 }
  0x13   :  { %4919 = vmatpush3.bf16.msra.mxu0 %v5512_v10  ;;  %5498 = vmatpush3.bf16.msra.mxu1 %v5512_v10  ;;  %v1657_v42 = vld [vmem:[#allocation2 + $0x240] sm:$0xff]  ;;  %124 = vst [vmem:[#allocation2 + $0x48] sm:$0xff] %v123_v40  ;;  %v4623_v44 = vcombine.high %v1585_v38, %v123_v40  ;;  %v906_v45 = vsel %vm5795_vm13, %v854_v35, %v905_v41  ;;  %v5525_v62 = vld [vmem:[%s7930_s1 + $0x88] sm:$0xff]   ;;  %v825_v4 = vld [vmem:[#allocation2 + $0x318] sm:$0x11]  ;;  %v823_v6 = vsel %vm5767_vm8, 0, %v822_v3 }
  0x14   :  { %4920 = vmatprep.subr.bf16.mxu0 %v5513_v11  ;;  %5491 = vmatprep.subr.bf16.mxu1 %v5513_v11  ;;  %v4622_v48 = vcombine.low %v1585_v38, %v123_v40  ;;  %907 = vst [vmem:[#allocation2 + $0x288] sm:$0xff] %v906_v45  ;;  %v4694_v49 = vcombine.low %v1657_v42, %v906_v45  ;;  %v5526_v63 = vld [vmem:[%s7930_s1 + $0x108] sm:$0xff]   ;;  %v826_v7 = vsel %vm5767_vm8, 0, %v825_v4  ;;  %v5862_v8 = vld [vmem:[%s7931_s0 + $0x50] sm:$0xff]  ;;  %v856_v9 = vshrl.u32 %v5843_v61, 16  ;;  %v5933_v4 = vld [vmem:[%s7931_s0 + $0x58] sm:$0xff] }
  0x15   :  { %v4695_v50 = vcombine.high %v1657_v42, %v906_v45  ;;  %3640 = vmatprep.mubr.bf16.mxu0 %v4623_v44  ;;  %v5527_v10 = vld [vmem:[%s7930_s1 + $0xd0] sm:$0xff]   ;;  %v75_v11 = vrot.slane %v73_v0, 7  ;;  %824 = vst [vmem:[#allocation2 + $0x2d0] sm:$0x11] %v823_v6  ;;  %827 = vst [vmem:[#allocation2 + $0x318] sm:$0x11] %v826_v7  ;;  %v4715_v21 = vcombine.high %v5843_v61, %v5862_v8 }
  0x16   :  { %v859_v12 = vshll.u32 %v5843_v61, 16  ;;  %v863_v13 = vshrl.u32 %v5862_v8, 16  ;;  %v858_v16 = vrot.slane %v856_v9, 7  ;;  %v4714_v22 = vcombine.low %v5843_v61, %v5862_v8  ;;  %v5529_v26 = vld [vmem:[%s7930_s1 + $0x90] sm:$0xff]   ;;  %v828_v57 = vld [vmem:[#allocation2 + $0x360] sm:$0x11]  ;;  %vm6052_vm9 = vmor %vm5979_vm3, %vm5973_vm2 }
  0x17   :  { %4921 = vmatpush3.bf16.msra.mxu0 %v5514_v14  ;;  %5499 = vmatpush3.bf16.msra.mxu1 %v5514_v14  ;;  %v866_v14 = vshll.u32 %v5862_v8, 16  ;;  %v71_v23 = vor.u32 %v69_v60, %v68_v5  ;;  %v78_v24 = vor.u32 %v76_v2, %v75_v11  ;;  %v5530_v29 = vld [vmem:[%s7930_s1 + $0x110] sm:$0xff]   ;;  %v831_v3 = vld [vmem:[#allocation2 + $0x3a8] sm:$0x11]  ;;  %v5938_v5 = vld [vmem:[%s7931_s0 + $0x60] sm:$0xff]  ;;  %v873_v11 = vshll.u32 %v5933_v4, 16 }
  0x18   :  { %4922 = vmatprep.subr.bf16.mxu0 %v5515_v17  ;;  %5492 = vmatprep.subr.bf16.mxu1 %v5515_v17  ;;  %v5528_v17 = vld [vmem:[%s7930_s1 + $0x150] sm:$0xff]   ;;  %v865_v25 = vrot.slane %v863_v13, 7  ;;  %v861_v27 = vor.u32 %v859_v12, %v858_v16  ;;  %v832_v9 = vsel %vm5767_vm8, 0, %v831_v3  ;;  %v877_v12 = vshrl.u32 %v5938_v5, 16  ;;  %vm6086_vm10 = vmand %vm115_vm6, %vm267_vm4  ;;  %v5673_v34 = vld [vmem:[%s7930_s1 + $0x478] sm:$0xff]  }
  0x19   :  { %3672 = vmatprep.mubr.bf16.mxu1 %v4695_v50  ;;  %v125_v30 = vld [vmem:[#allocation2 + $0x90] sm:$0xff]  ;;  %v5915_v50 = vld [vmem:[%s7931_s0 + $0x18] sm:$0xff]  ;;  %833 = vst [vmem:[#allocation2 + $0x3a8] sm:$0x11] %v832_v9  ;;  %v880_v13 = vshll.u32 %v5938_v5, 16  ;;  %v4733_v16 = vcombine.high %v5933_v4, %v5938_v5  ;;  %vm6133_vm6 = vmand %vm118_vm7, %vm269_vm5 }
  0x1a   :  { %v868_v28 = vor.u32 %v866_v14, %v865_v25  ;;  %v126_v33 = vsel %vm5795_vm13, %v71_v23, %v125_v30  ;;  %v80_v53 = vshrl.u32 %v5915_v50, 16  ;;  %v83_v54 = vshll.u32 %v5915_v50, 16  ;;  %v5535_v14 = vld [vmem:[%s7930_s1 + $0xe0] sm:$0xff]   ;;  %v6022_v9 = vld [vmem:[%s7931_s0 + $0x30] sm:$0xff]  ;;  %vm6156_vm7 = vmor %vm6133_vm6, %vm6086_vm10 }
  0x1b   :  { %4923 = vmatpush3.bf16.msra.mxu0 %v5516_v31  ;;  %5500 = vmatpush3.bf16.msra.mxu1 %v5516_v31  ;;  %v128_v31 = vld [vmem:[#allocation2 + $0xd8] sm:$0xff]  ;;  %127 = vst [vmem:[#allocation2 + $0x90] sm:$0xff] %v126_v33  ;;  %v4732_v25 = vcombine.low %v5933_v4, %v5938_v5 }
  0x1c   :  { %4924 = vmatprep.subr.bf16.mxu0 %v5517_v32  ;;  %5493 = vmatprep.subr.bf16.mxu1 %v5517_v32  ;;  %v5531_v32 = vld [vmem:[%s7930_s1 + $0xd8] sm:$0xff]   ;;  %v129_v35 = vsel %vm5795_vm13, %v78_v24, %v128_v31  ;;  %v908_v38 = vld [vmem:[#allocation2 + $0x2d0] sm:$0xff]  ;;  %v82_v6 = vrot.slane %v80_v53, 7  ;;  %v5536_v24 = vld [vmem:[%s7930_s1 + $0x160] sm:$0xff]  }
  0x1d   :  { %130 = vst [vmem:[#allocation2 + $0xd8] sm:$0xff] %v129_v35  ;;  %v4641_v37 = vcombine.high %v126_v33, %v129_v35  ;;  %v4640_v40 = vcombine.low %v126_v33, %v129_v35  ;;  %v909_v41 = vsel %vm5795_vm13, %v861_v27, %v908_v38  ;;  %v879_v27 = vrot.slane %v877_v12, 7  ;;  %v5539_v38 = vld [vmem:[%s7930_s1 + $0xe8] sm:$0xff]  }
  0x1e   :  { %910 = vst [vmem:[#allocation2 + $0x2d0] sm:$0xff] %v909_v41 }
  0x1f   :  { %4925 = vmatpush3.bf16.msra.mxu0 %v5518_v36  ;;  %5501 = vmatpush3.bf16.msra.mxu1 %v5518_v36  ;;  %v5532_v36 = vld [vmem:[%s7930_s1 + $0x158] sm:$0xff]   ;;  %v882_v35 = vor.u32 %v880_v13, %v879_v27 }
  0x20   :  { %4974 = vmatprep.subr.bf16.mxu1 %v5519_v39  ;;  %5038 = vmatprep.subr.bf16.mxu0 %v5520_v43  ;;  %v911_v39 = vld [vmem:[#allocation2 + $0x318] sm:$0xff] }
  0x21   :  { %v912_v42 = vsel %vm5795_vm13, %v868_v28, %v911_v39  ;;  %v5533_v43 = vld [vmem:[%s7930_s1 + $0x98] sm:$0xff]   ;;  %v5537_v28 = vld [vmem:[%s7930_s1 + $0xa0] sm:$0xff]  }
  0x22   :  { %3641 = vmatmul.mubr.bf16.vlgmr.msra.gmra.mrb[0].mxu0 %v4622_v48  ;;  %3673 = vmatmul.mubr.bf16.vlgmr.msra.gmra.mrb[0].mxu1 %v4694_v49  ;;  %913 = vst [vmem:[#allocation2 + $0x318] sm:$0xff] %v912_v42  ;;  %v4713_v44 = vcombine.high %v909_v41, %v912_v42  ;;  %v4712_v45 = vcombine.low %v909_v41, %v912_v42  ;;  %v42_v49 = vld [vmem:[#allocation2 + $0x168] sm:$0x11]  ;;  %v837_v27 = vld [vmem:[#allocation2 + $0x438] sm:$0x11] }
  0x23   :  { %4975 = vmatpush3.bf16.msra.mxu1 %v5521_v46  ;;  %5039 = vmatpush3.bf16.msra.mxu0 %v5522_v47  ;;  %v5534_v46 = vld [vmem:[%s7930_s1 + $0x118] sm:$0xff]   ;;  %v39_v47 = vld [vmem:[#allocation2 + $0x120] sm:$0x11]  ;;  %v5540_v41 = vld [vmem:[%s7930_s1 + $0x168] sm:$0xff]  }
  0x24   :  { %4976 = vmatprep.subr.bf16.mxu1 %v5523_v51  ;;  %5040 = vmatprep.subr.bf16.mxu0 %v5524_v52  ;;  %v40_v48 = vsel %vm5767_vm8, 0, %v39_v47  ;;  %v5920_v51 = vld [vmem:[%s7931_s0 + $0x20] sm:$0xff]  ;;  %v43_v52 = vsel %vm5767_vm8, 0, %v42_v49  ;;  %v5541_v47 = vld [vmem:[%s7930_s1 + $0xa8] sm:$0xff]  }
  0x25   :  { %3648 = vmatprep.mubr.bf16.mxu0 %v4641_v37  ;;  %3680 = vmatprep.mubr.bf16.mxu1 %v4713_v44  ;;  %41 = vst [vmem:[#allocation2 + $0x120] sm:$0x11] %v40_v48  ;;  %v87_v56 = vshrl.u32 %v5920_v51, 16  ;;  %44 = vst [vmem:[#allocation2 + $0x168] sm:$0x11] %v43_v52  ;;  %v917_v44 = vld [vmem:[#allocation2 + $0x3a8] sm:$0xff] }
  0x26   :  { %v5542_v52 = vld [vmem:[%s7930_s1 + $0x128] sm:$0xff]  }
  0x27   :  { %4977 = vmatpush3.bf16.msra.mxu1 %v5525_v62  ;;  %5041 = vmatpush3.bf16.msra.mxu0 %v5526_v63  ;;  %v90_v62 = vshll.u32 %v5920_v51, 16  ;;  %v829_v63 = vsel %vm5767_vm8, 0, %v828_v57  ;;  %v89_v7 = vrot.slane %v87_v56, 7  ;;  %v45_v57 = vld [vmem:[#allocation2 + $0x1b0] sm:$0x11] }
  0x28   :  { %4978 = vmatprep.subr.bf16.mxu1 %v5527_v10  ;;  %5042 = vmatprep.subr.bf16.mxu0 %v5528_v17  ;;  %830 = vst [vmem:[#allocation2 + $0x360] sm:$0x11] %v829_v63  ;;  %v870_v10 = vshrl.u32 %v5933_v4, 16  ;;  %v85_v17 = vor.u32 %v83_v54, %v82_v6  ;;  %v48_v63 = vld [vmem:[#allocation2 + $0x1f8] sm:$0x11]  ;;  %v46_v3 = vsel %vm5767_vm8, 0, %v45_v57 }
  0x29   :  { %v49_v6 = vsel %vm5767_vm8, 0, %v48_v63  ;;  %47 = vst [vmem:[#allocation2 + $0x1b0] sm:$0x11] %v46_v3 }
  0x2a   :  { %3649 = vmatmul.mubr.bf16.gmra.mrb[4].mxu0 %v4640_v40  ;;  %3681 = vmatmul.mubr.bf16.gmra.mrb[4].mxu1 %v4712_v45  ;;  %v872_v23 = vrot.slane %v870_v10, 7  ;;  %50 = vst [vmem:[#allocation2 + $0x1f8] sm:$0x11] %v49_v6 }
  0x2b   :  { %4979 = vmatpush3.bf16.msra.mxu1 %v5529_v26  ;;  %5043 = vmatpush3.bf16.msra.mxu0 %v5530_v29  ;;  %v92_v26 = vor.u32 %v90_v62, %v89_v7  ;;  %v6017_v7 = vld [vmem:[%s7931_s0 + $0x28] sm:$0xff] }
  0x2c   :  { %4980 = vmatprep.subr.bf16.mxu1 %v5531_v32  ;;  %5044 = vmatprep.subr.bf16.mxu0 %v5532_v36  ;;  %v875_v31 = vor.u32 %v873_v11, %v872_v23  ;;  %v5538_v32 = vld [vmem:[%s7930_s1 + $0x120] sm:$0xff]   ;;  %v134_v37 = vld [vmem:[#allocation2 + $0x168] sm:$0xff]  ;;  %v97_v23 = vshll.u32 %v6017_v7, 16 }
  0x2d   :  { %v131_v33 = vld [vmem:[#allocation2 + $0x120] sm:$0xff]  ;;  %v135_v39 = vsel %vm5795_vm13, %v92_v26, %v134_v37  ;;  %v104_v26 = vshll.u32 %v6022_v9, 16 }
  0x2e   :  { %v132_v36 = vsel %vm5795_vm13, %v85_v17, %v131_v33  ;;  %136 = vst [vmem:[#allocation2 + $0x168] sm:$0xff] %v135_v39  ;;  %v94_v17 = vshrl.u32 %v6017_v7, 16  ;;  %v6040_v33 = vld [vmem:[%s7931_s0 + $0x70] sm:$0xff] }
  0x2f   :  { %5045 = vmatpush3.bf16.msra.mxu0 %v5534_v46  ;;  %4981 = vmatpush3.bf16.msra.mxu1 %v5533_v43  ;;  %133 = vst [vmem:[#allocation2 + $0x120] sm:$0xff] %v132_v36  ;;  %v914_v40 = vld [vmem:[#allocation2 + $0x360] sm:$0xff]  ;;  %v4659_v42 = vcombine.high %v132_v36, %v135_v39  ;;  %v4658_v45 = vcombine.low %v132_v36, %v135_v39 }
  0x30   :  { %4982 = vmatprep.subr.bf16.mxu1 %v5535_v14  ;;  %5046 = vmatprep.subr.bf16.mxu0 %v5536_v24  ;;  %v915_v43 = vsel %vm5795_vm13, %v875_v31, %v914_v40  ;;  %v918_v46 = vsel %vm5795_vm13, %v882_v35, %v917_v44  ;;  %v834_v14 = vld [vmem:[#allocation2 + $0x3f0] sm:$0x11]  ;;  %v101_v24 = vshrl.u32 %v6022_v9, 16  ;;  %v838_v31 = vsel %vm5767_vm8, 0, %v837_v27 }
  0x31   :  { %916 = vst [vmem:[#allocation2 + $0x360] sm:$0xff] %v915_v43  ;;  %3656 = vmatprep.mubr.bf16.mxu0 %v4659_v42  ;;  %919 = vst [vmem:[#allocation2 + $0x3a8] sm:$0xff] %v918_v46  ;;  %v4731_v48 = vcombine.high %v915_v43, %v918_v46  ;;  %v4730_v49 = vcombine.low %v915_v43, %v918_v46  ;;  %v96_v35 = vrot.slane %v94_v17, 7  ;;  %v891_v40 = vshrl.u32 %v6040_v33, 16  ;;  %v5543_v42 = vld [vmem:[%s7930_s1 + $0xf0] sm:$0xff]   ;;  %v140_v3 = vld [vmem:[#allocation2 + $0x1f8] sm:$0xff] }
  0x32   :  { %3657 = vmatmul.mubr.bf16.gmra.mrb[8].mxu0 %v4658_v45  ;;  %v103_v36 = vrot.slane %v101_v24, 7  ;;  %839 = vst [vmem:[#allocation2 + $0x438] sm:$0x11] %v838_v31  ;;  %v5544_v43 = vld [vmem:[%s7930_s1 + $0x170] sm:$0xff]   ;;  %v200_v27 = vrot.slane %v59_v19, 4  ;;  %v209_v19 = vrot.slane %v66_v59, 4 }
  0x33   :  { %4983 = vmatpush3.bf16.msra.mxu1 %v5537_v28  ;;  %5047 = vmatpush3.bf16.msra.mxu0 %v5538_v32  ;;  %v835_v28 = vsel %vm5767_vm8, 0, %v834_v14  ;;  %v6035_v32 = vld [vmem:[%s7931_s0 + $0x68] sm:$0xff]  ;;  %v99_v44 = vor.u32 %v97_v23, %v96_v35  ;;  %v137_v63 = vld [vmem:[#allocation2 + $0x1b0] sm:$0xff]  ;;  %v5547_v14 = vld [vmem:[%s7930_s1 + $0xf8] sm:$0xff]   ;;  %v218_v59 = vrot.slane %v73_v0, 4 }
  0x34   :  { %4984 = vmatprep.subr.bf16.mxu1 %v5539_v38  ;;  %5048 = vmatprep.subr.bf16.mxu0 %v5540_v41  ;;  %836 = vst [vmem:[#allocation2 + $0x3f0] sm:$0x11] %v835_v28  ;;  %v884_v37 = vshrl.u32 %v6035_v32, 16  ;;  %v887_v38 = vshll.u32 %v6035_v32, 16  ;;  %v894_v41 = vshll.u32 %v6040_v33, 16  ;;  %v4751_v29 = vcombine.high %v6035_v32, %v6040_v33 }
  0x35   :  { %3688 = vmatprep.mubr.bf16.mxu1 %v4731_v48  ;;  %v4750_v30 = vcombine.low %v6035_v32, %v6040_v33  ;;  %v106_v45 = vor.u32 %v104_v26, %v103_v36  ;;  %v893_v48 = vrot.slane %v891_v40, 7  ;;  %v203_v28 = vrot.slane %v62_v20, 5  ;;  %v5548_v36 = vld [vmem:[%s7930_s1 + $0x178] sm:$0xff]  }
  0x36   :  { %3689 = vmatmul.mubr.bf16.gmra.mrb[8].mxu1 %v4730_v49  ;;  %v886_v46 = vrot.slane %v884_v37, 7  ;;  %v5546_v49 = vld [vmem:[%s7930_s1 + $0x130] sm:$0xff]   ;;  %v138_v31 = vsel %vm5795_vm13, %v99_v44, %v137_v63  ;;  %v212_v20 = vrot.slane %v69_v60, 5  ;;  %v169_v0 = vld [vmem:[#allocation2 + $0x58] sm:$0x88] }
  0x37   :  { %4985 = vmatpush3.bf16.msra.mxu1 %v5541_v47  ;;  %5049 = vmatpush3.bf16.msra.mxu0 %v5542_v52  ;;  %v5545_v47 = vld [vmem:[%s7930_s1 + $0xb0] sm:$0xff]   ;;  %v896_v6 = vor.u32 %v894_v41, %v893_v48  ;;  %v141_v35 = vsel %vm5795_vm13, %v106_v45, %v140_v3  ;;  %139 = vst [vmem:[#allocation2 + $0x1b0] sm:$0xff] %v138_v31  ;;  %v5549_v48 = vld [vmem:[%s7930_s1 + $0xb8] sm:$0xff]  }
  0x38   :  { %4986 = vmatprep.subr.bf16.mxu1 %v5543_v42  ;;  %5050 = vmatprep.subr.bf16.mxu0 %v5544_v43  ;;  %v889_v52 = vor.u32 %v887_v38, %v886_v46  ;;  %142 = vst [vmem:[#allocation2 + $0x1f8] sm:$0xff] %v141_v35  ;;  %v4677_v42 = vcombine.high %v138_v31, %v141_v35  ;;  %v166_v3 = vld [vmem:[#allocation2 + $0x10] sm:$0x88] }
  0x39   :  { %v923_v46 = vld [vmem:[#allocation2 + $0x438] sm:$0xff] }
  0x3a   :  { %v924_v45 = vsel %vm5795_vm13, %v896_v6, %v923_v46  ;;  %3664 = vmatprep.mubr.bf16.mxu0 %v4677_v42  ;;  %v204_v6 = vor.u32 %v203_v28, %v200_v27  ;;  %v5553_v28 = vld [vmem:[%s7930_s1 + $0x240] sm:$0xff]   ;;  %v213_v46 = vor.u32 %v212_v20, %v209_v19 }
  0x3b   :  { %4987 = vmatpush3.bf16.msra.mxu1 %v5545_v47  ;;  %5051 = vmatpush3.bf16.msra.mxu0 %v5546_v49  ;;  %v920_v43 = vld [vmem:[#allocation2 + $0x3f0] sm:$0xff]  ;;  %v4676_v47 = vcombine.low %v138_v31, %v141_v35  ;;  %v4625_v49 = vcombine.high %v5690_v1, %v5759_v15  ;;  %925 = vst [vmem:[#allocation2 + $0x438] sm:$0xff] %v924_v45  ;;  %v167_v31 = vsel %vm6052_vm9, 0, %v166_v3  ;;  %v5551_v35 = vld [vmem:[%s7930_s1 + $0x1c0] sm:$0xff]   ;;  %v6180_v3 = vrot.slane %v94_v17, 4  ;;  %v5559_v17 = vld [vmem:[%s7930_s1 + $0x248] sm:$0xff]  }
  0x3c   :  { %4988 = vmatprep.subr.bf16.mxu1 %v5547_v14  ;;  %v921_v44 = vsel %vm5795_vm13, %v889_v52, %v920_v43  ;;  %5052 = vmatprep.subr.bf16.mxu0 %v5548_v36  ;;  %v5550_v52 = vld [vmem:[%s7930_s1 + $0x138] sm:$0xff]   ;;  %v221_v14 = vrot.slane %v76_v2, 5  ;;  %168 = vst [vmem:[#allocation2 + $0x10] sm:$0x88] %v167_v31  ;;  %v170_v2 = vsel %vm6052_vm9, 0, %v169_v0  ;;  %v205_v27 = vrot.slane %v204_v6, 4 }
  0x3d   :  { %922 = vst [vmem:[#allocation2 + $0x3f0] sm:$0xff] %v921_v44  ;;  %v4749_v60 = vcombine.high %v921_v44, %v924_v45  ;;  %v4748_v63 = vcombine.low %v921_v44, %v924_v45  ;;  %3665 = vmatmul.mubr.bf16.gmra.mrb[12].mxu0 %v4676_v47  ;;  %171 = vst [vmem:[#allocation2 + $0x58] sm:$0x88] %v170_v2  ;;  %v172_v42 = vld [vmem:[#allocation2 + $0xa0] sm:$0x88]  ;;  %v227_v44 = vrot.slane %v80_v53, 4 }
  0x3e   :  { %v175_v43 = vld [vmem:[#allocation2 + $0xe8] sm:$0x88]  ;;  %v222_v47 = vor.u32 %v221_v14, %v218_v59  ;;  %v230_v45 = vrot.slane %v83_v54, 5  ;;  %v236_v53 = vrot.slane %v87_v56, 4  ;;  %v239_v54 = vrot.slane %v90_v62, 5  ;;  %v5554_v56 = vld [vmem:[%s7930_s1 + $0x200] sm:$0xff]  }
  0x3f   :  { %4989 = vmatpush3.bf16.msra.mxu1 %v5549_v48  ;;  %3696 = vmatprep.mubr.bf16.mxu1 %v4749_v60  ;;  %v173_v48 = vsel %vm6052_vm9, 0, %v172_v42  ;;  %v4624_v60 = vcombine.low %v5690_v1, %v5759_v15  ;;  %v5552_v1 = vld [vmem:[%s7930_s1 + $0x180] sm:$0xff]   ;;  %v4643_v15 = vcombine.high %v5827_v55, %v5836_v58  ;;  %v214_v20 = vrot.slane %v213_v46, 4  ;;  %v5558_v62 = vld [vmem:[%s7930_s1 + $0x188] sm:$0xff]   ;;  %v178_v31 = vld [vmem:[#allocation2 + $0x130] sm:$0x88] }
  0x40   :  { %5053 = vmatpush3.bf16.msra.mxu0 %v5550_v52  ;;  %3697 = vmatmul.mubr.bf16.gmra.mrb[12].mxu1 %v4748_v63  ;;  %174 = vst [vmem:[#allocation2 + $0xa0] sm:$0x88] %v173_v48  ;;  %v223_v59 = vrot.slane %v222_v47, 4  ;;  %v5557_v63 = vld [vmem:[%s7930_s1 + $0x1c8] sm:$0xff]   ;;  %v6184_v6 = vrot.slane %v97_v23, 5  ;;  %v240_v36 = vor.u32 %v239_v54, %v236_v53  ;;  %v179_v23 = vsel %vm6052_vm9, 0, %v178_v31 }
  0x41   :  { %5102 = vmatprep.subr.bf16.mxu1 %v5551_v35  ;;  %3737 = vmatprep.mubr.bf16.mxu1 %v4625_v49  ;;  %v176_v49 = vsel %vm6052_vm9, 0, %v175_v43  ;;  %v181_v0 = vld [vmem:[#allocation2 + $0x178] sm:$0x88]  ;;  %v231_v35 = vor.u32 %v230_v45, %v227_v44  ;;  %v5563_v42 = vld [vmem:[%s7930_s1 + $0x1d0] sm:$0xff]   ;;  %180 = vst [vmem:[#allocation2 + $0x130] sm:$0x88] %v179_v23 }
  0x42   :  { %5166 = vmatprep.subr.bf16.mxu0 %v5553_v28  ;;  %177 = vst [vmem:[#allocation2 + $0xe8] sm:$0x88] %v176_v49  ;;  %v5560_v47 = vld [vmem:[%s7930_s1 + $0x208] sm:$0xff]   ;;  %v254_v44 = vrot.slane %v101_v24, 4  ;;  %v257_v45 = vrot.slane %v104_v26, 5  ;;  %v5564_v54 = vld [vmem:[%s7930_s1 + $0x190] sm:$0xff]   ;;  %v4661_v26 = vcombine.high %v5915_v50, %v5920_v51 }
  0x43   :  { %v1587_v57 = vld [vmem:[#allocation2 + $0x10] sm:$0xff]  ;;  %v232_v53 = vrot.slane %v231_v35, 4  ;;  %v6259_v23 = vld [vmem:[%s7931_s0 + $0x40] sm:$0xff] }
  0x44   :  { %v272_v52 = vld [vmem:[#allocation2 + $0x58] sm:$0xff] }
  0x45   :  { %v273_v14 = vsel %vm6156_vm7, %v205_v27, %v272_v52  ;;  %v182_v27 = vsel %vm6052_vm9, 0, %v181_v0  ;;  %v5569_v52 = vld [vmem:[%s7930_s1 + $0x1d8] sm:$0xff]  }
  0x46   :  { %274 = vst [vmem:[#allocation2 + $0x58] sm:$0xff] %v273_v14  ;;  %v4626_v2 = vcombine.low %v1587_v57, %v273_v14  ;;  %v4627_v28 = vcombine.high %v1587_v57, %v273_v14  ;;  %183 = vst [vmem:[#allocation2 + $0x178] sm:$0x88] %v182_v27  ;;  %v184_v57 = vld [vmem:[#allocation2 + $0x1c0] sm:$0x88] }
  0x47   :  { %v275_v43 = vld [vmem:[#allocation2 + $0xa0] sm:$0xff]  ;;  %v942_v27 = vld [vmem:[#allocation2 + $0x250] sm:$0x88] }
  0x48   :  { %3738 = vmatmul.mubr.bf16.vlgmr.msra.gmra.mrb[16].mxu1 %v4624_v60  ;;  %3834 = vmatprep.mubr.bf16.mxu0 %v4627_v28  ;;  %v276_v48 = vsel %vm6156_vm7, %v214_v20, %v275_v43  ;;  %v4642_v60 = vcombine.low %v5827_v55, %v5836_v58  ;;  %v187_v55 = vld [vmem:[#allocation2 + $0x208] sm:$0x88]  ;;  %v185_v58 = vsel %vm6052_vm9, 0, %v184_v57  ;;  %v281_v14 = vld [vmem:[#allocation2 + $0x130] sm:$0xff]  ;;  %v4660_v43 = vcombine.low %v5915_v50, %v5920_v51  ;;  %v5574_v51 = vld [vmem:[%s7930_s1 + $0x1a0] sm:$0xff]  }
  0x49   :  { %5103 = vmatpush3.bf16.msra.mxu1 %v5552_v1  ;;  %3745 = vmatprep.mubr.bf16.mxu1 %v4643_v15  ;;  %v278_v46 = vld [vmem:[#allocation2 + $0xe8] sm:$0xff]  ;;  %277 = vst [vmem:[#allocation2 + $0xa0] sm:$0xff] %v276_v48  ;;  %v241_v1 = vrot.slane %v240_v36, 4  ;;  %v5565_v15 = vld [vmem:[%s7930_s1 + $0x250] sm:$0xff]   ;;  %v188_v20 = vsel %vm6052_vm9, 0, %v187_v55  ;;  %v6240_v0 = vsel %vm6156_vm7, %v232_v53, %v281_v14  ;;  %v977_v50 = vshll.u32 %v6259_v23, 16 }
  0x4a   :  { %5104 = vmatprep.subr.bf16.mxu1 %v5557_v63  ;;  %3835 = vmatmul.mubr.bf16.vlgmr.msra.gmra.mrb[16].mxu0 %v4626_v2  ;;  %v279_v49 = vsel %vm6156_vm7, %v223_v59, %v278_v46  ;;  %v249_v59 = vor.u32 %v6184_v6, %v6180_v3  ;;  %186 = vst [vmem:[#allocation2 + $0x1c0] sm:$0x88] %v185_v58  ;;  %189 = vst [vmem:[#allocation2 + $0x208] sm:$0x88] %v188_v20  ;;  %v5570_v3 = vld [vmem:[%s7930_s1 + $0x198] sm:$0xff]   ;;  %v6236_v6 = vrot.slane %v870_v10, 4 }
  0x4b   :  { %5167 = vmatpush3.bf16.msra.mxu0 %v5554_v56  ;;  %280 = vst [vmem:[#allocation2 + $0xe8] sm:$0xff] %v279_v49  ;;  %v4645_v24 = vcombine.high %v276_v48, %v279_v49  ;;  %v258_v63 = vor.u32 %v257_v45, %v254_v44  ;;  %v4644_v56 = vcombine.low %v276_v48, %v279_v49  ;;  %v5571_v2 = vld [vmem:[%s7930_s1 + $0x258] sm:$0xff]   ;;  %283 = vst [vmem:[#allocation2 + $0x130] sm:$0xff] %v6240_v0  ;;  %v5573_v45 = vld [vmem:[%s7930_s1 + $0x1e0] sm:$0xff]  }
  0x4c   :  { %5168 = vmatprep.subr.bf16.mxu0 %v5559_v17  ;;  %v250_v36 = vrot.slane %v249_v59, 4  ;;  %v5572_v17 = vld [vmem:[%s7930_s1 + $0x218] sm:$0xff]   ;;  %v943_v46 = vsel %vm6052_vm9, 0, %v942_v27  ;;  %v974_v44 = vshrl.u32 %v6259_v23, 16  ;;  %v4679_v48 = vcombine.high %v6017_v7, %v6022_v9  ;;  %v5576_v57 = vld [vmem:[%s7930_s1 + $0x220] sm:$0xff]   ;;  %v6325_v14 = vld [vmem:[%s7931_s0 + $0x50] sm:$0xff] }
  0x4d   :  { %5105 = vmatpush3.bf16.msra.mxu1 %v5558_v62  ;;  %3842 = vmatprep.mubr.bf16.mxu0 %v4645_v24  ;;  %v5566_v62 = vld [vmem:[%s7930_s1 + $0x210] sm:$0xff]   ;;  %v284_v31 = vld [vmem:[#allocation2 + $0x178] sm:$0xff]  ;;  %v259_v28 = vrot.slane %v258_v63, 4  ;;  %944 = vst [vmem:[#allocation2 + $0x250] sm:$0x88] %v943_v46  ;;  %v6305_v55 = vrot.slane %v877_v12, 4 }
  0x4e   :  { %5106 = vmatprep.subr.bf16.mxu1 %v5563_v42  ;;  %v6244_v35 = vsel %vm6156_vm7, %v241_v1, %v284_v31  ;;  %v945_v42 = vld [vmem:[#allocation2 + $0x298] sm:$0x88]  ;;  %v976_v53 = vrot.slane %v974_v44, 4  ;;  %v979_v1 = vrot.slane %v977_v50, 5  ;;  %v948_v59 = vld [vmem:[#allocation2 + $0x2e0] sm:$0x88] }
  0x4f   :  { %5169 = vmatpush3.bf16.msra.mxu0 %v5560_v47  ;;  %286 = vst [vmem:[#allocation2 + $0x178] sm:$0xff] %v6244_v35  ;;  %v4663_v10 = vcombine.high %v6240_v0, %v6244_v35  ;;  %v946_v47 = vsel %vm6052_vm9, 0, %v945_v42  ;;  %v951_v63 = vld [vmem:[#allocation2 + $0x328] sm:$0x88]  ;;  %v949_v12 = vsel %vm6052_vm9, 0, %v948_v59  ;;  %1194 = vst [vmem:[#allocation2 + $0x2f0] sm:$0xff] %v6325_v14 }
  0x50   :  { %3746 = vmatmul.mubr.bf16.gmra.mrb[20].mxu1 %v4642_v60  ;;  %5170 = vmatprep.subr.bf16.mxu0 %v5565_v15  ;;  %947 = vst [vmem:[#allocation2 + $0x298] sm:$0x88] %v946_v47  ;;  %v5575_v15 = vld [vmem:[%s7930_s1 + $0x260] sm:$0xff]   ;;  %v980_v20 = vor.u32 %v979_v1, %v976_v53  ;;  %950 = vst [vmem:[#allocation2 + $0x2e0] sm:$0x88] %v949_v12  ;;  %v5687_v47 = vld [vmem:[#allocation2 + $0x8] sm:$0xff] }
  0x51   :  { %3753 = vmatprep.mubr.bf16.mxu1 %v4661_v26  ;;  %5107 = vmatpush3.bf16.msra.mxu1 %v5564_v54  ;;  %v287_v49 = vld [vmem:[#allocation2 + $0x1c0] sm:$0xff]  ;;  %v290_v60 = vld [vmem:[#allocation2 + $0x208] sm:$0xff]  ;;  %v6281_v54 = vrot.slane %v873_v11, 5  ;;  %v4662_v11 = vcombine.low %v6240_v0, %v6244_v35  ;;  %v992_v35 = vshrl.u32 %v6325_v14, 16 }
  0x52   :  { %5108 = vmatprep.subr.bf16.mxu1 %v5569_v52  ;;  %3843 = vmatmul.mubr.bf16.gmra.mrb[20].mxu0 %v4644_v56  ;;  %v6285_v24 = vsel %vm6156_vm7, %v250_v36, %v287_v49  ;;  %v6289_v26 = vsel %vm6156_vm7, %v259_v28, %v290_v60  ;;  %v6312_v52 = vld [vmem:[%s7931_s0 + $0x48] sm:$0xff]  ;;  %v6316_v56 = vrot.slane %v880_v13, 5  ;;  %v981_v0 = vrot.slane %v980_v20, 4  ;;  %v957_v20 = vld [vmem:[#allocation2 + $0x3b8] sm:$0x88] }
  0x53   :  { %3850 = vmatprep.mubr.bf16.mxu0 %v4663_v10  ;;  %5171 = vmatpush3.bf16.msra.mxu0 %v5566_v62  ;;  %289 = vst [vmem:[#allocation2 + $0x1c0] sm:$0xff] %v6285_v24  ;;  %292 = vst [vmem:[#allocation2 + $0x208] sm:$0xff] %v6289_v26  ;;  %v4681_v58 = vcombine.high %v6285_v24, %v6289_v26  ;;  %v952_v62 = vsel %vm6052_vm9, 0, %v951_v63  ;;  %v983_v31 = vshrl.u32 %v6312_v52, 16  ;;  %v5579_v13 = vld [vmem:[%s7930_s1 + $0x1e8] sm:$0xff]   ;;  %v995_v36 = vshll.u32 %v6325_v14, 16 }
  0x54   :  { %5172 = vmatprep.subr.bf16.mxu0 %v5571_v2  ;;  %953 = vst [vmem:[#allocation2 + $0x328] sm:$0x88] %v952_v62  ;;  %v5580_v2 = vld [vmem:[%s7930_s1 + $0x1a8] sm:$0xff]   ;;  %v4703_v10 = vcombine.high %v6259_v23, %v6312_v52  ;;  %v4678_v28 = vcombine.low %v6017_v7, %v6022_v9  ;;  %v6342_v27 = vld [vmem:[#allocation2 + $0x250] sm:$0xff]  ;;  %v4702_v46 = vcombine.low %v6259_v23, %v6312_v52  ;;  %v994_v9 = vrot.slane %v992_v35, 4  ;;  %v6762_v14 = vld [vmem:[%s7931_s0 + $0x60] sm:$0xff] }
  0x55   :  { %5109 = vmatpush3.bf16.msra.mxu1 %v5570_v3  ;;  %v986_v3 = vshll.u32 %v6312_v52, 16  ;;  %v985_v42 = vrot.slane %v983_v31, 4  ;;  %v5581_v49 = vld [vmem:[%s7930_s1 + $0x268] sm:$0xff]   ;;  %v6365_v60 = vrot.slane %v884_v37, 4  ;;  %v1007_v37 = vor.u32 %v6281_v54, %v6236_v6  ;;  %v5585_v63 = vld [vmem:[%s7930_s1 + $0x1f0] sm:$0xff]  }
  0x56   :  { %5110 = vmatprep.subr.bf16.mxu1 %v5573_v45  ;;  %v4697_v45 = vcombine.high %v5687_v47, %v6259_v23  ;;  %v5582_v1 = vld [vmem:[%s7930_s1 + $0x228] sm:$0xff]   ;;  %v1016_v59 = vor.u32 %v6316_v56, %v6305_v55  ;;  %v5586_v6 = vld [vmem:[%s7930_s1 + $0x1b0] sm:$0xff]   ;;  %v1030_v56 = vrot.slane %v891_v40, 4  ;;  %v1033_v62 = vrot.slane %v894_v41, 5  ;;  %v582_v52 = vld [vmem:[#allocation2 + $0x198] sm:$0x11] }
  0x57   :  { %5173 = vmatpush3.bf16.msra.mxu0 %v5572_v17  ;;  %v1043_v17 = vld [vmem:[#allocation2 + $0x298] sm:$0xff]  ;;  %v1046_v54 = vld [vmem:[#allocation2 + $0x2e0] sm:$0xff]  ;;  %v1008_v40 = vrot.slane %v1007_v37, 4  ;;  %v5587_v41 = vld [vmem:[%s7930_s1 + $0x270] sm:$0xff]  }
  0x58   :  { %3754 = vmatmul.mubr.bf16.gmra.mrb[24].mxu1 %v4660_v43  ;;  %5174 = vmatprep.subr.bf16.mxu0 %v5575_v15  ;;  %v988_v43 = vrot.slane %v986_v3, 5  ;;  %v6353_v7 = vsel %vm6156_vm7, %v981_v0, %v1043_v17  ;;  %v1024_v15 = vrot.slane %v887_v38, 5  ;;  %v5588_v17 = vld [vmem:[%s7930_s1 + $0x230] sm:$0xff]   ;;  %v296_v37 = vld [vmem:[#allocation2 + $0x60] sm:$0x11] }
  0x59   :  { %3761 = vmatprep.mubr.bf16.mxu1 %v4679_v48  ;;  %5111 = vmatpush3.bf16.msra.mxu1 %v5574_v51  ;;  %v997_v48 = vrot.slane %v995_v36, 5  ;;  %1045 = vst [vmem:[#allocation2 + $0x298] sm:$0xff] %v6353_v7  ;;  %v4699_v38 = vcombine.high %v6342_v27, %v6353_v7 }
  0x5a   :  { %3851 = vmatmul.mubr.bf16.gmra.mrb[24].mxu0 %v4662_v11  ;;  %5112 = vmatprep.subr.bf16.mxu1 %v5579_v13  ;;  %v989_v51 = vor.u32 %v988_v43, %v985_v42  ;;  %v4680_v11 = vcombine.low %v6285_v24, %v6289_v26  ;;  %v958_v26 = vsel %vm6052_vm9, 0, %v957_v20  ;;  %v960_v42 = vld [vmem:[#allocation2 + $0x400] sm:$0x88]  ;;  %v293_v20 = vld [vmem:[#allocation2 + $0x18] sm:$0x11] }
  0x5b   :  { %3858 = vmatprep.mubr.bf16.mxu0 %v4681_v58  ;;  %5175 = vmatpush3.bf16.msra.mxu0 %v5576_v57  ;;  %v998_v53 = vor.u32 %v997_v48, %v994_v9  ;;  %v954_v58 = vld [vmem:[#allocation2 + $0x370] sm:$0x88]  ;;  %v1049_v55 = vld [vmem:[#allocation2 + $0x328] sm:$0xff]  ;;  %959 = vst [vmem:[#allocation2 + $0x3b8] sm:$0x88] %v958_v26  ;;  %v961_v43 = vsel %vm6052_vm9, 0, %v960_v42 }
  0x5c   :  { %v990_v57 = vrot.slane %v989_v51, 4  ;;  %5176 = vmatprep.subr.bf16.mxu0 %v5581_v49  ;;  %v955_v24 = vsel %vm6052_vm9, 0, %v954_v58  ;;  %v5591_v9 = vld [vmem:[%s7930_s1 + $0x1f8] sm:$0xff]   ;;  %962 = vst [vmem:[#allocation2 + $0x400] sm:$0x88] %v961_v43  ;;  %v1034_v51 = vor.u32 %v1033_v62, %v1030_v56  ;;  %v5599_v42 = vld [vmem:[%s7930_s1 + $0x340] sm:$0xff]  }
  0x5d   :  { %5113 = vmatpush3.bf16.msra.mxu1 %v5580_v2  ;;  %v999_v12 = vrot.slane %v998_v53, 4  ;;  %956 = vst [vmem:[#allocation2 + $0x370] sm:$0x88] %v955_v24  ;;  %v4696_v2 = vcombine.low %v5687_v47, %v6259_v23  ;;  %v963_v47 = vld [vmem:[#allocation2 + $0x448] sm:$0x88]  ;;  %v5592_v49 = vld [vmem:[%s7930_s1 + $0x1b8] sm:$0xff]   ;;  %v4698_v53 = vcombine.low %v6342_v27, %v6353_v7 }
  0x5e   :  { %5114 = vmatprep.subr.bf16.mxu1 %v5585_v63  ;;  %v6396_v13 = vsel %vm6156_vm7, %v990_v57, %v1046_v54  ;;  %v964_v48 = vsel %vm6052_vm9, 0, %v963_v47  ;;  %v1035_v58 = vrot.slane %v1034_v51, 4  ;;  %v294_v63 = vsel %vm5767_vm8, 0, %v293_v20  ;;  %v302_v43 = vld [vmem:[#allocation2 + $0xf0] sm:$0x11]  ;;  %v6509_v47 = vld [vmem:[%s7931_s0 + $0x18] sm:$0xff] }
  0x5f   :  { %5177 = vmatpush3.bf16.msra.mxu0 %v5582_v1  ;;  %v6400_v0 = vsel %vm6156_vm7, %v999_v12, %v1049_v55  ;;  %1048 = vst [vmem:[#allocation2 + $0x2e0] sm:$0xff] %v6396_v13  ;;  %965 = vst [vmem:[#allocation2 + $0x448] sm:$0x88] %v964_v48  ;;  %v6457_v12 = vld [vmem:[%s7931_s0 + $0x8] sm:$0xff]  ;;  %v347_v51 = vshrl.u32 %v6509_v47, 16 }
  0x60   :  { %3762 = vmatmul.mubr.bf16.gmra.mrb[28].mxu1 %v4678_v28  ;;  %1051 = vst [vmem:[#allocation2 + $0x328] sm:$0xff] %v6400_v0  ;;  %v1017_v28 = vrot.slane %v1016_v59, 4  ;;  %5178 = vmatprep.subr.bf16.mxu0 %v5587_v41  ;;  %v6448_v59 = vld [vmem:[%s7931_s0] sm:$0xff]  ;;  %295 = vst [vmem:[#allocation2 + $0x18] sm:$0x11] %v294_v63  ;;  %v333_v54 = vshrl.u32 %v6457_v12, 16 }
  0x61   :  { %3769 = vmatprep.mubr.bf16.mxu1 %v4697_v45  ;;  %5115 = vmatpush3.bf16.msra.mxu1 %v5586_v6  ;;  %v1025_v45 = vor.u32 %v1024_v15, %v6365_v60  ;;  %v4717_v60 = vcombine.high %v6396_v13, %v6400_v0  ;;  %v326_v24 = vshrl.u32 %v6448_v59, 16  ;;  %v329_v26 = vshll.u32 %v6448_v59, 16  ;;  %v5597_v6 = vld [vmem:[%s7930_s1 + $0x2c0] sm:$0xff]  }
  0x62   :  { %3859 = vmatmul.mubr.bf16.gmra.mrb[28].mxu0 %v4680_v11  ;;  %5116 = vmatprep.subr.bf16.mxu1 %v5591_v9  ;;  %v1055_v15 = vld [vmem:[#allocation2 + $0x3b8] sm:$0xff]  ;;  %v336_v55 = vshll.u32 %v6457_v12, 16  ;;  %v335_v41 = vrot.slane %v333_v54, 7  ;;  %v308_v63 = vld [vmem:[#allocation2 + $0x180] sm:$0x11] }
  0x63   :  { %3866 = vmatprep.mubr.bf16.mxu0 %v4699_v38  ;;  %5179 = vmatpush3.bf16.msra.mxu0 %v5588_v17  ;;  %v5593_v11 = vld [vmem:[%s7930_s1 + $0x278] sm:$0xff]   ;;  %v6438_v27 = vsel %vm6156_vm7, %v1017_v28, %v1055_v15  ;;  %v1026_v7 = vrot.slane %v1025_v45, 4  ;;  %v297_v38 = vsel %vm5767_vm8, 0, %v296_v37  ;;  %v1058_v56 = vld [vmem:[#allocation2 + $0x400] sm:$0xff]  ;;  %v328_v62 = vrot.slane %v326_v24, 7 }
  0x64   :  { %v1052_v1 = vld [vmem:[#allocation2 + $0x370] sm:$0xff]  ;;  %1057 = vst [vmem:[#allocation2 + $0x3b8] sm:$0xff] %v6438_v27  ;;  %5180 = vmatprep.subr.bf16.mxu0 %v5593_v11  ;;  %298 = vst [vmem:[#allocation2 + $0x60] sm:$0x11] %v297_v38  ;;  %v4716_v28 = vcombine.low %v6396_v13, %v6400_v0  ;;  %v299_v13 = vld [vmem:[#allocation2 + $0xa8] sm:$0x11] }
  0x65   :  { %5117 = vmatpush3.bf16.msra.mxu1 %v5592_v49  ;;  %v6434_v57 = vsel %vm6156_vm7, %v1008_v40, %v1052_v1  ;;  %v331_v8 = vor.u32 %v329_v26, %v328_v62  ;;  %v300_v0 = vsel %vm5767_vm8, 0, %v299_v13  ;;  %v303_v45 = vsel %vm5767_vm8, 0, %v302_v43  ;;  %v305_v37 = vld [vmem:[#allocation2 + $0x138] sm:$0x11]  ;;  %v311_v43 = vld [vmem:[#allocation2 + $0x1c8] sm:$0x11] }
  0x66   :  { %1054 = vst [vmem:[#allocation2 + $0x370] sm:$0xff] %v6434_v57  ;;  %5230 = vmatprep.subr.bf16.mxu1 %v5597_v6  ;;  %v1061_v40 = vld [vmem:[#allocation2 + $0x448] sm:$0xff]  ;;  %v4735_v61 = vcombine.high %v6434_v57, %v6438_v27  ;;  %301 = vst [vmem:[#allocation2 + $0xa8] sm:$0x11] %v300_v0  ;;  %v306_v4 = vsel %vm5767_vm8, 0, %v305_v37  ;;  %v309_v5 = vsel %vm5767_vm8, 0, %v308_v63  ;;  %v4631_v63 = vcombine.high %v6448_v59, %v6457_v12 }
  0x67   :  { %v6482_v17 = vsel %vm6156_vm7, %v1035_v58, %v1061_v40  ;;  %v389_v49 = vld [vmem:[#allocation2 + $0x18] sm:$0xff]  ;;  %304 = vst [vmem:[#allocation2 + $0xf0] sm:$0x11] %v303_v45  ;;  %v4734_v58 = vcombine.low %v6434_v57, %v6438_v27  ;;  %v6562_v57 = vld [vmem:[%s7931_s0 + $0x28] sm:$0xff]  ;;  %307 = vst [vmem:[#allocation2 + $0x138] sm:$0x11] %v306_v4 }
  0x68   :  { %3770 = vmatmul.mubr.bf16.gmra.mrb[32].mxu1 %v4696_v2  ;;  %v6470_v2 = vsel %vm6156_vm7, %v1026_v7, %v1058_v56  ;;  %1063 = vst [vmem:[#allocation2 + $0x448] sm:$0xff] %v6482_v17  ;;  %v6519_v1 = vsel %vm5795_vm13, %v331_v8, %v389_v49  ;;  %v349_v7 = vrot.slane %v347_v51, 7  ;;  %310 = vst [vmem:[#allocation2 + $0x180] sm:$0x11] %v309_v5  ;;  %v361_v56 = vshrl.u32 %v6562_v57, 16 }
  0x69   :  { %3777 = vmatprep.mubr.bf16.mxu1 %v4715_v21  ;;  %v5594_v21 = vld [vmem:[%s7930_s1 + $0x238] sm:$0xff]   ;;  %1060 = vst [vmem:[#allocation2 + $0x400] sm:$0xff] %v6470_v2  ;;  %391 = vst [vmem:[#allocation2 + $0x18] sm:$0xff] %v6519_v1  ;;  %v4753_v38 = vcombine.high %v6470_v2, %v6482_v17  ;;  %v364_v62 = vshll.u32 %v6562_v57, 16  ;;  %v4752_v45 = vcombine.low %v6470_v2, %v6482_v17  ;;  %v312_v49 = vsel %vm5767_vm8, 0, %v311_v43  ;;  %v5603_v43 = vld [vmem:[%s7930_s1 + $0x2c8] sm:$0xff]  }
  0x6a   :  { %3867 = vmatmul.mubr.bf16.gmra.mrb[32].mxu0 %v4698_v53  ;;  %313 = vst [vmem:[#allocation2 + $0x1c8] sm:$0x11] %v312_v49 }
  0x6b   :  { %3874 = vmatprep.mubr.bf16.mxu0 %v4717_v60  ;;  %5181 = vmatpush3.bf16.msra.mxu0 %v5594_v21  ;;  %v392_v53 = vld [vmem:[#allocation2 + $0x60] sm:$0xff]  ;;  %v350_v60 = vshll.u32 %v6509_v47, 16 }
  0x6c   :  { %5294 = vmatprep.subr.bf16.mxu0 %v5599_v42 }
  0x6d   :  { %v6543_v20 = vor.u32 %v350_v60, %v349_v7  ;;  %v6606_v7 = vld [vmem:[%s7931_s0 + $0x38] sm:$0xff] }
  0x6e   :  { %v7935_v37 = vshrl.u32 %v6606_v7, 16  ;;  %v7934_v32 = vshll.u32 %v6606_v7, 16 }
  0x6f   :  { %v404_v4 = vld [vmem:[#allocation2 + $0x180] sm:$0xff] }
  0x70   :  { %3778 = vmatmul.mubr.bf16.gmra.mrb[36].mxu1 %v4714_v22  ;;  %v6497_v22 = vor.u32 %v336_v55, %v335_v41  ;;  %v398_v41 = vld [vmem:[#allocation2 + $0xf0] sm:$0xff] }
  0x71   :  { %3785 = vmatprep.mubr.bf16.mxu1 %v4733_v16  ;;  %v6504_v16 = vld [vmem:[%s7931_s0 + $0x10] sm:$0xff] }
  0x72   :  { %v340_v9 = vshrl.u32 %v6504_v16, 16  ;;  %v343_v48 = vshll.u32 %v6504_v16, 16  ;;  %3875 = vmatmul.mubr.bf16.gmra.mrb[36].mxu0 %v4716_v28  ;;  %v6524_v15 = vsel %vm5795_vm13, %v6497_v22, %v392_v53  ;;  %v6577_v28 = vsel %vm5795_vm13, %v6543_v20, %v398_v41  ;;  %v314_v53 = vld [vmem:[#allocation2 + $0x210] sm:$0x11] }
  0x73   :  { %3882 = vmatprep.mubr.bf16.mxu0 %v4735_v61  ;;  %394 = vst [vmem:[#allocation2 + $0x60] sm:$0xff] %v6524_v15  ;;  %v363_v61 = vrot.slane %v361_v56, 7  ;;  %v4629_v8 = vcombine.high %v6519_v1, %v6524_v15  ;;  %400 = vst [vmem:[#allocation2 + $0xf0] sm:$0xff] %v6577_v28  ;;  %v315_v2 = vsel %vm5767_vm8, 0, %v314_v53  ;;  %v4628_v41 = vcombine.low %v6519_v1, %v6524_v15  ;;  %v1064_v1 = vld [vmem:[#allocation2 + $0x258] sm:$0x11] }
  0x74   :  { %v342_v11 = vrot.slane %v340_v9, 7  ;;  %316 = vst [vmem:[#allocation2 + $0x210] sm:$0x11] %v315_v2  ;;  %v1067_v15 = vld [vmem:[#allocation2 + $0x2a0] sm:$0x11]  ;;  %v1065_v49 = vsel %vm5767_vm8, 0, %v1064_v1 }
  0x75   :  { %v6592_v0 = vor.u32 %v364_v62, %v363_v61  ;;  %v1068_v53 = vsel %vm5767_vm8, 0, %v1067_v15  ;;  %v5600_v2 = vld [vmem:[%s7930_s1 + $0x300] sm:$0xff]   ;;  %1066 = vst [vmem:[#allocation2 + $0x258] sm:$0x11] %v1065_v49  ;;  %v5609_v49 = vld [vmem:[%s7930_s1 + $0x2d0] sm:$0xff]  }
  0x76   :  { %v6534_v21 = vor.u32 %v343_v48, %v342_v11  ;;  %v6601_v11 = vld [vmem:[%s7931_s0 + $0x30] sm:$0xff]  ;;  %1069 = vst [vmem:[#allocation2 + $0x2a0] sm:$0x11] %v1068_v53 }
  0x77   :  { %v368_v17 = vshrl.u32 %v6601_v11, 16 }
  0x78   :  { %3786 = vmatmul.mubr.bf16.gmra.mrb[40].mxu1 %v4732_v25  ;;  %v6557_v25 = vld [vmem:[%s7931_s0 + $0x20] sm:$0xff] }
  0x79   :  { %3793 = vmatprep.mubr.bf16.mxu1 %v4751_v29  ;;  %v395_v29 = vld [vmem:[#allocation2 + $0xa8] sm:$0xff]  ;;  %v354_v27 = vshrl.u32 %v6557_v25, 16  ;;  %v357_v6 = vshll.u32 %v6557_v25, 16  ;;  %v370_v5 = vrot.slane %v368_v17, 7 }
  0x7a   :  { %v6571_v40 = vsel %vm5795_vm13, %v6534_v21, %v395_v29  ;;  %3883 = vmatmul.mubr.bf16.gmra.mrb[40].mxu0 %v4734_v58  ;;  %v7936_v58 = vshll.u32 %v6601_v11, 16  ;;  %v377_v29 = vrot.slane %v7935_v37, 7  ;;  %v1079_v37 = vld [vmem:[#allocation2 + $0x3c0] sm:$0x11] }
  0x7b   :  { %397 = vst [vmem:[#allocation2 + $0xa8] sm:$0xff] %v6571_v40  ;;  %v356_v42 = vrot.slane %v354_v27, 7  ;;  %3890 = vmatprep.mubr.bf16.mxu0 %v4753_v38  ;;  %v401_v38 = vld [vmem:[#allocation2 + $0x138] sm:$0xff]  ;;  %v410_v15 = vld [vmem:[#allocation2 + $0x210] sm:$0xff] }
  0x7c   :  { %v6642_v61 = vor.u32 %v7936_v58, %v370_v5  ;;  %v4630_v5 = vcombine.low %v6448_v59, %v6457_v12  ;;  %v6753_v58 = vrot.slane %v329_v26, 5  ;;  %v5618_v59 = vld [vmem:[%s7930_s1 + $0x318] sm:$0xff]   ;;  %v1125_v26 = vshrl.u32 %v6762_v14, 16 }
  0x7d   :  { %v6588_v13 = vor.u32 %v357_v6, %v356_v42  ;;  %v5598_v42 = vld [vmem:[%s7930_s1 + $0x280] sm:$0xff]   ;;  %v6836_v12 = vld [vmem:[%s7931_s0 + $0x78] sm:$0xff] }
  0x7f   :  { %v6622_v33 = vsel %vm5795_vm13, %v6588_v13, %v401_v38  ;;  %v1099_v38 = vrot.slane %v974_v44, 7  ;;  %v4649_v44 = vcombine.high %v6504_v16, %v6509_v47 }
  0x80   :  { %3794 = vmatmul.mubr.bf16.gmra.mrb[44].mxu1 %v4750_v30  ;;  %v6627_v30 = vsel %vm5795_vm13, %v6592_v0, %v404_v4  ;;  %403 = vst [vmem:[#allocation2 + $0x138] sm:$0xff] %v6622_v33  ;;  %v1106_v4 = vrot.slane %v983_v31, 7  ;;  %v5605_v31 = vld [vmem:[%s7930_s1 + $0x348] sm:$0xff]  }
  0x81   :  { %3931 = vmatprep.mubr.bf16.mxu1 %v4629_v8  ;;  %406 = vst [vmem:[#allocation2 + $0x180] sm:$0xff] %v6627_v30  ;;  %v4647_v8 = vcombine.high %v6571_v40, %v6577_v28 }
  0x82   :  { %3891 = vmatmul.mubr.bf16.gmra.mrb[44].mxu0 %v4752_v45  ;;  %v380_v45 = vor.u32 %v7934_v32, %v377_v29  ;;  %v5604_v29 = vld [vmem:[%s7930_s1 + $0x288] sm:$0xff]   ;;  %v1109_v53 = vor.u32 %v1106_v4, %v986_v3  ;;  %v4646_v32 = vcombine.low %v6571_v40, %v6577_v28  ;;  %v5611_v40 = vld [vmem:[%s7930_s1 + $0x350] sm:$0xff]  }
  0x83   :  { %4028 = vmatprep.mubr.bf16.mxu0 %v4631_v63  ;;  %v407_v63 = vld [vmem:[#allocation2 + $0x1c8] sm:$0xff] }
  0x84   :  { %v6670_v1 = vsel %vm5795_vm13, %v6642_v61, %v407_v63  ;;  %v1070_v63 = vld [vmem:[#allocation2 + $0x2e8] sm:$0x11] }
  0x85   :  { %409 = vst [vmem:[#allocation2 + $0x1c8] sm:$0xff] %v6670_v1  ;;  %v1071_v3 = vsel %vm5767_vm8, 0, %v1070_v63  ;;  %v1163_v63 = vld [vmem:[#allocation2 + $0x2a0] sm:$0xff] }
  0x86   :  { %1072 = vst [vmem:[#allocation2 + $0x2e8] sm:$0x11] %v1071_v3 }
  0x88   :  { %3932 = vmatmul.mubr.bf16.vlgmr.msra.gmra.mrb[48].mxu1 %v4628_v41  ;;  %v6680_v41 = vsel %vm5795_vm13, %v380_v45, %v410_v15  ;;  %v1073_v45 = vld [vmem:[#allocation2 + $0x330] sm:$0x11]  ;;  %v1113_v15 = vrot.slane %v992_v35, 7  ;;  %v4665_v35 = vcombine.high %v6622_v33, %v6627_v30 }
  0x89   :  { %5231 = vmatpush3.bf16.msra.mxu1 %v5598_v42  ;;  %3939 = vmatprep.mubr.bf16.mxu1 %v4647_v8  ;;  %412 = vst [vmem:[#allocation2 + $0x210] sm:$0xff] %v6680_v41  ;;  %v5606_v42 = vld [vmem:[%s7930_s1 + $0x308] sm:$0xff]   ;;  %v1102_v8 = vor.u32 %v1099_v38, %v977_v50  ;;  %v5610_v50 = vld [vmem:[%s7930_s1 + $0x290] sm:$0xff]   ;;  %v1074_v38 = vsel %vm5767_vm8, 0, %v1073_v45 }
  0x8a   :  { %5232 = vmatprep.subr.bf16.mxu1 %v5603_v43  ;;  %v6696_v43 = vld [vmem:[%s7931_s0 + $0x58] sm:$0xff]  ;;  %4029 = vmatmul.mubr.bf16.vlgmr.msra.gmra.mrb[48].mxu0 %v4630_v5  ;;  %1075 = vst [vmem:[#allocation2 + $0x330] sm:$0x11] %v1074_v38 }
  0x8b   :  { %v1118_v4 = vshrl.u32 %v6696_v43, 16  ;;  %5295 = vmatpush3.bf16.msra.mxu0 %v5600_v2  ;;  %4036 = vmatprep.mubr.bf16.mxu0 %v4649_v44  ;;  %v1121_v28 = vshll.u32 %v6696_v43, 16  ;;  %v1160_v5 = vld [vmem:[#allocation2 + $0x258] sm:$0xff]  ;;  %v5612_v2 = vld [vmem:[%s7930_s1 + $0x310] sm:$0xff]  }
  0x8c   :  { %5296 = vmatprep.subr.bf16.mxu0 %v5605_v31  ;;  %v5615_v44 = vld [vmem:[%s7930_s1 + $0x2d8] sm:$0xff]   ;;  %v6724_v3 = vsel %vm5795_vm13, %v1102_v8, %v1160_v5  ;;  %v4648_v31 = vcombine.low %v6504_v16, %v6509_v47  ;;  %v6742_v8 = vrot.slane %v326_v24, 4  ;;  %v5643_v16 = vld [vmem:[%s7930_s1 + $0x3c0] sm:$0xff]  }
  0x8d   :  { %5233 = vmatpush3.bf16.msra.mxu1 %v5604_v29  ;;  %v1120_v45 = vrot.slane %v1118_v4, 7  ;;  %v6728_v29 = vsel %vm5795_vm13, %v1109_v53, %v1163_v63  ;;  %v5617_v38 = vld [vmem:[%s7930_s1 + $0x358] sm:$0xff]   ;;  %1162 = vst [vmem:[#allocation2 + $0x258] sm:$0xff] %v6724_v3  ;;  %v5621_v53 = vld [vmem:[%s7930_s1 + $0x2e0] sm:$0xff]   ;;  %v1116_v4 = vor.u32 %v1113_v15, %v995_v36  ;;  %v6767_v36 = vld [vmem:[%s7931_s0 + $0x68] sm:$0xff] }
  0x8e   :  { %5234 = vmatprep.subr.bf16.mxu1 %v5609_v49  ;;  %v5616_v49 = vld [vmem:[%s7930_s1 + $0x298] sm:$0xff]   ;;  %1165 = vst [vmem:[#allocation2 + $0x2a0] sm:$0xff] %v6728_v29  ;;  %v1132_v15 = vshrl.u32 %v6767_v36, 16  ;;  %v438_v47 = vld [vmem:[#allocation2 + $0x100] sm:$0x88] }
  0x8f   :  { %5297 = vmatpush3.bf16.msra.mxu0 %v5606_v42  ;;  %v1123_v5 = vor.u32 %v1121_v28, %v1120_v45  ;;  %v1076_v63 = vld [vmem:[#allocation2 + $0x378] sm:$0x11]  ;;  %v1080_v42 = vsel %vm5767_vm8, 0, %v1079_v37  ;;  %v1128_v37 = vshll.u32 %v6762_v14, 16  ;;  %v5622_v28 = vld [vmem:[%s7930_s1 + $0x2a0] sm:$0xff]   ;;  %v1166_v45 = vld [vmem:[#allocation2 + $0x2e8] sm:$0xff] }
  0x90   :  { %3940 = vmatmul.mubr.bf16.gmra.mrb[52].mxu1 %v4646_v32  ;;  %v4667_v32 = vcombine.high %v6557_v25, %v6562_v57  ;;  %5298 = vmatprep.subr.bf16.mxu0 %v5611_v40  ;;  %v1077_v24 = vsel %vm5767_vm8, 0, %v1076_v63  ;;  %1081 = vst [vmem:[#allocation2 + $0x3c0] sm:$0x11] %v1080_v42  ;;  %v4683_v40 = vcombine.high %v6670_v1, %v6680_v41  ;;  %v5628_v42 = vld [vmem:[%s7930_s1 + $0x2a8] sm:$0xff]  }
  0x91   :  { %3947 = vmatprep.mubr.bf16.mxu1 %v4665_v35  ;;  %5235 = vmatpush3.bf16.msra.mxu1 %v5610_v50  ;;  %1078 = vst [vmem:[#allocation2 + $0x378] sm:$0x11] %v1077_v24  ;;  %v1135_v50 = vshll.u32 %v6767_v36, 16  ;;  %v4664_v35 = vcombine.low %v6622_v33, %v6627_v30  ;;  %v6785_v63 = vsel %vm5795_vm13, %v1116_v4, %v1166_v45  ;;  %v1127_v33 = vrot.slane %v1125_v26, 7  ;;  %v5623_v24 = vld [vmem:[%s7930_s1 + $0x360] sm:$0xff]   ;;  %v5629_v26 = vld [vmem:[%s7930_s1 + $0x368] sm:$0xff]  }
  0x92   :  { %5236 = vmatprep.subr.bf16.mxu1 %v5615_v44  ;;  %4037 = vmatmul.mubr.bf16.gmra.mrb[52].mxu0 %v4648_v31  ;;  %v1169_v44 = vld [vmem:[#allocation2 + $0x330] sm:$0xff]  ;;  %v1134_v30 = vrot.slane %v1132_v15, 7  ;;  %1168 = vst [vmem:[#allocation2 + $0x2e8] sm:$0xff] %v6785_v63 }
  0x93   :  { %4044 = vmatprep.mubr.bf16.mxu0 %v4667_v32  ;;  %5299 = vmatpush3.bf16.msra.mxu0 %v5612_v2  ;;  %v6789_v31 = vsel %vm5795_vm13, %v1123_v5, %v1169_v44  ;;  %v5624_v2 = vld [vmem:[%s7930_s1 + $0x320] sm:$0xff]   ;;  %v5627_v32 = vld [vmem:[%s7930_s1 + $0x2e8] sm:$0xff]   ;;  %v6802_v4 = vor.u32 %v1128_v37, %v1127_v33  ;;  %v6808_v5 = vrot.slane %v333_v54, 4  ;;  %v1085_v15 = vld [vmem:[#allocation2 + $0x450] sm:$0x11]  ;;  %v4685_v54 = vcombine.high %v6601_v11, %v6606_v7 }
  0x94   :  { %5300 = vmatprep.subr.bf16.mxu0 %v5617_v38  ;;  %1171 = vst [vmem:[#allocation2 + $0x330] sm:$0xff] %v6789_v31  ;;  %v468_v38 = vor.u32 %v6753_v58, %v6742_v8  ;;  %v1082_v37 = vld [vmem:[#allocation2 + $0x408] sm:$0x11]  ;;  %v6820_v58 = vrot.slane %v336_v55, 5  ;;  %v1146_v44 = vshrl.u32 %v6836_v12, 16  ;;  %v1149_v33 = vshll.u32 %v6836_v12, 16 }
  0x95   :  { %5237 = vmatpush3.bf16.msra.mxu1 %v5616_v49  ;;  %v1137_v49 = vor.u32 %v1135_v50, %v1134_v30  ;;  %v1083_v8 = vsel %vm5767_vm8, 0, %v1082_v37  ;;  %v1086_v50 = vsel %vm5767_vm8, 0, %v1085_v15  ;;  %v4682_v15 = vcombine.low %v6670_v1, %v6680_v41  ;;  %v5635_v1 = vld [vmem:[%s7930_s1 + $0x370] sm:$0xff]  }
  0x96   :  { %5238 = vmatprep.subr.bf16.mxu1 %v5621_v53  ;;  %v4666_v53 = vcombine.low %v6557_v25, %v6562_v57  ;;  %1084 = vst [vmem:[#allocation2 + $0x408] sm:$0x11] %v1083_v8  ;;  %1087 = vst [vmem:[#allocation2 + $0x450] sm:$0x11] %v1086_v50  ;;  %v6854_v37 = vrot.slane %v468_v38, 4  ;;  %v1148_v50 = vrot.slane %v1146_v44, 7  ;;  %v4701_v38 = vcombine.high %v6724_v3, %v6728_v29 }
  0x97   :  { %5301 = vmatpush3.bf16.msra.mxu0 %v5618_v59  ;;  %v1175_v59 = vld [vmem:[#allocation2 + $0x3c0] sm:$0xff] }
  0x98   :  { %3948 = vmatmul.mubr.bf16.gmra.mrb[56].mxu1 %v4664_v35  ;;  %v6831_v35 = vld [vmem:[%s7931_s0 + $0x70] sm:$0xff]  ;;  %5302 = vmatprep.subr.bf16.mxu0 %v5623_v24  ;;  %v1172_v55 = vld [vmem:[#allocation2 + $0x378] sm:$0xff] }
  0x99   :  { %3955 = vmatprep.mubr.bf16.mxu1 %v4683_v40  ;;  %5239 = vmatpush3.bf16.msra.mxu1 %v5622_v28  ;;  %v1139_v40 = vshrl.u32 %v6831_v35, 16  ;;  %v1142_v45 = vshll.u32 %v6831_v35, 16  ;;  %v6845_v30 = vsel %vm5795_vm13, %v6802_v4, %v1172_v55  ;;  %v6849_v28 = vsel %vm5795_vm13, %v1137_v49, %v1175_v59  ;;  %v5633_v24 = vld [vmem:[%s7930_s1 + $0x2f0] sm:$0xff]   ;;  %v429_v55 = vld [vmem:[#allocation2 + $0x28] sm:$0x88] }
  0x9a   :  { %5240 = vmatprep.subr.bf16.mxu1 %v5627_v32  ;;  %4045 = vmatmul.mubr.bf16.gmra.mrb[56].mxu0 %v4666_v53  ;;  %v5630_v32 = vld [vmem:[%s7930_s1 + $0x328] sm:$0xff]   ;;  %1174 = vst [vmem:[#allocation2 + $0x378] sm:$0xff] %v6845_v30  ;;  %1177 = vst [vmem:[#allocation2 + $0x3c0] sm:$0xff] %v6849_v28  ;;  %v5634_v49 = vld [vmem:[%s7930_s1 + $0x2b0] sm:$0xff]   ;;  %v1151_v53 = vor.u32 %v1149_v33, %v1148_v50  ;;  %v6873_v59 = vrot.slane %v340_v9, 4  ;;  %v477_v33 = vor.u32 %v6820_v58, %v6808_v5 }
  0x9b   :  { %v1141_v8 = vrot.slane %v1139_v40, 7  ;;  %4052 = vmatprep.mubr.bf16.mxu0 %v4685_v54  ;;  %5303 = vmatpush3.bf16.msra.mxu0 %v5624_v2  ;;  %v5636_v54 = vld [vmem:[%s7930_s1 + $0x330] sm:$0xff]   ;;  %v5639_v2 = vld [vmem:[%s7930_s1 + $0x2f8] sm:$0xff]   ;;  %v4737_v57 = vcombine.high %v6845_v30, %v6849_v28 }
  0x9c   :  { %5304 = vmatprep.subr.bf16.mxu0 %v5629_v26  ;;  %v432_v26 = vld [vmem:[#allocation2 + $0x70] sm:$0x88]  ;;  %v567_v40 = vld [vmem:[#allocation2 + $0x30] sm:$0x11]  ;;  %v5640_v9 = vld [vmem:[%s7930_s1 + $0x2b8] sm:$0xff]  }
  0x9d   :  { %5241 = vmatpush3.bf16.msra.mxu1 %v5628_v42  ;;  %v1144_v41 = vor.u32 %v1142_v45, %v1141_v8  ;;  %v430_v42 = vsel %vm6052_vm9, 0, %v429_v55  ;;  %v4684_v45 = vcombine.low %v6601_v11, %v6606_v7  ;;  %v433_v44 = vsel %vm6052_vm9, 0, %v432_v26  ;;  %v570_v8 = vld [vmem:[#allocation2 + $0x78] sm:$0x11]  ;;  %v1181_v50 = vld [vmem:[#allocation2 + $0x450] sm:$0xff] }
  0x9e   :  { %5242 = vmatprep.subr.bf16.mxu1 %v5633_v24  ;;  %431 = vst [vmem:[#allocation2 + $0x28] sm:$0x88] %v430_v42  ;;  %v568_v24 = vsel %vm5767_vm8, 0, %v567_v40  ;;  %434 = vst [vmem:[#allocation2 + $0x70] sm:$0x88] %v433_v44  ;;  %v571_v55 = vsel %vm5767_vm8, 0, %v570_v8  ;;  %v6904_v58 = vsel %vm5795_vm13, %v1151_v53, %v1181_v50 }
  0x9f   :  { %5305 = vmatpush3.bf16.msra.mxu0 %v5630_v32  ;;  %569 = vst [vmem:[#allocation2 + $0x30] sm:$0x11] %v568_v24  ;;  %v485_v42 = vrot.slane %v343_v48, 5  ;;  %v5641_v32 = vld [vmem:[%s7930_s1 + $0x378] sm:$0xff]   ;;  %572 = vst [vmem:[#allocation2 + $0x78] sm:$0x11] %v571_v55 }
  0xa0   :  { %3956 = vmatmul.mubr.bf16.gmra.mrb[60].mxu1 %v4682_v15  ;;  %v1178_v15 = vld [vmem:[#allocation2 + $0x408] sm:$0xff]  ;;  %5306 = vmatprep.subr.bf16.mxu0 %v5635_v1  ;;  %1183 = vst [vmem:[#allocation2 + $0x450] sm:$0xff] %v6904_v58  ;;  %v494_v48 = vrot.slane %v350_v60, 5  ;;  %v478_v1 = vrot.slane %v477_v33, 4  ;;  %v435_v53 = vld [vmem:[#allocation2 + $0xb8] sm:$0x88] }
  0xa1   :  { %3963 = vmatprep.mubr.bf16.mxu1 %v4701_v38  ;;  %5243 = vmatpush3.bf16.msra.mxu1 %v5634_v49  ;;  %v6900_v5 = vsel %vm5795_vm13, %v1144_v41, %v1178_v15  ;;  %v491_v38 = vrot.slane %v347_v51, 4  ;;  %v4700_v49 = vcombine.low %v6724_v3, %v6728_v29  ;;  %v5642_v51 = vld [vmem:[%s7930_s1 + $0x338] sm:$0xff]   ;;  %v4719_v41 = vcombine.high %v6785_v63, %v6789_v31  ;;  %v5645_v3 = vld [vmem:[%s7930_s1 + $0x440] sm:$0xff]   ;;  %v576_v26 = vld [vmem:[#allocation2 + $0x108] sm:$0x11] }
  0xa2   :  { %1180 = vst [vmem:[#allocation2 + $0x408] sm:$0xff] %v6900_v5  ;;  %5244 = vmatprep.subr.bf16.mxu1 %v5639_v2  ;;  %4053 = vmatmul.mubr.bf16.gmra.mrb[60].mxu0 %v4684_v45  ;;  %v486_v60 = vor.u32 %v485_v42, %v6873_v59  ;;  %v573_v2 = vld [vmem:[#allocation2 + $0xc0] sm:$0x11]  ;;  %v436_v29 = vsel %vm6052_vm9, 0, %v435_v53  ;;  %v577_v45 = vsel %vm5767_vm8, 0, %v576_v26  ;;  %v500_v24 = vrot.slane %v354_v27, 4 }
  0xa3   :  { %4060 = vmatprep.mubr.bf16.mxu0 %v4703_v10  ;;  %5307 = vmatpush3.bf16.msra.mxu0 %v5636_v54  ;;  %v439_v10 = vsel %vm6052_vm9, 0, %v438_v47  ;;  %v574_v54 = vsel %vm5767_vm8, 0, %v573_v2  ;;  %437 = vst [vmem:[#allocation2 + $0xb8] sm:$0x88] %v436_v29  ;;  %v495_v59 = vor.u32 %v494_v48, %v491_v38  ;;  %578 = vst [vmem:[#allocation2 + $0x108] sm:$0x11] %v577_v45 }
  0xa4   :  { %5308 = vmatprep.subr.bf16.mxu0 %v5641_v32  ;;  %440 = vst [vmem:[#allocation2 + $0x100] sm:$0x88] %v439_v10  ;;  %575 = vst [vmem:[#allocation2 + $0xc0] sm:$0x11] %v574_v54  ;;  %v503_v8 = vrot.slane %v357_v6, 5  ;;  %v5688_v15 = vld [vmem:[#allocation2 + $0x2f0] sm:$0xff] }
  0xa5   :  { %5245 = vmatpush3.bf16.msra.mxu1 %v5640_v9  ;;  %v541_v40 = vld [vmem:[#allocation2 + $0x28] sm:$0xff]  ;;  %v544_v44 = vld [vmem:[#allocation2 + $0x70] sm:$0xff]  ;;  %v4721_v50 = vcombine.high %v5688_v15, %v6696_v43  ;;  %v487_v42 = vrot.slane %v486_v60, 4  ;;  %v509_v6 = vrot.slane %v361_v56, 4  ;;  %v512_v32 = vrot.slane %v364_v62, 5 }
  0xa6   :  { %5358 = vmatprep.subr.bf16.mxu1 %v5643_v16  ;;  %v6943_v9 = vsel %vm6156_vm7, %v6854_v37, %v541_v40  ;;  %v655_v33 = vld [vmem:[#allocation2 + $0x30] sm:$0xff]  ;;  %v6953_v37 = vsel %vm6156_vm7, %v478_v1, %v544_v44  ;;  %v658_v27 = vld [vmem:[#allocation2 + $0x78] sm:$0xff]  ;;  %v6974_v38 = vrot.slane %v368_v17, 4  ;;  %v441_v16 = vld [vmem:[#allocation2 + $0x148] sm:$0x88]  ;;  %v504_v56 = vor.u32 %v503_v8, %v500_v24 }
  0xa7   :  { %5309 = vmatpush3.bf16.msra.mxu0 %v5642_v51  ;;  %543 = vst [vmem:[#allocation2 + $0x28] sm:$0xff] %v6943_v9  ;;  %v6958_v55 = vsel %vm5795_vm13, %v6497_v22, %v655_v33  ;;  %546 = vst [vmem:[#allocation2 + $0x70] sm:$0xff] %v6953_v37  ;;  %v6965_v25 = vsel %vm5795_vm13, %v6534_v21, %v658_v27  ;;  %v496_v22 = vrot.slane %v495_v59, 4  ;;  %v444_v48 = vld [vmem:[#allocation2 + $0x190] sm:$0x88]  ;;  %v442_v62 = vsel %vm6052_vm9, 0, %v441_v16 }
  0xa8   :  { %3964 = vmatmul.mubr.bf16.gmra.mrb[64].mxu1 %v4700_v49  ;;  %657 = vst [vmem:[#allocation2 + $0x30] sm:$0xff] %v6958_v55  ;;  %5422 = vmatprep.subr.bf16.mxu0 %v5645_v3  ;;  %660 = vst [vmem:[#allocation2 + $0x78] sm:$0xff] %v6965_v25  ;;  %v4718_v21 = vcombine.low %v6785_v63, %v6789_v31  ;;  %v579_v49 = vld [vmem:[#allocation2 + $0x150] sm:$0x11]  ;;  %v445_v17 = vsel %vm6052_vm9, 0, %v444_v48  ;;  %v513_v51 = vor.u32 %v512_v32, %v509_v6 }
  0xa9   :  { %3971 = vmatprep.mubr.bf16.mxu1 %v4719_v41  ;;  %v580_v23 = vsel %vm5767_vm8, 0, %v579_v49  ;;  %443 = vst [vmem:[#allocation2 + $0x148] sm:$0x88] %v442_v62  ;;  %446 = vst [vmem:[#allocation2 + $0x190] sm:$0x88] %v445_v17  ;;  %v583_v1 = vsel %vm5767_vm8, 0, %v582_v52  ;;  %v4720_v26 = vcombine.low %v5688_v15, %v6696_v43  ;;  %v4736_v8 = vcombine.low %v6845_v30, %v6849_v28 }
  0xaa   :  { %4061 = vmatmul.mubr.bf16.gmra.mrb[64].mxu0 %v4702_v46  ;;  %v547_v46 = vld [vmem:[#allocation2 + $0xb8] sm:$0xff]  ;;  %581 = vst [vmem:[#allocation2 + $0x150] sm:$0x11] %v580_v23  ;;  %v7953_v41 = vshll.u32 %v6601_v11, 16  ;;  %v7954_v47 = vshrl.u32 %v6606_v7, 16  ;;  %v664_v10 = vld [vmem:[#allocation2 + $0x108] sm:$0xff]  ;;  %v4755_v6 = vcombine.high %v6900_v5, %v6904_v58  ;;  %v4738_v17 = vcombine.low %v6762_v14, %v6767_v36 }
  0xab   :  { %4068 = vmatprep.mubr.bf16.mxu0 %v4721_v50  ;;  %v550_v63 = vld [vmem:[#allocation2 + $0x100] sm:$0xff]  ;;  %v6997_v2 = vsel %vm6156_vm7, %v487_v42, %v547_v46  ;;  %584 = vst [vmem:[#allocation2 + $0x198] sm:$0x11] %v583_v1  ;;  %v7955_v11 = vshll.u32 %v6606_v7, 16  ;;  %v7017_v40 = vsel %vm5795_vm13, %v6588_v13, %v664_v10  ;;  %v505_v7 = vrot.slane %v504_v56, 4  ;;  %v4540_v42 = vld [vmem:[%s7931_s0 + $0x38] sm:$0xff] }
  0xac   :  { %v661_v31 = vld [vmem:[#allocation2 + $0xc0] sm:$0xff]  ;;  %v521_v53 = vrot.slane %v7953_v41, 5  ;;  %v527_v60 = vrot.slane %v7954_v47, 4  ;;  %v7001_v3 = vsel %vm6156_vm7, %v496_v22, %v550_v63  ;;  %549 = vst [vmem:[#allocation2 + $0xb8] sm:$0xff] %v6997_v2  ;;  %666 = vst [vmem:[#allocation2 + $0x108] sm:$0xff] %v7017_v40  ;;  %v514_v59 = vrot.slane %v513_v51, 4 }
  0xad   :  { %v7006_v29 = vsel %vm5795_vm13, %v6543_v20, %v661_v31  ;;  %v530_v54 = vrot.slane %v7955_v11, 5  ;;  %552 = vst [vmem:[#allocation2 + $0x100] sm:$0xff] %v7001_v3  ;;  %v4739_v20 = vcombine.high %v6762_v14, %v6767_v36  ;;  %v447_v43 = vld [vmem:[#allocation2 + $0x1d8] sm:$0x88]  ;;  %v450_v45 = vld [vmem:[#allocation2 + $0x220] sm:$0x88]  ;;  %v4633_v41 = vcombine.high %v6943_v9, %v6953_v37 }
  0xae   :  { %663 = vst [vmem:[#allocation2 + $0xc0] sm:$0xff] %v7006_v29  ;;  %v522_v44 = vor.u32 %v521_v53, %v6974_v38  ;;  %v585_v24 = vld [vmem:[#allocation2 + $0x1e0] sm:$0x11]  ;;  %v448_v13 = vsel %vm6052_vm9, 0, %v447_v43  ;;  %v451_v15 = vsel %vm6052_vm9, 0, %v450_v45  ;;  %v642_v38 = vshrl.u32 %v4540_v42, 16 }
  0xaf   :  { %v531_v33 = vor.u32 %v530_v54, %v527_v60  ;;  %v586_v50 = vsel %vm5767_vm8, 0, %v585_v24  ;;  %v588_v27 = vld [vmem:[#allocation2 + $0x228] sm:$0x11]  ;;  %449 = vst [vmem:[#allocation2 + $0x1d8] sm:$0x88] %v448_v13  ;;  %v4592_v36 = vld [vmem:[%s7931_s0 + $0x40] sm:$0xff]  ;;  %v4756_v45 = vcombine.low %v6831_v35, %v6836_v12 }
  0xb0   :  { %3972 = vmatmul.mubr.bf16.gmra.mrb[68].mxu1 %v4718_v21  ;;  %v553_v32 = vld [vmem:[#allocation2 + $0x148] sm:$0xff]  ;;  %v556_v30 = vld [vmem:[#allocation2 + $0x190] sm:$0xff]  ;;  %452 = vst [vmem:[#allocation2 + $0x220] sm:$0x88] %v451_v15  ;;  %587 = vst [vmem:[#allocation2 + $0x1e0] sm:$0x11] %v586_v50 }
  0xb1   :  { %3979 = vmatprep.mubr.bf16.mxu1 %v4737_v57  ;;  %v667_v28 = vld [vmem:[#allocation2 + $0x150] sm:$0xff]  ;;  %v589_v22 = vsel %vm5767_vm8, 0, %v588_v27  ;;  %v645_v21 = vshll.u32 %v4540_v42, 16  ;;  %v7040_v16 = vsel %vm6156_vm7, %v505_v7, %v553_v32  ;;  %v7044_v48 = vsel %vm6156_vm7, %v514_v59, %v556_v30  ;;  %v1200_v63 = vld [vmem:[#allocation2 + $0x268] sm:$0x88] }
  0xb2   :  { %4069 = vmatmul.mubr.bf16.gmra.mrb[68].mxu0 %v4720_v26  ;;  %v7049_v56 = vsel %vm5795_vm13, %v6592_v0, %v667_v28  ;;  %v670_v49 = vld [vmem:[#allocation2 + $0x198] sm:$0xff]  ;;  %590 = vst [vmem:[#allocation2 + $0x228] sm:$0x11] %v589_v22  ;;  %555 = vst [vmem:[#allocation2 + $0x148] sm:$0xff] %v7040_v16  ;;  %v644_v62 = vrot.slane %v642_v38, 7  ;;  %v4757_v0 = vcombine.high %v6831_v35, %v6836_v12  ;;  %v523_v23 = vrot.slane %v522_v44, 4 }
  0xb3   :  { %4076 = vmatprep.mubr.bf16.mxu0 %v4739_v20  ;;  %558 = vst [vmem:[#allocation2 + $0x190] sm:$0xff] %v7044_v48  ;;  %669 = vst [vmem:[#allocation2 + $0x150] sm:$0xff] %v7049_v56  ;;  %v7057_v57 = vsel %vm5795_vm13, %v6642_v61, %v670_v49  ;;  %v532_v52 = vrot.slane %v531_v33, 4  ;;  %v1203_v31 = vld [vmem:[#allocation2 + $0x2b0] sm:$0x88]  ;;  %v4754_v61 = vcombine.low %v6900_v5, %v6904_v58  ;;  %v1201_v51 = vsel %vm6052_vm9, 0, %v1200_v63 }
  0xb4   :  { %672 = vst [vmem:[#allocation2 + $0x198] sm:$0xff] %v7057_v57  ;;  %v647_v46 = vor.u32 %v645_v21, %v644_v62  ;;  %v1204_v14 = vsel %vm6052_vm9, 0, %v1203_v31  ;;  %v4593_v1 = vld [vmem:[%s7931_s0 + $0x48] sm:$0xff]  ;;  %1202 = vst [vmem:[#allocation2 + $0x268] sm:$0x88] %v1201_v51  ;;  %v1233_v47 = vshrl.u32 %v4592_v36, 16  ;;  %v4635_v35 = vcombine.high %v6958_v55, %v6965_v25 }
  0xb5   :  { %1205 = vst [vmem:[#allocation2 + $0x2b0] sm:$0x88] %v1204_v14  ;;  %v1236_v60 = vshll.u32 %v4592_v36, 16  ;;  %v1242_v10 = vshrl.u32 %v4593_v1, 16  ;;  %v1245_v20 = vshll.u32 %v4593_v1, 16  ;;  %v4601_v43 = vld [vmem:[%s7931_s0 + $0x50] sm:$0xff]  ;;  %v4632_v30 = vcombine.low %v6943_v9, %v6953_v37 }
  0xb6   :  { %v559_v53 = vld [vmem:[#allocation2 + $0x1d8] sm:$0xff]  ;;  %v1338_v7 = vld [vmem:[#allocation2 + $0x270] sm:$0x11]  ;;  %v1235_v44 = vrot.slane %v1233_v47, 4  ;;  %v1378_v27 = vshrl.u32 %v4601_v43, 16  ;;  %v5644_v28 = vld [vmem:[%s7930_s1 + $0x380] sm:$0xff]  }
  0xb7   :  { %v562_v5 = vld [vmem:[#allocation2 + $0x220] sm:$0xff]  ;;  %v7080_v11 = vsel %vm6156_vm7, %v523_v23, %v559_v53  ;;  %v1341_v59 = vld [vmem:[#allocation2 + $0x2b8] sm:$0x11]  ;;  %v1238_v33 = vrot.slane %v1236_v60, 5  ;;  %v1244_v24 = vrot.slane %v1242_v10, 4  ;;  %v1339_v13 = vsel %vm5767_vm8, 0, %v1338_v7 }
  0xb8   :  { %3980 = vmatmul.mubr.bf16.gmra.mrb[72].mxu1 %v4736_v8  ;;  %v673_v58 = vld [vmem:[#allocation2 + $0x1e0] sm:$0xff]  ;;  %v7084_v54 = vsel %vm6156_vm7, %v532_v52, %v562_v5  ;;  %561 = vst [vmem:[#allocation2 + $0x1d8] sm:$0xff] %v7080_v11  ;;  %v1247_v8 = vrot.slane %v1245_v20, 5  ;;  %v1342_v15 = vsel %vm5767_vm8, 0, %v1341_v59  ;;  %v1373_v50 = vrot.slane %v1242_v10, 7  ;;  %v4595_v9 = vld [vmem:[%s7931_s0 + $0x58] sm:$0xff] }
  0xb9   :  { %3987 = vmatprep.mubr.bf16.mxu1 %v4755_v6  ;;  %v7088_v26 = vsel %vm5795_vm13, %v647_v46, %v673_v58  ;;  %564 = vst [vmem:[#allocation2 + $0x220] sm:$0xff] %v7084_v54  ;;  %v1239_v12 = vor.u32 %v1238_v33, %v1235_v44  ;;  %1340 = vst [vmem:[#allocation2 + $0x270] sm:$0x11] %v1339_v13  ;;  %v1381_v6 = vshll.u32 %v4601_v43, 16  ;;  %v1380_v32 = vrot.slane %v1378_v27, 7  ;;  %v5647_v1 = vld [vmem:[%s7930_s1 + $0x3c8] sm:$0xff]  }
  0xba   :  { %4077 = vmatmul.mubr.bf16.gmra.mrb[72].mxu0 %v4738_v17  ;;  %675 = vst [vmem:[#allocation2 + $0x1e0] sm:$0xff] %v7088_v26  ;;  %v1248_v42 = vor.u32 %v1247_v8, %v1244_v24  ;;  %1343 = vst [vmem:[#allocation2 + $0x2b8] sm:$0x11] %v1342_v15  ;;  %v1253_v62 = vrot.slane %v1378_v27, 4  ;;  %v4651_v17 = vcombine.high %v6997_v2, %v7001_v3  ;;  %v1206_v52 = vld [vmem:[#allocation2 + $0x2f8] sm:$0x88] }
  0xbb   :  { %4084 = vmatprep.mubr.bf16.mxu0 %v4757_v0  ;;  %v1240_v22 = vrot.slane %v1239_v12, 4  ;;  %v1312_v21 = vld [vmem:[#allocation2 + $0x268] sm:$0xff]  ;;  %v1376_v0 = vor.u32 %v1373_v50, %v1245_v20  ;;  %v1383_v23 = vor.u32 %v1381_v6, %v1380_v32  ;;  %v1209_v46 = vld [vmem:[#allocation2 + $0x340] sm:$0x88]  ;;  %v1256_v37 = vrot.slane %v1381_v6, 5 }
  0xbc   :  { %v1249_v38 = vrot.slane %v1248_v42, 4  ;;  %v1315_v49 = vld [vmem:[#allocation2 + $0x2b0] sm:$0xff]  ;;  %v1210_v51 = vsel %vm6052_vm9, 0, %v1209_v46  ;;  %v1344_v14 = vld [vmem:[#allocation2 + $0x300] sm:$0x11]  ;;  %v1260_v53 = vshrl.u32 %v4595_v9, 16  ;;  %v4634_v10 = vcombine.low %v6958_v55, %v6965_v25 }
  0xbd   :  { %v7116_v63 = vsel %vm6156_vm7, %v1240_v22, %v1312_v21  ;;  %v1347_v36 = vld [vmem:[#allocation2 + $0x348] sm:$0x11]  ;;  %1211 = vst [vmem:[#allocation2 + $0x340] sm:$0x88] %v1210_v51  ;;  %v5646_v5 = vld [vmem:[%s7930_s1 + $0x400] sm:$0xff]   ;;  %v1263_v58 = vshll.u32 %v4595_v9, 16  ;;  %v4653_v20 = vcombine.high %v7006_v29, %v7017_v40  ;;  %v4650_v15 = vcombine.low %v6997_v2, %v7001_v3 }
  0xbe   :  { %v7120_v31 = vsel %vm6156_vm7, %v1249_v38, %v1315_v49  ;;  %1314 = vst [vmem:[#allocation2 + $0x268] sm:$0xff] %v7116_v63  ;;  %v1345_v47 = vsel %vm5767_vm8, 0, %v1344_v14  ;;  %v1348_v60 = vsel %vm5767_vm8, 0, %v1347_v36  ;;  %v5648_v7 = vld [vmem:[%s7930_s1 + $0x388] sm:$0xff]   ;;  %v1262_v44 = vrot.slane %v1260_v53, 4  ;;  %v5651_v55 = vld [vmem:[%s7930_s1 + $0x3d0] sm:$0xff]  }
  0xbf   :  { %1317 = vst [vmem:[#allocation2 + $0x2b0] sm:$0xff] %v7120_v31  ;;  %v5649_v59 = vld [vmem:[%s7930_s1 + $0x448] sm:$0xff]   ;;  %1346 = vst [vmem:[#allocation2 + $0x300] sm:$0x11] %v1345_v47  ;;  %v1387_v33 = vrot.slane %v1260_v53, 7  ;;  %v1265_v13 = vrot.slane %v1263_v58, 5  ;;  %v4669_v27 = vcombine.high %v7040_v16, %v7044_v48 }
  0xc0   :  { %3988 = vmatmul.mubr.bf16.gmra.mrb[76].mxu1 %v4754_v61  ;;  %v1207_v61 = vsel %vm6052_vm9, 0, %v1206_v52  ;;  %v1426_v43 = vld [vmem:[#allocation2 + $0x270] sm:$0xff]  ;;  %1349 = vst [vmem:[#allocation2 + $0x348] sm:$0x11] %v1348_v60  ;;  %v5650_v50 = vld [vmem:[%s7930_s1 + $0x408] sm:$0xff]   ;;  %v7171_v32 = vld [vmem:[%s7931_s0 + $0x60] sm:$0xff] }
  0xc1   :  { %4125 = vmatprep.mubr.bf16.mxu1 %v4633_v41  ;;  %1208 = vst [vmem:[#allocation2 + $0x2f8] sm:$0x88] %v1207_v61  ;;  %v1257_v41 = vor.u32 %v1256_v37, %v1253_v62  ;;  %v7153_v25 = vsel %vm5795_vm13, %v1376_v0, %v1426_v43  ;;  %v1390_v12 = vor.u32 %v1387_v33, %v1263_v58  ;;  %v1212_v42 = vld [vmem:[#allocation2 + $0x388] sm:$0x88]  ;;  %v1215_v6 = vld [vmem:[#allocation2 + $0x3d0] sm:$0x88] }
  0xc2   :  { %4085 = vmatmul.mubr.bf16.gmra.mrb[76].mxu0 %v4756_v45  ;;  %v1429_v45 = vld [vmem:[#allocation2 + $0x2b8] sm:$0xff]  ;;  %1428 = vst [vmem:[#allocation2 + $0x270] sm:$0xff] %v7153_v25  ;;  %v5652_v2 = vld [vmem:[%s7930_s1 + $0x390] sm:$0xff]   ;;  %v7186_v22 = vld [vmem:[%s7931_s0 + $0x68] sm:$0xff]  ;;  %v1269_v38 = vshrl.u32 %v7171_v32, 16  ;;  %v1272_v21 = vshll.u32 %v7171_v32, 16  ;;  %v4671_v43 = vcombine.high %v7049_v56, %v7057_v57 }
  0xc3   :  { %4222 = vmatprep.mubr.bf16.mxu0 %v4635_v35  ;;  %v7157_v24 = vsel %vm5795_vm13, %v1383_v23, %v1429_v45  ;;  %v1258_v8 = vrot.slane %v1257_v41, 4  ;;  %v1266_v35 = vor.u32 %v1265_v13, %v1262_v44  ;;  %v5653_v3 = vld [vmem:[%s7930_s1 + $0x450] sm:$0xff]   ;;  %v1278_v23 = vshrl.u32 %v7186_v22, 16  ;;  %v1353_v14 = vld [vmem:[#allocation2 + $0x3d8] sm:$0x11] }
  0xc4   :  { %1431 = vst [vmem:[#allocation2 + $0x2b8] sm:$0xff] %v7157_v24  ;;  %v7193_v49 = vld [vmem:[%s7931_s0 + $0x70] sm:$0xff]  ;;  %v1321_v0 = vld [vmem:[#allocation2 + $0x340] sm:$0xff]  ;;  %v1281_v52 = vshll.u32 %v7186_v22, 16  ;;  %v1271_v37 = vrot.slane %v1269_v38, 4  ;;  %v1274_v61 = vrot.slane %v1272_v21, 5 }
  0xc5   :  { %v1267_v62 = vrot.slane %v1266_v35, 4  ;;  %v1406_v46 = vshrl.u32 %v7193_v49, 16  ;;  %v1350_v51 = vld [vmem:[#allocation2 + $0x390] sm:$0x11]  ;;  %v4745_v36 = vcombine.high %v7186_v22, %v7193_v49  ;;  %v5655_v41 = vld [vmem:[%s7930_s1 + $0x3d8] sm:$0xff]   ;;  %v1280_v47 = vrot.slane %v1278_v23, 4 }
  0xc6   :  { %v1283_v60 = vrot.slane %v1281_v52, 5  ;;  %v1354_v45 = vsel %vm5767_vm8, 0, %v1353_v14  ;;  %v1401_v33 = vrot.slane %v1278_v23, 7  ;;  %v5658_v13 = vld [vmem:[%s7930_s1 + $0x418] sm:$0xff]   ;;  %v4668_v35 = vcombine.low %v7040_v16, %v7044_v48  ;;  %v1356_v14 = vld [vmem:[#allocation2 + $0x420] sm:$0x11] }
  0xc7   :  { %v7213_v53 = vsel %vm6156_vm7, %v1267_v62, %v1321_v0  ;;  %v1435_v58 = vld [vmem:[#allocation2 + $0x348] sm:$0xff]  ;;  %1355 = vst [vmem:[#allocation2 + $0x3d8] sm:$0x11] %v1354_v45  ;;  %v1289_v38 = vrot.slane %v1406_v46, 4  ;;  %v4687_v16 = vcombine.high %v7080_v11, %v7084_v54  ;;  %v1218_v62 = vld [vmem:[#allocation2 + $0x418] sm:$0x88] }
  0xc8   :  { %4126 = vmatmul.mubr.bf16.vlgmr.msra.gmra.mrb[80].mxu1 %v4632_v30  ;;  %v1213_v30 = vsel %vm6052_vm9, 0, %v1212_v42  ;;  %1323 = vst [vmem:[#allocation2 + $0x340] sm:$0xff] %v7213_v53  ;;  %v1284_v44 = vor.u32 %v1283_v60, %v1280_v47  ;;  %v5660_v42 = vld [vmem:[%s7930_s1 + $0x3a0] sm:$0xff]   ;;  %v7272_v0 = vld [vmem:[%s7931_s0 + $0x78] sm:$0xff]  ;;  %v1359_v60 = vld [vmem:[#allocation2 + $0x468] sm:$0x11] }
  0xc9   :  { %5359 = vmatpush3.bf16.msra.mxu1 %v5644_v28  ;;  %4133 = vmatprep.mubr.bf16.mxu1 %v4651_v17  ;;  %v1216_v28 = vsel %vm6052_vm9, 0, %v1215_v6  ;;  %v1318_v17 = vld [vmem:[#allocation2 + $0x2f8] sm:$0xff]  ;;  %1214 = vst [vmem:[#allocation2 + $0x388] sm:$0x88] %v1213_v30  ;;  %v5661_v6 = vld [vmem:[%s7930_s1 + $0x460] sm:$0xff]   ;;  %v1299_v47 = vshll.u32 %v7272_v0, 16 }
  0xca   :  { %5360 = vmatprep.subr.bf16.mxu1 %v5647_v1  ;;  %4223 = vmatmul.mubr.bf16.vlgmr.msra.gmra.mrb[80].mxu0 %v4634_v10  ;;  %1217 = vst [vmem:[#allocation2 + $0x3d0] sm:$0x88] %v1216_v28  ;;  %v7200_v9 = vsel %vm6156_vm7, %v1258_v8, %v1318_v17  ;;  %v5654_v1 = vld [vmem:[%s7930_s1 + $0x410] sm:$0xff]   ;;  %v1351_v10 = vsel %vm5767_vm8, 0, %v1350_v51  ;;  %v1409_v8 = vshll.u32 %v7193_v49, 16  ;;  %v1404_v28 = vor.u32 %v1401_v33, %v1281_v52  ;;  %v5663_v52 = vld [vmem:[%s7930_s1 + $0x3e8] sm:$0xff]  }
  0xcb   :  { %5423 = vmatpush3.bf16.msra.mxu0 %v5646_v5  ;;  %4230 = vmatprep.mubr.bf16.mxu0 %v4653_v20  ;;  %1320 = vst [vmem:[#allocation2 + $0x2f8] sm:$0xff] %v7200_v9  ;;  %v1432_v5 = vld [vmem:[#allocation2 + $0x300] sm:$0xff]  ;;  %v4652_v20 = vcombine.low %v7006_v29, %v7017_v40  ;;  %1352 = vst [vmem:[#allocation2 + $0x390] sm:$0x11] %v1351_v10  ;;  %v5656_v29 = vld [vmem:[%s7930_s1 + $0x398] sm:$0xff]   ;;  %v1275_v40 = vor.u32 %v1274_v61, %v1271_v37  ;;  %v1219_v37 = vsel %vm6052_vm9, 0, %v1218_v62 }
  0xcc   :  { %5424 = vmatprep.subr.bf16.mxu0 %v5649_v59  ;;  %v7227_v59 = vsel %vm5795_vm13, %v6802_v4, %v1435_v58  ;;  %v5657_v4 = vld [vmem:[%s7930_s1 + $0x458] sm:$0xff]   ;;  %v1221_v17 = vld [vmem:[#allocation2 + $0x460] sm:$0x88]  ;;  %v1292_v23 = vrot.slane %v1409_v8, 5  ;;  %v1296_v51 = vshrl.u32 %v7272_v0, 16  ;;  %v5664_v10 = vld [vmem:[%s7930_s1 + $0x3a8] sm:$0xff]  }
  0xcd   :  { %5361 = vmatpush3.bf16.msra.mxu1 %v5648_v7  ;;  %v7222_v7 = vsel %vm5795_vm13, %v1390_v12, %v1432_v5  ;;  %1437 = vst [vmem:[#allocation2 + $0x348] sm:$0xff] %v7227_v59  ;;  %v7254_v12 = vld [vmem:[#allocation2 + $0x228] sm:$0xff]  ;;  %v1222_v61 = vsel %vm6052_vm9, 0, %v1221_v17  ;;  %1220 = vst [vmem:[#allocation2 + $0x418] sm:$0x88] %v1219_v37 }
  0xce   :  { %5362 = vmatprep.subr.bf16.mxu1 %v5651_v55  ;;  %1434 = vst [vmem:[#allocation2 + $0x300] sm:$0xff] %v7222_v7  ;;  %v1408_v55 = vrot.slane %v1406_v46, 7  ;;  %1223 = vst [vmem:[#allocation2 + $0x460] sm:$0x88] %v1222_v61  ;;  %v1293_v58 = vor.u32 %v1292_v23, %v1289_v38  ;;  %v1441_v45 = vld [vmem:[#allocation2 + $0x3d8] sm:$0xff]  ;;  %v5666_v33 = vld [vmem:[%s7930_s1 + $0x428] sm:$0xff]  }
  0xcf   :  { %5425 = vmatpush3.bf16.msra.mxu0 %v5650_v50  ;;  %v7248_v50 = vrot.slane %v1275_v40, 4  ;;  %v5665_v40 = vld [vmem:[%s7930_s1 + $0x468] sm:$0xff]  }
  0xd0   :  { %4134 = vmatmul.mubr.bf16.gmra.mrb[84].mxu1 %v4650_v15  ;;  %5426 = vmatprep.subr.bf16.mxu0 %v5653_v3  ;;  %v5659_v15 = vld [vmem:[%s7930_s1 + $0x3e0] sm:$0xff]   ;;  %v1324_v3 = vld [vmem:[#allocation2 + $0x388] sm:$0xff]  ;;  %v1411_v21 = vor.u32 %v1409_v8, %v1408_v55  ;;  %v5667_v55 = vld [vmem:[%s7930_s1 + $0x3f0] sm:$0xff]   ;;  %v7322_v8 = vrot.slane %v1293_v58, 4 }
  0xd1   :  { %4141 = vmatprep.mubr.bf16.mxu1 %v4669_v27  ;;  %5363 = vmatpush3.bf16.msra.mxu1 %v5652_v2  ;;  %v4744_v27 = vcombine.low %v7186_v22, %v7193_v49  ;;  %v1285_v2 = vrot.slane %v1284_v44, 4  ;;  %v1327_v30 = vld [vmem:[#allocation2 + $0x3d0] sm:$0xff]  ;;  %v7267_v48 = vsel %vm6156_vm7, %v7248_v50, %v1324_v3  ;;  %v1415_v44 = vrot.slane %v1296_v51, 7  ;;  %v695_v38 = vld [vmem:[#allocation2 + $0x88] sm:$0x88] }
  0xd2   :  { %5364 = vmatprep.subr.bf16.mxu1 %v5655_v41  ;;  %4231 = vmatmul.mubr.bf16.gmra.mrb[84].mxu0 %v4652_v20  ;;  %1326 = vst [vmem:[#allocation2 + $0x388] sm:$0xff] %v7267_v48  ;;  %v5662_v41 = vld [vmem:[%s7930_s1 + $0x420] sm:$0xff]   ;;  %v1438_v5 = vld [vmem:[#allocation2 + $0x390] sm:$0xff]  ;;  %v1357_v20 = vsel %vm5767_vm8, 0, %v1356_v14  ;;  %v7313_v18 = vsel %vm5795_vm13, %v1411_v21, %v1441_v45  ;;  %v696_v23 = vsel %vm6052_vm9, 0, %v695_v38  ;;  %v7422_v38 = vld [vmem:[%s7931_s0 + $0x48] sm:$0xff] }
  0xd3   :  { %4238 = vmatprep.mubr.bf16.mxu0 %v4671_v43  ;;  %5427 = vmatpush3.bf16.msra.mxu0 %v5654_v1  ;;  %v7280_v46 = vsel %vm6156_vm7, %v1285_v2, %v1327_v30  ;;  %v4670_v1 = vcombine.low %v7049_v56, %v7057_v57  ;;  %v7299_v56 = vsel %vm5795_vm13, %v1404_v28, %v1438_v5  ;;  %v1298_v57 = vrot.slane %v1296_v51, 4  ;;  %v7340_v2 = vld [vmem:[%s7931_s0 + $0x10] sm:$0xff]  ;;  %v5671_v30 = vld [vmem:[%s7930_s1 + $0x3f8] sm:$0xff]   ;;  %v692_v28 = vld [vmem:[#allocation2 + $0x40] sm:$0x88] }
  0xd4   :  { %5428 = vmatprep.subr.bf16.mxu0 %v5657_v4  ;;  %1329 = vst [vmem:[#allocation2 + $0x3d0] sm:$0xff] %v7280_v46  ;;  %v1360_v43 = vsel %vm5767_vm8, 0, %v1359_v60  ;;  %1440 = vst [vmem:[#allocation2 + $0x390] sm:$0xff] %v7299_v56  ;;  %v1301_v4 = vrot.slane %v1299_v47, 5  ;;  %v1418_v3 = vor.u32 %v1415_v44, %v1299_v47  ;;  %v1330_v21 = vld [vmem:[#allocation2 + $0x418] sm:$0xff]  ;;  %v693_v17 = vsel %vm6052_vm9, 0, %v692_v28 }
  0xd5   :  { %5365 = vmatpush3.bf16.msra.mxu1 %v5656_v29  ;;  %v4689_v29 = vcombine.high %v7088_v26, %v7254_v12  ;;  %1358 = vst [vmem:[#allocation2 + $0x420] sm:$0x11] %v1357_v20  ;;  %1361 = vst [vmem:[#allocation2 + $0x468] sm:$0x11] %v1360_v43  ;;  %v1333_v62 = vld [vmem:[#allocation2 + $0x460] sm:$0xff]  ;;  %v733_v37 = vshrl.u32 %v7340_v2, 16  ;;  %v7359_v61 = vsel %vm6156_vm7, %v7322_v8, %v1330_v21 }
  0xd6   :  { %5366 = vmatprep.subr.bf16.mxu1 %v5659_v15  ;;  %1443 = vst [vmem:[#allocation2 + $0x3d8] sm:$0xff] %v7313_v18  ;;  %v4686_v15 = vcombine.low %v7080_v11, %v7084_v54  ;;  %v4705_v11 = vcombine.high %v7116_v63, %v7120_v31  ;;  %694 = vst [vmem:[#allocation2 + $0x40] sm:$0x88] %v693_v17  ;;  %v7375_v5 = vld [vmem:[%s7931_s0 + $0x20] sm:$0xff]  ;;  %v698_v58 = vld [vmem:[#allocation2 + $0xd0] sm:$0x88]  ;;  %v4688_v47 = vcombine.low %v7088_v26, %v7254_v12 }
  0xd7   :  { %5429 = vmatpush3.bf16.msra.mxu0 %v5658_v13  ;;  %v1302_v13 = vor.u32 %v1301_v4, %v1298_v57  ;;  %697 = vst [vmem:[#allocation2 + $0x88] sm:$0x88] %v696_v23  ;;  %v5670_v60 = vld [vmem:[%s7930_s1 + $0x430] sm:$0xff]   ;;  %1332 = vst [vmem:[#allocation2 + $0x418] sm:$0xff] %v7359_v61  ;;  %v735_v20 = vrot.slane %v733_v37, 4  ;;  %v5672_v12 = vld [vmem:[%s7930_s1 + $0x3b8] sm:$0xff]  }
  0xd8   :  { %4142 = vmatmul.mubr.bf16.gmra.mrb[88].mxu1 %v4668_v35  ;;  %5430 = vmatprep.subr.bf16.mxu0 %v5661_v6  ;;  %v5668_v35 = vld [vmem:[%s7930_s1 + $0x3b0] sm:$0xff]   ;;  %v7335_v6 = vld [vmem:[%s7931_s0 + $0x8] sm:$0xff]  ;;  %v701_v43 = vld [vmem:[#allocation2 + $0x118] sm:$0x88]  ;;  %v699_v45 = vsel %vm6052_vm9, 0, %v698_v58  ;;  %vm4513_vm8 = vcmask 257024  }
  0xd9   :  { %4149 = vmatprep.mubr.bf16.mxu1 %v4687_v16  ;;  %5367 = vmatpush3.bf16.msra.mxu1 %v5660_v42  ;;  %v5669_v42 = vld [vmem:[%s7930_s1 + $0x470] sm:$0xff]   ;;  %v7344_v54 = vrot.slane %v1302_v13, 4  ;;  %v724_v16 = vshrl.u32 %v7335_v6, 16  ;;  %v7398_v4 = vld [vmem:[%s7931_s0 + $0x28] sm:$0xff]  ;;  %700 = vst [vmem:[#allocation2 + $0xd0] sm:$0x88] %v699_v45  ;;  %v4706_v45 = vcombine.low %v7153_v25, %v7157_v24 }
  0xda   :  { %5368 = vmatprep.subr.bf16.mxu1 %v5663_v52  ;;  %4239 = vmatmul.mubr.bf16.gmra.mrb[88].mxu0 %v4670_v1  ;;  %v727_v52 = vshll.u32 %v7335_v6, 16  ;;  %v736_v1 = vshll.u32 %v7340_v2, 16  ;;  %v7403_v44 = vld [vmem:[%s7931_s0 + $0x30] sm:$0xff]  ;;  %v704_v13 = vld [vmem:[#allocation2 + $0x160] sm:$0x88]  ;;  %v7437_v23 = vld [vmem:[%s7931_s0 + $0x58] sm:$0xff] }
  0xdb   :  { %4246 = vmatprep.mubr.bf16.mxu0 %v4689_v29  ;;  %5431 = vmatpush3.bf16.msra.mxu0 %v5662_v41  ;;  %v7364_v51 = vsel %vm6156_vm7, %v7344_v54, %v1333_v62  ;;  %v726_v14 = vrot.slane %v724_v16, 4  ;;  %v7370_v41 = vld [vmem:[%s7931_s0 + $0x18] sm:$0xff]  ;;  %v4707_v29 = vcombine.high %v7153_v25, %v7157_v24  ;;  %v707_v28 = vld [vmem:[#allocation2 + $0x1a8] sm:$0x88]  ;;  %v4704_v16 = vcombine.low %v7116_v63, %v7120_v31  ;;  %v7432_v17 = vld [vmem:[%s7931_s0 + $0x50] sm:$0xff] }
  0xdc   :  { %5432 = vmatprep.subr.bf16.mxu0 %v5665_v40  ;;  %1335 = vst [vmem:[#allocation2 + $0x460] sm:$0xff] %v7364_v51  ;;  %v729_v57 = vrot.slane %v727_v52, 5  ;;  %v738_v40 = vrot.slane %v736_v1, 5  ;;  %v754_v62 = vshll.u32 %v7375_v5, 16  ;;  %v5674_v63 = vld [vmem:[%s7930_s1 + $0x438] sm:$0xff]   ;;  %v4722_v25 = vcombine.low %v7200_v9, %v7213_v53 }
  0xdd   :  { %5369 = vmatpush3.bf16.msra.mxu1 %v5664_v10  ;;  %v1444_v10 = vld [vmem:[#allocation2 + $0x420] sm:$0xff]  ;;  %v4654_v19 = vcombine.low %v7370_v41, %v7375_v5 }
  0xde   :  { %5370 = vmatprep.subr.bf16.mxu1 %v5667_v55  ;;  %v7388_v26 = vsel %vm5795_vm13, %v1418_v3, %v1444_v10  ;;  %v702_v55 = vsel %vm6052_vm9, 0, %v701_v43  ;;  %v751_v3 = vshrl.u32 %v7375_v5, 16  ;;  %v793_v1 = vld [vmem:[#allocation2 + $0x40] sm:$0xff]  ;;  %v796_v58 = vld [vmem:[#allocation2 + $0x88] sm:$0xff]  ;;  %v705_v10 = vsel %vm6052_vm9, 0, %v704_v13 }
  0xdf   :  { %5433 = vmatpush3.bf16.msra.mxu0 %v5666_v33  ;;  %1446 = vst [vmem:[#allocation2 + $0x420] sm:$0xff] %v7388_v26  ;;  %v730_v33 = vor.u32 %v729_v57, %v726_v14  ;;  %703 = vst [vmem:[#allocation2 + $0x118] sm:$0x88] %v702_v55  ;;  %v708_v57 = vsel %vm6052_vm9, 0, %v707_v28  ;;  %v713_v13 = vld [vmem:[#allocation2 + $0x238] sm:$0x88] }
  0xe0   :  { %4150 = vmatmul.mubr.bf16.gmra.mrb[92].mxu1 %v4686_v15  ;;  %5434 = vmatprep.subr.bf16.mxu0 %v5669_v42  ;;  %v7414_v15 = vld [vmem:[%s7931_s0 + $0x38] sm:$0xff]  ;;  %v742_v42 = vshrl.u32 %v7370_v41, 16  ;;  %v753_v14 = vrot.slane %v751_v3, 4  ;;  %706 = vst [vmem:[#allocation2 + $0x160] sm:$0x88] %v705_v10  ;;  %v769_v3 = vshrl.u32 %v7403_v44, 16  ;;  %v4741_v10 = vcombine.high %v7267_v48, %v7280_v46 }
  0xe1   :  { %4157 = vmatprep.mubr.bf16.mxu1 %v4705_v11  ;;  %5371 = vmatpush3.bf16.msra.mxu1 %v5668_v35  ;;  %v739_v35 = vor.u32 %v738_v40, %v735_v20  ;;  %v745_v11 = vshll.u32 %v7370_v41, 16  ;;  %v731_v21 = vrot.slane %v730_v33, 4  ;;  %709 = vst [vmem:[#allocation2 + $0x1a8] sm:$0x88] %v708_v57  ;;  %v710_v40 = vld [vmem:[#allocation2 + $0x1f0] sm:$0x88] }
  0xe2   :  { %5372 = vmatprep.subr.bf16.mxu1 %v5671_v30  ;;  %4247 = vmatmul.mubr.bf16.gmra.mrb[92].mxu0 %v4688_v47  ;;  %v4723_v30 = vcombine.high %v7200_v9, %v7213_v53  ;;  %v744_v52 = vrot.slane %v742_v42, 4  ;;  %v756_v47 = vrot.slane %v754_v62, 5  ;;  %v799_v42 = vld [vmem:[#allocation2 + $0xd0] sm:$0xff]  ;;  %v772_v28 = vshll.u32 %v7403_v44, 16 }
  0xe3   :  { %4254 = vmatprep.mubr.bf16.mxu0 %v4707_v29  ;;  %5435 = vmatpush3.bf16.msra.mxu0 %v5670_v60  ;;  %v740_v31 = vrot.slane %v739_v35, 4  ;;  %v747_v37 = vrot.slane %v745_v11, 5  ;;  %v760_v60 = vshrl.u32 %v7398_v4, 16  ;;  %v7449_v20 = vsel %vm6156_vm7, %v731_v21, %v793_v1 }
  0xe4   :  { %5436 = vmatprep.subr.bf16.mxu0 %v5673_v34  ;;  %v4725_v34 = vcombine.high %v7222_v7, %v7227_v59  ;;  %795 = vst [vmem:[#allocation2 + $0x40] sm:$0xff] %v7449_v20  ;;  %v757_v33 = vor.u32 %v756_v47, %v753_v14  ;;  %v711_v21 = vsel %vm6052_vm9, 0, %v710_v40  ;;  %v714_v53 = vsel %vm6052_vm9, 0, %v713_v13  ;;  %v1463_v40 = vld [vmem:[#allocation2 + $0x280] sm:$0x88] }
  0xe5   :  { %5373 = vmatpush3.bf16.msra.mxu1 %v5672_v12  ;;  %v7453_v43 = vsel %vm6156_vm7, %v740_v31, %v796_v58  ;;  %v748_v29 = vor.u32 %v747_v37, %v744_v52  ;;  %v763_v12 = vshll.u32 %v7398_v4, 16  ;;  %v762_v55 = vrot.slane %v760_v60, 4  ;;  %712 = vst [vmem:[#allocation2 + $0x1f0] sm:$0x88] %v711_v21  ;;  %715 = vst [vmem:[#allocation2 + $0x238] sm:$0x88] %v714_v53 }
  0xe6   :  { %798 = vst [vmem:[#allocation2 + $0x88] sm:$0xff] %v7453_v43  ;;  %v758_v24 = vrot.slane %v757_v33, 4  ;;  %v771_v52 = vrot.slane %v769_v3, 4  ;;  %v774_v37 = vrot.slane %v772_v28, 5  ;;  %v778_v58 = vshrl.u32 %v7414_v15, 16 }
  0xe7   :  { %5437 = vmatpush3.bf16.msra.mxu0 %v5674_v63  ;;  %v749_v35 = vrot.slane %v748_v29, 4  ;;  %v765_v11 = vrot.slane %v763_v12, 5  ;;  %v781_v47 = vshll.u32 %v7414_v15, 16  ;;  %v4639_v39 = vcombine.high %v7449_v20, %v7453_v43 }
  0xe8   :  { %4158 = vmatmul.mubr.bf16.gmra.mrb[96].mxu1 %v4704_v16  ;;  %v802_v16 = vld [vmem:[#allocation2 + $0x118] sm:$0xff]  ;;  %v808_v28 = vld [vmem:[#allocation2 + $0x1a8] sm:$0xff] }
  0xe9   :  { %4165 = vmatprep.mubr.bf16.mxu1 %v4723_v30  ;;  %v7470_v30 = vsel %vm6156_vm7, %v749_v35, %v799_v42  ;;  %v766_v63 = vor.u32 %v765_v11, %v762_v55  ;;  %v7475_v9 = vsel %vm6156_vm7, %v758_v24, %v802_v16  ;;  %v775_v35 = vor.u32 %v774_v37, %v771_v52  ;;  %v805_v42 = vld [vmem:[#allocation2 + $0x160] sm:$0xff] }
  0xea   :  { %4255 = vmatmul.mubr.bf16.gmra.mrb[96].mxu0 %v4706_v45  ;;  %801 = vst [vmem:[#allocation2 + $0xd0] sm:$0xff] %v7470_v30  ;;  %804 = vst [vmem:[#allocation2 + $0x118] sm:$0xff] %v7475_v9  ;;  %v1466_v45 = vld [vmem:[#allocation2 + $0x2c8] sm:$0x88]  ;;  %v4724_v24 = vcombine.low %v7222_v7, %v7227_v59  ;;  %v1495_v37 = vshrl.u32 %v7422_v38, 16 }
  0xeb   :  { %4262 = vmatprep.mubr.bf16.mxu0 %v4725_v34  ;;  %v767_v13 = vrot.slane %v766_v63, 4  ;;  %v780_v34 = vrot.slane %v778_v58, 4  ;;  %v776_v16 = vrot.slane %v775_v35, 4  ;;  %v4740_v63 = vcombine.low %v7267_v48, %v7280_v46  ;;  %v1469_v48 = vld [vmem:[#allocation2 + $0x310] sm:$0x88] }
  0xec   :  { %v1467_v7 = vsel %vm6052_vm9, 0, %v1466_v45  ;;  %v4742_v46 = vcombine.low %v7299_v56, %v7313_v18  ;;  %v811_v53 = vld [vmem:[#allocation2 + $0x1f0] sm:$0xff]  ;;  %v1504_v58 = vshrl.u32 %v7432_v17, 16  ;;  %v4708_v45 = vcombine.low %v7422_v38, %v7432_v17 }
  0xed   :  { %v7496_v21 = vsel %vm6156_vm7, %v767_v13, %v805_v42  ;;  %v7509_v59 = vsel %vm6156_vm7, %v776_v16, %v808_v28  ;;  %1468 = vst [vmem:[#allocation2 + $0x2c8] sm:$0x88] %v1467_v7  ;;  %v7526_v13 = vld [vmem:[#allocation2 + $0x468] sm:$0xff] }
  0xee   :  { %807 = vst [vmem:[#allocation2 + $0x160] sm:$0xff] %v7496_v21  ;;  %810 = vst [vmem:[#allocation2 + $0x1a8] sm:$0xff] %v7509_v59 }
  0xf0   :  { %4166 = vmatmul.mubr.bf16.gmra.mrb[100].mxu1 %v4722_v25  ;;  %v1464_v25 = vsel %vm6052_vm9, 0, %v1463_v40 }
  0xf1   :  { %4173 = vmatprep.mubr.bf16.mxu1 %v4741_v10  ;;  %1465 = vst [vmem:[#allocation2 + $0x280] sm:$0x88] %v1464_v25  ;;  %v1472_v10 = vld [vmem:[#allocation2 + $0x358] sm:$0x88]  ;;  %v1475_v25 = vld [vmem:[#allocation2 + $0x3a0] sm:$0x88] }
  0xf2   :  { %4263 = vmatmul.mubr.bf16.gmra.mrb[100].mxu0 %v4724_v24  ;;  %v1473_v28 = vsel %vm6052_vm9, 0, %v1472_v10  ;;  %v1513_v24 = vshrl.u32 %v7437_v23, 16 }
  0xf3   :  { %1474 = vst [vmem:[#allocation2 + $0x358] sm:$0x88] %v1473_v28  ;;  %v1481_v28 = vld [vmem:[#allocation2 + $0x430] sm:$0x88] }
  0xf5   :  { %v4926_v62 = vpop.f32.mrb[0].mxu0  ;;  %v4950_v31 = vpop.f32.mrb[0].mxu1 }
  0xf6   :  { %v4927_v14 = vpop.f32.mrb[1].mxu0  ;;  %v4951_v1 = vpop.f32.mrb[1].mxu1 }
  0xf7   :  { %v7483_v57 = vadd.f32 %v4927_v14, %v4926_v62  ;;  %v7485_v60 = vadd.f32 %v4951_v1, %v4950_v31  ;;  %v4929_v29 = vpop.f32.mrb[2].mxu0  ;;  %v4953_v12 = vpop.f32.mrb[2].mxu1  ;;  %v783_v62 = vrot.slane %v781_v47, 5  ;;  %v4743_v31 = vcombine.high %v7299_v56, %v7313_v18 }
  0xf8   :  { %v4930_v33 = vpop.f32.mrb[3].mxu0  ;;  %v4954_v55 = vpop.f32.mrb[3].mxu1  ;;  %v1498_v14 = vshll.u32 %v7422_v38, 16  ;;  %v4759_v1 = vcombine.high %v7359_v61, %v7364_v51  ;;  %v1507_v47 = vshll.u32 %v7432_v17, 16  ;;  %v1506_v56 = vrot.slane %v1504_v58, 4  ;;  %4174 = vmatmul.mubr.bf16.gmra.mrb[104].mxu1 %v4740_v63 }
  0xf9   :  { %v7488_v11 = vadd.f32 %v4930_v33, %v4929_v29  ;;  %v7490_v3 = vadd.f32 %v4954_v55, %v4953_v12  ;;  %v784_v52 = vor.u32 %v783_v62, %v780_v34  ;;  %v1497_v12 = vrot.slane %v1495_v37, 4  ;;  %4270 = vmatprep.mubr.bf16.mxu0 %v4743_v31  ;;  %v1478_v58 = vld [vmem:[#allocation2 + $0x3e8] sm:$0x88] }
  0xfa   :  { %v1500_v40 = vrot.slane %v1498_v14, 5  ;;  %v1509_v18 = vrot.slane %v1507_v47, 5  ;;  %v4727_v33 = vcombine.high %v7437_v23, %v7171_v32  ;;  %v1470_v55 = vsel %vm6052_vm9, 0, %v1469_v48  ;;  %4181 = vmatprep.mubr.bf16.mxu1 %v4759_v1  ;;  %v4618_v1 = vld [vmem:[%s7931_s0 + $0x68] sm:$0xff]  ;;  %4271 = vmatmul.mubr.bf16.gmra.mrb[104].mxu0 %v4742_v46 }
  0xfb   :  { %v785_v29 = vrot.slane %v784_v52, 4  ;;  %1471 = vst [vmem:[#allocation2 + $0x310] sm:$0x88] %v1470_v55  ;;  %v1516_v31 = vshll.u32 %v7437_v23, 16  ;;  %v1515_v48 = vrot.slane %v1513_v24, 4  ;;  %v4761_v47 = vcombine.high %v7388_v26, %v7526_v13 }
  0xfc   :  { %v1501_v34 = vor.u32 %v1500_v40, %v1497_v12  ;;  %v1510_v62 = vor.u32 %v1509_v18, %v1506_v56  ;;  %v1564_v40 = vld [vmem:[#allocation2 + $0x280] sm:$0xff]  ;;  %v1567_v56 = vld [vmem:[#allocation2 + $0x2c8] sm:$0xff]  ;;  %v1482_v46 = vsel %vm6052_vm9, 0, %v1481_v28 }
  0xfd   :  { %v4932_v35 = vpop.f32.mrb[4].mxu0  ;;  %v7530_v42 = vsel %vm6156_vm7, %v785_v29, %v811_v53  ;;  %v4956_v7 = vpop.f32.mrb[4].mxu1  ;;  %v4726_v53 = vcombine.low %v7437_v23, %v7171_v32  ;;  %v1518_v63 = vrot.slane %v1516_v31, 5  ;;  %v1476_v31 = vsel %vm6052_vm9, 0, %v1475_v25  ;;  %4278 = vmatprep.mubr.bf16.mxu0 %v4761_v47  ;;  %1483 = vst [vmem:[#allocation2 + $0x430] sm:$0x88] %v1482_v46 }
  0xfe   :  { %v4933_v16 = vpop.f32.mrb[5].mxu0  ;;  %813 = vst [vmem:[#allocation2 + $0x1f0] sm:$0xff] %v7530_v42  ;;  %v1502_v14 = vrot.slane %v1501_v34, 4  ;;  %v4957_v10 = vpop.f32.mrb[5].mxu1  ;;  %v1511_v12 = vrot.slane %v1510_v62, 4 }
  0xff   :  { %v7537_v52 = vadd.f32 %v4933_v16, %v4932_v35  ;;  %v4935_v37 = vpop.f32.mrb[6].mxu0  ;;  %v7543_v18 = vadd.f32 %v4957_v10, %v4956_v7  ;;  %v4959_v55 = vpop.f32.mrb[6].mxu1  ;;  %v1519_v62 = vor.u32 %v1518_v63, %v1515_v48  ;;  %v1479_v7 = vsel %vm6052_vm9, 0, %v1478_v58  ;;  %1477 = vst [vmem:[#allocation2 + $0x3a0] sm:$0x88] %v1476_v31  ;;  %v1573_v58 = vld [vmem:[#allocation2 + $0x358] sm:$0xff] }
 0x100   :  { %v4936_v29 = vpop.f32.mrb[7].mxu0  ;;  %v7549_v34 = vsel %vm6156_vm7, %v1502_v14, %v1564_v40  ;;  %v4960_v24 = vpop.f32.mrb[7].mxu1  ;;  %v7557_v16 = vsel %vm6156_vm7, %v1511_v12, %v1567_v56  ;;  %v4758_v14 = vcombine.low %v7359_v61, %v7364_v51  ;;  %1480 = vst [vmem:[#allocation2 + $0x3e8] sm:$0x88] %v1479_v7  ;;  %v4637_v48 = vcombine.high %v7335_v6, %v7340_v2 }
 0x101   :  { %v7545_v35 = vadd.f32 %v4936_v29, %v4935_v37  ;;  %1566 = vst [vmem:[#allocation2 + $0x280] sm:$0xff] %v7549_v34  ;;  %v1484_v37 = vld [vmem:[#allocation2 + $0x478] sm:$0x88]  ;;  %v7565_v10 = vadd.f32 %v4960_v24, %v4959_v55  ;;  %1569 = vst [vmem:[#allocation2 + $0x2c8] sm:$0xff] %v7557_v16  ;;  %v1520_v29 = vrot.slane %v1519_v62, 4  ;;  %v1531_v12 = vshrl.u32 %v4618_v1, 16 }
 0x102   :  { %v1570_v25 = vld [vmem:[#allocation2 + $0x310] sm:$0xff]  ;;  %v1534_v40 = vshll.u32 %v4618_v1, 16  ;;  %v1485_v61 = vsel %vm6052_vm9, 0, %v1484_v37  ;;  %v7581_v47 = vsel %vm6156_vm7, %v7248_v50, %v1573_v58  ;;  %4182 = vmatmul.mubr.bf16.gmra.mrb[108].mxu1 %v4758_v14  ;;  %v4760_v55 = vcombine.low %v7388_v26, %v7526_v13 }
 0x103   :  { %v7576_v51 = vsel %vm6156_vm7, %v1520_v29, %v1570_v25  ;;  %v1533_v56 = vrot.slane %v1531_v12, 4  ;;  %1486 = vst [vmem:[#allocation2 + $0x478] sm:$0x88] %v1485_v61  ;;  %1575 = vst [vmem:[#allocation2 + $0x358] sm:$0xff] %v7581_v47  ;;  %4319 = vmatprep.mubr.bf16.mxu1 %v4637_v48  ;;  %v4636_v62 = vcombine.low %v7335_v6, %v7340_v2 }
 0x104   :  { %v1536_v63 = vrot.slane %v1534_v40, 5  ;;  %1572 = vst [vmem:[#allocation2 + $0x310] sm:$0xff] %v7576_v51  ;;  %4279 = vmatmul.mubr.bf16.gmra.mrb[108].mxu0 %v4760_v55  ;;  %v4655_v7 = vcombine.high %v7370_v41, %v7375_v5  ;;  %v1582_v2 = vld [vmem:[#allocation2 + $0x430] sm:$0xff]  ;;  %v4638_v12 = vcombine.low %v7449_v20, %v7453_v43  ;;  %v4656_v20 = vcombine.low %v7470_v30, %v7475_v9 }
 0x105   :  { %v4938_v31 = vpop.f32.mrb[8].mxu0  ;;  %4416 = vmatprep.mubr.bf16.mxu0 %v4639_v39  ;;  %v7609_v25 = vsel %vm6156_vm7, %v7344_v54, %v1582_v2  ;;  %v4673_v54 = vcombine.high %v7398_v4, %v7403_v44  ;;  %v4675_v55 = vcombine.high %v7496_v21, %v7509_v59  ;;  %v4674_v2 = vcombine.low %v7496_v21, %v7509_v59 }
 0x106   :  { %v1537_v1 = vor.u32 %v1536_v63, %v1533_v56  ;;  %v1576_v50 = vld [vmem:[#allocation2 + $0x3a0] sm:$0xff]  ;;  %v4939_v13 = vpop.f32.mrb[9].mxu0  ;;  %1584 = vst [vmem:[#allocation2 + $0x430] sm:$0xff] %v7609_v25  ;;  %v4657_v56 = vcombine.high %v7470_v30, %v7475_v9  ;;  %v7638_v9 = vld [vmem:[#allocation2 + $0x8] sm:$0xff]  ;;  %v4709_v21 = vcombine.high %v7422_v38, %v7432_v17 }
 0x107   :  { %v1579_v24 = vld [vmem:[#allocation2 + $0x3e8] sm:$0xff]  ;;  %v7603_v48 = vadd.f32 %v4939_v13, %v4938_v31  ;;  %v4941_v6 = vpop.f32.mrb[10].mxu0  ;;  %v4691_v13 = vcombine.high %v7414_v15, %v7638_v9  ;;  %v4762_v22 = vcombine.low %v7272_v0, %v7638_v9 }
 0x108   :  { %v1538_v28 = vrot.slane %v1537_v1, 4  ;;  %v7594_v26 = vsel %vm6156_vm7, %v7322_v8, %v1579_v24  ;;  %v4942_v29 = vpop.f32.mrb[11].mxu0  ;;  %v4672_v24 = vcombine.low %v7398_v4, %v7403_v44  ;;  %v7650_v44 = vld [vmem:[%s7932_s2] ss:$0 sm:$0xff] }
 0x109   :  { %1581 = vst [vmem:[#allocation2 + $0x3e8] sm:$0xff] %v7594_v26  ;;  %v4962_v14 = vpop.f32.mrb[8].mxu1  ;;  %v7615_v46 = vadd.f32 %v4942_v29, %v4941_v6  ;;  %v3659_v17 = vadd.f32 %v7603_v48, %v7650_v44  ;;  %v4728_v48 = vcombine.low %v7576_v51, %v7581_v47  ;;  %v3675_v49 = vadd.f32 %v7485_v60, %v7650_v44 }
 0x10a   :  { %v7600_v37 = vsel %vm6156_vm7, %v1538_v28, %v1576_v50  ;;  %v4963_v8 = vpop.f32.mrb[9].mxu1  ;;  %4320 = vmatmul.mubr.bf16.vlgmr.msra.gmra.mrb[112].mxu1 %v4636_v62 }
 0x10b   :  { %1578 = vst [vmem:[#allocation2 + $0x3a0] sm:$0xff] %v7600_v37  ;;  %v7613_v40 = vadd.f32 %v4963_v8, %v4962_v14  ;;  %v4965_v58 = vpop.f32.mrb[10].mxu1  ;;  %4327 = vmatprep.mubr.bf16.mxu1 %v4655_v7  ;;  %v1656_v14 = vld [vmem:[#allocation2 + $0x238] sm:$0xff] }
 0x10c   :  { %v4966_v61 = vpop.f32.mrb[11].mxu1  ;;  %4417 = vmatmul.mubr.bf16.vlgmr.msra.gmra.mrb[112].mxu0 %v4638_v12  ;;  %v4693_v4 = vcombine.high %v7530_v42, %v1656_v14  ;;  %v4690_v12 = vcombine.low %v7414_v15, %v7638_v9  ;;  %v4692_v15 = vcombine.low %v7530_v42, %v1656_v14 }
 0x10d   :  { %v7620_v63 = vadd.f32 %v4966_v61, %v4965_v58  ;;  %4424 = vmatprep.mubr.bf16.mxu0 %v4657_v56  ;;  %v3643_v58 = vadd.f32 %v7483_v57, %v7650_v44 }
 0x110   :  { %v4944_v43 = vpop.f32.mrb[12].mxu0 }
 0x111   :  { %v4945_v39 = vpop.f32.mrb[13].mxu0 }
 0x112   :  { %4328 = vmatmul.mubr.bf16.gmra.mrb[116].mxu1 %v4654_v19  ;;  %v7630_v28 = vadd.f32 %v4945_v39, %v4944_v43  ;;  %v4947_v50 = vpop.f32.mrb[14].mxu0  ;;  %v3646_v19 = vadd.f32 %v7488_v11, %v7650_v44 }
 0x113   :  { %4335 = vmatprep.mubr.bf16.mxu1 %v4673_v54  ;;  %v4968_v1 = vpop.f32.mrb[12].mxu1  ;;  %v4948_v5 = vpop.f32.mrb[15].mxu0 }
 0x114   :  { %4425 = vmatmul.mubr.bf16.gmra.mrb[116].mxu0 %v4656_v20  ;;  %v4969_v41 = vpop.f32.mrb[13].mxu1  ;;  %v7636_v30 = vadd.f32 %v4948_v5, %v4947_v50  ;;  %v4711_v50 = vcombine.high %v7549_v34, %v7557_v16  ;;  %v3667_v23 = vadd.f32 %v7630_v28, %v7650_v44  ;;  %v4746_v28 = vcombine.low %v7600_v37, %v7594_v26 }
 0x115   :  { %v7634_v62 = vadd.f32 %v4969_v41, %v4968_v1  ;;  %v4971_v31 = vpop.f32.mrb[14].mxu1  ;;  %4432 = vmatprep.mubr.bf16.mxu0 %v4675_v55 }
 0x116   :  { %v4972_v7 = vpop.f32.mrb[15].mxu1 }
 0x117   :  { %v7642_v6 = vadd.f32 %v4972_v7, %v4971_v31 }
 0x11a   :  { %4336 = vmatmul.mubr.bf16.gmra.mrb[120].mxu1 %v4672_v24 }
 0x11b   :  { %4343 = vmatprep.mubr.bf16.mxu1 %v4691_v13  ;;  %v4990_v8 = vpop.f32.mrb[16].mxu1  ;;  %v3651_v13 = vadd.f32 %v7537_v52, %v7650_v44  ;;  %v4710_v52 = vcombine.low %v7549_v34, %v7557_v16 }
 0x11c   :  { %4433 = vmatmul.mubr.bf16.gmra.mrb[120].mxu0 %v4674_v2  ;;  %v4991_v29 = vpop.f32.mrb[17].mxu1 }
 0x11d   :  { %v4992_v61 = vadd.f32 %v4991_v29, %v4990_v8  ;;  %v4993_v56 = vpop.f32.mrb[18].mxu1  ;;  %4440 = vmatprep.mubr.bf16.mxu0 %v4693_v4  ;;  %v5054_v54 = vpop.f32.mrb[16].mxu0  ;;  %v3654_v4 = vadd.f32 %v7545_v35, %v7650_v44  ;;  %v4729_v35 = vcombine.high %v7576_v51, %v7581_v47 }
 0x11e   :  { %v4994_v59 = vpop.f32.mrb[19].mxu1  ;;  %v5055_v55 = vpop.f32.mrb[17].mxu0 }
 0x11f   :  { %v3740_v20 = vadd.f32 %v4992_v61, %v3643_v58  ;;  %v4995_v43 = vadd.f32 %v4994_v59, %v4993_v56  ;;  %v5056_v39 = vadd.f32 %v5055_v55, %v5054_v54  ;;  %v5057_v1 = vpop.f32.mrb[18].mxu0 }
 0x120   :  { %v5058_v41 = vpop.f32.mrb[19].mxu0 }
 0x121   :  { %v3743_v57 = vadd.f32 %v4995_v43, %v3646_v19  ;;  %v7663_v5 = vadd.f32 %v5056_v39, %v3740_v20  ;;  %v5059_v24 = vadd.f32 %v5058_v41, %v5057_v1 }
 0x122   :  { %4344 = vmatmul.mubr.bf16.gmra.mrb[124].mxu1 %v4690_v12 }
 0x123   :  { %4351 = vmatprep.mubr.bf16.mxu1 %v4709_v21  ;;  %v4996_v31 = vpop.f32.mrb[20].mxu1  ;;  %v7667_v7 = vadd.f32 %v5059_v24, %v3743_v57 }
 0x124   :  { %4441 = vmatmul.mubr.bf16.gmra.mrb[124].mxu0 %v4692_v15  ;;  %v4997_v11 = vpop.f32.mrb[21].mxu1 }
 0x125   :  { %v4998_v42 = vadd.f32 %v4997_v11, %v4996_v31  ;;  %v4999_v14 = vpop.f32.mrb[22].mxu1  ;;  %4448 = vmatprep.mubr.bf16.mxu0 %v4711_v50  ;;  %v5060_v8 = vpop.f32.mrb[20].mxu0 }
 0x126   :  { %v5000_v2 = vpop.f32.mrb[23].mxu1  ;;  %v5061_v58 = vpop.f32.mrb[21].mxu0 }
 0x127   :  { %v3748_v29 = vadd.f32 %v4998_v42, %v3651_v13  ;;  %v5001_v12 = vadd.f32 %v5000_v2, %v4999_v14  ;;  %v5062_v61 = vadd.f32 %v5061_v58, %v5060_v8  ;;  %v5063_v56 = vpop.f32.mrb[22].mxu0  ;;  %v1728_v14 = vld [vmem:[#allocation2 + $0x478] sm:$0xff]  ;;  %v3670_v2 = vadd.f32 %v7636_v30, %v7650_v44 }
 0x128   :  { %v5064_v59 = vpop.f32.mrb[23].mxu0 }
 0x129   :  { %v3751_v21 = vadd.f32 %v5001_v12, %v3654_v4  ;;  %v7681_v19 = vadd.f32 %v5062_v61, %v3748_v29  ;;  %v5065_v54 = vadd.f32 %v5064_v59, %v5063_v56  ;;  %v4765_v56 = vcombine.high %v7609_v25, %v1728_v14 }
 0x12a   :  { %4352 = vmatmul.mubr.bf16.gmra.mrb[128].mxu1 %v4708_v45 }
 0x12b   :  { %4359 = vmatprep.mubr.bf16.mxu1 %v4727_v33  ;;  %v5002_v20 = vpop.f32.mrb[24].mxu1  ;;  %v7685_v45 = vadd.f32 %v5065_v54, %v3751_v21  ;;  %v3662_v33 = vadd.f32 %v7615_v46, %v7650_v44  ;;  %v4747_v46 = vcombine.high %v7600_v37, %v7594_v26 }
 0x12c   :  { %4449 = vmatmul.mubr.bf16.gmra.mrb[128].mxu0 %v4710_v52  ;;  %v5003_v38 = vpop.f32.mrb[25].mxu1 }
 0x12d   :  { %v5004_v34 = vadd.f32 %v5003_v38, %v5002_v20  ;;  %v5005_v16 = vpop.f32.mrb[26].mxu1  ;;  %4456 = vmatprep.mubr.bf16.mxu0 %v4729_v35  ;;  %v5066_v55 = vpop.f32.mrb[24].mxu0  ;;  %v3678_v38 = vadd.f32 %v7490_v3, %v7650_v44  ;;  %v3683_v3 = vadd.f32 %v7543_v18, %v7650_v44 }
 0x12e   :  { %v5006_v43 = vpop.f32.mrb[27].mxu1  ;;  %v5067_v1 = vpop.f32.mrb[25].mxu0 }
 0x12f   :  { %v3756_v15 = vadd.f32 %v5004_v34, %v3659_v17  ;;  %v5007_v39 = vadd.f32 %v5006_v43, %v5005_v16  ;;  %v5068_v57 = vadd.f32 %v5067_v1, %v5066_v55  ;;  %v5069_v50 = vpop.f32.mrb[26].mxu0 }
 0x130   :  { %v5070_v24 = vpop.f32.mrb[27].mxu0 }
 0x131   :  { %v3759_v41 = vadd.f32 %v5007_v39, %v3662_v33  ;;  %v7699_v31 = vadd.f32 %v5068_v57, %v3756_v15  ;;  %v5071_v11 = vadd.f32 %v5070_v24, %v5069_v50  ;;  %v4764_v33 = vcombine.low %v7609_v25, %v1728_v14 }
 0x132   :  { %4360 = vmatmul.mubr.bf16.gmra.mrb[132].mxu1 %v4726_v53  ;;  %v3686_v25 = vadd.f32 %v7565_v10, %v7650_v44 }
 0x133   :  { %4367 = vmatprep.mubr.bf16.mxu1 %v4745_v36  ;;  %v5008_v13 = vpop.f32.mrb[28].mxu1  ;;  %v7703_v53 = vadd.f32 %v5071_v11, %v3759_v41  ;;  %v4763_v36 = vcombine.high %v7272_v0, %v7638_v9 }
 0x134   :  { %4457 = vmatmul.mubr.bf16.gmra.mrb[132].mxu0 %v4728_v48  ;;  %v5009_v32 = vpop.f32.mrb[29].mxu1 }
 0x135   :  { %v5010_v51 = vadd.f32 %v5009_v32, %v5008_v13  ;;  %v5011_v47 = vpop.f32.mrb[30].mxu1  ;;  %4464 = vmatprep.mubr.bf16.mxu0 %v4747_v46  ;;  %v5072_v4 = vpop.f32.mrb[28].mxu0 }
 0x136   :  { %v5012_v42 = vpop.f32.mrb[31].mxu1  ;;  %v5073_v12 = vpop.f32.mrb[29].mxu0 }
 0x137   :  { %v3764_v8 = vadd.f32 %v5010_v51, %v3667_v23  ;;  %v5013_v29 = vadd.f32 %v5012_v42, %v5011_v47  ;;  %v5074_v58 = vadd.f32 %v5073_v12, %v5072_v4  ;;  %v5075_v52 = vpop.f32.mrb[30].mxu0  ;;  %v3691_v4 = vadd.f32 %v7613_v40, %v7650_v44 }
 0x138   :  { %v5076_v21 = vpop.f32.mrb[31].mxu0 }
 0x139   :  { %v3767_v61 = vadd.f32 %v5013_v29, %v3670_v2  ;;  %v7715_v35 = vadd.f32 %v5074_v58, %v3764_v8  ;;  %v5077_v30 = vadd.f32 %v5076_v21, %v5075_v52 }
 0x13a   :  { %4368 = vmatmul.mubr.bf16.gmra.mrb[136].mxu1 %v4744_v27 }
 0x13b   :  { %4375 = vmatprep.mubr.bf16.mxu1 %v4763_v36  ;;  %v5014_v59 = vpop.f32.mrb[32].mxu1  ;;  %v7721_v27 = vadd.f32 %v5077_v30, %v3767_v61 }
 0x13c   :  { %4465 = vmatmul.mubr.bf16.gmra.mrb[136].mxu0 %v4746_v28  ;;  %v5015_v54 = vpop.f32.mrb[33].mxu1  ;;  %v3694_v28 = vadd.f32 %v7620_v63, %v7650_v44 }
 0x13d   :  { %v5016_v26 = vadd.f32 %v5015_v54, %v5014_v59  ;;  %v5017_v37 = vpop.f32.mrb[34].mxu1  ;;  %4472 = vmatprep.mubr.bf16.mxu0 %v4765_v56  ;;  %v5078_v17 = vpop.f32.mrb[32].mxu0 }
 0x13e   :  { %v5018_v20 = vpop.f32.mrb[35].mxu1  ;;  %v5079_v43 = vpop.f32.mrb[33].mxu0 }
 0x13f   :  { %v3772_v34 = vadd.f32 %v5016_v26, %v3675_v49  ;;  %v5019_v16 = vadd.f32 %v5018_v20, %v5017_v37  ;;  %v5080_v0 = vadd.f32 %v5079_v43, %v5078_v17  ;;  %v5081_v9 = vpop.f32.mrb[34].mxu0  ;;  %v3699_v37 = vadd.f32 %v7634_v62, %v7650_v44 }
 0x140   :  { %v5082_v60 = vpop.f32.mrb[35].mxu0 }
 0x141   :  { %v3775_v55 = vadd.f32 %v5019_v16, %v3678_v38  ;;  %v7726_v15 = vadd.f32 %v5080_v0, %v3772_v34  ;;  %v5083_v39 = vadd.f32 %v5082_v60, %v5081_v9  ;;  %v3702_v34 = vadd.f32 %v7642_v6, %v7650_v44 }
 0x142   :  { %4376 = vmatmul.mubr.bf16.gmra.mrb[140].mxu1 %v4762_v22 }
 0x143   :  { %v5020_v1 = vpop.f32.mrb[36].mxu1  ;;  %v7730_v57 = vadd.f32 %v5083_v39, %v3775_v55 }
 0x144   :  { %4473 = vmatmul.mubr.bf16.gmra.mrb[140].mxu0 %v4764_v33  ;;  %v5021_v48 = vpop.f32.mrb[37].mxu1 }
 0x145   :  { %v5022_v50 = vadd.f32 %v5021_v48, %v5020_v1  ;;  %v5023_v41 = vpop.f32.mrb[38].mxu1  ;;  %v5084_v24 = vpop.f32.mrb[36].mxu0 }
 0x146   :  { %v5024_v46 = vpop.f32.mrb[39].mxu1  ;;  %v5085_v32 = vpop.f32.mrb[37].mxu0 }
 0x147   :  { %v3780_v11 = vadd.f32 %v5022_v50, %v3683_v3  ;;  %v5025_v13 = vadd.f32 %v5024_v46, %v5023_v41  ;;  %v5086_v23 = vadd.f32 %v5085_v32, %v5084_v24  ;;  %v5087_v51 = vpop.f32.mrb[38].mxu0 }
 0x148   :  { %v5088_v36 = vpop.f32.mrb[39].mxu0 }
 0x149   :  { %v3783_v47 = vadd.f32 %v5025_v13, %v3686_v25  ;;  %v7734_v42 = vadd.f32 %v5086_v23, %v3780_v11  ;;  %v5089_v14 = vadd.f32 %v5088_v36, %v5087_v51 }
 0x14b   :  { %v5026_v18 = vpop.f32.mrb[40].mxu1  ;;  %v7738_v8 = vadd.f32 %v5089_v14, %v3783_v47 }
 0x14c   :  { %v5027_v2 = vpop.f32.mrb[41].mxu1 }
 0x14d   :  { %v5028_v29 = vadd.f32 %v5027_v2, %v5026_v18  ;;  %v5029_v10 = vpop.f32.mrb[42].mxu1  ;;  %v5090_v58 = vpop.f32.mrb[40].mxu0 }
 0x14e   :  { %v5030_v12 = vpop.f32.mrb[43].mxu1  ;;  %v5091_v56 = vpop.f32.mrb[41].mxu0 }
 0x14f   :  { %v3788_v52 = vadd.f32 %v5028_v29, %v3691_v4  ;;  %v5031_v61 = vadd.f32 %v5030_v12, %v5029_v10  ;;  %v5092_v21 = vadd.f32 %v5091_v56, %v5090_v58  ;;  %v5093_v30 = vpop.f32.mrb[42].mxu0 }
 0x150   :  { %v5094_v54 = vpop.f32.mrb[43].mxu0 }
 0x151   :  { %v3791_v59 = vadd.f32 %v5031_v61, %v3694_v28  ;;  %v7742_v22 = vadd.f32 %v5092_v21, %v3788_v52  ;;  %v5095_v49 = vadd.f32 %v5094_v54, %v5093_v30 }
 0x153   :  { %v5032_v40 = vpop.f32.mrb[44].mxu1  ;;  %v7746_v20 = vadd.f32 %v5095_v49, %v3791_v59 }
 0x154   :  { %v5033_v26 = vpop.f32.mrb[45].mxu1 }
 0x155   :  { %v5034_v38 = vadd.f32 %v5033_v26, %v5032_v40  ;;  %v5035_v63 = vpop.f32.mrb[46].mxu1  ;;  %v5096_v16 = vpop.f32.mrb[44].mxu0 }
 0x156   :  { %v5036_v17 = vpop.f32.mrb[47].mxu1  ;;  %v5097_v0 = vpop.f32.mrb[45].mxu0 }
 0x157   :  { %v3796_v43 = vadd.f32 %v5034_v38, %v3699_v37  ;;  %v5037_v33 = vadd.f32 %v5036_v17, %v5035_v63  ;;  %v5098_v9 = vadd.f32 %v5097_v0, %v5096_v16  ;;  %v5099_v55 = vpop.f32.mrb[46].mxu0 }
 0x158   :  { %v5100_v39 = vpop.f32.mrb[47].mxu0 }
 0x159   :  { %v3799_v60 = vadd.f32 %v5037_v33, %v3702_v34  ;;  %v7750_v1 = vadd.f32 %v5098_v9, %v3796_v43  ;;  %v5101_v48 = vadd.f32 %v5100_v39, %v5099_v55 }
 0x15b   :  { %v5118_v62 = vpop.f32.mrb[48].mxu1  ;;  %v7752_v50 = vadd.f32 %v5101_v48, %v3799_v60 }
 0x15c   :  { %v5119_v3 = vpop.f32.mrb[49].mxu1 }
 0x15d   :  { %v5120_v41 = vadd.f32 %v5119_v3, %v5118_v62  ;;  %v5121_v46 = vpop.f32.mrb[50].mxu1  ;;  %v5182_v24 = vpop.f32.mrb[48].mxu0 }
 0x15e   :  { %v5122_v25 = vpop.f32.mrb[51].mxu1  ;;  %v5183_v11 = vpop.f32.mrb[49].mxu0 }
 0x15f   :  { %v3934_v6 = vadd.f32 %v5120_v41, %v7663_v5  ;;  %v5123_v44 = vadd.f32 %v5122_v25, %v5121_v46  ;;  %v5184_v13 = vadd.f32 %v5183_v11, %v5182_v24  ;;  %v5185_v32 = vpop.f32.mrb[50].mxu0 }
 0x160   :  { %v5186_v51 = vpop.f32.mrb[51].mxu0 }
 0x161   :  { %v3937_v23 = vadd.f32 %v5123_v44, %v7667_v7  ;;  %v7756_v47 = vadd.f32 %v5184_v13, %v3934_v6  ;;  %v5187_v36 = vadd.f32 %v5186_v51, %v5185_v32 }
 0x163   :  { %v5124_v14 = vpop.f32.mrb[52].mxu1  ;;  %v7758_v2 = vadd.f32 %v5187_v36, %v3937_v23 }
 0x164   :  { %v5125_v18 = vpop.f32.mrb[53].mxu1 }
 0x165   :  { %v5126_v4 = vadd.f32 %v5125_v18, %v5124_v14  ;;  %v5127_v29 = vpop.f32.mrb[54].mxu1  ;;  %v5188_v12 = vpop.f32.mrb[52].mxu0 }
 0x166   :  { %v5128_v10 = vpop.f32.mrb[55].mxu1  ;;  %v5189_v58 = vpop.f32.mrb[53].mxu0 }
 0x167   :  { %v3942_v5 = vadd.f32 %v5126_v4, %v7681_v19  ;;  %v5129_v28 = vadd.f32 %v5128_v10, %v5127_v29  ;;  %v5190_v52 = vadd.f32 %v5189_v58, %v5188_v12  ;;  %v5191_v61 = vpop.f32.mrb[54].mxu0 }
 0x168   :  { %v5192_v56 = vpop.f32.mrb[55].mxu0 }
 0x169   :  { %v3945_v7 = vadd.f32 %v5129_v28, %v7685_v45  ;;  %v7762_v21 = vadd.f32 %v5190_v52, %v3942_v5  ;;  %v5193_v30 = vadd.f32 %v5192_v56, %v5191_v61 }
 0x16b   :  { %v5130_v59 = vpop.f32.mrb[56].mxu1  ;;  %v7764_v49 = vadd.f32 %v5193_v30, %v3945_v7 }
 0x16c   :  { %v5131_v54 = vpop.f32.mrb[57].mxu1 }
 0x16d   :  { %v5132_v40 = vadd.f32 %v5131_v54, %v5130_v59  ;;  %v5133_v26 = vpop.f32.mrb[58].mxu1  ;;  %v5194_v38 = vpop.f32.mrb[56].mxu0 }
 0x16e   :  { %v5134_v37 = vpop.f32.mrb[59].mxu1  ;;  %v5195_v17 = vpop.f32.mrb[57].mxu0 }
 0x16f   :  { %v3950_v19 = vadd.f32 %v5132_v40, %v7699_v31  ;;  %v5135_v63 = vadd.f32 %v5134_v37, %v5133_v26  ;;  %v5196_v34 = vadd.f32 %v5195_v17, %v5194_v38  ;;  %v5197_v16 = vpop.f32.mrb[58].mxu0 }
 0x170   :  { %v5198_v43 = vpop.f32.mrb[59].mxu0 }
 0x171   :  { %v3953_v45 = vadd.f32 %v5135_v63, %v7703_v53  ;;  %v7768_v33 = vadd.f32 %v5196_v34, %v3950_v19  ;;  %v5199_v0 = vadd.f32 %v5198_v43, %v5197_v16 }
 0x173   :  { %v5136_v9 = vpop.f32.mrb[60].mxu1  ;;  %v7770_v60 = vadd.f32 %v5199_v0, %v3953_v45 }
 0x174   :  { %v5137_v55 = vpop.f32.mrb[61].mxu1 }
 0x175   :  { %v5138_v39 = vadd.f32 %v5137_v55, %v5136_v9  ;;  %v5139_v48 = vpop.f32.mrb[62].mxu1  ;;  %v5200_v3 = vpop.f32.mrb[60].mxu0 }
 0x176   :  { %v5140_v62 = vpop.f32.mrb[63].mxu1  ;;  %v5201_v46 = vpop.f32.mrb[61].mxu0 }
 0x177   :  { %v3958_v31 = vadd.f32 %v5138_v39, %v7715_v35  ;;  %v5141_v41 = vadd.f32 %v5140_v62, %v5139_v48  ;;  %v5202_v25 = vadd.f32 %v5201_v46, %v5200_v3  ;;  %v5203_v24 = vpop.f32.mrb[62].mxu0 }
 0x178   :  { %v5204_v6 = vpop.f32.mrb[63].mxu0 }
 0x179   :  { %v3961_v53 = vadd.f32 %v5141_v41, %v7721_v27  ;;  %v7774_v44 = vadd.f32 %v5202_v25, %v3958_v31  ;;  %v5205_v11 = vadd.f32 %v5204_v6, %v5203_v24 }
 0x17b   :  { %v5142_v13 = vpop.f32.mrb[64].mxu1  ;;  %v7776_v23 = vadd.f32 %v5205_v11, %v3961_v53 }
 0x17c   :  { %v5143_v32 = vpop.f32.mrb[65].mxu1 }
 0x17d   :  { %v5144_v51 = vadd.f32 %v5143_v32, %v5142_v13  ;;  %v5145_v36 = vpop.f32.mrb[66].mxu1  ;;  %v5206_v18 = vpop.f32.mrb[64].mxu0 }
 0x17e   :  { %v5146_v14 = vpop.f32.mrb[67].mxu1  ;;  %v5207_v29 = vpop.f32.mrb[65].mxu0 }
 0x17f   :  { %v3966_v35 = vadd.f32 %v5144_v51, %v7726_v15  ;;  %v5147_v4 = vadd.f32 %v5146_v14, %v5145_v36  ;;  %v5208_v10 = vadd.f32 %v5207_v29, %v5206_v18  ;;  %v5209_v12 = vpop.f32.mrb[66].mxu0 }
 0x180   :  { %v5210_v5 = vpop.f32.mrb[67].mxu0 }
 0x181   :  { %v3969_v27 = vadd.f32 %v5147_v4, %v7730_v57  ;;  %v7780_v28 = vadd.f32 %v5208_v10, %v3966_v35  ;;  %v5211_v58 = vadd.f32 %v5210_v5, %v5209_v12 }
 0x183   :  { %v5148_v52 = vpop.f32.mrb[68].mxu1  ;;  %v7782_v7 = vadd.f32 %v5211_v58, %v3969_v27 }
 0x184   :  { %v5149_v61 = vpop.f32.mrb[69].mxu1 }
 0x185   :  { %v5150_v56 = vadd.f32 %v5149_v61, %v5148_v52  ;;  %v5151_v30 = vpop.f32.mrb[70].mxu1  ;;  %v5212_v54 = vpop.f32.mrb[68].mxu0 }
 0x186   :  { %v5152_v59 = vpop.f32.mrb[71].mxu1  ;;  %v5213_v26 = vpop.f32.mrb[69].mxu0 }
 0x187   :  { %v3974_v15 = vadd.f32 %v5150_v56, %v7734_v42  ;;  %v5153_v40 = vadd.f32 %v5152_v59, %v5151_v30  ;;  %v5214_v37 = vadd.f32 %v5213_v26, %v5212_v54  ;;  %v5215_v38 = vpop.f32.mrb[70].mxu0 }
 0x188   :  { %v5216_v19 = vpop.f32.mrb[71].mxu0 }
 0x189   :  { %v3977_v57 = vadd.f32 %v5153_v40, %v7738_v8  ;;  %v7786_v63 = vadd.f32 %v5214_v37, %v3974_v15  ;;  %v5217_v17 = vadd.f32 %v5216_v19, %v5215_v38 }
 0x18b   :  { %v5154_v34 = vpop.f32.mrb[72].mxu1  ;;  %v7788_v45 = vadd.f32 %v5217_v17, %v3977_v57 }
 0x18c   :  { %v5155_v16 = vpop.f32.mrb[73].mxu1 }
 0x18d   :  { %v5156_v43 = vadd.f32 %v5155_v16, %v5154_v34  ;;  %v5157_v0 = vpop.f32.mrb[74].mxu1  ;;  %v5218_v55 = vpop.f32.mrb[72].mxu0 }
 0x18e   :  { %v5158_v9 = vpop.f32.mrb[75].mxu1  ;;  %v5219_v48 = vpop.f32.mrb[73].mxu0 }
 0x18f   :  { %v3982_v42 = vadd.f32 %v5156_v43, %v7742_v22  ;;  %v5159_v39 = vadd.f32 %v5158_v9, %v5157_v0  ;;  %v5220_v62 = vadd.f32 %v5219_v48, %v5218_v55  ;;  %v5221_v3 = vpop.f32.mrb[74].mxu0 }
 0x190   :  { %v5222_v31 = vpop.f32.mrb[75].mxu0 }
 0x191   :  { %v3985_v8 = vadd.f32 %v5159_v39, %v7746_v20  ;;  %v7792_v41 = vadd.f32 %v5220_v62, %v3982_v42  ;;  %v5223_v46 = vadd.f32 %v5222_v31, %v5221_v3 }
 0x193   :  { %v5160_v25 = vpop.f32.mrb[76].mxu1  ;;  %v7794_v53 = vadd.f32 %v5223_v46, %v3985_v8 }
 0x194   :  { %v5161_v24 = vpop.f32.mrb[77].mxu1 }
 0x195   :  { %v5162_v6 = vadd.f32 %v5161_v24, %v5160_v25  ;;  %v5163_v11 = vpop.f32.mrb[78].mxu1  ;;  %v5224_v32 = vpop.f32.mrb[76].mxu0 }
 0x196   :  { %v5164_v13 = vpop.f32.mrb[79].mxu1  ;;  %v5225_v36 = vpop.f32.mrb[77].mxu0 }
 0x197   :  { %v3990_v22 = vadd.f32 %v5162_v6, %v7750_v1  ;;  %v5165_v51 = vadd.f32 %v5164_v13, %v5163_v11  ;;  %v5226_v14 = vadd.f32 %v5225_v36, %v5224_v32  ;;  %v5227_v18 = vpop.f32.mrb[78].mxu0 }
 0x198   :  { %v5228_v35 = vpop.f32.mrb[79].mxu0 }
 0x199   :  { %v3993_v20 = vadd.f32 %v5165_v51, %v7752_v50  ;;  %v7798_v4 = vadd.f32 %v5226_v14, %v3990_v22  ;;  %v5229_v29 = vadd.f32 %v5228_v35, %v5227_v18 }
 0x19b   :  { %v5246_v10 = vpop.f32.mrb[80].mxu1  ;;  %v7800_v27 = vadd.f32 %v5229_v29, %v3993_v20 }
 0x19c   :  { %v5247_v12 = vpop.f32.mrb[81].mxu1 }
 0x19d   :  { %v5248_v5 = vadd.f32 %v5247_v12, %v5246_v10  ;;  %v5249_v58 = vpop.f32.mrb[82].mxu1  ;;  %v5310_v61 = vpop.f32.mrb[80].mxu0 }
 0x19e   :  { %v5250_v52 = vpop.f32.mrb[83].mxu1  ;;  %v5311_v30 = vpop.f32.mrb[81].mxu0 }
 0x19f   :  { %v4128_v1 = vadd.f32 %v5248_v5, %v7756_v47  ;;  %v5251_v56 = vadd.f32 %v5250_v52, %v5249_v58  ;;  %v5312_v59 = vadd.f32 %v5311_v30, %v5310_v61  ;;  %v5313_v54 = vpop.f32.mrb[82].mxu0 }
 0x1a0   :  { %v5314_v15 = vpop.f32.mrb[83].mxu0 }
 0x1a1   :  { %v4131_v50 = vadd.f32 %v5251_v56, %v7758_v2  ;;  %v7804_v40 = vadd.f32 %v5312_v59, %v4128_v1  ;;  %v5315_v26 = vadd.f32 %v5314_v15, %v5313_v54 }
 0x1a3   :  { %v5252_v37 = vpop.f32.mrb[84].mxu1  ;;  %v7806_v57 = vadd.f32 %v5315_v26, %v4131_v50 }
 0x1a4   :  { %v5253_v38 = vpop.f32.mrb[85].mxu1 }
 0x1a5   :  { %v5254_v19 = vadd.f32 %v5253_v38, %v5252_v37  ;;  %v5255_v17 = vpop.f32.mrb[86].mxu1  ;;  %v5316_v16 = vpop.f32.mrb[84].mxu0 }
 0x1a6   :  { %v5256_v34 = vpop.f32.mrb[87].mxu1  ;;  %v5317_v0 = vpop.f32.mrb[85].mxu0 }
 0x1a7   :  { %v4136_v47 = vadd.f32 %v5254_v19, %v7762_v21  ;;  %v5257_v43 = vadd.f32 %v5256_v34, %v5255_v17  ;;  %v5318_v9 = vadd.f32 %v5317_v0, %v5316_v16  ;;  %v5319_v55 = vpop.f32.mrb[86].mxu0 }
 0x1a8   :  { %v5320_v42 = vpop.f32.mrb[87].mxu0 }
 0x1a9   :  { %v4139_v2 = vadd.f32 %v5257_v43, %v7764_v49  ;;  %v7810_v39 = vadd.f32 %v5318_v9, %v4136_v47  ;;  %v5321_v48 = vadd.f32 %v5320_v42, %v5319_v55 }
 0x1ab   :  { %v5258_v62 = vpop.f32.mrb[88].mxu1  ;;  %v7812_v8 = vadd.f32 %v5321_v48, %v4139_v2 }
 0x1ac   :  { %v5259_v3 = vpop.f32.mrb[89].mxu1 }
 0x1ad   :  { %v5260_v31 = vadd.f32 %v5259_v3, %v5258_v62  ;;  %v5261_v46 = vpop.f32.mrb[90].mxu1  ;;  %v5322_v24 = vpop.f32.mrb[88].mxu0 }
 0x1ae   :  { %v5262_v25 = vpop.f32.mrb[91].mxu1  ;;  %v5323_v11 = vpop.f32.mrb[89].mxu0 }
 0x1af   :  { %v4144_v21 = vadd.f32 %v5260_v31, %v7768_v33  ;;  %v5263_v6 = vadd.f32 %v5262_v25, %v5261_v46  ;;  %v5324_v13 = vadd.f32 %v5323_v11, %v5322_v24  ;;  %v5325_v32 = vpop.f32.mrb[90].mxu0 }
 0x1b0   :  { %v5326_v22 = vpop.f32.mrb[91].mxu0 }
 0x1b1   :  { %v4147_v49 = vadd.f32 %v5263_v6, %v7770_v60  ;;  %v7816_v51 = vadd.f32 %v5324_v13, %v4144_v21  ;;  %v5327_v36 = vadd.f32 %v5326_v22, %v5325_v32 }
 0x1b3   :  { %v5264_v14 = vpop.f32.mrb[92].mxu1  ;;  %v7818_v20 = vadd.f32 %v5327_v36, %v4147_v49 }
 0x1b4   :  { %v5265_v18 = vpop.f32.mrb[93].mxu1 }
 0x1b5   :  { %v5266_v35 = vadd.f32 %v5265_v18, %v5264_v14  ;;  %v5267_v29 = vpop.f32.mrb[94].mxu1  ;;  %v5328_v12 = vpop.f32.mrb[92].mxu0 }
 0x1b6   :  { %v5268_v10 = vpop.f32.mrb[95].mxu1  ;;  %v5329_v58 = vpop.f32.mrb[93].mxu0 }
 0x1b7   :  { %v4152_v33 = vadd.f32 %v5266_v35, %v7774_v44  ;;  %v5269_v5 = vadd.f32 %v5268_v10, %v5267_v29  ;;  %v5330_v52 = vadd.f32 %v5329_v58, %v5328_v12  ;;  %v5331_v61 = vpop.f32.mrb[94].mxu0 }
 0x1b8   :  { %v5332_v1 = vpop.f32.mrb[95].mxu0 }
 0x1b9   :  { %v4155_v60 = vadd.f32 %v5269_v5, %v7776_v23  ;;  %v7822_v56 = vadd.f32 %v5330_v52, %v4152_v33  ;;  %v5333_v30 = vadd.f32 %v5332_v1, %v5331_v61 }
 0x1bb   :  { %v5270_v59 = vpop.f32.mrb[96].mxu1  ;;  %v7824_v50 = vadd.f32 %v5333_v30, %v4155_v60 }
 0x1bc   :  { %v5271_v54 = vpop.f32.mrb[97].mxu1 }
 0x1bd   :  { %v5272_v15 = vadd.f32 %v5271_v54, %v5270_v59  ;;  %v5273_v26 = vpop.f32.mrb[98].mxu1  ;;  %v5334_v38 = vpop.f32.mrb[96].mxu0 }
 0x1be   :  { %v5274_v37 = vpop.f32.mrb[99].mxu1  ;;  %v5335_v17 = vpop.f32.mrb[97].mxu0 }
 0x1bf   :  { %v4160_v44 = vadd.f32 %v5272_v15, %v7780_v28  ;;  %v5275_v19 = vadd.f32 %v5274_v37, %v5273_v26  ;;  %v5336_v34 = vadd.f32 %v5335_v17, %v5334_v38  ;;  %v5337_v16 = vpop.f32.mrb[98].mxu0 }
 0x1c0   :  { %v5338_v47 = vpop.f32.mrb[99].mxu0 }
 0x1c1   :  { %v4163_v23 = vadd.f32 %v5275_v19, %v7782_v7  ;;  %v7828_v43 = vadd.f32 %v5336_v34, %v4160_v44  ;;  %v5339_v0 = vadd.f32 %v5338_v47, %v5337_v16 }
 0x1c3   :  { %v5276_v9 = vpop.f32.mrb[100].mxu1  ;;  %v7830_v2 = vadd.f32 %v5339_v0, %v4163_v23 }
 0x1c4   :  { %v5277_v55 = vpop.f32.mrb[101].mxu1 }
 0x1c5   :  { %v5278_v42 = vadd.f32 %v5277_v55, %v5276_v9  ;;  %v5279_v48 = vpop.f32.mrb[102].mxu1  ;;  %v5340_v3 = vpop.f32.mrb[100].mxu0 }
 0x1c6   :  { %v5280_v62 = vpop.f32.mrb[103].mxu1  ;;  %v5341_v46 = vpop.f32.mrb[101].mxu0 }
 0x1c7   :  { %v4168_v28 = vadd.f32 %v5278_v42, %v7786_v63  ;;  %v5281_v31 = vadd.f32 %v5280_v62, %v5279_v48  ;;  %v5342_v25 = vadd.f32 %v5341_v46, %v5340_v3  ;;  %v5343_v24 = vpop.f32.mrb[102].mxu0 }
 0x1c8   :  { %v5344_v21 = vpop.f32.mrb[103].mxu0 }
 0x1c9   :  { %v4171_v7 = vadd.f32 %v5281_v31, %v7788_v45  ;;  %v7834_v6 = vadd.f32 %v5342_v25, %v4168_v28  ;;  %v5345_v11 = vadd.f32 %v5344_v21, %v5343_v24 }
 0x1cb   :  { %v5282_v13 = vpop.f32.mrb[104].mxu1  ;;  %v7836_v49 = vadd.f32 %v5345_v11, %v4171_v7 }
 0x1cc   :  { %v5283_v32 = vpop.f32.mrb[105].mxu1 }
 0x1cd   :  { %v5284_v22 = vadd.f32 %v5283_v32, %v5282_v13  ;;  %v5285_v36 = vpop.f32.mrb[106].mxu1  ;;  %v5346_v18 = vpop.f32.mrb[104].mxu0 }
 0x1ce   :  { %v5286_v14 = vpop.f32.mrb[107].mxu1  ;;  %v5347_v29 = vpop.f32.mrb[105].mxu0 }
 0x1cf   :  { %v4176_v63 = vadd.f32 %v5284_v22, %v7792_v41  ;;  %v5287_v35 = vadd.f32 %v5286_v14, %v5285_v36  ;;  %v5348_v10 = vadd.f32 %v5347_v29, %v5346_v18  ;;  %v5349_v12 = vpop.f32.mrb[106].mxu0 }
 0x1d0   :  { %v5350_v33 = vpop.f32.mrb[107].mxu0 }
 0x1d1   :  { %v4179_v45 = vadd.f32 %v5287_v35, %v7794_v53  ;;  %v7840_v5 = vadd.f32 %v5348_v10, %v4176_v63  ;;  %v5351_v58 = vadd.f32 %v5350_v33, %v5349_v12 }
 0x1d3   :  { %v7842_v60 = vadd.f32 %v5351_v58, %v4179_v45 }
 0x1d5   :  { %v5288_v52 = vpop.f32.mrb[108].mxu1 }
 0x1d6   :  { %v5289_v61 = vpop.f32.mrb[109].mxu1 }
 0x1d7   :  { %v5290_v1 = vadd.f32 %v5289_v61, %v5288_v52  ;;  %v5291_v30 = vpop.f32.mrb[110].mxu1  ;;  %v5352_v54 = vpop.f32.mrb[108].mxu0 }
 0x1d8   :  { %v5292_v59 = vpop.f32.mrb[111].mxu1  ;;  %v5353_v26 = vpop.f32.mrb[109].mxu0 }
 0x1d9   :  { %v4184_v41 = vadd.f32 %v5290_v1, %v7798_v4  ;;  %v5293_v15 = vadd.f32 %v5292_v59, %v5291_v30  ;;  %v5354_v37 = vadd.f32 %v5353_v26, %v5352_v54  ;;  %v5355_v38 = vpop.f32.mrb[110].mxu0 }
 0x1da   :  { %v5356_v44 = vpop.f32.mrb[111].mxu0 }
 0x1db   :  { %v4187_v53 = vadd.f32 %v5293_v15, %v7800_v27  ;;  %v7846_v19 = vadd.f32 %v5354_v37, %v4184_v41  ;;  %v5357_v17 = vadd.f32 %v5356_v44, %v5355_v38 }
 0x1dd   :  { %v5374_v34 = vpop.f32.mrb[112].mxu1  ;;  %v7848_v23 = vadd.f32 %v5357_v17, %v4187_v53 }
 0x1de   :  { %v5375_v16 = vpop.f32.mrb[113].mxu1 }
 0x1df   :  { %v5376_v47 = vadd.f32 %v5375_v16, %v5374_v34  ;;  %v5377_v0 = vpop.f32.mrb[114].mxu1  ;;  %v5438_v55 = vpop.f32.mrb[112].mxu0 }
 0x1e0   :  { %v5378_v9 = vpop.f32.mrb[115].mxu1  ;;  %v5439_v48 = vpop.f32.mrb[113].mxu0 }
 0x1e1   :  { %v4322_v4 = vadd.f32 %v5376_v47, %v7804_v40  ;;  %v5379_v42 = vadd.f32 %v5378_v9, %v5377_v0  ;;  %v5440_v62 = vadd.f32 %v5439_v48, %v5438_v55  ;;  %v5441_v3 = vpop.f32.mrb[114].mxu0 }
 0x1e2   :  { %v5442_v28 = vpop.f32.mrb[115].mxu0 }
 0x1e3   :  { %v4325_v27 = vadd.f32 %v5379_v42, %v7806_v57  ;;  %v4419_v31 = vadd.f32 %v5440_v62, %v4322_v4  ;;  %v5443_v46 = vadd.f32 %v5442_v28, %v5441_v3 }
 0x1e5   :  { %v5380_v25 = vpop.f32.mrb[116].mxu1  ;;  %v4481_v7 = vmax.f32 %v4419_v31, 0.0  ;;  %v4422_v21 = vadd.f32 %v5443_v46, %v4325_v27 }
 0x1e6   :  { %v5381_v24 = vpop.f32.mrb[117].mxu1 }
 0x1e7   :  { %v5382_v11 = vadd.f32 %v5381_v24, %v5380_v25  ;;  %v5383_v13 = vpop.f32.mrb[118].mxu1  ;;  %v4497_v22 = vpack.c.bf16 %v4481_v7, %v4481_v7  ;;  %v4482_v36 = vmax.f32 %v4422_v21, 0.0  ;;  %v5444_v40 = vpop.f32.mrb[116].mxu0 }
 0x1e8   :  { %v5384_v32 = vpop.f32.mrb[119].mxu1  ;;  %v5445_v63 = vpop.f32.mrb[117].mxu0 }
 0x1e9   :  { %v4330_v14 = vadd.f32 %v5382_v11, %v7810_v39  ;;  %v5385_v18 = vadd.f32 %v5384_v32, %v5383_v13  ;;  %4514 = vst.msk [vmem:[%s7933_s3] sm:$0xf] %vm4513_vm8, %v4497_v22  ;;  %v4498_v57 = vpack.c.bf16 %v4482_v36, %v4482_v36  ;;  %v5446_v35 = vadd.f32 %v5445_v63, %v5444_v40  ;;  %v5447_v29 = vpop.f32.mrb[118].mxu0 }
 0x1ea   :  { %v5448_v12 = vpop.f32.mrb[119].mxu0 }
 0x1eb   :  { %v4333_v10 = vadd.f32 %v5385_v18, %v7812_v8  ;;  %4515 = vst.msk [vmem:[%s7933_s3 + $0x4] sm:$0xf] %vm4513_vm8, %v4498_v57  ;;  %v4427_v45 = vadd.f32 %v5446_v35, %v4330_v14  ;;  %v5449_v39 = vadd.f32 %v5448_v12, %v5447_v29 }
 0x1ed   :  { %v5386_v33 = vpop.f32.mrb[120].mxu1  ;;  %v4483_v52 = vmax.f32 %v4427_v45, 0.0  ;;  %v4430_v61 = vadd.f32 %v5449_v39, %v4333_v10 }
 0x1ee   :  { %v5387_v58 = vpop.f32.mrb[121].mxu1 }
 0x1ef   :  { %v5388_v1 = vadd.f32 %v5387_v58, %v5386_v33  ;;  %v5389_v30 = vpop.f32.mrb[122].mxu1  ;;  %v4499_v54 = vpack.c.bf16 %v4483_v52, %v4483_v52  ;;  %v4484_v41 = vmax.f32 %v4430_v61, 0.0  ;;  %v5450_v15 = vpop.f32.mrb[120].mxu0 }
 0x1f0   :  { %v5390_v59 = vpop.f32.mrb[123].mxu1  ;;  %v5451_v37 = vpop.f32.mrb[121].mxu0 }
 0x1f1   :  { %v4338_v8 = vadd.f32 %v5388_v1, %v7816_v51  ;;  %v5391_v26 = vadd.f32 %v5390_v59, %v5389_v30  ;;  %4516 = vst.msk [vmem:[%s7933_s3 + $0x8] sm:$0xf] %vm4513_vm8, %v4499_v54  ;;  %v4500_v38 = vpack.c.bf16 %v4484_v41, %v4484_v41  ;;  %v5452_v53 = vadd.f32 %v5451_v37, %v5450_v15  ;;  %v5453_v44 = vpop.f32.mrb[122].mxu0 }
 0x1f2   :  { %v5454_v34 = vpop.f32.mrb[123].mxu0 }
 0x1f3   :  { %v4341_v17 = vadd.f32 %v5391_v26, %v7818_v20  ;;  %4517 = vst.msk [vmem:[%s7933_s3 + $0xc] sm:$0xf] %vm4513_vm8, %v4500_v38  ;;  %v4435_v16 = vadd.f32 %v5452_v53, %v4338_v8  ;;  %v5455_v51 = vadd.f32 %v5454_v34, %v5453_v44 }
 0x1f5   :  { %v5392_v47 = vpop.f32.mrb[124].mxu1  ;;  %v4485_v9 = vmax.f32 %v4435_v16, 0.0  ;;  %v4438_v55 = vadd.f32 %v5455_v51, %v4341_v17 }
 0x1f6   :  { %v5393_v0 = vpop.f32.mrb[125].mxu1 }
 0x1f7   :  { %v5394_v4 = vadd.f32 %v5393_v0, %v5392_v47  ;;  %v5395_v42 = vpop.f32.mrb[126].mxu1  ;;  %v4501_v62 = vpack.c.bf16 %v4485_v9, %v4485_v9  ;;  %v4486_v3 = vmax.f32 %v4438_v55, 0.0  ;;  %v5456_v27 = vpop.f32.mrb[124].mxu0 }
 0x1f8   :  { %v5396_v48 = vpop.f32.mrb[127].mxu1  ;;  %v5457_v31 = vpop.f32.mrb[125].mxu0 }
 0x1f9   :  { %v4346_v20 = vadd.f32 %v5394_v4, %v7822_v56  ;;  %v5397_v28 = vadd.f32 %v5396_v48, %v5395_v42  ;;  %4518 = vst.msk [vmem:[%s7933_s3 + $0x10] sm:$0xf] %vm4513_vm8, %v4501_v62  ;;  %v4502_v46 = vpack.c.bf16 %v4486_v3, %v4486_v3  ;;  %v5458_v25 = vadd.f32 %v5457_v31, %v5456_v27  ;;  %v5459_v24 = vpop.f32.mrb[126].mxu0 }
 0x1fa   :  { %v5460_v21 = vpop.f32.mrb[127].mxu0 }
 0x1fb   :  { %v4349_v7 = vadd.f32 %v5397_v28, %v7824_v50  ;;  %4519 = vst.msk [vmem:[%s7933_s3 + $0x14] sm:$0xf] %vm4513_vm8, %v4502_v46  ;;  %v4443_v11 = vadd.f32 %v5458_v25, %v4346_v20  ;;  %v5461_v56 = vadd.f32 %v5460_v21, %v5459_v24 }
 0x1fd   :  { %v5398_v13 = vpop.f32.mrb[128].mxu1  ;;  %v4487_v22 = vmax.f32 %v4443_v11, 0.0  ;;  %v4446_v36 = vadd.f32 %v5461_v56, %v4349_v7 }
 0x1fe   :  { %v5399_v32 = vpop.f32.mrb[129].mxu1 }
 0x1ff   :  { %v5400_v40 = vadd.f32 %v5399_v32, %v5398_v13  ;;  %v5401_v14 = vpop.f32.mrb[130].mxu1  ;;  %v4503_v63 = vpack.c.bf16 %v4487_v22, %v4487_v22  ;;  %v4488_v57 = vmax.f32 %v4446_v36, 0.0  ;;  %v5462_v35 = vpop.f32.mrb[128].mxu0 }
 0x200   :  { %v5402_v18 = vpop.f32.mrb[131].mxu1  ;;  %v5463_v10 = vpop.f32.mrb[129].mxu0 }
 0x201   :  { %v4354_v50 = vadd.f32 %v5400_v40, %v7828_v43  ;;  %v5403_v29 = vadd.f32 %v5402_v18, %v5401_v14  ;;  %4520 = vst.msk [vmem:[%s7933_s3 + $0x18] sm:$0xf] %vm4513_vm8, %v4503_v63  ;;  %v4504_v12 = vpack.c.bf16 %v4488_v57, %v4488_v57  ;;  %v5464_v45 = vadd.f32 %v5463_v10, %v5462_v35  ;;  %v5465_v39 = vpop.f32.mrb[130].mxu0 }
 0x202   :  { %v5466_v58 = vpop.f32.mrb[131].mxu0 }
 0x203   :  { %v4357_v33 = vadd.f32 %v5403_v29, %v7830_v2  ;;  %4521 = vst.msk [vmem:[%s7933_s3 + $0x1c] sm:$0xf] %vm4513_vm8, %v4504_v12  ;;  %v4451_v52 = vadd.f32 %v5464_v45, %v4354_v50  ;;  %v5467_v43 = vadd.f32 %v5466_v58, %v5465_v39 }
 0x205   :  { %v5404_v61 = vpop.f32.mrb[132].mxu1  ;;  %v4489_v30 = vmax.f32 %v4451_v52, 0.0  ;;  %v4454_v59 = vadd.f32 %v5467_v43, %v4357_v33 }
 0x206   :  { %v5405_v1 = vpop.f32.mrb[133].mxu1 }
 0x207   :  { %v5406_v54 = vadd.f32 %v5405_v1, %v5404_v61  ;;  %v5407_v41 = vpop.f32.mrb[134].mxu1  ;;  %v4505_v8 = vpack.c.bf16 %v4489_v30, %v4489_v30  ;;  %v4490_v26 = vmax.f32 %v4454_v59, 0.0  ;;  %v5468_v37 = vpop.f32.mrb[132].mxu0 }
 0x208   :  { %v5408_v15 = vpop.f32.mrb[135].mxu1  ;;  %v5469_v53 = vpop.f32.mrb[133].mxu0 }
 0x209   :  { %v4362_v2 = vadd.f32 %v5406_v54, %v7834_v6  ;;  %v5409_v38 = vadd.f32 %v5408_v15, %v5407_v41  ;;  %4522 = vst.msk [vmem:[%s7933_s3 + $0x20] sm:$0xf] %vm4513_vm8, %v4505_v8  ;;  %v4506_v44 = vpack.c.bf16 %v4490_v26, %v4490_v26  ;;  %v5470_v17 = vadd.f32 %v5469_v53, %v5468_v37  ;;  %v5471_v34 = vpop.f32.mrb[134].mxu0 }
 0x20a   :  { %v5472_v51 = vpop.f32.mrb[135].mxu0 }
 0x20b   :  { %v4365_v16 = vadd.f32 %v5409_v38, %v7836_v49  ;;  %4523 = vst.msk [vmem:[%s7933_s3 + $0x24] sm:$0xf] %vm4513_vm8, %v4506_v44  ;;  %v4459_v47 = vadd.f32 %v5470_v17, %v4362_v2  ;;  %v5473_v6 = vadd.f32 %v5472_v51, %v5471_v34 }
 0x20d   :  { %v5410_v0 = vpop.f32.mrb[136].mxu1  ;;  %v4491_v55 = vmax.f32 %v4459_v47, 0.0  ;;  %v4462_v4 = vadd.f32 %v5473_v6, %v4365_v16 }
 0x20e   :  { %v5411_v9 = vpop.f32.mrb[137].mxu1 }
 0x20f   :  { %v5412_v42 = vadd.f32 %v5411_v9, %v5410_v0  ;;  %v5413_v48 = vpop.f32.mrb[138].mxu1  ;;  %v4507_v3 = vpack.c.bf16 %v4491_v55, %v4491_v55  ;;  %v4492_v27 = vmax.f32 %v4462_v4, 0.0  ;;  %v5474_v20 = vpop.f32.mrb[136].mxu0 }
 0x210   :  { %v5414_v62 = vpop.f32.mrb[139].mxu1  ;;  %v5475_v31 = vpop.f32.mrb[137].mxu0 }
 0x211   :  { %v4370_v49 = vadd.f32 %v5412_v42, %v7840_v5  ;;  %v5415_v28 = vadd.f32 %v5414_v62, %v5413_v48  ;;  %4524 = vst.msk [vmem:[%s7933_s3 + $0x28] sm:$0xf] %vm4513_vm8, %v4507_v3  ;;  %v4508_v46 = vpack.c.bf16 %v4492_v27, %v4492_v27  ;;  %v5476_v25 = vadd.f32 %v5475_v31, %v5474_v20  ;;  %v5477_v24 = vpop.f32.mrb[138].mxu0 }
 0x212   :  { %v5478_v21 = vpop.f32.mrb[139].mxu0 }
 0x213   :  { %v4373_v7 = vadd.f32 %v5415_v28, %v7842_v60  ;;  %4525 = vst.msk [vmem:[%s7933_s3 + $0x2c] sm:$0xf] %vm4513_vm8, %v4508_v46  ;;  %v4467_v11 = vadd.f32 %v5476_v25, %v4370_v49  ;;  %v5479_v5 = vadd.f32 %v5478_v21, %v5477_v24 }
 0x215   :  { %v5416_v56 = vpop.f32.mrb[140].mxu1  ;;  %v4493_v32 = vmax.f32 %v4467_v11, 0.0  ;;  %v4470_v22 = vadd.f32 %v5479_v5, %v4373_v7 }
 0x216   :  { %v5417_v13 = vpop.f32.mrb[141].mxu1 }
 0x217   :  { %v5418_v36 = vadd.f32 %v5417_v13, %v5416_v56  ;;  %v5419_v40 = vpop.f32.mrb[142].mxu1  ;;  %v4509_v18 = vpack.c.bf16 %v4493_v32, %v4493_v32  ;;  %v4494_v63 = vmax.f32 %v4470_v22, 0.0  ;;  %v5480_v57 = vpop.f32.mrb[140].mxu0 }
 0x218   :  { %v5420_v14 = vpop.f32.mrb[143].mxu1  ;;  %v5481_v50 = vpop.f32.mrb[141].mxu0 }
 0x219   :  { %v4378_v60 = vadd.f32 %v5418_v36, %v7846_v19  ;;  %v5421_v35 = vadd.f32 %v5420_v14, %v5419_v40  ;;  %4526 = vst.msk [vmem:[%s7933_s3 + $0x30] sm:$0xf] %vm4513_vm8, %v4509_v18  ;;  %v4510_v29 = vpack.c.bf16 %v4494_v63, %v4494_v63  ;;  %v5482_v10 = vadd.f32 %v5481_v50, %v5480_v57  ;;  %v5483_v12 = vpop.f32.mrb[142].mxu0 }
 0x21a   :  { %v5484_v39 = vpop.f32.mrb[143].mxu0 }
 0x21b   :  { %v4381_v45 = vadd.f32 %v5421_v35, %v7848_v23  ;;  %4527 = vst.msk [vmem:[%s7933_s3 + $0x34] sm:$0xf] %vm4513_vm8, %v4510_v29  ;;  %v4475_v33 = vadd.f32 %v5482_v10, %v4378_v60  ;;  %v5485_v19 = vadd.f32 %v5484_v39, %v5483_v12 }
 0x21d   :  { %v4495_v58 = vmax.f32 %v4475_v33, 0.0  ;;  %v4478_v52 = vadd.f32 %v5485_v19, %v4381_v45 }
 0x21f   :  { %v4511_v43 = vpack.c.bf16 %v4495_v58, %v4495_v58  ;;  %v4496_v61 = vmax.f32 %v4478_v52, 0.0 }
 0x221   :  { %4528 = vst.msk [vmem:[%s7933_s3 + $0x38] sm:$0xf] %vm4513_vm8, %v4511_v43  ;;  %v4512_v1 = vpack.c.bf16 %v4496_v61, %v4496_v61 }
 0x223   :  { %4529 = vst.msk [vmem:[%s7933_s3 + $0x3c] sm:$0xf] %vm4513_vm8, %v4512_v1 }

// kernel: face_encoder_forward.7
= control target key start
LH: loop header
LB: loop body
LE: loop exit
PB: predicated region body
PF: predicated region fallthrough
CT: control target
= control target key end

     0   :  { %v1939_v22 = vmov 1966171168   ;;  %v293_v24 = vlaneseq  ;;  %vm26_vm0 = vcmask 517120   ;;  %s2393_s1 = inlined_call_operand.vmem [shape: bf16[2048,64], index: 1, kind: input, shape index: {}]   ;;  %s2394_s0 = inlined_call_operand.vmem [shape: bf16[2,2048], index: 0, kind: input, shape index: {}]   ;;  %s2395_s2 = inlined_call_operand.vmem [shape: f32[1,64], index: 2, kind: input, shape index: {}]   ;;  %s2396_s3 = inlined_call_operand.vmem [shape: f32[2,64], index: 3, kind: output, shape index: {}]  }
   0x1   :  { %v1809_v0 = vld [vmem:[%s2393_s1 + $0x40] sm:$0xff]   ;;  %v1813_v4 = vld [vmem:[%s2393_s1 + $0x48] sm:$0xff]   ;;  %v1817_v8 = vld [vmem:[%s2393_s1 + $0x50] sm:$0xff]   ;;  %v291_v23 = vunpack.c.l.s4 %v1939_v22 }
   0x2   :  { %v1810_v1 = vld [vmem:[%s2393_s1 + $0xc0] sm:$0xff]   ;;  %1632 = vmatprep.subr.bf16.mxu0 %v1809_v0  ;;  %v1814_v5 = vld [vmem:[%s2393_s1 + $0xc8] sm:$0xff]   ;;  %v1818_v9 = vld [vmem:[%s2393_s1 + $0xd0] sm:$0xff]   ;;  %v294_v30 = vshrl.u32 %v293_v24, 7 }
   0x3   :  { %v1811_v2 = vld [vmem:[%s2393_s1] sm:$0xff]   ;;  %1654 = vmatprep.subr.bf16.mxu1 %v1810_v1  ;;  %v1815_v6 = vld [vmem:[%s2393_s1 + $0x8] sm:$0xff]   ;;  %v1819_v10 = vld [vmem:[%s2393_s1 + $0x10] sm:$0xff]   ;;  %v292_v29 = vunpack.c.0.s8 %v291_v23 }
   0x4   :  { %v1812_v3 = vld [vmem:[%s2393_s1 + $0x80] sm:$0xff]   ;;  %1633 = vmatpush3.bf16.msra.mxu0 %v1811_v2  ;;  %v1816_v7 = vld [vmem:[%s2393_s1 + $0x88] sm:$0xff]   ;;  %v1820_v11 = vld [vmem:[%s2393_s1 + $0x90] sm:$0xff]  }
   0x5   :  { %1655 = vmatpush3.bf16.msra.mxu1 %v1812_v3  ;;  %1634 = vmatprep.subr.bf16.mxu0 %v1813_v4  ;;  %v1821_v12 = vld [vmem:[%s2393_s1 + $0x58] sm:$0xff]   ;;  %v1825_v16 = vld [vmem:[%s2393_s1 + $0x60] sm:$0xff]   ;;  %v1829_v20 = vld [vmem:[%s2393_s1 + $0x68] sm:$0xff]   ;;  %v2050_v35 = vsub.s32 %v292_v29, %v294_v30 }
   0x6   :  { %1656 = vmatprep.subr.bf16.mxu1 %v1814_v5  ;;  %v1822_v13 = vld [vmem:[%s2393_s1 + $0xd8] sm:$0xff]   ;;  %v1826_v17 = vld [vmem:[%s2393_s1 + $0xe0] sm:$0xff]   ;;  %v1830_v21 = vld [vmem:[%s2393_s1 + $0xe8] sm:$0xff]  }
   0x7   :  { %v1823_v14 = vld [vmem:[%s2393_s1 + $0x18] sm:$0xff]   ;;  %v1827_v18 = vld [vmem:[%s2393_s1 + $0x20] sm:$0xff]   ;;  %v1831_v25 = vld [vmem:[%s2393_s1 + $0x28] sm:$0xff]  }
   0x8   :  { %1635 = vmatpush3.bf16.msra.mxu0 %v1815_v6  ;;  %v1824_v15 = vld [vmem:[%s2393_s1 + $0x98] sm:$0xff]   ;;  %v1828_v19 = vld [vmem:[%s2393_s1 + $0xa0] sm:$0xff]   ;;  %v1832_v26 = vld [vmem:[%s2393_s1 + $0xa8] sm:$0xff]  }
   0x9   :  { %1657 = vmatpush3.bf16.msra.mxu1 %v1816_v7  ;;  %1636 = vmatprep.subr.bf16.mxu0 %v1817_v8  ;;  %v1833_v27 = vld [vmem:[%s2393_s1 + $0x70] sm:$0xff]   ;;  %v1837_v33 = vld [vmem:[%s2393_s1 + $0x78] sm:$0xff]   ;;  %v29_v38 = vld [vmem:[%s2394_s0] sm:$0xff] }
   0xa   :  { %1658 = vmatprep.subr.bf16.mxu1 %v1818_v9  ;;  %v1834_v28 = vld [vmem:[%s2393_s1 + $0xf0] sm:$0xff]   ;;  %v1838_v34 = vld [vmem:[%s2393_s1 + $0xf8] sm:$0xff]   ;;  %v289_v39 = vcombine.high %v29_v38, %v29_v38  ;;  %v296_v40 = vrot.slane %v29_v38, %v2050_v35  ;;  %v1843_v41 = vld [vmem:[%s2393_s1 + $0x140] sm:$0xff]  }
   0xb   :  { %v1835_v31 = vld [vmem:[%s2393_s1 + $0x30] sm:$0xff]   ;;  %v1839_v36 = vld [vmem:[%s2393_s1 + $0x38] sm:$0xff]   ;;  %v1844_v42 = vld [vmem:[%s2393_s1 + $0x1c0] sm:$0xff]  }
   0xc   :  { %1637 = vmatpush3.bf16.msra.mxu0 %v1819_v10  ;;  %v1836_v32 = vld [vmem:[%s2393_s1 + $0xb0] sm:$0xff]   ;;  %v1840_v37 = vld [vmem:[%s2393_s1 + $0xb8] sm:$0xff]   ;;  %v304_v43 = vcombine.high %v296_v40, %v296_v40  ;;  %v312_v44 = vrot.slane %v296_v40, %v2050_v35  ;;  %v2070_v45 = vrot.slane %v289_v39, %v2050_v35  ;;  %v1845_v47 = vld [vmem:[%s2393_s1 + $0x100] sm:$0xff]  }
   0xd   :  { %1659 = vmatpush3.bf16.msra.mxu1 %v1820_v11  ;;  %1638 = vmatprep.subr.bf16.mxu0 %v1821_v12  ;;  %v1847_v50 = vld [vmem:[%s2393_s1 + $0x148] sm:$0xff]   ;;  %v1846_v52 = vld [vmem:[%s2393_s1 + $0x180] sm:$0xff]   ;;  %v1851_v57 = vld [vmem:[%s2393_s1 + $0x150] sm:$0xff]  }
   0xe   :  { %1660 = vmatprep.subr.bf16.mxu1 %v1822_v13  ;;  %v326_v46 = vrot.slane %v304_v43, %v2050_v35  ;;  %v305_v48 = vcombine.high %v2070_v45, %v2070_v45  ;;  %v334_v49 = vcombine.high %v312_v44, %v312_v44  ;;  %v1848_v54 = vld [vmem:[%s2393_s1 + $0x1c8] sm:$0xff]   ;;  %v1852_v59 = vld [vmem:[%s2393_s1 + $0x1d0] sm:$0xff]   ;;  %v1855_v61 = vld [vmem:[%s2393_s1 + $0x158] sm:$0xff]  }
   0xf   :  { %v1849_v55 = vld [vmem:[%s2393_s1 + $0x108] sm:$0xff]   ;;  %v1853_v60 = vld [vmem:[%s2393_s1 + $0x110] sm:$0xff]   ;;  %v1856_v63 = vld [vmem:[%s2393_s1 + $0x1d8] sm:$0xff]  }
  0x10   :  { %1639 = vmatpush3.bf16.msra.mxu0 %v1823_v14  ;;  %1203 = vmatprep.mubr.bf16.mxu0 %v326_v46  ;;  %v336_v51 = vcombine.high %v326_v46, %v326_v46  ;;  %v333_v53 = vrot.slane %v305_v48, %v2050_v35  ;;  %v1850_v58 = vld [vmem:[%s2393_s1 + $0x188] sm:$0xff]   ;;  %v1854_v62 = vld [vmem:[%s2393_s1 + $0x190] sm:$0xff]   ;;  %v1857_v0 = vld [vmem:[%s2393_s1 + $0x118] sm:$0xff]  }
  0x11   :  { %1661 = vmatpush3.bf16.msra.mxu1 %v1824_v15  ;;  %1640 = vmatprep.subr.bf16.mxu0 %v1825_v16  ;;  %v1859_v1 = vld [vmem:[%s2393_s1 + $0x160] sm:$0xff]   ;;  %v1858_v2 = vld [vmem:[%s2393_s1 + $0x198] sm:$0xff]   ;;  %v2130_v5 = vld [vmem:[%s2394_s0 + $0x8] sm:$0xff] }
  0x12   :  { %1662 = vmatprep.subr.bf16.mxu1 %v1826_v17  ;;  %1243 = vmatprep.mubr.bf16.mxu1 %v336_v51  ;;  %v337_v56 = vcombine.high %v333_v53, %v333_v53  ;;  %v1860_v3 = vld [vmem:[%s2393_s1 + $0x1e0] sm:$0xff]   ;;  %v1863_v6 = vld [vmem:[%s2393_s1 + $0x168] sm:$0xff]   ;;  %v1867_v10 = vld [vmem:[%s2393_s1 + $0x170] sm:$0xff]   ;;  %v2152_v12 = vrot.slane %v2130_v5, %v2050_v35  ;;  %v338_v46 = vcombine.high %v2130_v5, %v2130_v5 }
  0x13   :  { %v1861_v4 = vld [vmem:[%s2393_s1 + $0x120] sm:$0xff]   ;;  %v1864_v8 = vld [vmem:[%s2393_s1 + $0x1e8] sm:$0xff]   ;;  %v1868_v13 = vld [vmem:[%s2393_s1 + $0x1f0] sm:$0xff]  }
  0x14   :  { %1641 = vmatpush3.bf16.msra.mxu0 %v1827_v18  ;;  %v1862_v7 = vld [vmem:[%s2393_s1 + $0x1a0] sm:$0xff]   ;;  %v1865_v9 = vld [vmem:[%s2393_s1 + $0x128] sm:$0xff]   ;;  %v1869_v14 = vld [vmem:[%s2393_s1 + $0x130] sm:$0xff]   ;;  %v353_v17 = vcombine.high %v2152_v12, %v2152_v12 }
  0x15   :  { %1663 = vmatpush3.bf16.msra.mxu1 %v1828_v19  ;;  %1642 = vmatprep.subr.bf16.mxu0 %v1829_v20  ;;  %v1866_v11 = vld [vmem:[%s2393_s1 + $0x1a8] sm:$0xff]   ;;  %v1871_v15 = vld [vmem:[%s2393_s1 + $0x178] sm:$0xff]   ;;  %v1870_v16 = vld [vmem:[%s2393_s1 + $0x1b0] sm:$0xff]   ;;  %v319_v20 = vrot.slane %v2070_v45, %v2050_v35 }
  0x16   :  { %1664 = vmatprep.subr.bf16.mxu1 %v1830_v21  ;;  %v1872_v18 = vld [vmem:[%s2393_s1 + $0x1f8] sm:$0xff]   ;;  %v1875_v21 = vld [vmem:[%s2393_s1 + $0x240] sm:$0xff]   ;;  %v375_v23 = vrot.slane %v353_v17, %v2050_v35  ;;  %v1880_v30 = vld [vmem:[%s2393_s1 + $0x2c8] sm:$0xff]  }
  0x17   :  { %v1873_v19 = vld [vmem:[%s2393_s1 + $0x138] sm:$0xff]   ;;  %v1876_v24 = vld [vmem:[%s2393_s1 + $0x2c0] sm:$0xff]   ;;  %v1886_v38 = vld [vmem:[%s2393_s1 + $0x290] sm:$0xff]  }
  0x18   :  { %1643 = vmatpush3.bf16.msra.mxu0 %v1831_v25  ;;  %v1874_v22 = vld [vmem:[%s2393_s1 + $0x1b8] sm:$0xff]   ;;  %v1877_v25 = vld [vmem:[%s2393_s1 + $0x200] sm:$0xff]   ;;  %v385_v29 = vcombine.high %v375_v23, %v375_v23  ;;  %v1895_v45 = vld [vmem:[%s2393_s1 + $0x268] sm:$0xff]  }
  0x19   :  { %1665 = vmatpush3.bf16.msra.mxu1 %v1832_v26  ;;  %1644 = vmatprep.subr.bf16.mxu0 %v1833_v27  ;;  %v335_v26 = vcombine.high %v319_v20, %v319_v20  ;;  %v1879_v27 = vld [vmem:[%s2393_s1 + $0x248] sm:$0xff]   ;;  %v1888_v39 = vld [vmem:[%s2393_s1 + $0x2d8] sm:$0xff]   ;;  %v1892_v43 = vld [vmem:[%s2393_s1 + $0x2e0] sm:$0xff]  }
  0x1a   :  { %1666 = vmatprep.subr.bf16.mxu1 %v1834_v28  ;;  %v1878_v28 = vld [vmem:[%s2393_s1 + $0x280] sm:$0xff]   ;;  %v1889_v40 = vld [vmem:[%s2393_s1 + $0x218] sm:$0xff]   ;;  %v1896_v48 = vld [vmem:[%s2393_s1 + $0x2e8] sm:$0xff]  }
  0x1b   :  { %v1898_v51 = vld [vmem:[%s2393_s1 + $0x2a8] sm:$0xff]   ;;  %v1922_v17 = vld [vmem:[%s2393_s1 + $0x398] sm:$0xff]  }
  0x1c   :  { %1645 = vmatpush3.bf16.msra.mxu0 %v1835_v31  ;;  %v1881_v31 = vld [vmem:[%s2393_s1 + $0x208] sm:$0xff]  }
  0x1d   :  { %1667 = vmatpush3.bf16.msra.mxu1 %v1836_v32  ;;  %1646 = vmatprep.subr.bf16.mxu0 %v1837_v33  ;;  %v1883_v32 = vld [vmem:[%s2393_s1 + $0x250] sm:$0xff]   ;;  %v1882_v33 = vld [vmem:[%s2393_s1 + $0x288] sm:$0xff]  }
  0x1e   :  { %1668 = vmatprep.subr.bf16.mxu1 %v1838_v34  ;;  %v1884_v34 = vld [vmem:[%s2393_s1 + $0x2d0] sm:$0xff]  }
  0x20   :  { %1647 = vmatpush3.bf16.msra.mxu0 %v1839_v36  ;;  %v1885_v36 = vld [vmem:[%s2393_s1 + $0x210] sm:$0xff]  }
  0x21   :  { %1669 = vmatpush3.bf16.msra.mxu1 %v1840_v37  ;;  %1676 = vmatprep.subr.bf16.mxu0 %v1843_v41  ;;  %v1887_v37 = vld [vmem:[%s2393_s1 + $0x258] sm:$0xff]   ;;  %v1891_v41 = vld [vmem:[%s2393_s1 + $0x260] sm:$0xff]  }
  0x22   :  { %1698 = vmatprep.subr.bf16.mxu1 %v1844_v42  ;;  %v1890_v42 = vld [vmem:[%s2393_s1 + $0x298] sm:$0xff]  }
  0x23   :  { %1204 = vmatmul.mubr.bf16.vlgmr.msra.gmra.mrb[0].mxu0 %v312_v44  ;;  %v1893_v44 = vld [vmem:[%s2393_s1 + $0x220] sm:$0xff]  }
  0x24   :  { %1677 = vmatpush3.bf16.msra.mxu0 %v1845_v47  ;;  %1244 = vmatmul.mubr.bf16.vlgmr.msra.gmra.mrb[0].mxu1 %v334_v49  ;;  %v1894_v47 = vld [vmem:[%s2393_s1 + $0x2a0] sm:$0xff]   ;;  %v1897_v49 = vld [vmem:[%s2393_s1 + $0x228] sm:$0xff]  }
  0x25   :  { %1678 = vmatprep.subr.bf16.mxu0 %v1847_v50  ;;  %1699 = vmatpush3.bf16.msra.mxu1 %v1846_v52  ;;  %v1899_v50 = vld [vmem:[%s2393_s1 + $0x270] sm:$0xff]   ;;  %v2258_v52 = vrot.slane %v338_v46, %v2050_v35 }
  0x26   :  { %1283 = vmatprep.mubr.bf16.mxu0 %v333_v53  ;;  %1700 = vmatprep.subr.bf16.mxu1 %v1848_v54  ;;  %v1900_v53 = vld [vmem:[%s2393_s1 + $0x2f0] sm:$0xff]  }
  0x27   :  { %1323 = vmatprep.mubr.bf16.mxu1 %v337_v56  ;;  %v1901_v54 = vld [vmem:[%s2393_s1 + $0x230] sm:$0xff]  }
  0x28   :  { %1679 = vmatpush3.bf16.msra.mxu0 %v1849_v55  ;;  %v1903_v55 = vld [vmem:[%s2393_s1 + $0x278] sm:$0xff]   ;;  %v1902_v56 = vld [vmem:[%s2393_s1 + $0x2b0] sm:$0xff]  }
  0x29   :  { %1680 = vmatprep.subr.bf16.mxu0 %v1851_v57  ;;  %1701 = vmatpush3.bf16.msra.mxu1 %v1850_v58  ;;  %v354_v57 = vcombine.high %v2258_v52, %v2258_v52  ;;  %v1904_v58 = vld [vmem:[%s2393_s1 + $0x2f8] sm:$0xff]  }
  0x2a   :  { %1702 = vmatprep.subr.bf16.mxu1 %v1852_v59  ;;  %v1905_v59 = vld [vmem:[%s2393_s1 + $0x238] sm:$0xff]  }
  0x2c   :  { %1681 = vmatpush3.bf16.msra.mxu0 %v1853_v60  ;;  %v361_v60 = vrot.slane %v2152_v12, %v2050_v35  ;;  %v1919_v12 = vld [vmem:[%s2393_s1 + $0x358] sm:$0xff]  }
  0x2d   :  { %1682 = vmatprep.subr.bf16.mxu0 %v1855_v61  ;;  %1703 = vmatpush3.bf16.msra.mxu1 %v1854_v62  ;;  %v1907_v61 = vld [vmem:[%s2393_s1 + $0x340] sm:$0xff]   ;;  %v1906_v62 = vld [vmem:[%s2393_s1 + $0x2b8] sm:$0xff]  }
  0x2e   :  { %1704 = vmatprep.subr.bf16.mxu1 %v1856_v63  ;;  %v382_v63 = vrot.slane %v354_v57, %v2050_v35 }
  0x30   :  { %1683 = vmatpush3.bf16.msra.mxu0 %v1857_v0  ;;  %v1908_v0 = vld [vmem:[%s2393_s1 + $0x3c0] sm:$0xff]   ;;  %v386_v5 = vcombine.high %v382_v63, %v382_v63 }
  0x31   :  { %1684 = vmatprep.subr.bf16.mxu0 %v1859_v1  ;;  %1705 = vmatpush3.bf16.msra.mxu1 %v1858_v2  ;;  %v1909_v1 = vld [vmem:[%s2393_s1 + $0x300] sm:$0xff]   ;;  %v383_v2 = vcombine.high %v361_v60, %v361_v60 }
  0x32   :  { %1706 = vmatprep.subr.bf16.mxu1 %v1860_v3  ;;  %v1911_v3 = vld [vmem:[%s2393_s1 + $0x348] sm:$0xff]  }
  0x34   :  { %1685 = vmatpush3.bf16.msra.mxu0 %v1861_v4  ;;  %v1910_v4 = vld [vmem:[%s2393_s1 + $0x380] sm:$0xff]  }
  0x35   :  { %1686 = vmatprep.subr.bf16.mxu0 %v1863_v6  ;;  %1707 = vmatpush3.bf16.msra.mxu1 %v1862_v7  ;;  %v1912_v6 = vld [vmem:[%s2393_s1 + $0x3c8] sm:$0xff]  }
  0x36   :  { %1708 = vmatprep.subr.bf16.mxu1 %v1864_v8  ;;  %v1913_v7 = vld [vmem:[%s2393_s1 + $0x308] sm:$0xff]   ;;  %v1915_v8 = vld [vmem:[%s2393_s1 + $0x350] sm:$0xff]  }
  0x38   :  { %1687 = vmatpush3.bf16.msra.mxu0 %v1865_v9  ;;  %v1914_v9 = vld [vmem:[%s2393_s1 + $0x388] sm:$0xff]  }
  0x39   :  { %1688 = vmatprep.subr.bf16.mxu0 %v1867_v10  ;;  %1709 = vmatpush3.bf16.msra.mxu1 %v1866_v11  ;;  %v1916_v10 = vld [vmem:[%s2393_s1 + $0x3d0] sm:$0xff]  }
  0x3a   :  { %1710 = vmatprep.subr.bf16.mxu1 %v1868_v13  ;;  %v1917_v11 = vld [vmem:[%s2393_s1 + $0x310] sm:$0xff]  }
  0x3b   :  { %v1918_v13 = vld [vmem:[%s2393_s1 + $0x390] sm:$0xff]  }
  0x3c   :  { %1689 = vmatpush3.bf16.msra.mxu0 %v1869_v14  ;;  %v1920_v14 = vld [vmem:[%s2393_s1 + $0x3d8] sm:$0xff]  }
  0x3d   :  { %1690 = vmatprep.subr.bf16.mxu0 %v1871_v15  ;;  %1711 = vmatpush3.bf16.msra.mxu1 %v1870_v16  ;;  %v1921_v15 = vld [vmem:[%s2393_s1 + $0x318] sm:$0xff]   ;;  %v1923_v16 = vld [vmem:[%s2393_s1 + $0x360] sm:$0xff]  }
  0x3e   :  { %1712 = vmatprep.subr.bf16.mxu1 %v1872_v18  ;;  %v1924_v18 = vld [vmem:[%s2393_s1 + $0x3e0] sm:$0xff]  }
  0x40   :  { %1691 = vmatpush3.bf16.msra.mxu0 %v1873_v19  ;;  %v1925_v19 = vld [vmem:[%s2393_s1 + $0x320] sm:$0xff]  }
  0x41   :  { %1720 = vmatprep.subr.bf16.mxu0 %v1875_v21  ;;  %1713 = vmatpush3.bf16.msra.mxu1 %v1874_v22  ;;  %v1926_v21 = vld [vmem:[%s2393_s1 + $0x3a0] sm:$0xff]   ;;  %v1928_v22 = vld [vmem:[%s2393_s1 + $0x3e8] sm:$0xff]  }
  0x42   :  { %1742 = vmatprep.subr.bf16.mxu1 %v1876_v24  ;;  %v1931_v24 = vld [vmem:[%s2393_s1 + $0x370] sm:$0xff]  }
  0x43   :  { %1284 = vmatmul.mubr.bf16.vlgmr.msra.gmra.mrb[4].mxu0 %v319_v20  ;;  %v1927_v20 = vld [vmem:[%s2393_s1 + $0x368] sm:$0xff]  }
  0x44   :  { %1721 = vmatpush3.bf16.msra.mxu0 %v1877_v25  ;;  %1363 = vmatprep.mubr.bf16.mxu0 %v375_v23  ;;  %v1929_v23 = vld [vmem:[%s2393_s1 + $0x328] sm:$0xff]  }
  0x45   :  { %1324 = vmatmul.mubr.bf16.vlgmr.msra.gmra.mrb[4].mxu1 %v335_v26  ;;  %1722 = vmatprep.subr.bf16.mxu0 %v1879_v27  ;;  %v1930_v25 = vld [vmem:[%s2393_s1 + $0x3a8] sm:$0xff]   ;;  %v1932_v26 = vld [vmem:[%s2393_s1 + $0x3f0] sm:$0xff]  }
  0x46   :  { %1743 = vmatpush3.bf16.msra.mxu1 %v1878_v28  ;;  %1403 = vmatprep.mubr.bf16.mxu1 %v385_v29  ;;  %v1933_v27 = vld [vmem:[%s2393_s1 + $0x330] sm:$0xff]   ;;  %v1935_v28 = vld [vmem:[%s2393_s1 + $0x378] sm:$0xff]  }
  0x47   :  { %1744 = vmatprep.subr.bf16.mxu1 %v1880_v30  ;;  %v1934_v29 = vld [vmem:[%s2393_s1 + $0x3b0] sm:$0xff]   ;;  %v1936_v30 = vld [vmem:[%s2393_s1 + $0x3f8] sm:$0xff]  }
  0x48   :  { %1723 = vmatpush3.bf16.msra.mxu0 %v1881_v31  ;;  %v1937_v31 = vld [vmem:[%s2393_s1 + $0x338] sm:$0xff]  }
  0x49   :  { %1724 = vmatprep.subr.bf16.mxu0 %v1883_v32  ;;  %v368_v32 = vrot.slane %v2258_v52, %v2050_v35 }
  0x4a   :  { %1745 = vmatpush3.bf16.msra.mxu1 %v1882_v33  ;;  %v1938_v33 = vld [vmem:[%s2393_s1 + $0x3b8] sm:$0xff]  }
  0x4b   :  { %1746 = vmatprep.subr.bf16.mxu1 %v1884_v34  ;;  %v384_v34 = vcombine.high %v368_v32, %v368_v32 }
  0x4c   :  { %1725 = vmatpush3.bf16.msra.mxu0 %v1885_v36  ;;  %v1503_v36 = vld [vmem:[%s2395_s2] ss:$0 sm:$0xff] }
  0x4d   :  { %1726 = vmatprep.subr.bf16.mxu0 %v1887_v37  ;;  %27 = vst.msk [vmem:[#allocation2] sm:$0x3] %vm26_vm0, %v1503_v36 }
  0x4e   :  { %1747 = vmatpush3.bf16.msra.mxu1 %v1886_v38 }
  0x4f   :  { %1748 = vmatprep.subr.bf16.mxu1 %v1888_v39 }
  0x50   :  { %1727 = vmatpush3.bf16.msra.mxu0 %v1889_v40 }
  0x51   :  { %1728 = vmatprep.subr.bf16.mxu0 %v1891_v41 }
  0x52   :  { %1749 = vmatpush3.bf16.msra.mxu1 %v1890_v42 }
  0x53   :  { %1750 = vmatprep.subr.bf16.mxu1 %v1892_v43 }
  0x54   :  { %1729 = vmatpush3.bf16.msra.mxu0 %v1893_v44 }
  0x55   :  { %1730 = vmatprep.subr.bf16.mxu0 %v1895_v45 }
  0x56   :  { %1751 = vmatpush3.bf16.msra.mxu1 %v1894_v47 }
  0x57   :  { %1752 = vmatprep.subr.bf16.mxu1 %v1896_v48 }
  0x58   :  { %1731 = vmatpush3.bf16.msra.mxu0 %v1897_v49 }
  0x59   :  { %1732 = vmatprep.subr.bf16.mxu0 %v1899_v50 }
  0x5a   :  { %1753 = vmatpush3.bf16.msra.mxu1 %v1898_v51 }
  0x5b   :  { %1754 = vmatprep.subr.bf16.mxu1 %v1900_v53 }
  0x5c   :  { %1733 = vmatpush3.bf16.msra.mxu0 %v1901_v54 }
  0x5d   :  { %1734 = vmatprep.subr.bf16.mxu0 %v1903_v55 }
  0x5e   :  { %1755 = vmatpush3.bf16.msra.mxu1 %v1902_v56 }
  0x5f   :  { %1756 = vmatprep.subr.bf16.mxu1 %v1904_v58 }
  0x60   :  { %1735 = vmatpush3.bf16.msra.mxu0 %v1905_v59 }
  0x61   :  { %1764 = vmatprep.subr.bf16.mxu0 %v1907_v61 }
  0x62   :  { %1757 = vmatpush3.bf16.msra.mxu1 %v1906_v62 }
  0x63   :  { %1364 = vmatmul.mubr.bf16.vlgmr.msra.gmra.mrb[8].mxu0 %v361_v60  ;;  %1786 = vmatprep.subr.bf16.mxu1 %v1908_v0 }
  0x64   :  { %1765 = vmatpush3.bf16.msra.mxu0 %v1909_v1  ;;  %1443 = vmatprep.mubr.bf16.mxu0 %v382_v63 }
  0x65   :  { %1404 = vmatmul.mubr.bf16.vlgmr.msra.gmra.mrb[8].mxu1 %v383_v2  ;;  %1766 = vmatprep.subr.bf16.mxu0 %v1911_v3 }
  0x66   :  { %1787 = vmatpush3.bf16.msra.mxu1 %v1910_v4  ;;  %1483 = vmatprep.mubr.bf16.mxu1 %v386_v5 }
  0x67   :  { %1788 = vmatprep.subr.bf16.mxu1 %v1912_v6 }
  0x68   :  { %1767 = vmatpush3.bf16.msra.mxu0 %v1913_v7 }
  0x69   :  { %1768 = vmatprep.subr.bf16.mxu0 %v1915_v8 }
  0x6a   :  { %1789 = vmatpush3.bf16.msra.mxu1 %v1914_v9 }
  0x6b   :  { %1790 = vmatprep.subr.bf16.mxu1 %v1916_v10 }
  0x6c   :  { %1769 = vmatpush3.bf16.msra.mxu0 %v1917_v11 }
  0x6d   :  { %1770 = vmatprep.subr.bf16.mxu0 %v1919_v12 }
  0x6e   :  { %1791 = vmatpush3.bf16.msra.mxu1 %v1918_v13 }
  0x6f   :  { %1792 = vmatprep.subr.bf16.mxu1 %v1920_v14 }
  0x70   :  { %1771 = vmatpush3.bf16.msra.mxu0 %v1921_v15 }
  0x71   :  { %1772 = vmatprep.subr.bf16.mxu0 %v1923_v16 }
  0x72   :  { %1793 = vmatpush3.bf16.msra.mxu1 %v1922_v17  ;;  %v28_v17 = vld [vmem:[#allocation2] sm:$0x3] }
  0x73   :  { %1794 = vmatprep.subr.bf16.mxu1 %v1924_v18 }
  0x74   :  { %1773 = vmatpush3.bf16.msra.mxu0 %v1925_v19 }
  0x75   :  { %1774 = vmatprep.subr.bf16.mxu0 %v1927_v20 }
  0x76   :  { %1795 = vmatpush3.bf16.msra.mxu1 %v1926_v21 }
  0x77   :  { %1796 = vmatprep.subr.bf16.mxu1 %v1928_v22 }
  0x78   :  { %1775 = vmatpush3.bf16.msra.mxu0 %v1929_v23 }
  0x79   :  { %1776 = vmatprep.subr.bf16.mxu0 %v1931_v24 }
  0x7a   :  { %1797 = vmatpush3.bf16.msra.mxu1 %v1930_v25 }
  0x7b   :  { %1798 = vmatprep.subr.bf16.mxu1 %v1932_v26 }
  0x7c   :  { %1777 = vmatpush3.bf16.msra.mxu0 %v1933_v27 }
  0x7d   :  { %1778 = vmatprep.subr.bf16.mxu0 %v1935_v28 }
  0x7e   :  { %1799 = vmatpush3.bf16.msra.mxu1 %v1934_v29 }
  0x7f   :  { %1800 = vmatprep.subr.bf16.mxu1 %v1936_v30 }
  0x80   :  { %1779 = vmatpush3.bf16.msra.mxu0 %v1937_v31 }
  0x82   :  { %1801 = vmatpush3.bf16.msra.mxu1 %v1938_v33 }
  0x83   :  { %1444 = vmatmul.mubr.bf16.vlgmr.msra.gmra.mrb[12].mxu0 %v368_v32 }
  0x85   :  { %1484 = vmatmul.mubr.bf16.vlgmr.msra.gmra.mrb[12].mxu1 %v384_v34 }
  0xf6   :  { %v1648_v37 = vpop.f32.mrb[0].mxu0 }
  0xf7   :  { %v1649_v35 = vpop.f32.mrb[1].mxu0  ;;  %v1670_v38 = vpop.f32.mrb[0].mxu1 }
  0xf8   :  { %v1650_v39 = vadd.f32 %v1649_v35, %v1648_v37  ;;  %v1651_v40 = vpop.f32.mrb[2].mxu0  ;;  %v1671_v41 = vpop.f32.mrb[1].mxu1 }
  0xf9   :  { %v1652_v42 = vpop.f32.mrb[3].mxu0  ;;  %v1672_v43 = vadd.f32 %v1671_v41, %v1670_v38  ;;  %v1673_v44 = vpop.f32.mrb[2].mxu1 }
  0xfa   :  { %v1674_v45 = vpop.f32.mrb[3].mxu1 }
  0xfb   :  { %v1246_v46 = vadd.f32 %v1672_v43, %v1650_v39 }
 0x116   :  { %v1692_v47 = vpop.f32.mrb[4].mxu0 }
 0x117   :  { %v1693_v48 = vpop.f32.mrb[5].mxu0 }
 0x118   :  { %v1714_v49 = vpop.f32.mrb[4].mxu1  ;;  %v1694_v50 = vadd.f32 %v1693_v48, %v1692_v47  ;;  %v1695_v51 = vpop.f32.mrb[6].mxu0 }
 0x119   :  { %v1715_v52 = vpop.f32.mrb[5].mxu1  ;;  %v1696_v53 = vpop.f32.mrb[7].mxu0 }
 0x11a   :  { %v1286_v54 = vadd.f32 %v1694_v50, %v1246_v46  ;;  %v1716_v55 = vadd.f32 %v1715_v52, %v1714_v49  ;;  %v1717_v56 = vpop.f32.mrb[6].mxu1 }
 0x11b   :  { %v1718_v57 = vpop.f32.mrb[7].mxu1 }
 0x11c   :  { %v1326_v58 = vadd.f32 %v1716_v55, %v1286_v54 }
 0x136   :  { %v1736_v59 = vpop.f32.mrb[8].mxu0 }
 0x137   :  { %v1737_v60 = vpop.f32.mrb[9].mxu0 }
 0x138   :  { %v1758_v61 = vpop.f32.mrb[8].mxu1  ;;  %v1738_v62 = vadd.f32 %v1737_v60, %v1736_v59  ;;  %v1739_v63 = vpop.f32.mrb[10].mxu0 }
 0x139   :  { %v1759_v0 = vpop.f32.mrb[9].mxu1  ;;  %v1740_v1 = vpop.f32.mrb[11].mxu0 }
 0x13a   :  { %v1366_v2 = vadd.f32 %v1738_v62, %v1326_v58  ;;  %v1760_v3 = vadd.f32 %v1759_v0, %v1758_v61  ;;  %v1761_v4 = vpop.f32.mrb[10].mxu1 }
 0x13b   :  { %v1762_v5 = vpop.f32.mrb[11].mxu1 }
 0x13c   :  { %v1406_v6 = vadd.f32 %v1760_v3, %v1366_v2 }
 0x156   :  { %v1780_v7 = vpop.f32.mrb[12].mxu0 }
 0x157   :  { %v1781_v8 = vpop.f32.mrb[13].mxu0 }
 0x158   :  { %v1802_v9 = vpop.f32.mrb[12].mxu1  ;;  %v1782_v10 = vadd.f32 %v1781_v8, %v1780_v7  ;;  %v1783_v11 = vpop.f32.mrb[14].mxu0 }
 0x159   :  { %v1803_v12 = vpop.f32.mrb[13].mxu1  ;;  %v1784_v13 = vpop.f32.mrb[15].mxu0 }
 0x15a   :  { %v1446_v14 = vadd.f32 %v1782_v10, %v1406_v6  ;;  %v1804_v15 = vadd.f32 %v1803_v12, %v1802_v9  ;;  %v1805_v16 = vpop.f32.mrb[14].mxu1 }
 0x15b   :  { %v1806_v18 = vpop.f32.mrb[15].mxu1 }
 0x15c   :  { %v1486_v19 = vadd.f32 %v1804_v15, %v1446_v14 }
 0x15e   :  { %v1491_v20 = vadd.f32 %v1486_v19, %v28_v17 }
 0x160   :  { %1493 = vst.msk [vmem:[#allocation2] sm:$0x3] %vm26_vm0, %v1491_v20 }
 0x167   :  { %v1497_v21 = vld [vmem:[#allocation2] sm:$0x3] }
 0x168   :  { %1498 = vst.msk [vmem:[%s2396_s3] sm:$0x3] %vm26_vm0, %v1497_v21 }

</bundles_post_ra>
